<compile_context>
chip_gen: v7x
topology: tpu7x:2x2x1
jax: 0.10.0
libtpu: 0.0.40
codegen_flags: <defaults>
</compile_context>

<pallas_src>
import functools

import jax
import jax.numpy as jnp
from jax.experimental import pallas as pl
from jax.experimental.pallas import tpu as pltpu

# v7x has only 64 MiB VMEM per TensorCore; keep scoped limit well under that.
_VMEM_LIMIT = 48 * 1024 * 1024


# ----------------------------- Pallas kernels ------------------------------ #
def _matmul_bias_act_kernel(a_ref, w_ref, b_ref, o_ref, *, activation):
    # bf16 operands, f32 accumulation on the MXU; f32 epilogue.
    acc = jnp.dot(a_ref[...], w_ref[...], preferred_element_type=jnp.float32)
    acc = acc + b_ref[...]                     # (1, N) f32 bias broadcast
    if activation == "relu":
        acc = jnp.maximum(acc, 0.0)
    o_ref[...] = acc.astype(o_ref.dtype)


def _head_kernel(x_ref, wfc_ref, bfc_ref, wq_ref, bq_ref, o_ref, *, n_actions):
    # fused: h = relu(x @ Wfc + bfc); per action a: softmax(h @ Wq[a] + bq[a])
    h = jnp.dot(x_ref[...], wfc_ref[...], preferred_element_type=jnp.float32)
    h = jnp.maximum(h + bfc_ref[...], 0.0)
    h = h.astype(wq_ref.dtype)                 # bf16 for the second MXU pass
    for a in range(n_actions):                 # static unroll (small n_actions)
        logits = jnp.dot(h, wq_ref[a], preferred_element_type=jnp.float32)
        logits = logits + bq_ref[a]            # (1, n_atoms) broadcast
        m = jnp.max(logits, axis=-1, keepdims=True)
        e = jnp.exp(logits - m)
        probs = e / jnp.sum(e, axis=-1, keepdims=True)
        o_ref[a] = probs.astype(o_ref.dtype)   # output laid out (A, rows, Z)


# ------------------------------ Pallas wrappers ---------------------------- #
def matmul_bias_act(a, w, bias, *, activation="none", out_dtype=jnp.bfloat16,
                    tile_m=512):
    """out = act(a @ w + bias); a:(M,K) bf16, w:(K,N) bf16, bias:(N,) f32."""
    M, K = a.shape
    Kw, N = w.shape
    assert K == Kw
    tm = min(tile_m, M)
    nm = pl.cdiv(M, tm)
    b2 = bias.reshape(1, N).astype(jnp.float32)
    return pl.pallas_call(
        functools.partial(_matmul_bias_act_kernel, activation=activation),
        out_shape=jax.ShapeDtypeStruct((M, N), out_dtype),
        grid=(nm,),
        in_specs=[
            pl.BlockSpec((tm, K), lambda i: (i, 0)),     # row tiles stream
            pl.BlockSpec((K, N), lambda i: (0, 0)),      # weight stays resident
            pl.BlockSpec((1, N), lambda i: (0, 0)),
        ],
        out_specs=pl.BlockSpec((tm, N), lambda i: (i, 0)),
        compiler_params=pltpu.CompilerParams(
            dimension_semantics=("parallel",),           # megacore on v7x
            vmem_limit_bytes=_VMEM_LIMIT,
        ),
    )(a, w, b2)


def head_pallas(x, wfc, bfc, wq, bq, *, n_actions, n_atoms, tile_m=128):
    """Fused fc+ReLU -> fc_q -> per-action softmax. Returns (A, B, n_atoms)."""
    B, K = x.shape
    H = wfc.shape[1]
    tm = min(tile_m, B)
    nm = pl.cdiv(B, tm)
    return pl.pallas_call(
        functools.partial(_head_kernel, n_actions=n_actions),
        out_shape=jax.ShapeDtypeStruct((n_actions, B, n_atoms), jnp.float32),
        grid=(nm,),
        in_specs=[
            pl.BlockSpec((tm, K), lambda i: (i, 0)),
            pl.BlockSpec((K, H), lambda i: (0, 0)),
            pl.BlockSpec((1, H), lambda i: (0, 0)),
            pl.BlockSpec((n_actions, H, n_atoms), lambda i: (0, 0, 0)),
            pl.BlockSpec((n_actions, 1, n_atoms), lambda i: (0, 0, 0)),
        ],
        out_specs=pl.BlockSpec((n_actions, tm, n_atoms), lambda i: (0, i, 0)),
        compiler_params=pltpu.CompilerParams(
            dimension_semantics=("parallel",),
            vmem_limit_bytes=_VMEM_LIMIT,
        ),
    )(x, wfc, bfc, wq, bq)


# --------------------------------- glue ------------------------------------ #
def _im2col(x_nhwc, ksize, stride):
    """Extract conv patches (bf16); column order is (kh, kw, c_in)."""
    B, H, W, C = x_nhwc.shape
    OH = (H - ksize) // stride + 1
    OW = (W - ksize) // stride + 1
    cols = []
    for kh in range(ksize):
        for kw in range(ksize):
            patch = jax.lax.slice(
                x_nhwc,
                (0, kh, kw, 0),
                (B, kh + (OH - 1) * stride + 1, kw + (OW - 1) * stride + 1, C),
                (1, stride, stride, 1),
            )  # (B, OH, OW, C)
            cols.append(patch)
    patches = jnp.concatenate(cols, axis=-1)             # (B, OH, OW, K*K*C)
    return patches.reshape(B * OH * OW, ksize * ksize * C), OH, OW


def conv2d_relu(x_nhwc, w_mat, bias, *, ksize, stride, c_out):
    """Conv2d (valid) + ReLU via im2col + tiled Pallas matmul. bf16 in/out."""
    B = x_nhwc.shape[0]
    patches, OH, OW = _im2col(x_nhwc, ksize, stride)
    out = matmul_bias_act(patches, w_mat, bias, activation="relu",
                          out_dtype=jnp.bfloat16)
    return out.reshape(B, OH, OW, c_out)


# ------------------------- parameters (deterministic) ----------------------- #
def init_params(key, state_len, n_actions, n_atoms):
    """Torch-layout params, same init scheme as the PyTorch module."""
    c_in = state_len[0]
    ks = jax.random.split(key, 5)

    def xavier_normal(k, shape):                          # conv: (out, in, kh, kw)
        fan_in = shape[1] * shape[2] * shape[3]
        fan_out = shape[0] * shape[2] * shape[3]
        std = (2.0 / (fan_in + fan_out)) ** 0.5
        return std * jax.random.normal(k, shape, jnp.float32)

    def kaiming_normal(k, shape):                         # linear: (out, in)
        std = (2.0 / shape[1]) ** 0.5
        return std * jax.random.normal(k, shape, jnp.float32)

    return {
        "w1": xavier_normal(ks[0], (32, c_in, 8, 8)),
        "b1": jnp.zeros((32,), jnp.float32),
        "w2": xavier_normal(ks[1], (64, 32, 4, 4)),
        "b2": jnp.zeros((64,), jnp.float32),
        "w3": xavier_normal(ks[2], (64, 64, 3, 3)),
        "b3": jnp.zeros((64,), jnp.float32),
        "wfc": kaiming_normal(ks[3], (512, 7 * 7 * 64)),
        "bfc": jnp.zeros((512,), jnp.float32),
        "wq": kaiming_normal(ks[4], (n_actions * n_atoms, 512)),
        "bq": jnp.zeros((n_actions * n_atoms,), jnp.float32),
    }


def prepare_params(p, n_actions, n_atoms):
    """One-time (outside jit) conversion to matmul-ready bf16 layouts."""
    def conv_w(w, scale=1.0):
        o, i, k, _ = w.shape
        wm = jnp.transpose(w, (2, 3, 1, 0)).reshape(k * k * i, o)  # (kh,kw,cin,cout)
        return (wm * scale).astype(jnp.bfloat16)

    hidden = p["wfc"].shape[0]
    # Torch flattens conv3 output as (C, H, W); we keep activations NHWC and
    # instead permute fc weight columns once to (H, W, C) order. This removes
    # the per-forward activation transpose entirely.
    wfc_nhwc = (p["wfc"].reshape(hidden, 64, 7, 7)
                        .transpose(0, 2, 3, 1)            # (512, 7, 7, 64)
                        .reshape(hidden, 7 * 7 * 64)
                        .T)                               # (3136, 512), rows (h,w,c)
    return {
        "w1": conv_w(p["w1"], 1.0 / 255.0),    # fold x/255 into conv1 weights
        "b1": p["b1"].astype(jnp.float32),
        "w2": conv_w(p["w2"]),
        "b2": p["b2"].astype(jnp.float32),
        "w3": conv_w(p["w3"]),
        "b3": p["b3"].astype(jnp.float32),
        "wfc": wfc_nhwc.astype(jnp.bfloat16),
        "bfc": p["bfc"].reshape(1, hidden).astype(jnp.float32),
        # (A*Z, 512) -> (A, Z, 512) -> (A, 512, Z) so column z of slice a is
        # the torch row a*Z + z.
        "wq": p["wq"].reshape(n_actions, n_atoms, hidden)
                     .transpose(0, 2, 1).astype(jnp.bfloat16),
        "bq": p["bq"].reshape(n_actions, 1, n_atoms).astype(jnp.float32),
    }


# -------------------------------- forward ----------------------------------- #
def convnet_forward(params, x_nchw, *, n_actions, n_atoms):
    B = x_nchw.shape[0]
    # NCHW -> NHWC, bf16 (the /255 scale lives in w1).
    x = jnp.transpose(x_nchw, (0, 2, 3, 1)).astype(jnp.bfloat16)
    h = conv2d_relu(x, params["w1"], params["b1"], ksize=8, stride=4, c_out=32)
    h = conv2d_relu(h, params["w2"], params["b2"], ksize=4, stride=2, c_out=64)
    h = conv2d_relu(h, params["w3"], params["b3"], ksize=3, stride=1, c_out=64)
    # flatten directly in NHWC order (fc weight rows were permuted to match
    # torch's NCHW flatten), so no per-forward activation transpose.
    _, oh, ow, c = h.shape
    h = h.reshape(B, oh * ow * c)
    probs = head_pallas(h, params["wfc"], params["bfc"], params["wq"],
                        params["bq"], n_actions=n_actions, n_atoms=n_atoms)
    return jnp.transpose(probs, (1, 0, 2))                 # (A,B,Z) -> (B,A,Z)


# ---------------------------------- main ------------------------------------ #
if __name__ == "__main__":
    # The fc layer (7*7*64 -> 512) implies an 84x84 spatial input (Atari C51).
    state_len = (4, 84, 84)
    n_actions, n_atoms = 4, 51
    batch = 2

    key = jax.random.PRNGKey(0)
    kp, kx = jax.random.split(key)
    params = prepare_params(init_params(kp, state_len, n_actions, n_atoms),
                            n_actions, n_atoms)
    x = jax.random.uniform(kx, (batch,) + state_len, jnp.float32, 0.0, 255.0)

    fwd = jax.jit(functools.partial(convnet_forward,
                                    n_actions=n_actions, n_atoms=n_atoms))
    out = fwd(params, x)
    jax.block_until_ready(out)

    assert out.shape == (batch, n_actions, n_atoms)
    assert out.dtype == jnp.float32
    # distribution over atoms should sum to 1 per (batch, action)
    assert bool(jnp.allclose(jnp.sum(out, axis=2), 1.0, atol=1e-5))
    print("KERNEL_OK")
</pallas_src>

<mosaic_0001>
module attributes {stable_mosaic.version = 11 : i64} {
  func.func @_matmul_bias_act_kernel(%arg0: i32, %arg1: memref<512x256xbf16, #tpu.memory_space<vmem>>, %arg2: memref<256x32xbf16, #tpu.memory_space<vmem>>, %arg3: memref<1x32xf32, #tpu.memory_space<vmem>>, %arg4: memref<512x32xbf16, #tpu.memory_space<vmem>>) attributes {dimension_semantics = [#tpu.dimension_semantics<parallel>], iteration_bounds = array<i64: 2>, scalar_prefetch = 0 : i64, scratch_operands = 0 : i64, tpu.core_type = #tpu.core_type<tc>, window_params = [{transform_indices = @transform_0, window_bounds = array<i64: 512, 256>}, {pipeline_mode = #tpu.pipeline_mode<synchronous>, transform_indices = @transform_1, window_bounds = array<i64: 256, 32>}, {pipeline_mode = #tpu.pipeline_mode<synchronous>, transform_indices = @transform_2, window_bounds = array<i64: 1, 32>}, {transform_indices = @transform_3, window_bounds = array<i64: 512, 32>}]} {
    %c0 = arith.constant 0 : index
    %c0_0 = arith.constant 0 : index
    %0 = vector.load %arg1[%c0, %c0_0] : memref<512x256xbf16, #tpu.memory_space<vmem>>, vector<512x256xbf16>
    %c0_1 = arith.constant 0 : index
    %c0_2 = arith.constant 0 : index
    %1 = vector.load %arg2[%c0_1, %c0_2] : memref<256x32xbf16, #tpu.memory_space<vmem>>, vector<256x32xbf16>
    %cst = arith.constant dense<0.000000e+00> : vector<512x32xf32>
    %2 = tpu.matmul %0, %1, %cst {dimension_numbers = #tpu.dot_dimension_numbers<[1], [0], [0], [1], [0, 0, 1, 1], [], []>} : vector<512x256xbf16>, vector<256x32xbf16>, vector<512x32xf32> -> vector<512x32xf32>
    %c0_3 = arith.constant 0 : index
    %c0_4 = arith.constant 0 : index
    %3 = vector.load %arg3[%c0_3, %c0_4] : memref<1x32xf32, #tpu.memory_space<vmem>>, vector<1x32xf32>
    %4 = vector.broadcast %3 : vector<1x32xf32> to vector<512x32xf32>
    %5 = arith.addf %2, %4 : vector<512x32xf32>
    %cst_5 = arith.constant 0.000000e+00 : f32
    %6 = vector.broadcast %cst_5 : f32 to vector<512x32xf32>
    %7 = arith.maximumf %5, %6 : vector<512x32xf32>
    %8 = arith.truncf %7 : vector<512x32xf32> to vector<512x32xbf16>
    %c0_6 = arith.constant 0 : index
    %c0_7 = arith.constant 0 : index
    %9 = vector.load %arg4[%c0_6, %c0_7] : memref<512x32xbf16, #tpu.memory_space<vmem>>, vector<512x32xbf16>
    tpu.vector_store %arg4[%c0_6, %c0_7], %8 {strides = array<i32>} : memref<512x32xbf16, #tpu.memory_space<vmem>>, vector<512x32xbf16>,
    return
  }
  func.func @transform_0(%arg0: i32) -> (i32, i32) {
    %c0_i32 = arith.constant 0 : i32
    %c0_i32_0 = arith.constant 0 : i32
    return %arg0, %c0_i32 : i32, i32
  }
  func.func @transform_1(%arg0: i32) -> (i32, i32) {
    %c0_i32 = arith.constant 0 : i32
    %c0_i32_0 = arith.constant 0 : i32
    %c0_i32_1 = arith.constant 0 : i32
    return %c0_i32, %c0_i32_0 : i32, i32
  }
  func.func @transform_2(%arg0: i32) -> (i32, i32) {
    %c0_i32 = arith.constant 0 : i32
    %c0_i32_0 = arith.constant 0 : i32
    %c0_i32_1 = arith.constant 0 : i32
    return %c0_i32, %c0_i32_0 : i32, i32
  }
  func.func @transform_3(%arg0: i32) -> (i32, i32) {
    %c0_i32 = arith.constant 0 : i32
    %c0_i32_0 = arith.constant 0 : i32
    return %arg0, %c0_i32 : i32, i32
  }
}

module attributes {stable_mosaic.version = 11 : i64} {
  func.func @_matmul_bias_act_kernel(%arg0: i32, %arg1: memref<162x512xbf16, #tpu.memory_space<vmem>>, %arg2: memref<512x64xbf16, #tpu.memory_space<vmem>>, %arg3: memref<1x64xf32, #tpu.memory_space<vmem>>, %arg4: memref<162x64xbf16, #tpu.memory_space<vmem>>) attributes {dimension_semantics = [#tpu.dimension_semantics<parallel>], iteration_bounds = array<i64: 1>, scalar_prefetch = 0 : i64, scratch_operands = 0 : i64, tpu.core_type = #tpu.core_type<tc>, window_params = [{transform_indices = @transform_0, window_bounds = array<i64: 162, 512>}, {pipeline_mode = #tpu.pipeline_mode<synchronous>, transform_indices = @transform_1, window_bounds = array<i64: 512, 64>}, {pipeline_mode = #tpu.pipeline_mode<synchronous>, transform_indices = @transform_2, window_bounds = array<i64: 1, 64>}, {transform_indices = @transform_3, window_bounds = array<i64: 162, 64>}]} {
    %c0 = arith.constant 0 : index
    %c0_0 = arith.constant 0 : index
    %0 = vector.load %arg1[%c0, %c0_0] : memref<162x512xbf16, #tpu.memory_space<vmem>>, vector<162x512xbf16>
    %c0_1 = arith.constant 0 : index
    %c0_2 = arith.constant 0 : index
    %1 = vector.load %arg2[%c0_1, %c0_2] : memref<512x64xbf16, #tpu.memory_space<vmem>>, vector<512x64xbf16>
    %cst = arith.constant dense<0.000000e+00> : vector<162x64xf32>
    %2 = tpu.matmul %0, %1, %cst {dimension_numbers = #tpu.dot_dimension_numbers<[1], [0], [0], [1], [0, 0, 1, 1], [], []>} : vector<162x512xbf16>, vector<512x64xbf16>, vector<162x64xf32> -> vector<162x64xf32>
    %c0_3 = arith.constant 0 : index
    %c0_4 = arith.constant 0 : index
    %3 = vector.load %arg3[%c0_3, %c0_4] : memref<1x64xf32, #tpu.memory_space<vmem>>, vector<1x64xf32>
    %4 = vector.broadcast %3 : vector<1x64xf32> to vector<162x64xf32>
    %5 = arith.addf %2, %4 : vector<162x64xf32>
    %cst_5 = arith.constant 0.000000e+00 : f32
    %6 = vector.broadcast %cst_5 : f32 to vector<162x64xf32>
    %7 = arith.maximumf %5, %6 : vector<162x64xf32>
    %8 = arith.truncf %7 : vector<162x64xf32> to vector<162x64xbf16>
    %c0_6 = arith.constant 0 : index
    %c0_7 = arith.constant 0 : index
    %9 = vector.load %arg4[%c0_6, %c0_7] : memref<162x64xbf16, #tpu.memory_space<vmem>>, vector<162x64xbf16>
    tpu.vector_store %arg4[%c0_6, %c0_7], %8 {strides = array<i32>} : memref<162x64xbf16, #tpu.memory_space<vmem>>, vector<162x64xbf16>,
    return
  }
  func.func @transform_0(%arg0: i32) -> (i32, i32) {
    %c0_i32 = arith.constant 0 : i32
    %c0_i32_0 = arith.constant 0 : i32
    return %arg0, %c0_i32 : i32, i32
  }
  func.func @transform_1(%arg0: i32) -> (i32, i32) {
    %c0_i32 = arith.constant 0 : i32
    %c0_i32_0 = arith.constant 0 : i32
    %c0_i32_1 = arith.constant 0 : i32
    return %c0_i32, %c0_i32_0 : i32, i32
  }
  func.func @transform_2(%arg0: i32) -> (i32, i32) {
    %c0_i32 = arith.constant 0 : i32
    %c0_i32_0 = arith.constant 0 : i32
    %c0_i32_1 = arith.constant 0 : i32
    return %c0_i32, %c0_i32_0 : i32, i32
  }
  func.func @transform_3(%arg0: i32) -> (i32, i32) {
    %c0_i32 = arith.constant 0 : i32
    %c0_i32_0 = arith.constant 0 : i32
    return %arg0, %c0_i32 : i32, i32
  }
}

module attributes {stable_mosaic.version = 11 : i64} {
  func.func @_matmul_bias_act_kernel(%arg0: i32, %arg1: memref<98x576xbf16, #tpu.memory_space<vmem>>, %arg2: memref<576x64xbf16, #tpu.memory_space<vmem>>, %arg3: memref<1x64xf32, #tpu.memory_space<vmem>>, %arg4: memref<98x64xbf16, #tpu.memory_space<vmem>>) attributes {dimension_semantics = [#tpu.dimension_semantics<parallel>], iteration_bounds = array<i64: 1>, scalar_prefetch = 0 : i64, scratch_operands = 0 : i64, tpu.core_type = #tpu.core_type<tc>, window_params = [{transform_indices = @transform_0, window_bounds = array<i64: 98, 576>}, {pipeline_mode = #tpu.pipeline_mode<synchronous>, transform_indices = @transform_1, window_bounds = array<i64: 576, 64>}, {pipeline_mode = #tpu.pipeline_mode<synchronous>, transform_indices = @transform_2, window_bounds = array<i64: 1, 64>}, {transform_indices = @transform_3, window_bounds = array<i64: 98, 64>}]} {
    %c0 = arith.constant 0 : index
    %c0_0 = arith.constant 0 : index
    %0 = vector.load %arg1[%c0, %c0_0] : memref<98x576xbf16, #tpu.memory_space<vmem>>, vector<98x576xbf16>
    %c0_1 = arith.constant 0 : index
    %c0_2 = arith.constant 0 : index
    %1 = vector.load %arg2[%c0_1, %c0_2] : memref<576x64xbf16, #tpu.memory_space<vmem>>, vector<576x64xbf16>
    %cst = arith.constant dense<0.000000e+00> : vector<98x64xf32>
    %2 = tpu.matmul %0, %1, %cst {dimension_numbers = #tpu.dot_dimension_numbers<[1], [0], [0], [1], [0, 0, 1, 1], [], []>} : vector<98x576xbf16>, vector<576x64xbf16>, vector<98x64xf32> -> vector<98x64xf32>
    %c0_3 = arith.constant 0 : index
    %c0_4 = arith.constant 0 : index
    %3 = vector.load %arg3[%c0_3, %c0_4] : memref<1x64xf32, #tpu.memory_space<vmem>>, vector<1x64xf32>
    %4 = vector.broadcast %3 : vector<1x64xf32> to vector<98x64xf32>
    %5 = arith.addf %2, %4 : vector<98x64xf32>
    %cst_5 = arith.constant 0.000000e+00 : f32
    %6 = vector.broadcast %cst_5 : f32 to vector<98x64xf32>
    %7 = arith.maximumf %5, %6 : vector<98x64xf32>
    %8 = arith.truncf %7 : vector<98x64xf32> to vector<98x64xbf16>
    %c0_6 = arith.constant 0 : index
    %c0_7 = arith.constant 0 : index
    %9 = vector.load %arg4[%c0_6, %c0_7] : memref<98x64xbf16, #tpu.memory_space<vmem>>, vector<98x64xbf16>
    tpu.vector_store %arg4[%c0_6, %c0_7], %8 {strides = array<i32>} : memref<98x64xbf16, #tpu.memory_space<vmem>>, vector<98x64xbf16>,
    return
  }
  func.func @transform_0(%arg0: i32) -> (i32, i32) {
    %c0_i32 = arith.constant 0 : i32
    %c0_i32_0 = arith.constant 0 : i32
    return %arg0, %c0_i32 : i32, i32
  }
  func.func @transform_1(%arg0: i32) -> (i32, i32) {
    %c0_i32 = arith.constant 0 : i32
    %c0_i32_0 = arith.constant 0 : i32
    %c0_i32_1 = arith.constant 0 : i32
    return %c0_i32, %c0_i32_0 : i32, i32
  }
  func.func @transform_2(%arg0: i32) -> (i32, i32) {
    %c0_i32 = arith.constant 0 : i32
    %c0_i32_0 = arith.constant 0 : i32
    %c0_i32_1 = arith.constant 0 : i32
    return %c0_i32, %c0_i32_0 : i32, i32
  }
  func.func @transform_3(%arg0: i32) -> (i32, i32) {
    %c0_i32 = arith.constant 0 : i32
    %c0_i32_0 = arith.constant 0 : i32
    return %arg0, %c0_i32 : i32, i32
  }
}

module attributes {stable_mosaic.version = 11 : i64} {
  func.func @_head_kernel(%arg0: i32, %arg1: memref<2x3136xbf16, #tpu.memory_space<vmem>>, %arg2: memref<3136x512xbf16, #tpu.memory_space<vmem>>, %arg3: memref<1x512xf32, #tpu.memory_space<vmem>>, %arg4: memref<4x512x51xbf16, #tpu.memory_space<vmem>>, %arg5: memref<4x1x51xf32, #tpu.memory_space<vmem>>, %arg6: memref<4x2x51xf32, #tpu.memory_space<vmem>>) attributes {dimension_semantics = [#tpu.dimension_semantics<parallel>], iteration_bounds = array<i64: 1>, scalar_prefetch = 0 : i64, scratch_operands = 0 : i64, tpu.core_type = #tpu.core_type<tc>, window_params = [{transform_indices = @transform_0, window_bounds = array<i64: 2, 3136>}, {pipeline_mode = #tpu.pipeline_mode<synchronous>, transform_indices = @transform_1, window_bounds = array<i64: 3136, 512>}, {pipeline_mode = #tpu.pipeline_mode<synchronous>, transform_indices = @transform_2, window_bounds = array<i64: 1, 512>}, {pipeline_mode = #tpu.pipeline_mode<synchronous>, transform_indices = @transform_3, window_bounds = array<i64: 4, 512, 51>}, {pipeline_mode = #tpu.pipeline_mode<synchronous>, transform_indices = @transform_4, window_bounds = array<i64: 4, 1, 51>}, {transform_indices = @transform_5, window_bounds = array<i64: 4, 2, 51>}]} {
    %c0 = arith.constant 0 : index
    %c0_0 = arith.constant 0 : index
    %0 = vector.load %arg1[%c0, %c0_0] : memref<2x3136xbf16, #tpu.memory_space<vmem>>, vector<2x3136xbf16>
    %c0_1 = arith.constant 0 : index
    %c0_2 = arith.constant 0 : index
    %1 = vector.load %arg2[%c0_1, %c0_2] : memref<3136x512xbf16, #tpu.memory_space<vmem>>, vector<3136x512xbf16>
    %cst = arith.constant dense<0.000000e+00> : vector<2x512xf32>
    %2 = tpu.matmul %0, %1, %cst {dimension_numbers = #tpu.dot_dimension_numbers<[1], [0], [0], [1], [0, 0, 1, 1], [], []>} : vector<2x3136xbf16>, vector<3136x512xbf16>, vector<2x512xf32> -> vector<2x512xf32>
    %c0_3 = arith.constant 0 : index
    %c0_4 = arith.constant 0 : index
    %3 = vector.load %arg3[%c0_3, %c0_4] : memref<1x512xf32, #tpu.memory_space<vmem>>, vector<1x512xf32>
    %4 = vector.broadcast %3 : vector<1x512xf32> to vector<2x512xf32>
    %5 = arith.addf %2, %4 : vector<2x512xf32>
    %cst_5 = arith.constant 0.000000e+00 : f32
    %6 = vector.broadcast %cst_5 : f32 to vector<2x512xf32>
    %7 = arith.maximumf %5, %6 : vector<2x512xf32>
    %8 = arith.truncf %7 : vector<2x512xf32> to vector<2x512xbf16>
    %c0_6 = arith.constant 0 : index
    %c0_7 = arith.constant 0 : index
    %c0_8 = arith.constant 0 : index
    %9 = vector.load %arg4[%c0_6, %c0_7, %c0_8] : memref<4x512x51xbf16, #tpu.memory_space<vmem>>, vector<1x512x51xbf16>
    %10 = vector.shape_cast %9 : vector<1x512x51xbf16> to vector<512x51xbf16>
    %cst_9 = arith.constant dense<0.000000e+00> : vector<2x51xf32>
    %11 = tpu.matmul %8, %10, %cst_9 {dimension_numbers = #tpu.dot_dimension_numbers<[1], [0], [0], [1], [0, 0, 1, 1], [], []>} : vector<2x512xbf16>, vector<512x51xbf16>, vector<2x51xf32> -> vector<2x51xf32>
    %c0_10 = arith.constant 0 : index
    %c0_11 = arith.constant 0 : index
    %c0_12 = arith.constant 0 : index
    %12 = vector.load %arg5[%c0_10, %c0_11, %c0_12] : memref<4x1x51xf32, #tpu.memory_space<vmem>>, vector<1x1x51xf32>
    %13 = vector.shape_cast %12 : vector<1x1x51xf32> to vector<1x51xf32>
    %14 = vector.broadcast %13 : vector<1x51xf32> to vector<2x51xf32>
    %15 = arith.addf %11, %14 : vector<2x51xf32>
    %cst_13 = arith.constant dense<0xFF800000> : vector<2xf32>
    %16 = vector.multi_reduction <maximumf>, %15, %cst_13 [1] : vector<2x51xf32> to vector<2xf32>
    %17 = vector.shape_cast %16 : vector<2xf32> to vector<2x1xf32>
    %18 = vector.broadcast %17 : vector<2x1xf32> to vector<2x51xf32>
    %19 = arith.subf %15, %18 : vector<2x51xf32>
    %20 = math.exp %19 : vector<2x51xf32>
    %cst_14 = arith.constant dense<0.000000e+00> : vector<2xf32>
    %21 = vector.multi_reduction <add>, %20, %cst_14 [1] : vector<2x51xf32> to vector<2xf32>
    %22 = vector.shape_cast %21 : vector<2xf32> to vector<2x1xf32>
    %23 = vector.broadcast %22 : vector<2x1xf32> to vector<2x51xf32>
    %24 = arith.divf %20, %23 : vector<2x51xf32>
    %c0_15 = arith.constant 0 : index
    %c0_16 = arith.constant 0 : index
    %c0_17 = arith.constant 0 : index
    %25 = vector.load %arg6[%c0_15, %c0_16, %c0_17] : memref<4x2x51xf32, #tpu.memory_space<vmem>>, vector<1x2x51xf32>
    %26 = vector.shape_cast %25 : vector<1x2x51xf32> to vector<2x51xf32>
    %27 = vector.shape_cast %24 : vector<2x51xf32> to vector<1x2x51xf32>
    tpu.vector_store %arg6[%c0_15, %c0_16, %c0_17], %27 {strides = array<i32>} : memref<4x2x51xf32, #tpu.memory_space<vmem>>, vector<1x2x51xf32>,
    %c1 = arith.constant 1 : index
    %c0_18 = arith.constant 0 : index
    %c0_19 = arith.constant 0 : index
    %28 = vector.load %arg4[%c1, %c0_18, %c0_19] : memref<4x512x51xbf16, #tpu.memory_space<vmem>>, vector<1x512x51xbf16>
    %29 = vector.shape_cast %28 : vector<1x512x51xbf16> to vector<512x51xbf16>
    %cst_20 = arith.constant dense<0.000000e+00> : vector<2x51xf32>
    %30 = tpu.matmul %8, %29, %cst_20 {dimension_numbers = #tpu.dot_dimension_numbers<[1], [0], [0], [1], [0, 0, 1, 1], [], []>} : vector<2x512xbf16>, vector<512x51xbf16>, vector<2x51xf32> -> vector<2x51xf32>
    %c1_21 = arith.constant 1 : index
    %c0_22 = arith.constant 0 : index
    %c0_23 = arith.constant 0 : index
    %31 = vector.load %arg5[%c1_21, %c0_22, %c0_23] : memref<4x1x51xf32, #tpu.memory_space<vmem>>, vector<1x1x51xf32>
    %32 = vector.shape_cast %31 : vector<1x1x51xf32> to vector<1x51xf32>
    %33 = vector.broadcast %32 : vector<1x51xf32> to vector<2x51xf32>
    %34 = arith.addf %30, %33 : vector<2x51xf32>
    %cst_24 = arith.constant dense<0xFF800000> : vector<2xf32>
    %35 = vector.multi_reduction <maximumf>, %34, %cst_24 [1] : vector<2x51xf32> to vector<2xf32>
    %36 = vector.shape_cast %35 : vector<2xf32> to vector<2x1xf32>
    %37 = vector.broadcast %36 : vector<2x1xf32> to vector<2x51xf32>
    %38 = arith.subf %34, %37 : vector<2x51xf32>
    %39 = math.exp %38 : vector<2x51xf32>
    %cst_25 = arith.constant dense<0.000000e+00> : vector<2xf32>
    %40 = vector.multi_reduction <add>, %39, %cst_25 [1] : vector<2x51xf32> to vector<2xf32>
    %41 = vector.shape_cast %40 : vector<2xf32> to vector<2x1xf32>
    %42 = vector.broadcast %41 : vector<2x1xf32> to vector<2x51xf32>
    %43 = arith.divf %39, %42 : vector<2x51xf32>
    %c1_26 = arith.constant 1 : index
    %c0_27 = arith.constant 0 : index
    %c0_28 = arith.constant 0 : index
    %44 = vector.load %arg6[%c1_26, %c0_27, %c0_28] : memref<4x2x51xf32, #tpu.memory_space<vmem>>, vector<1x2x51xf32>
    %45 = vector.shape_cast %44 : vector<1x2x51xf32> to vector<2x51xf32>
    %46 = vector.shape_cast %43 : vector<2x51xf32> to vector<1x2x51xf32>
    tpu.vector_store %arg6[%c1_26, %c0_27, %c0_28], %46 {strides = array<i32>} : memref<4x2x51xf32, #tpu.memory_space<vmem>>, vector<1x2x51xf32>,
    %c2 = arith.constant 2 : index
    %c0_29 = arith.constant 0 : index
    %c0_30 = arith.constant 0 : index
    %47 = vector.load %arg4[%c2, %c0_29, %c0_30] : memref<4x512x51xbf16, #tpu.memory_space<vmem>>, vector<1x512x51xbf16>
    %48 = vector.shape_cast %47 : vector<1x512x51xbf16> to vector<512x51xbf16>
    %cst_31 = arith.constant dense<0.000000e+00> : vector<2x51xf32>
    %49 = tpu.matmul %8, %48, %cst_31 {dimension_numbers = #tpu.dot_dimension_numbers<[1], [0], [0], [1], [0, 0, 1, 1], [], []>} : vector<2x512xbf16>, vector<512x51xbf16>, vector<2x51xf32> -> vector<2x51xf32>
    %c2_32 = arith.constant 2 : index
    %c0_33 = arith.constant 0 : index
    %c0_34 = arith.constant 0 : index
    %50 = vector.load %arg5[%c2_32, %c0_33, %c0_34] : memref<4x1x51xf32, #tpu.memory_space<vmem>>, vector<1x1x51xf32>
    %51 = vector.shape_cast %50 : vector<1x1x51xf32> to vector<1x51xf32>
    %52 = vector.broadcast %51 : vector<1x51xf32> to vector<2x51xf32>
    %53 = arith.addf %49, %52 : vector<2x51xf32>
    %cst_35 = arith.constant dense<0xFF800000> : vector<2xf32>
    %54 = vector.multi_reduction <maximumf>, %53, %cst_35 [1] : vector<2x51xf32> to vector<2xf32>
    %55 = vector.shape_cast %54 : vector<2xf32> to vector<2x1xf32>
    %56 = vector.broadcast %55 : vector<2x1xf32> to vector<2x51xf32>
    %57 = arith.subf %53, %56 : vector<2x51xf32>
    %58 = math.exp %57 : vector<2x51xf32>
    %cst_36 = arith.constant dense<0.000000e+00> : vector<2xf32>
    %59 = vector.multi_reduction <add>, %58, %cst_36 [1] : vector<2x51xf32> to vector<2xf32>
    %60 = vector.shape_cast %59 : vector<2xf32> to vector<2x1xf32>
    %61 = vector.broadcast %60 : vector<2x1xf32> to vector<2x51xf32>
    %62 = arith.divf %58, %61 : vector<2x51xf32>
    %c2_37 = arith.constant 2 : index
    %c0_38 = arith.constant 0 : index
    %c0_39 = arith.constant 0 : index
    %63 = vector.load %arg6[%c2_37, %c0_38, %c0_39] : memref<4x2x51xf32, #tpu.memory_space<vmem>>, vector<1x2x51xf32>
    %64 = vector.shape_cast %63 : vector<1x2x51xf32> to vector<2x51xf32>
    %65 = vector.shape_cast %62 : vector<2x51xf32> to vector<1x2x51xf32>
    tpu.vector_store %arg6[%c2_37, %c0_38, %c0_39], %65 {strides = array<i32>} : memref<4x2x51xf32, #tpu.memory_space<vmem>>, vector<1x2x51xf32>,
    %c3 = arith.constant 3 : index
    %c0_40 = arith.constant 0 : index
    %c0_41 = arith.constant 0 : index
    %66 = vector.load %arg4[%c3, %c0_40, %c0_41] : memref<4x512x51xbf16, #tpu.memory_space<vmem>>, vector<1x512x51xbf16>
    %67 = vector.shape_cast %66 : vector<1x512x51xbf16> to vector<512x51xbf16>
    %cst_42 = arith.constant dense<0.000000e+00> : vector<2x51xf32>
    %68 = tpu.matmul %8, %67, %cst_42 {dimension_numbers = #tpu.dot_dimension_numbers<[1], [0], [0], [1], [0, 0, 1, 1], [], []>} : vector<2x512xbf16>, vector<512x51xbf16>, vector<2x51xf32> -> vector<2x51xf32>
    %c3_43 = arith.constant 3 : index
    %c0_44 = arith.constant 0 : index
    %c0_45 = arith.constant 0 : index
    %69 = vector.load %arg5[%c3_43, %c0_44, %c0_45] : memref<4x1x51xf32, #tpu.memory_space<vmem>>, vector<1x1x51xf32>
    %70 = vector.shape_cast %69 : vector<1x1x51xf32> to vector<1x51xf32>
    %71 = vector.broadcast %70 : vector<1x51xf32> to vector<2x51xf32>
    %72 = arith.addf %68, %71 : vector<2x51xf32>
    %cst_46 = arith.constant dense<0xFF800000> : vector<2xf32>
    %73 = vector.multi_reduction <maximumf>, %72, %cst_46 [1] : vector<2x51xf32> to vector<2xf32>
    %74 = vector.shape_cast %73 : vector<2xf32> to vector<2x1xf32>
    %75 = vector.broadcast %74 : vector<2x1xf32> to vector<2x51xf32>
    %76 = arith.subf %72, %75 : vector<2x51xf32>
    %77 = math.exp %76 : vector<2x51xf32>
    %cst_47 = arith.constant dense<0.000000e+00> : vector<2xf32>
    %78 = vector.multi_reduction <add>, %77, %cst_47 [1] : vector<2x51xf32> to vector<2xf32>
    %79 = vector.shape_cast %78 : vector<2xf32> to vector<2x1xf32>
    %80 = vector.broadcast %79 : vector<2x1xf32> to vector<2x51xf32>
    %81 = arith.divf %77, %80 : vector<2x51xf32>
    %c3_48 = arith.constant 3 : index
    %c0_49 = arith.constant 0 : index
    %c0_50 = arith.constant 0 : index
    %82 = vector.load %arg6[%c3_48, %c0_49, %c0_50] : memref<4x2x51xf32, #tpu.memory_space<vmem>>, vector<1x2x51xf32>
    %83 = vector.shape_cast %82 : vector<1x2x51xf32> to vector<2x51xf32>
    %84 = vector.shape_cast %81 : vector<2x51xf32> to vector<1x2x51xf32>
    tpu.vector_store %arg6[%c3_48, %c0_49, %c0_50], %84 {strides = array<i32>} : memref<4x2x51xf32, #tpu.memory_space<vmem>>, vector<1x2x51xf32>,
    return
  }
  func.func @transform_0(%arg0: i32) -> (i32, i32) {
    %c0_i32 = arith.constant 0 : i32
    %c0_i32_0 = arith.constant 0 : i32
    return %arg0, %c0_i32 : i32, i32
  }
  func.func @transform_1(%arg0: i32) -> (i32, i32) {
    %c0_i32 = arith.constant 0 : i32
    %c0_i32_0 = arith.constant 0 : i32
    %c0_i32_1 = arith.constant 0 : i32
    return %c0_i32, %c0_i32_0 : i32, i32
  }
  func.func @transform_2(%arg0: i32) -> (i32, i32) {
    %c0_i32 = arith.constant 0 : i32
    %c0_i32_0 = arith.constant 0 : i32
    %c0_i32_1 = arith.constant 0 : i32
    return %c0_i32, %c0_i32_0 : i32, i32
  }
  func.func @transform_3(%arg0: i32) -> (i32, i32, i32) {
    %c0_i32 = arith.constant 0 : i32
    %c0_i32_0 = arith.constant 0 : i32
    %c0_i32_1 = arith.constant 0 : i32
    %c0_i32_2 = arith.constant 0 : i32
    return %c0_i32, %c0_i32_0, %c0_i32_1 : i32, i32, i32
  }
  func.func @transform_4(%arg0: i32) -> (i32, i32, i32) {
    %c0_i32 = arith.constant 0 : i32
    %c0_i32_0 = arith.constant 0 : i32
    %c0_i32_1 = arith.constant 0 : i32
    %c0_i32_2 = arith.constant 0 : i32
    return %c0_i32, %c0_i32_0, %c0_i32_1 : i32, i32, i32
  }
  func.func @transform_5(%arg0: i32) -> (i32, i32, i32) {
    %c0_i32 = arith.constant 0 : i32
    %c0_i32_0 = arith.constant 0 : i32
    %c0_i32_1 = arith.constant 0 : i32
    return %c0_i32, %arg0, %c0_i32_0 : i32, i32, i32
  }
}

</mosaic_0001>

<bundles_post_ra>
// kernel: convnet_forward.4
= control target key start
LH: loop header
LB: loop body
LE: loop exit
PB: predicated region body
PF: predicated region fallthrough
CT: control target
= control target key end

     0   :  { %s2440_s12 = smov 0   ;;  %s2442_s13 = smov 0   ;;  %s3022_s0 = inlined_call_operand.vmem [shape: bf16[800,256], index: 0, kind: input, shape index: {}]   ;;  %s3023_s1 = inlined_call_operand.vmem [shape: bf16[256,32], index: 1, kind: input, shape index: {}]   ;;  %s3024_s2 = inlined_call_operand.vmem [shape: f32[1,32], index: 2, kind: input, shape index: {}]   ;;  %s3025_s3 = inlined_call_operand.vmem [shape: bf16[800,32], index: 3, kind: output, shape index: {}]  }
   0x1   :  { %s2444_s14 = smov 0  }
   0x2 LB: > { %s2453_s15 = sadd.s32 4294967295, %s2385_s14   ;;  %s2455_s16 = sadd.s32 1, %s2385_s14   ;;  %s2385_s14 = sphi %s2444_s14, %s3032_s14   ;;  %s2381_s13 = sphi %s2442_s13, %s3031_s13   ;;  %s2377_s12 = sphi %s2440_s12, %s3030_s12  }
   0x3   : > { %s85_s17 = ssub.s32 %s2385_s14, %s2455_s16  ;;  %s88_s18 = sadd.s32 1, %s2381_s13 }
   0x4   : > { %p86_p0 = scmp.eq.s32.totalorder %s85_s17, 0  ;;  %p98_p1 = scmp.ne.s32.totalorder %s2381_s13, %s2377_s12 }
   0x5   : > { %p99_p2 = scmp.eq.s32.totalorder %s2453_s15, 1  ;;  %p1863_p3 = scmp.ge.s32.totalorder %s2385_s14, 1 }
   0x6   : > { %s2463_s19 = scalar_select %p86_p0, %s2381_s13, %s88_s18  }
   0x7   : > { %p2465_p4 = por %p99_p2, %p98_p1  ;;  %p149_p5 = scmp.lt.s32.totalorder %s2385_s14, 3 }
   0x9   : > { %p150_p6 = pnand %p1863_p3, %p149_p5 }
   0xa   : > { %v2219_v0 = vld [vmem:[%s3023_s1] sm:$0xff] (!%p150_p6)   ;;  %v2419_v1 = vmov (!%p150_p6), 0   ;;  %s2475_s23 = sshll.u32 (!%p150_p6), %s2453_s15, 6  ;;  %v2220_v2 = vld [vmem:[%s3023_s1 + $0x8] sm:$0xff] (!%p150_p6)   ;;  %v2221_v3 = vld [vmem:[%s3023_s1 + $0x10] sm:$0xff] (!%p150_p6)   ;;  %s175_s17 = sand.u32 (!%p150_p6), 1, %s2377_s12  }
   0xb   : > { %153 = sbr.rel (%p150_p6) target bundleno = 507 (0x1fb), region = 32  ;;  %720 = vmatprep.subr.bf16.mxu0 (!%p150_p6), %v2419_v1  ;;  %2098 = vmatprep.subr.bf16.mxu1 (!%p150_p6), %v2419_v1  ;;  %p184_p7 = scmp.lt.s32.totalorder (!%p150_p6), %s2475_s23, 99  ;;  %v2222_v4 = vld [vmem:[%s3023_s1 + $0x18] sm:$0xff] (!%p150_p6)   ;;  %v2223_v5 = vld [vmem:[%s3023_s1 + $0x20] sm:$0xff] (!%p150_p6)   ;;  %v2224_v7 = vld [vmem:[%s3023_s1 + $0x28] sm:$0xff] (!%p150_p6)   ;;  %vm1329_vm0 = vcmask (!%p150_p6), 257024  }
   0xc   : > { %721 = vmatpush1.bf16.msra.mxu0 (!%p150_p6), %v2219_v0  ;;  %2114 = vmatpush1.bf16.msra.mxu1 (!%p150_p6), %v2219_v0  ;;  %v2225_v9 = vld [vmem:[%s3023_s1 + $0x30] sm:$0xff] (!%p150_p6)   ;;  %v2226_v10 = vld [vmem:[%s3023_s1 + $0x38] sm:$0xff] (!%p150_p6)   ;;  %v2227_v11 = vld [vmem:[%s3023_s1 + $0x40] sm:$0xff] (!%p150_p6)   ;;  %s1864_s22 = sshll.u32 (!%p150_p6), %s175_s17, 8 }
   0xd   : > { %722 = vmatprep.subr.bf16.mxu0 (!%p150_p6), %v2419_v1  ;;  %2099 = vmatprep.subr.bf16.mxu1 (!%p150_p6), %v2419_v1  ;;  %v2228_v12 = vld [vmem:[%s3023_s1 + $0x48] sm:$0xff] (!%p150_p6)   ;;  %v2229_v13 = vld [vmem:[%s3023_s1 + $0x50] sm:$0xff] (!%p150_p6)   ;;  %v2230_v14 = vld [vmem:[%s3023_s1 + $0x58] sm:$0xff] (!%p150_p6)   ;;  %s2633_s12 = scalar_lea.vmem (!%p150_p6), [#allocation2], %s1864_s22  }
   0xe   : > { %v2231_v15 = vld [vmem:[%s3023_s1 + $0x60] sm:$0xff] (!%p150_p6)   ;;  %v2232_v16 = vld [vmem:[%s3023_s1 + $0x68] sm:$0xff] (!%p150_p6)   ;;  %v2233_v17 = vld [vmem:[%s3023_s1 + $0x70] sm:$0xff] (!%p150_p6)  }
   0xf   : > { %v2234_v18 = vld [vmem:[%s3023_s1 + $0x78] sm:$0xff] (!%p150_p6)  }
  0x10   : > { %723 = vmatpush1.bf16.msra.mxu0 (!%p150_p6), %v2220_v2  ;;  %2115 = vmatpush1.bf16.msra.mxu1 (!%p150_p6), %v2220_v2 }
  0x11   : > { %724 = vmatprep.subr.bf16.mxu0 (!%p150_p6), %v2419_v1  ;;  %2100 = vmatprep.subr.bf16.mxu1 (!%p150_p6), %v2419_v1 }
  0x12   : > { %s185_s28 = scalar_select %p184_p7, %s2475_s23, 99 }
  0x13   : > { %s2095_s24 = sshll.u32 (%p2465_p4), %s2453_s15, 8 }
  0x14   : > { %725 = vmatpush1.bf16.msra.mxu0 %v2221_v3  ;;  %2116 = vmatpush1.bf16.msra.mxu1 %v2221_v3  ;;  %s2030_s4 = sshll.u32 %s185_s28, 3  ;;  %s2830_s27 = scalar_lea.vmem (%p2465_p4), %s3025_s3, %s2095_s24  }
  0x15   : > { %726 = vmatprep.subr.bf16.mxu0 %v2419_v1  ;;  %2101 = vmatprep.subr.bf16.mxu1 %v2419_v1  ;;  %s2500_s9 = scalar_lea.vmem %s3022_s0, %s2030_s4 }
  0x16   : > { %v2237_v6 = vld [vmem:[%s2500_s9 + $0x4] ss:$8 sps:$4 sm:$0xff]   ;;  %v2235_v19 = vld [vmem:[%s2500_s9] ss:$8 sps:$4 sm:$0xff]   ;;  %v2241_v21 = vld [vmem:[%s2500_s9 + $0x14] ss:$8 sps:$4 sm:$0xff]  }
  0x17   : > { %v2240_v8 = vld [vmem:[%s2500_s9 + $0x104] ss:$8 sps:$4 sm:$0xff]   ;;  %752 = vmatprep.mubr.bf16.mxu0 %v2237_v6  ;;  %v2238_v20 = vld [vmem:[%s2500_s9 + $0x100] ss:$8 sps:$4 sm:$0xff]   ;;  %v2243_v22 = vld [vmem:[%s2500_s9 + $0x114] ss:$8 sps:$4 sm:$0xff]  }
  0x18   : > { %727 = vmatpush1.bf16.msra.mxu0 %v2222_v4  ;;  %2117 = vmatpush1.bf16.msra.mxu1 %v2222_v4  ;;  %v2245_v23 = vld [vmem:[%s2500_s9 + $0x10] ss:$8 sps:$4 sm:$0xff]   ;;  %v2247_v25 = vld [vmem:[%s2500_s9 + $0x24] ss:$8 sps:$4 sm:$0xff]   ;;  %v2251_v27 = vld [vmem:[%s2500_s9 + $0x20] ss:$8 sps:$4 sm:$0xff]  }
  0x19   : > { %728 = vmatprep.subr.bf16.mxu0 %v2419_v1  ;;  %2102 = vmatprep.subr.bf16.mxu1 %v2419_v1  ;;  %v2246_v24 = vld [vmem:[%s2500_s9 + $0x110] ss:$8 sps:$4 sm:$0xff]   ;;  %v2249_v26 = vld [vmem:[%s2500_s9 + $0x124] ss:$8 sps:$4 sm:$0xff]   ;;  %v2252_v28 = vld [vmem:[%s2500_s9 + $0x120] ss:$8 sps:$4 sm:$0xff]  }
  0x1a   : > { %880 = vmatprep.mubr.bf16.mxu1 %v2240_v8  ;;  %v2253_v29 = vld [vmem:[%s2500_s9 + $0x34] ss:$8 sps:$4 sm:$0xff]   ;;  %v2257_v31 = vld [vmem:[%s2500_s9 + $0x30] ss:$8 sps:$4 sm:$0xff]   ;;  %v2259_v33 = vld [vmem:[%s2500_s9 + $0x44] ss:$8 sps:$4 sm:$0xff]  }
  0x1b   : > { %v2255_v30 = vld [vmem:[%s2500_s9 + $0x134] ss:$8 sps:$4 sm:$0xff]   ;;  %v2258_v32 = vld [vmem:[%s2500_s9 + $0x130] ss:$8 sps:$4 sm:$0xff]   ;;  %v2261_v34 = vld [vmem:[%s2500_s9 + $0x144] ss:$8 sps:$4 sm:$0xff]  }
  0x1c   : > { %729 = vmatpush1.bf16.msra.mxu0 %v2223_v5  ;;  %2118 = vmatpush1.bf16.msra.mxu1 %v2223_v5  ;;  %v2263_v35 = vld [vmem:[%s2500_s9 + $0x40] ss:$8 sps:$4 sm:$0xff]   ;;  %v2265_v37 = vld [vmem:[%s2500_s9 + $0x54] ss:$8 sps:$4 sm:$0xff]   ;;  %v2269_v39 = vld [vmem:[%s2500_s9 + $0x50] ss:$8 sps:$4 sm:$0xff]  }
  0x1d   : > { %730 = vmatprep.subr.bf16.mxu0 %v2419_v1  ;;  %2103 = vmatprep.subr.bf16.mxu1 %v2419_v1  ;;  %v2264_v36 = vld [vmem:[%s2500_s9 + $0x140] ss:$8 sps:$4 sm:$0xff]   ;;  %v2267_v38 = vld [vmem:[%s2500_s9 + $0x154] ss:$8 sps:$4 sm:$0xff]   ;;  %v2270_v40 = vld [vmem:[%s2500_s9 + $0x150] ss:$8 sps:$4 sm:$0xff]  }
  0x1e   : > { %v2271_v41 = vld [vmem:[%s2500_s9 + $0x64] ss:$8 sps:$4 sm:$0xff]   ;;  %v2275_v43 = vld [vmem:[%s2500_s9 + $0x60] ss:$8 sps:$4 sm:$0xff]   ;;  %v2277_v45 = vld [vmem:[%s2500_s9 + $0x74] ss:$8 sps:$4 sm:$0xff]  }
  0x1f   : > { %v2273_v42 = vld [vmem:[%s2500_s9 + $0x164] ss:$8 sps:$4 sm:$0xff]   ;;  %v2276_v44 = vld [vmem:[%s2500_s9 + $0x160] ss:$8 sps:$4 sm:$0xff]   ;;  %v2279_v46 = vld [vmem:[%s2500_s9 + $0x174] ss:$8 sps:$4 sm:$0xff]  }
  0x20   : > { %731 = vmatpush1.bf16.msra.mxu0 %v2224_v7  ;;  %2119 = vmatpush1.bf16.msra.mxu1 %v2224_v7  ;;  %v2281_v47 = vld [vmem:[%s2500_s9 + $0x70] ss:$8 sps:$4 sm:$0xff]   ;;  %v2283_v49 = vld [vmem:[%s2500_s9 + $0x84] ss:$8 sps:$4 sm:$0xff]   ;;  %v2287_v51 = vld [vmem:[%s2500_s9 + $0x80] ss:$8 sps:$4 sm:$0xff]  }
  0x21   : > { %732 = vmatprep.subr.bf16.mxu0 %v2419_v1  ;;  %2104 = vmatprep.subr.bf16.mxu1 %v2419_v1  ;;  %v2282_v48 = vld [vmem:[%s2500_s9 + $0x170] ss:$8 sps:$4 sm:$0xff]   ;;  %v2285_v50 = vld [vmem:[%s2500_s9 + $0x184] ss:$8 sps:$4 sm:$0xff]   ;;  %v2288_v52 = vld [vmem:[%s2500_s9 + $0x180] ss:$8 sps:$4 sm:$0xff]  }
  0x22   : > { %v2289_v53 = vld [vmem:[%s2500_s9 + $0x94] ss:$8 sps:$4 sm:$0xff]   ;;  %v2293_v55 = vld [vmem:[%s2500_s9 + $0x90] ss:$8 sps:$4 sm:$0xff]   ;;  %v2295_v57 = vld [vmem:[%s2500_s9 + $0xa4] ss:$8 sps:$4 sm:$0xff]  }
  0x23   : > { %v2291_v54 = vld [vmem:[%s2500_s9 + $0x194] ss:$8 sps:$4 sm:$0xff]   ;;  %v2294_v56 = vld [vmem:[%s2500_s9 + $0x190] ss:$8 sps:$4 sm:$0xff]   ;;  %v2297_v58 = vld [vmem:[%s2500_s9 + $0x1a4] ss:$8 sps:$4 sm:$0xff]  }
  0x24   : > { %733 = vmatpush1.bf16.msra.mxu0 %v2225_v9  ;;  %2120 = vmatpush1.bf16.msra.mxu1 %v2225_v9  ;;  %v2299_v59 = vld [vmem:[%s2500_s9 + $0xa0] ss:$8 sps:$4 sm:$0xff]   ;;  %v2301_v61 = vld [vmem:[%s2500_s9 + $0xb4] ss:$8 sps:$4 sm:$0xff]   ;;  %v2305_v63 = vld [vmem:[%s2500_s9 + $0xb0] ss:$8 sps:$4 sm:$0xff]  }
  0x25   : > { %734 = vmatprep.subr.bf16.mxu0 %v2419_v1  ;;  %2105 = vmatprep.subr.bf16.mxu1 %v2419_v1  ;;  %v2300_v60 = vld [vmem:[%s2500_s9 + $0x1a0] ss:$8 sps:$4 sm:$0xff]   ;;  %v2303_v62 = vld [vmem:[%s2500_s9 + $0x1b4] ss:$8 sps:$4 sm:$0xff]   ;;  %v2306_v0 = vld [vmem:[%s2500_s9 + $0x1b0] ss:$8 sps:$4 sm:$0xff]  }
  0x26   : > { %v2309_v2 = vld [vmem:[%s2500_s9 + $0x1c4] ss:$8 sps:$4 sm:$0xff]   ;;  %v2311_v3 = vld [vmem:[%s2500_s9 + $0xc0] ss:$8 sps:$4 sm:$0xff]   ;;  %v2313_v5 = vld [vmem:[%s2500_s9 + $0xd4] ss:$8 sps:$4 sm:$0xff]  }
  0x27   : > { %v2312_v4 = vld [vmem:[%s2500_s9 + $0x1c0] ss:$8 sps:$4 sm:$0xff]   ;;  %v2315_v6 = vld [vmem:[%s2500_s9 + $0x1d4] ss:$8 sps:$4 sm:$0xff]   ;;  %v2317_v7 = vld [vmem:[%s2500_s9 + $0xd0] ss:$8 sps:$4 sm:$0xff]  }
  0x28   : > { %735 = vmatpush1.bf16.msra.mxu0 %v2226_v10  ;;  %2121 = vmatpush1.bf16.msra.mxu1 %v2226_v10  ;;  %v2318_v8 = vld [vmem:[%s2500_s9 + $0x1d0] ss:$8 sps:$4 sm:$0xff]   ;;  %v2319_v9 = vld [vmem:[%s2500_s9 + $0xe4] ss:$8 sps:$4 sm:$0xff]  }
  0x29   : > { %736 = vmatprep.subr.bf16.mxu0 %v2419_v1  ;;  %2106 = vmatprep.subr.bf16.mxu1 %v2419_v1  ;;  %v2321_v10 = vld [vmem:[%s2500_s9 + $0x1e4] ss:$8 sps:$4 sm:$0xff]  }
  0x2c   : > { %737 = vmatpush1.bf16.msra.mxu0 %v2227_v11  ;;  %2122 = vmatpush1.bf16.msra.mxu1 %v2227_v11  ;;  %v2323_v11 = vld [vmem:[%s2500_s9 + $0xe0] ss:$8 sps:$4 sm:$0xff]  }
  0x2d   : > { %738 = vmatprep.subr.bf16.mxu0 %v2419_v1  ;;  %2107 = vmatprep.subr.bf16.mxu1 %v2419_v1 }
  0x30   : > { %739 = vmatpush1.bf16.msra.mxu0 %v2228_v12  ;;  %2123 = vmatpush1.bf16.msra.mxu1 %v2228_v12  ;;  %v2324_v12 = vld [vmem:[%s2500_s9 + $0x1e0] ss:$8 sps:$4 sm:$0xff]  }
  0x31   : > { %740 = vmatprep.subr.bf16.mxu0 %v2419_v1  ;;  %2108 = vmatprep.subr.bf16.mxu1 %v2419_v1 }
  0x34   : > { %741 = vmatpush1.bf16.msra.mxu0 %v2229_v13  ;;  %2124 = vmatpush1.bf16.msra.mxu1 %v2229_v13  ;;  %v2325_v13 = vld [vmem:[%s2500_s9 + $0xf4] ss:$8 sps:$4 sm:$0xff]  }
  0x35   : > { %742 = vmatprep.subr.bf16.mxu0 %v2419_v1  ;;  %2109 = vmatprep.subr.bf16.mxu1 %v2419_v1 }
  0x38   : > { %743 = vmatpush1.bf16.msra.mxu0 %v2230_v14  ;;  %2125 = vmatpush1.bf16.msra.mxu1 %v2230_v14  ;;  %v2327_v14 = vld [vmem:[%s2500_s9 + $0x1f4] ss:$8 sps:$4 sm:$0xff]  }
  0x39   : > { %744 = vmatprep.subr.bf16.mxu0 %v2419_v1  ;;  %2110 = vmatprep.subr.bf16.mxu1 %v2419_v1 }
  0x3c   : > { %745 = vmatpush1.bf16.msra.mxu0 %v2231_v15  ;;  %2126 = vmatpush1.bf16.msra.mxu1 %v2231_v15  ;;  %v2329_v15 = vld [vmem:[%s2500_s9 + $0xf0] ss:$8 sps:$4 sm:$0xff]  }
  0x3d   : > { %746 = vmatprep.subr.bf16.mxu0 %v2419_v1  ;;  %2111 = vmatprep.subr.bf16.mxu1 %v2419_v1 }
  0x40   : > { %747 = vmatpush1.bf16.msra.mxu0 %v2232_v16  ;;  %2127 = vmatpush1.bf16.msra.mxu1 %v2232_v16  ;;  %v2330_v16 = vld [vmem:[%s2500_s9 + $0x1f0] ss:$8 sps:$4 sm:$0xff]  }
  0x41   : > { %748 = vmatprep.subr.bf16.mxu0 %v2419_v1  ;;  %2112 = vmatprep.subr.bf16.mxu1 %v2419_v1 }
  0x44   : > { %749 = vmatpush1.bf16.msra.mxu0 %v2233_v17  ;;  %2128 = vmatpush1.bf16.msra.mxu1 %v2233_v17  ;;  %v2627_v17 = vld [vmem:[%s3024_s2] ss:$0 sm:$0xff] }
  0x45   : > { %750 = vmatprep.subr.bf16.mxu0 %v2419_v1  ;;  %2113 = vmatprep.subr.bf16.mxu1 %v2419_v1  ;;  %v2307_v1 = vld [vmem:[%s2500_s9 + $0xc4] ss:$8 sps:$4 sm:$0xff]   ;;  %s1402_s9 = ssub.s32 (%p2465_p4), 100, %s2475_s23 }
  0x46   : > { %p1403_p8 = scmp.lt.s32.totalorder (%p2465_p4), %s1402_s9, 64 }
  0x48   : > { %751 = vmatpush1.bf16.msra.mxu0 %v2234_v18  ;;  %2129 = vmatpush1.bf16.msra.mxu1 %v2234_v18 }
  0x4b   : > { %753 = vmatmul.mubr.bf16.vlgmr.msra.gmra.mrb[0].mxu0 %v2235_v19  ;;  %881 = vmatmul.mubr.bf16.vlgmr.msra.gmra.mrb[0].mxu1 %v2238_v20 }
  0x4c   : > { %760 = vmatprep.mubr.bf16.mxu0 %v2241_v21  ;;  %888 = vmatprep.mubr.bf16.mxu1 %v2243_v22 }
  0x53   : > { %761 = vmatmul.mubr.bf16.gmra.mrb[4].mxu0 %v2245_v23  ;;  %889 = vmatmul.mubr.bf16.gmra.mrb[4].mxu1 %v2246_v24 }
  0x54   : > { %768 = vmatprep.mubr.bf16.mxu0 %v2247_v25  ;;  %896 = vmatprep.mubr.bf16.mxu1 %v2249_v26 }
  0x5b   : > { %769 = vmatmul.mubr.bf16.gmra.mrb[8].mxu0 %v2251_v27  ;;  %897 = vmatmul.mubr.bf16.gmra.mrb[8].mxu1 %v2252_v28 }
  0x5c   : > { %776 = vmatprep.mubr.bf16.mxu0 %v2253_v29  ;;  %904 = vmatprep.mubr.bf16.mxu1 %v2255_v30 }
  0x63   : > { %777 = vmatmul.mubr.bf16.gmra.mrb[12].mxu0 %v2257_v31  ;;  %905 = vmatmul.mubr.bf16.gmra.mrb[12].mxu1 %v2258_v32 }
  0x64   : > { %784 = vmatprep.mubr.bf16.mxu0 %v2259_v33  ;;  %912 = vmatprep.mubr.bf16.mxu1 %v2261_v34 }
  0x6b   : > { %785 = vmatmul.mubr.bf16.gmra.mrb[16].mxu0 %v2263_v35  ;;  %913 = vmatmul.mubr.bf16.gmra.mrb[16].mxu1 %v2264_v36 }
  0x6c   : > { %792 = vmatprep.mubr.bf16.mxu0 %v2265_v37  ;;  %920 = vmatprep.mubr.bf16.mxu1 %v2267_v38 }
  0x73   : > { %793 = vmatmul.mubr.bf16.gmra.mrb[20].mxu0 %v2269_v39  ;;  %921 = vmatmul.mubr.bf16.gmra.mrb[20].mxu1 %v2270_v40 }
  0x74   : > { %800 = vmatprep.mubr.bf16.mxu0 %v2271_v41  ;;  %928 = vmatprep.mubr.bf16.mxu1 %v2273_v42 }
  0x7b   : > { %801 = vmatmul.mubr.bf16.gmra.mrb[24].mxu0 %v2275_v43  ;;  %929 = vmatmul.mubr.bf16.gmra.mrb[24].mxu1 %v2276_v44 }
  0x7c   : > { %808 = vmatprep.mubr.bf16.mxu0 %v2277_v45  ;;  %936 = vmatprep.mubr.bf16.mxu1 %v2279_v46 }
  0x83   : > { %809 = vmatmul.mubr.bf16.gmra.mrb[28].mxu0 %v2281_v47  ;;  %937 = vmatmul.mubr.bf16.gmra.mrb[28].mxu1 %v2282_v48 }
  0x84   : > { %816 = vmatprep.mubr.bf16.mxu0 %v2283_v49  ;;  %944 = vmatprep.mubr.bf16.mxu1 %v2285_v50 }
  0x8b   : > { %817 = vmatmul.mubr.bf16.gmra.mrb[32].mxu0 %v2287_v51  ;;  %945 = vmatmul.mubr.bf16.gmra.mrb[32].mxu1 %v2288_v52 }
  0x8c   : > { %824 = vmatprep.mubr.bf16.mxu0 %v2289_v53  ;;  %952 = vmatprep.mubr.bf16.mxu1 %v2291_v54 }
  0x93   : > { %825 = vmatmul.mubr.bf16.gmra.mrb[36].mxu0 %v2293_v55  ;;  %953 = vmatmul.mubr.bf16.gmra.mrb[36].mxu1 %v2294_v56 }
  0x94   : > { %832 = vmatprep.mubr.bf16.mxu0 %v2295_v57  ;;  %960 = vmatprep.mubr.bf16.mxu1 %v2297_v58 }
  0x9b   : > { %833 = vmatmul.mubr.bf16.gmra.mrb[40].mxu0 %v2299_v59  ;;  %961 = vmatmul.mubr.bf16.gmra.mrb[40].mxu1 %v2300_v60 }
  0x9c   : > { %840 = vmatprep.mubr.bf16.mxu0 %v2301_v61  ;;  %968 = vmatprep.mubr.bf16.mxu1 %v2303_v62 }
  0xa3   : > { %841 = vmatmul.mubr.bf16.gmra.mrb[44].mxu0 %v2305_v63  ;;  %969 = vmatmul.mubr.bf16.gmra.mrb[44].mxu1 %v2306_v0 }
  0xa4   : > { %848 = vmatprep.mubr.bf16.mxu0 %v2307_v1  ;;  %976 = vmatprep.mubr.bf16.mxu1 %v2309_v2 }
  0xab   : > { %849 = vmatmul.mubr.bf16.gmra.mrb[48].mxu0 %v2311_v3  ;;  %977 = vmatmul.mubr.bf16.gmra.mrb[48].mxu1 %v2312_v4 }
  0xac   : > { %856 = vmatprep.mubr.bf16.mxu0 %v2313_v5  ;;  %984 = vmatprep.mubr.bf16.mxu1 %v2315_v6 }
  0xb3   : > { %857 = vmatmul.mubr.bf16.gmra.mrb[52].mxu0 %v2317_v7  ;;  %985 = vmatmul.mubr.bf16.gmra.mrb[52].mxu1 %v2318_v8 }
  0xb4   : > { %864 = vmatprep.mubr.bf16.mxu0 %v2319_v9  ;;  %992 = vmatprep.mubr.bf16.mxu1 %v2321_v10 }
  0xbb   : > { %865 = vmatmul.mubr.bf16.gmra.mrb[56].mxu0 %v2323_v11  ;;  %993 = vmatmul.mubr.bf16.gmra.mrb[56].mxu1 %v2324_v12 }
  0xbc   : > { %872 = vmatprep.mubr.bf16.mxu0 %v2325_v13  ;;  %1000 = vmatprep.mubr.bf16.mxu1 %v2327_v14 }
  0xc3   : > { %873 = vmatmul.mubr.bf16.gmra.mrb[60].mxu0 %v2329_v15  ;;  %1001 = vmatmul.mubr.bf16.gmra.mrb[60].mxu1 %v2330_v16 }
 0x11e   : > { %v754_v18 = vpop.f32.mrb[0].mxu0  ;;  %v882_v19 = vpop.f32.mrb[0].mxu1 }
 0x11f   : > { %v755_v20 = vadd.f32 %v2627_v17, %v754_v18  ;;  %v883_v21 = vadd.f32 %v2627_v17, %v882_v19  ;;  %v756_v22 = vpop.f32.mrb[1].mxu0  ;;  %v884_v23 = vpop.f32.mrb[1].mxu1 }
 0x120   : > { %v757_v24 = vpop.f32.mrb[2].mxu0  ;;  %v885_v25 = vpop.f32.mrb[2].mxu1 }
 0x121   : > { %v1009_v26 = vmax.f32 %v755_v20, 0.0  ;;  %v1041_v27 = vmax.f32 %v883_v21, 0.0  ;;  %v758_v28 = vadd.f32 %v2627_v17, %v757_v24  ;;  %v886_v29 = vadd.f32 %v2627_v17, %v885_v25  ;;  %v759_v30 = vpop.f32.mrb[3].mxu0  ;;  %v887_v31 = vpop.f32.mrb[3].mxu1 }
 0x123   : > { %v2031_v32 = vpack.c.bf16 %v1009_v26, %v1009_v26  ;;  %v2063_v33 = vpack.c.bf16 %v1041_v27, %v1041_v27  ;;  %v1010_v34 = vmax.f32 %v758_v28, 0.0  ;;  %v1042_v35 = vmax.f32 %v886_v29, 0.0 }
 0x125   : > { %1330 = vst.msk [vmem:[%s2633_s12] sm:$0xf] %vm1329_vm0, %v2031_v32  ;;  %1362 = vst.msk [vmem:[%s2633_s12 + $0x80] sm:$0xf] %vm1329_vm0, %v2063_v33  ;;  %v2032_v36 = vpack.c.bf16 %v1010_v34, %v1010_v34  ;;  %v2064_v37 = vpack.c.bf16 %v1042_v35, %v1042_v35 }
 0x126   : > { %v762_v38 = vpop.f32.mrb[4].mxu0  ;;  %v890_v39 = vpop.f32.mrb[4].mxu1 }
 0x127   : > { %1331 = vst.msk [vmem:[%s2633_s12 + $0x4] sm:$0xf] %vm1329_vm0, %v2032_v36  ;;  %1363 = vst.msk [vmem:[%s2633_s12 + $0x84] sm:$0xf] %vm1329_vm0, %v2064_v37  ;;  %v763_v40 = vadd.f32 %v2627_v17, %v762_v38  ;;  %v891_v41 = vadd.f32 %v2627_v17, %v890_v39  ;;  %v764_v42 = vpop.f32.mrb[5].mxu0  ;;  %v892_v43 = vpop.f32.mrb[5].mxu1 }
 0x128   : > { %v765_v44 = vpop.f32.mrb[6].mxu0  ;;  %v893_v45 = vpop.f32.mrb[6].mxu1 }
 0x129   : > { %v1011_v46 = vmax.f32 %v763_v40, 0.0  ;;  %v1043_v47 = vmax.f32 %v891_v41, 0.0  ;;  %v766_v48 = vadd.f32 %v2627_v17, %v765_v44  ;;  %v894_v49 = vadd.f32 %v2627_v17, %v893_v45  ;;  %v767_v50 = vpop.f32.mrb[7].mxu0  ;;  %v895_v51 = vpop.f32.mrb[7].mxu1 }
 0x12b   : > { %v2033_v52 = vpack.c.bf16 %v1011_v46, %v1011_v46  ;;  %v2065_v53 = vpack.c.bf16 %v1043_v47, %v1043_v47  ;;  %v1012_v54 = vmax.f32 %v766_v48, 0.0  ;;  %v1044_v55 = vmax.f32 %v894_v49, 0.0 }
 0x12d   : > { %1332 = vst.msk [vmem:[%s2633_s12 + $0x8] sm:$0xf] %vm1329_vm0, %v2033_v52  ;;  %1364 = vst.msk [vmem:[%s2633_s12 + $0x88] sm:$0xf] %vm1329_vm0, %v2065_v53  ;;  %v2034_v56 = vpack.c.bf16 %v1012_v54, %v1012_v54  ;;  %v2066_v57 = vpack.c.bf16 %v1044_v55, %v1044_v55 }
 0x12e   : > { %v770_v58 = vpop.f32.mrb[8].mxu0  ;;  %v898_v59 = vpop.f32.mrb[8].mxu1 }
 0x12f   : > { %1333 = vst.msk [vmem:[%s2633_s12 + $0xc] sm:$0xf] %vm1329_vm0, %v2034_v56  ;;  %1365 = vst.msk [vmem:[%s2633_s12 + $0x8c] sm:$0xf] %vm1329_vm0, %v2066_v57  ;;  %v771_v60 = vadd.f32 %v2627_v17, %v770_v58  ;;  %v899_v61 = vadd.f32 %v2627_v17, %v898_v59  ;;  %v772_v62 = vpop.f32.mrb[9].mxu0  ;;  %v900_v63 = vpop.f32.mrb[9].mxu1 }
 0x130   : > { %v773_v0 = vpop.f32.mrb[10].mxu0  ;;  %v901_v1 = vpop.f32.mrb[10].mxu1 }
 0x131   : > { %v1013_v2 = vmax.f32 %v771_v60, 0.0  ;;  %v1045_v3 = vmax.f32 %v899_v61, 0.0  ;;  %v774_v4 = vadd.f32 %v2627_v17, %v773_v0  ;;  %v902_v5 = vadd.f32 %v2627_v17, %v901_v1  ;;  %v775_v6 = vpop.f32.mrb[11].mxu0  ;;  %v903_v7 = vpop.f32.mrb[11].mxu1 }
 0x133   : > { %v2035_v8 = vpack.c.bf16 %v1013_v2, %v1013_v2  ;;  %v2067_v9 = vpack.c.bf16 %v1045_v3, %v1045_v3  ;;  %v1014_v10 = vmax.f32 %v774_v4, 0.0  ;;  %v1046_v11 = vmax.f32 %v902_v5, 0.0 }
 0x135   : > { %1334 = vst.msk [vmem:[%s2633_s12 + $0x10] sm:$0xf] %vm1329_vm0, %v2035_v8  ;;  %1366 = vst.msk [vmem:[%s2633_s12 + $0x90] sm:$0xf] %vm1329_vm0, %v2067_v9  ;;  %v2036_v12 = vpack.c.bf16 %v1014_v10, %v1014_v10  ;;  %v2068_v13 = vpack.c.bf16 %v1046_v11, %v1046_v11 }
 0x136   : > { %v778_v14 = vpop.f32.mrb[12].mxu0  ;;  %v906_v15 = vpop.f32.mrb[12].mxu1 }
 0x137   : > { %1335 = vst.msk [vmem:[%s2633_s12 + $0x14] sm:$0xf] %vm1329_vm0, %v2036_v12  ;;  %1367 = vst.msk [vmem:[%s2633_s12 + $0x94] sm:$0xf] %vm1329_vm0, %v2068_v13  ;;  %v779_v16 = vadd.f32 %v2627_v17, %v778_v14  ;;  %v907_v18 = vadd.f32 %v2627_v17, %v906_v15  ;;  %v780_v19 = vpop.f32.mrb[13].mxu0  ;;  %v908_v20 = vpop.f32.mrb[13].mxu1 }
 0x138   : > { %v781_v21 = vpop.f32.mrb[14].mxu0  ;;  %v909_v22 = vpop.f32.mrb[14].mxu1 }
 0x139   : > { %v1015_v23 = vmax.f32 %v779_v16, 0.0  ;;  %v1047_v24 = vmax.f32 %v907_v18, 0.0  ;;  %v782_v25 = vadd.f32 %v2627_v17, %v781_v21  ;;  %v910_v26 = vadd.f32 %v2627_v17, %v909_v22  ;;  %v783_v27 = vpop.f32.mrb[15].mxu0  ;;  %v911_v28 = vpop.f32.mrb[15].mxu1 }
 0x13b   : > { %v2037_v29 = vpack.c.bf16 %v1015_v23, %v1015_v23  ;;  %v2069_v30 = vpack.c.bf16 %v1047_v24, %v1047_v24  ;;  %v1016_v31 = vmax.f32 %v782_v25, 0.0  ;;  %v1048_v32 = vmax.f32 %v910_v26, 0.0 }
 0x13d   : > { %1336 = vst.msk [vmem:[%s2633_s12 + $0x18] sm:$0xf] %vm1329_vm0, %v2037_v29  ;;  %1368 = vst.msk [vmem:[%s2633_s12 + $0x98] sm:$0xf] %vm1329_vm0, %v2069_v30  ;;  %v2038_v33 = vpack.c.bf16 %v1016_v31, %v1016_v31  ;;  %v2070_v34 = vpack.c.bf16 %v1048_v32, %v1048_v32 }
 0x13e   : > { %v786_v35 = vpop.f32.mrb[16].mxu0  ;;  %v914_v36 = vpop.f32.mrb[16].mxu1 }
 0x13f   : > { %1337 = vst.msk [vmem:[%s2633_s12 + $0x1c] sm:$0xf] %vm1329_vm0, %v2038_v33  ;;  %1369 = vst.msk [vmem:[%s2633_s12 + $0x9c] sm:$0xf] %vm1329_vm0, %v2070_v34  ;;  %v787_v37 = vadd.f32 %v2627_v17, %v786_v35  ;;  %v915_v38 = vadd.f32 %v2627_v17, %v914_v36  ;;  %v788_v39 = vpop.f32.mrb[17].mxu0  ;;  %v916_v40 = vpop.f32.mrb[17].mxu1 }
 0x140   : > { %v789_v41 = vpop.f32.mrb[18].mxu0  ;;  %v917_v42 = vpop.f32.mrb[18].mxu1 }
 0x141   : > { %v1017_v43 = vmax.f32 %v787_v37, 0.0  ;;  %v1049_v44 = vmax.f32 %v915_v38, 0.0  ;;  %v790_v45 = vadd.f32 %v2627_v17, %v789_v41  ;;  %v918_v46 = vadd.f32 %v2627_v17, %v917_v42  ;;  %v791_v47 = vpop.f32.mrb[19].mxu0  ;;  %v919_v48 = vpop.f32.mrb[19].mxu1 }
 0x143   : > { %v2039_v49 = vpack.c.bf16 %v1017_v43, %v1017_v43  ;;  %v2071_v50 = vpack.c.bf16 %v1049_v44, %v1049_v44  ;;  %v1018_v51 = vmax.f32 %v790_v45, 0.0  ;;  %v1050_v52 = vmax.f32 %v918_v46, 0.0 }
 0x145   : > { %1338 = vst.msk [vmem:[%s2633_s12 + $0x20] sm:$0xf] %vm1329_vm0, %v2039_v49  ;;  %1370 = vst.msk [vmem:[%s2633_s12 + $0xa0] sm:$0xf] %vm1329_vm0, %v2071_v50  ;;  %v2040_v53 = vpack.c.bf16 %v1018_v51, %v1018_v51  ;;  %v2072_v54 = vpack.c.bf16 %v1050_v52, %v1050_v52 }
 0x146   : > { %v794_v55 = vpop.f32.mrb[20].mxu0  ;;  %v922_v56 = vpop.f32.mrb[20].mxu1 }
 0x147   : > { %1339 = vst.msk [vmem:[%s2633_s12 + $0x24] sm:$0xf] %vm1329_vm0, %v2040_v53  ;;  %1371 = vst.msk [vmem:[%s2633_s12 + $0xa4] sm:$0xf] %vm1329_vm0, %v2072_v54  ;;  %v795_v57 = vadd.f32 %v2627_v17, %v794_v55  ;;  %v923_v58 = vadd.f32 %v2627_v17, %v922_v56  ;;  %v796_v59 = vpop.f32.mrb[21].mxu0  ;;  %v924_v60 = vpop.f32.mrb[21].mxu1 }
 0x148   : > { %v797_v61 = vpop.f32.mrb[22].mxu0  ;;  %v925_v62 = vpop.f32.mrb[22].mxu1 }
 0x149   : > { %v1019_v63 = vmax.f32 %v795_v57, 0.0  ;;  %v1051_v0 = vmax.f32 %v923_v58, 0.0  ;;  %v798_v1 = vadd.f32 %v2627_v17, %v797_v61  ;;  %v926_v2 = vadd.f32 %v2627_v17, %v925_v62  ;;  %v799_v3 = vpop.f32.mrb[23].mxu0  ;;  %v927_v4 = vpop.f32.mrb[23].mxu1 }
 0x14b   : > { %v2041_v5 = vpack.c.bf16 %v1019_v63, %v1019_v63  ;;  %v2073_v6 = vpack.c.bf16 %v1051_v0, %v1051_v0  ;;  %v1020_v7 = vmax.f32 %v798_v1, 0.0  ;;  %v1052_v8 = vmax.f32 %v926_v2, 0.0 }
 0x14d   : > { %1340 = vst.msk [vmem:[%s2633_s12 + $0x28] sm:$0xf] %vm1329_vm0, %v2041_v5  ;;  %1372 = vst.msk [vmem:[%s2633_s12 + $0xa8] sm:$0xf] %vm1329_vm0, %v2073_v6  ;;  %v2042_v9 = vpack.c.bf16 %v1020_v7, %v1020_v7  ;;  %v2074_v10 = vpack.c.bf16 %v1052_v8, %v1052_v8 }
 0x14e   : > { %v802_v11 = vpop.f32.mrb[24].mxu0  ;;  %v930_v12 = vpop.f32.mrb[24].mxu1 }
 0x14f   : > { %1341 = vst.msk [vmem:[%s2633_s12 + $0x2c] sm:$0xf] %vm1329_vm0, %v2042_v9  ;;  %1373 = vst.msk [vmem:[%s2633_s12 + $0xac] sm:$0xf] %vm1329_vm0, %v2074_v10  ;;  %v803_v13 = vadd.f32 %v2627_v17, %v802_v11  ;;  %v931_v14 = vadd.f32 %v2627_v17, %v930_v12  ;;  %v804_v15 = vpop.f32.mrb[25].mxu0  ;;  %v932_v16 = vpop.f32.mrb[25].mxu1 }
 0x150   : > { %v805_v18 = vpop.f32.mrb[26].mxu0  ;;  %v933_v19 = vpop.f32.mrb[26].mxu1 }
 0x151   : > { %v1021_v20 = vmax.f32 %v803_v13, 0.0  ;;  %v1053_v21 = vmax.f32 %v931_v14, 0.0  ;;  %v806_v22 = vadd.f32 %v2627_v17, %v805_v18  ;;  %v934_v23 = vadd.f32 %v2627_v17, %v933_v19  ;;  %v807_v24 = vpop.f32.mrb[27].mxu0  ;;  %v935_v25 = vpop.f32.mrb[27].mxu1 }
 0x153   : > { %v2043_v26 = vpack.c.bf16 %v1021_v20, %v1021_v20  ;;  %v2075_v27 = vpack.c.bf16 %v1053_v21, %v1053_v21  ;;  %v1022_v28 = vmax.f32 %v806_v22, 0.0  ;;  %v1054_v29 = vmax.f32 %v934_v23, 0.0 }
 0x155   : > { %1342 = vst.msk [vmem:[%s2633_s12 + $0x30] sm:$0xf] %vm1329_vm0, %v2043_v26  ;;  %1374 = vst.msk [vmem:[%s2633_s12 + $0xb0] sm:$0xf] %vm1329_vm0, %v2075_v27  ;;  %v2044_v30 = vpack.c.bf16 %v1022_v28, %v1022_v28  ;;  %v2076_v31 = vpack.c.bf16 %v1054_v29, %v1054_v29 }
 0x156   : > { %v810_v32 = vpop.f32.mrb[28].mxu0  ;;  %v938_v33 = vpop.f32.mrb[28].mxu1 }
 0x157   : > { %1343 = vst.msk [vmem:[%s2633_s12 + $0x34] sm:$0xf] %vm1329_vm0, %v2044_v30  ;;  %1375 = vst.msk [vmem:[%s2633_s12 + $0xb4] sm:$0xf] %vm1329_vm0, %v2076_v31  ;;  %v811_v34 = vadd.f32 %v2627_v17, %v810_v32  ;;  %v939_v35 = vadd.f32 %v2627_v17, %v938_v33  ;;  %v812_v36 = vpop.f32.mrb[29].mxu0  ;;  %v940_v37 = vpop.f32.mrb[29].mxu1 }
 0x158   : > { %v813_v38 = vpop.f32.mrb[30].mxu0  ;;  %v941_v39 = vpop.f32.mrb[30].mxu1 }
 0x159   : > { %v1023_v40 = vmax.f32 %v811_v34, 0.0  ;;  %v1055_v41 = vmax.f32 %v939_v35, 0.0  ;;  %v814_v42 = vadd.f32 %v2627_v17, %v813_v38  ;;  %v942_v43 = vadd.f32 %v2627_v17, %v941_v39  ;;  %v815_v44 = vpop.f32.mrb[31].mxu0  ;;  %v943_v45 = vpop.f32.mrb[31].mxu1 }
 0x15b   : > { %v2045_v46 = vpack.c.bf16 %v1023_v40, %v1023_v40  ;;  %v2077_v47 = vpack.c.bf16 %v1055_v41, %v1055_v41  ;;  %v1024_v48 = vmax.f32 %v814_v42, 0.0  ;;  %v1056_v49 = vmax.f32 %v942_v43, 0.0 }
 0x15d   : > { %1344 = vst.msk [vmem:[%s2633_s12 + $0x38] sm:$0xf] %vm1329_vm0, %v2045_v46  ;;  %1376 = vst.msk [vmem:[%s2633_s12 + $0xb8] sm:$0xf] %vm1329_vm0, %v2077_v47  ;;  %v2046_v50 = vpack.c.bf16 %v1024_v48, %v1024_v48  ;;  %v2078_v51 = vpack.c.bf16 %v1056_v49, %v1056_v49 }
 0x15e   : > { %v818_v52 = vpop.f32.mrb[32].mxu0  ;;  %v946_v53 = vpop.f32.mrb[32].mxu1 }
 0x15f   : > { %1345 = vst.msk [vmem:[%s2633_s12 + $0x3c] sm:$0xf] %vm1329_vm0, %v2046_v50  ;;  %1377 = vst.msk [vmem:[%s2633_s12 + $0xbc] sm:$0xf] %vm1329_vm0, %v2078_v51  ;;  %v819_v54 = vadd.f32 %v2627_v17, %v818_v52  ;;  %v947_v55 = vadd.f32 %v2627_v17, %v946_v53  ;;  %v820_v56 = vpop.f32.mrb[33].mxu0  ;;  %v948_v57 = vpop.f32.mrb[33].mxu1 }
 0x160   : > { %v821_v58 = vpop.f32.mrb[34].mxu0  ;;  %v949_v59 = vpop.f32.mrb[34].mxu1 }
 0x161   : > { %v1025_v60 = vmax.f32 %v819_v54, 0.0  ;;  %v1057_v61 = vmax.f32 %v947_v55, 0.0  ;;  %v822_v62 = vadd.f32 %v2627_v17, %v821_v58  ;;  %v950_v63 = vadd.f32 %v2627_v17, %v949_v59  ;;  %v823_v0 = vpop.f32.mrb[35].mxu0  ;;  %v951_v1 = vpop.f32.mrb[35].mxu1 }
 0x163   : > { %v2047_v2 = vpack.c.bf16 %v1025_v60, %v1025_v60  ;;  %v2079_v3 = vpack.c.bf16 %v1057_v61, %v1057_v61  ;;  %v1026_v4 = vmax.f32 %v822_v62, 0.0  ;;  %v1058_v5 = vmax.f32 %v950_v63, 0.0 }
 0x165   : > { %1346 = vst.msk [vmem:[%s2633_s12 + $0x40] sm:$0xf] %vm1329_vm0, %v2047_v2  ;;  %1378 = vst.msk [vmem:[%s2633_s12 + $0xc0] sm:$0xf] %vm1329_vm0, %v2079_v3  ;;  %v2048_v6 = vpack.c.bf16 %v1026_v4, %v1026_v4  ;;  %v2080_v7 = vpack.c.bf16 %v1058_v5, %v1058_v5 }
 0x166   : > { %v826_v8 = vpop.f32.mrb[36].mxu0  ;;  %v954_v9 = vpop.f32.mrb[36].mxu1 }
 0x167   : > { %1347 = vst.msk [vmem:[%s2633_s12 + $0x44] sm:$0xf] %vm1329_vm0, %v2048_v6  ;;  %1379 = vst.msk [vmem:[%s2633_s12 + $0xc4] sm:$0xf] %vm1329_vm0, %v2080_v7  ;;  %v827_v10 = vadd.f32 %v2627_v17, %v826_v8  ;;  %v955_v11 = vadd.f32 %v2627_v17, %v954_v9  ;;  %v828_v12 = vpop.f32.mrb[37].mxu0  ;;  %v956_v13 = vpop.f32.mrb[37].mxu1 }
 0x168   : > { %v829_v14 = vpop.f32.mrb[38].mxu0  ;;  %v957_v15 = vpop.f32.mrb[38].mxu1 }
 0x169   : > { %v1027_v16 = vmax.f32 %v827_v10, 0.0  ;;  %v1059_v18 = vmax.f32 %v955_v11, 0.0  ;;  %v830_v19 = vadd.f32 %v2627_v17, %v829_v14  ;;  %v958_v20 = vadd.f32 %v2627_v17, %v957_v15  ;;  %v831_v21 = vpop.f32.mrb[39].mxu0  ;;  %v959_v22 = vpop.f32.mrb[39].mxu1 }
 0x16b   : > { %v2049_v23 = vpack.c.bf16 %v1027_v16, %v1027_v16  ;;  %v2081_v24 = vpack.c.bf16 %v1059_v18, %v1059_v18  ;;  %v1028_v25 = vmax.f32 %v830_v19, 0.0  ;;  %v1060_v26 = vmax.f32 %v958_v20, 0.0 }
 0x16d   : > { %1348 = vst.msk [vmem:[%s2633_s12 + $0x48] sm:$0xf] %vm1329_vm0, %v2049_v23  ;;  %1380 = vst.msk [vmem:[%s2633_s12 + $0xc8] sm:$0xf] %vm1329_vm0, %v2081_v24  ;;  %v2050_v27 = vpack.c.bf16 %v1028_v25, %v1028_v25  ;;  %v2082_v28 = vpack.c.bf16 %v1060_v26, %v1060_v26 }
 0x16e   : > { %v834_v29 = vpop.f32.mrb[40].mxu0  ;;  %v962_v30 = vpop.f32.mrb[40].mxu1 }
 0x16f   : > { %1349 = vst.msk [vmem:[%s2633_s12 + $0x4c] sm:$0xf] %vm1329_vm0, %v2050_v27  ;;  %1381 = vst.msk [vmem:[%s2633_s12 + $0xcc] sm:$0xf] %vm1329_vm0, %v2082_v28  ;;  %v835_v31 = vadd.f32 %v2627_v17, %v834_v29  ;;  %v963_v32 = vadd.f32 %v2627_v17, %v962_v30  ;;  %v836_v33 = vpop.f32.mrb[41].mxu0  ;;  %v964_v34 = vpop.f32.mrb[41].mxu1 }
 0x170   : > { %v837_v35 = vpop.f32.mrb[42].mxu0  ;;  %v965_v36 = vpop.f32.mrb[42].mxu1 }
 0x171   : > { %v1029_v37 = vmax.f32 %v835_v31, 0.0  ;;  %v1061_v38 = vmax.f32 %v963_v32, 0.0  ;;  %v838_v39 = vadd.f32 %v2627_v17, %v837_v35  ;;  %v966_v40 = vadd.f32 %v2627_v17, %v965_v36  ;;  %v839_v41 = vpop.f32.mrb[43].mxu0  ;;  %v967_v42 = vpop.f32.mrb[43].mxu1 }
 0x173   : > { %v2051_v43 = vpack.c.bf16 %v1029_v37, %v1029_v37  ;;  %v2083_v44 = vpack.c.bf16 %v1061_v38, %v1061_v38  ;;  %v1030_v45 = vmax.f32 %v838_v39, 0.0  ;;  %v1062_v46 = vmax.f32 %v966_v40, 0.0 }
 0x175   : > { %1350 = vst.msk [vmem:[%s2633_s12 + $0x50] sm:$0xf] %vm1329_vm0, %v2051_v43  ;;  %1382 = vst.msk [vmem:[%s2633_s12 + $0xd0] sm:$0xf] %vm1329_vm0, %v2083_v44  ;;  %v2052_v47 = vpack.c.bf16 %v1030_v45, %v1030_v45  ;;  %v2084_v48 = vpack.c.bf16 %v1062_v46, %v1062_v46 }
 0x176   : > { %v842_v49 = vpop.f32.mrb[44].mxu0  ;;  %v970_v50 = vpop.f32.mrb[44].mxu1 }
 0x177   : > { %1351 = vst.msk [vmem:[%s2633_s12 + $0x54] sm:$0xf] %vm1329_vm0, %v2052_v47  ;;  %1383 = vst.msk [vmem:[%s2633_s12 + $0xd4] sm:$0xf] %vm1329_vm0, %v2084_v48  ;;  %v843_v51 = vadd.f32 %v2627_v17, %v842_v49  ;;  %v971_v52 = vadd.f32 %v2627_v17, %v970_v50  ;;  %v844_v53 = vpop.f32.mrb[45].mxu0  ;;  %v972_v54 = vpop.f32.mrb[45].mxu1 }
 0x178   : > { %v845_v55 = vpop.f32.mrb[46].mxu0  ;;  %v973_v56 = vpop.f32.mrb[46].mxu1 }
 0x179   : > { %v1031_v57 = vmax.f32 %v843_v51, 0.0  ;;  %v1063_v58 = vmax.f32 %v971_v52, 0.0  ;;  %v846_v59 = vadd.f32 %v2627_v17, %v845_v55  ;;  %v974_v60 = vadd.f32 %v2627_v17, %v973_v56  ;;  %v847_v61 = vpop.f32.mrb[47].mxu0  ;;  %v975_v62 = vpop.f32.mrb[47].mxu1 }
 0x17b   : > { %v2053_v63 = vpack.c.bf16 %v1031_v57, %v1031_v57  ;;  %v2085_v0 = vpack.c.bf16 %v1063_v58, %v1063_v58  ;;  %v1032_v1 = vmax.f32 %v846_v59, 0.0  ;;  %v1064_v2 = vmax.f32 %v974_v60, 0.0 }
 0x17d   : > { %1352 = vst.msk [vmem:[%s2633_s12 + $0x58] sm:$0xf] %vm1329_vm0, %v2053_v63  ;;  %1384 = vst.msk [vmem:[%s2633_s12 + $0xd8] sm:$0xf] %vm1329_vm0, %v2085_v0  ;;  %v2054_v3 = vpack.c.bf16 %v1032_v1, %v1032_v1  ;;  %v2086_v4 = vpack.c.bf16 %v1064_v2, %v1064_v2 }
 0x17e   : > { %v850_v5 = vpop.f32.mrb[48].mxu0  ;;  %v978_v6 = vpop.f32.mrb[48].mxu1 }
 0x17f   : > { %1353 = vst.msk [vmem:[%s2633_s12 + $0x5c] sm:$0xf] %vm1329_vm0, %v2054_v3  ;;  %1385 = vst.msk [vmem:[%s2633_s12 + $0xdc] sm:$0xf] %vm1329_vm0, %v2086_v4  ;;  %v851_v7 = vadd.f32 %v2627_v17, %v850_v5  ;;  %v979_v8 = vadd.f32 %v2627_v17, %v978_v6  ;;  %v852_v9 = vpop.f32.mrb[49].mxu0  ;;  %v980_v10 = vpop.f32.mrb[49].mxu1 }
 0x180   : > { %v853_v11 = vpop.f32.mrb[50].mxu0  ;;  %v981_v12 = vpop.f32.mrb[50].mxu1 }
 0x181   : > { %v1033_v13 = vmax.f32 %v851_v7, 0.0  ;;  %v1065_v14 = vmax.f32 %v979_v8, 0.0  ;;  %v854_v15 = vadd.f32 %v2627_v17, %v853_v11  ;;  %v982_v16 = vadd.f32 %v2627_v17, %v981_v12  ;;  %v855_v18 = vpop.f32.mrb[51].mxu0  ;;  %v983_v19 = vpop.f32.mrb[51].mxu1 }
 0x183   : > { %v2055_v20 = vpack.c.bf16 %v1033_v13, %v1033_v13  ;;  %v2087_v21 = vpack.c.bf16 %v1065_v14, %v1065_v14  ;;  %v1034_v22 = vmax.f32 %v854_v15, 0.0  ;;  %v1066_v23 = vmax.f32 %v982_v16, 0.0 }
 0x185   : > { %1354 = vst.msk [vmem:[%s2633_s12 + $0x60] sm:$0xf] %vm1329_vm0, %v2055_v20  ;;  %1386 = vst.msk [vmem:[%s2633_s12 + $0xe0] sm:$0xf] %vm1329_vm0, %v2087_v21  ;;  %v2056_v24 = vpack.c.bf16 %v1034_v22, %v1034_v22  ;;  %v2088_v25 = vpack.c.bf16 %v1066_v23, %v1066_v23 }
 0x186   : > { %v858_v26 = vpop.f32.mrb[52].mxu0  ;;  %v986_v27 = vpop.f32.mrb[52].mxu1 }
 0x187   : > { %1355 = vst.msk [vmem:[%s2633_s12 + $0x64] sm:$0xf] %vm1329_vm0, %v2056_v24  ;;  %1387 = vst.msk [vmem:[%s2633_s12 + $0xe4] sm:$0xf] %vm1329_vm0, %v2088_v25  ;;  %v859_v28 = vadd.f32 %v2627_v17, %v858_v26  ;;  %v987_v29 = vadd.f32 %v2627_v17, %v986_v27  ;;  %v860_v30 = vpop.f32.mrb[53].mxu0  ;;  %v988_v31 = vpop.f32.mrb[53].mxu1 }
 0x188   : > { %v861_v32 = vpop.f32.mrb[54].mxu0  ;;  %v989_v33 = vpop.f32.mrb[54].mxu1 }
 0x189   : > { %v1035_v34 = vmax.f32 %v859_v28, 0.0  ;;  %v1067_v35 = vmax.f32 %v987_v29, 0.0  ;;  %v862_v36 = vadd.f32 %v2627_v17, %v861_v32  ;;  %v990_v37 = vadd.f32 %v2627_v17, %v989_v33  ;;  %v863_v38 = vpop.f32.mrb[55].mxu0  ;;  %v991_v39 = vpop.f32.mrb[55].mxu1 }
 0x18b   : > { %v2057_v40 = vpack.c.bf16 %v1035_v34, %v1035_v34  ;;  %v2089_v41 = vpack.c.bf16 %v1067_v35, %v1067_v35  ;;  %v1036_v42 = vmax.f32 %v862_v36, 0.0  ;;  %v1068_v43 = vmax.f32 %v990_v37, 0.0 }
 0x18d   : > { %1356 = vst.msk [vmem:[%s2633_s12 + $0x68] sm:$0xf] %vm1329_vm0, %v2057_v40  ;;  %1388 = vst.msk [vmem:[%s2633_s12 + $0xe8] sm:$0xf] %vm1329_vm0, %v2089_v41  ;;  %v2058_v44 = vpack.c.bf16 %v1036_v42, %v1036_v42  ;;  %v2090_v45 = vpack.c.bf16 %v1068_v43, %v1068_v43 }
 0x18e   : > { %v866_v46 = vpop.f32.mrb[56].mxu0  ;;  %v994_v47 = vpop.f32.mrb[56].mxu1 }
 0x18f   : > { %1357 = vst.msk [vmem:[%s2633_s12 + $0x6c] sm:$0xf] %vm1329_vm0, %v2058_v44  ;;  %1389 = vst.msk [vmem:[%s2633_s12 + $0xec] sm:$0xf] %vm1329_vm0, %v2090_v45  ;;  %v867_v48 = vadd.f32 %v2627_v17, %v866_v46  ;;  %v995_v49 = vadd.f32 %v2627_v17, %v994_v47  ;;  %v868_v50 = vpop.f32.mrb[57].mxu0  ;;  %v996_v51 = vpop.f32.mrb[57].mxu1 }
 0x190   : > { %v869_v52 = vpop.f32.mrb[58].mxu0  ;;  %v997_v53 = vpop.f32.mrb[58].mxu1 }
 0x191   : > { %v1037_v54 = vmax.f32 %v867_v48, 0.0  ;;  %v1069_v55 = vmax.f32 %v995_v49, 0.0  ;;  %v870_v56 = vadd.f32 %v2627_v17, %v869_v52  ;;  %v998_v57 = vadd.f32 %v2627_v17, %v997_v53  ;;  %v871_v58 = vpop.f32.mrb[59].mxu0  ;;  %v999_v59 = vpop.f32.mrb[59].mxu1 }
 0x193   : > { %v2059_v60 = vpack.c.bf16 %v1037_v54, %v1037_v54  ;;  %v2091_v61 = vpack.c.bf16 %v1069_v55, %v1069_v55  ;;  %v1038_v62 = vmax.f32 %v870_v56, 0.0  ;;  %v1070_v63 = vmax.f32 %v998_v57, 0.0 }
 0x195   : > { %1358 = vst.msk [vmem:[%s2633_s12 + $0x70] sm:$0xf] %vm1329_vm0, %v2059_v60  ;;  %1390 = vst.msk [vmem:[%s2633_s12 + $0xf0] sm:$0xf] %vm1329_vm0, %v2091_v61  ;;  %v2060_v0 = vpack.c.bf16 %v1038_v62, %v1038_v62  ;;  %v2092_v1 = vpack.c.bf16 %v1070_v63, %v1070_v63 }
 0x196   : > { %v874_v2 = vpop.f32.mrb[60].mxu0  ;;  %v1002_v3 = vpop.f32.mrb[60].mxu1 }
 0x197   : > { %1359 = vst.msk [vmem:[%s2633_s12 + $0x74] sm:$0xf] %vm1329_vm0, %v2060_v0  ;;  %1391 = vst.msk [vmem:[%s2633_s12 + $0xf4] sm:$0xf] %vm1329_vm0, %v2092_v1  ;;  %v875_v4 = vadd.f32 %v2627_v17, %v874_v2  ;;  %v1003_v5 = vadd.f32 %v2627_v17, %v1002_v3  ;;  %v876_v6 = vpop.f32.mrb[61].mxu0  ;;  %v1004_v7 = vpop.f32.mrb[61].mxu1 }
 0x198   : > { %v877_v8 = vpop.f32.mrb[62].mxu0  ;;  %v1005_v9 = vpop.f32.mrb[62].mxu1 }
 0x199   : > { %v1039_v10 = vmax.f32 %v875_v4, 0.0  ;;  %v1071_v11 = vmax.f32 %v1003_v5, 0.0  ;;  %v878_v12 = vadd.f32 %v2627_v17, %v877_v8  ;;  %v1006_v13 = vadd.f32 %v2627_v17, %v1005_v9  ;;  %v879_v14 = vpop.f32.mrb[63].mxu0  ;;  %v1007_v15 = vpop.f32.mrb[63].mxu1  ;;  %1400 = sbr.rel (!%p2465_p4) target bundleno = 507 (0x1fb), region = 36 }
 0x19b   : > { %v2061_v16 = vpack.c.bf16 %v1039_v10, %v1039_v10  ;;  %v2093_v18 = vpack.c.bf16 %v1071_v11, %v1071_v11  ;;  %v1040_v19 = vmax.f32 %v878_v12, 0.0  ;;  %v1072_v20 = vmax.f32 %v1006_v13, 0.0 }
 0x19d   : > { %1360 = vst.msk [vmem:[%s2633_s12 + $0x78] sm:$0xf] %vm1329_vm0, %v2061_v16  ;;  %1392 = vst.msk [vmem:[%s2633_s12 + $0xf8] sm:$0xf] %vm1329_vm0, %v2093_v18  ;;  %v2062_v21 = vpack.c.bf16 %v1040_v19, %v1040_v19  ;;  %v2094_v22 = vpack.c.bf16 %v1072_v20, %v1072_v20 }
 0x19f   : > { %1361 = vst.msk [vmem:[%s2633_s12 + $0x7c] sm:$0xf] %vm1329_vm0, %v2062_v21  ;;  %1393 = vst.msk [vmem:[%s2633_s12 + $0xfc] sm:$0xf] %vm1329_vm0, %v2094_v22 }
 0x1a0   : > { %s3034_s9 = smov (!%p1403_p8, %s1402_s9), 64 }
 0x1a1   : > { %s2015_s28 = sshll.u32 %s3034_s9, 6 }
 0x1a2   : > { %p2018_p9 = scmp.eq.s32.totalorder %s2015_s28, 0 }
 0x1a3   : > { %s2836_s29 = sshrl.u32 (!%p2018_p9), %s3034_s9, 6 }
 0x1a4   : > { %1411 = sbr.rel (%p2018_p9) target bundleno = 507 (0x1fb), region = 40  ;;  %p2019_p10 = scmp.le.s32.totalorder (!%p2018_p9), %s2836_s29, 0 }
 0x1ab   : > { %1816 = sbr.rel (%p2019_p10) target bundleno = 486 (0x1e6), region = 112  ;;  %s3027_s15 = smov (!%p2019_p10), %s2830_s27 }
 0x1ac   : > { %s3028_s20 = smov (!%p2019_p10), %s2633_s12  ;;  %s2845_s23 = smov (!%p2019_p10), 0  }
 0x1ad   : > { %s2847_s30 = smov (!%p2019_p10), 0  }
 0x1b2 LB: >> { %v1427_v17 = vld [vmem:[%s2393_s20] sm:$0xf]  ;;  %v1429_v23 = vld [vmem:[%s2393_s20 + $0x4] sm:$0xf]  ;;  %v1431_v24 = vld [vmem:[%s2393_s20 + $0x8] sm:$0xf]  ;;  %s2401_s30 = sphi %s2847_s30, %s1421_s30   ;;  %s2397_s23 = sphi %s2845_s23, %s3029_s23   ;;  %s2393_s20 = sphi %s3028_s20, %s1560_s20   ;;  %s2389_s15 = sphi %s3027_s15, %s1561_s15  }
 0x1b3   : >> { %1428 = vst [vmem:[%s2389_s15] sm:$0xf] %v1427_v17  ;;  %1430 = vst [vmem:[%s2389_s15 + $0x4] sm:$0xf] %v1429_v23  ;;  %v1433_v25 = vld [vmem:[%s2393_s20 + $0xc] sm:$0xf]  ;;  %s1555_s4 = sadd.s32 1, %s2397_s23 }
 0x1b4   : >> { %1432 = vst [vmem:[%s2389_s15 + $0x8] sm:$0xf] %v1431_v24  ;;  %v1435_v26 = vld [vmem:[%s2393_s20 + $0x10] sm:$0xf]  ;;  %v1437_v27 = vld [vmem:[%s2393_s20 + $0x14] sm:$0xf]  ;;  %p1556_p11 = scmp.ge.s32.totalorder %s1555_s4, %s2836_s29 }
 0x1b5   : >> { %1434 = vst [vmem:[%s2389_s15 + $0xc] sm:$0xf] %v1433_v25  ;;  %1436 = vst [vmem:[%s2389_s15 + $0x10] sm:$0xf] %v1435_v26  ;;  %v1439_v28 = vld [vmem:[%s2393_s20 + $0x18] sm:$0xf] }
 0x1b6   : >> { %1438 = vst [vmem:[%s2389_s15 + $0x14] sm:$0xf] %v1437_v27  ;;  %v1441_v29 = vld [vmem:[%s2393_s20 + $0x1c] sm:$0xf]  ;;  %v1443_v30 = vld [vmem:[%s2393_s20 + $0x20] sm:$0xf] }
 0x1b7   : >> { %1440 = vst [vmem:[%s2389_s15 + $0x18] sm:$0xf] %v1439_v28  ;;  %1442 = vst [vmem:[%s2389_s15 + $0x1c] sm:$0xf] %v1441_v29  ;;  %v1445_v31 = vld [vmem:[%s2393_s20 + $0x24] sm:$0xf] }
 0x1b8   : >> { %1444 = vst [vmem:[%s2389_s15 + $0x20] sm:$0xf] %v1443_v30  ;;  %v1447_v32 = vld [vmem:[%s2393_s20 + $0x28] sm:$0xf]  ;;  %v1449_v33 = vld [vmem:[%s2393_s20 + $0x2c] sm:$0xf] }
 0x1b9   : >> { %1446 = vst [vmem:[%s2389_s15 + $0x24] sm:$0xf] %v1445_v31  ;;  %1448 = vst [vmem:[%s2389_s15 + $0x28] sm:$0xf] %v1447_v32  ;;  %v1451_v34 = vld [vmem:[%s2393_s20 + $0x30] sm:$0xf] }
 0x1ba   : >> { %1450 = vst [vmem:[%s2389_s15 + $0x2c] sm:$0xf] %v1449_v33  ;;  %v1453_v35 = vld [vmem:[%s2393_s20 + $0x34] sm:$0xf]  ;;  %v1455_v36 = vld [vmem:[%s2393_s20 + $0x38] sm:$0xf] }
 0x1bb   : >> { %1452 = vst [vmem:[%s2389_s15 + $0x30] sm:$0xf] %v1451_v34  ;;  %1454 = vst [vmem:[%s2389_s15 + $0x34] sm:$0xf] %v1453_v35  ;;  %v1457_v37 = vld [vmem:[%s2393_s20 + $0x3c] sm:$0xf] }
 0x1bc   : >> { %1456 = vst [vmem:[%s2389_s15 + $0x38] sm:$0xf] %v1455_v36  ;;  %v1459_v38 = vld [vmem:[%s2393_s20 + $0x40] sm:$0xf]  ;;  %v1461_v39 = vld [vmem:[%s2393_s20 + $0x44] sm:$0xf] }
 0x1bd   : >> { %1458 = vst [vmem:[%s2389_s15 + $0x3c] sm:$0xf] %v1457_v37  ;;  %1460 = vst [vmem:[%s2389_s15 + $0x40] sm:$0xf] %v1459_v38  ;;  %v1463_v40 = vld [vmem:[%s2393_s20 + $0x48] sm:$0xf] }
 0x1be   : >> { %1462 = vst [vmem:[%s2389_s15 + $0x44] sm:$0xf] %v1461_v39  ;;  %v1465_v41 = vld [vmem:[%s2393_s20 + $0x4c] sm:$0xf]  ;;  %v1467_v42 = vld [vmem:[%s2393_s20 + $0x50] sm:$0xf] }
 0x1bf   : >> { %1464 = vst [vmem:[%s2389_s15 + $0x48] sm:$0xf] %v1463_v40  ;;  %1466 = vst [vmem:[%s2389_s15 + $0x4c] sm:$0xf] %v1465_v41  ;;  %v1469_v43 = vld [vmem:[%s2393_s20 + $0x54] sm:$0xf] }
 0x1c0   : >> { %1468 = vst [vmem:[%s2389_s15 + $0x50] sm:$0xf] %v1467_v42  ;;  %v1471_v44 = vld [vmem:[%s2393_s20 + $0x58] sm:$0xf]  ;;  %v1473_v45 = vld [vmem:[%s2393_s20 + $0x5c] sm:$0xf] }
 0x1c1   : >> { %1470 = vst [vmem:[%s2389_s15 + $0x54] sm:$0xf] %v1469_v43  ;;  %1472 = vst [vmem:[%s2389_s15 + $0x58] sm:$0xf] %v1471_v44  ;;  %v1475_v46 = vld [vmem:[%s2393_s20 + $0x60] sm:$0xf] }
 0x1c2   : >> { %1474 = vst [vmem:[%s2389_s15 + $0x5c] sm:$0xf] %v1473_v45  ;;  %v1477_v47 = vld [vmem:[%s2393_s20 + $0x64] sm:$0xf]  ;;  %v1479_v48 = vld [vmem:[%s2393_s20 + $0x68] sm:$0xf] }
 0x1c3   : >> { %1476 = vst [vmem:[%s2389_s15 + $0x60] sm:$0xf] %v1475_v46  ;;  %1478 = vst [vmem:[%s2389_s15 + $0x64] sm:$0xf] %v1477_v47  ;;  %v1481_v49 = vld [vmem:[%s2393_s20 + $0x6c] sm:$0xf] }
 0x1c4   : >> { %1480 = vst [vmem:[%s2389_s15 + $0x68] sm:$0xf] %v1479_v48  ;;  %v1483_v50 = vld [vmem:[%s2393_s20 + $0x70] sm:$0xf]  ;;  %v1485_v51 = vld [vmem:[%s2393_s20 + $0x74] sm:$0xf] }
 0x1c5   : >> { %1482 = vst [vmem:[%s2389_s15 + $0x6c] sm:$0xf] %v1481_v49  ;;  %1484 = vst [vmem:[%s2389_s15 + $0x70] sm:$0xf] %v1483_v50  ;;  %v1487_v52 = vld [vmem:[%s2393_s20 + $0x78] sm:$0xf] }
 0x1c6   : >> { %1486 = vst [vmem:[%s2389_s15 + $0x74] sm:$0xf] %v1485_v51  ;;  %v1489_v53 = vld [vmem:[%s2393_s20 + $0x7c] sm:$0xf]  ;;  %v1491_v54 = vld [vmem:[%s2393_s20 + $0x80] sm:$0xf] }
 0x1c7   : >> { %1488 = vst [vmem:[%s2389_s15 + $0x78] sm:$0xf] %v1487_v52  ;;  %1490 = vst [vmem:[%s2389_s15 + $0x7c] sm:$0xf] %v1489_v53  ;;  %v1493_v55 = vld [vmem:[%s2393_s20 + $0x84] sm:$0xf] }
 0x1c8   : >> { %1492 = vst [vmem:[%s2389_s15 + $0x80] sm:$0xf] %v1491_v54  ;;  %v1495_v56 = vld [vmem:[%s2393_s20 + $0x88] sm:$0xf]  ;;  %v1497_v57 = vld [vmem:[%s2393_s20 + $0x8c] sm:$0xf] }
 0x1c9   : >> { %1494 = vst [vmem:[%s2389_s15 + $0x84] sm:$0xf] %v1493_v55  ;;  %1496 = vst [vmem:[%s2389_s15 + $0x88] sm:$0xf] %v1495_v56  ;;  %v1499_v58 = vld [vmem:[%s2393_s20 + $0x90] sm:$0xf] }
 0x1ca   : >> { %1498 = vst [vmem:[%s2389_s15 + $0x8c] sm:$0xf] %v1497_v57  ;;  %v1501_v59 = vld [vmem:[%s2393_s20 + $0x94] sm:$0xf]  ;;  %v1503_v60 = vld [vmem:[%s2393_s20 + $0x98] sm:$0xf] }
 0x1cb   : >> { %1500 = vst [vmem:[%s2389_s15 + $0x90] sm:$0xf] %v1499_v58  ;;  %1502 = vst [vmem:[%s2389_s15 + $0x94] sm:$0xf] %v1501_v59  ;;  %v1505_v61 = vld [vmem:[%s2393_s20 + $0x9c] sm:$0xf] }
 0x1cc   : >> { %1504 = vst [vmem:[%s2389_s15 + $0x98] sm:$0xf] %v1503_v60  ;;  %v1507_v62 = vld [vmem:[%s2393_s20 + $0xa0] sm:$0xf]  ;;  %v1509_v63 = vld [vmem:[%s2393_s20 + $0xa4] sm:$0xf] }
 0x1cd   : >> { %1506 = vst [vmem:[%s2389_s15 + $0x9c] sm:$0xf] %v1505_v61  ;;  %1508 = vst [vmem:[%s2389_s15 + $0xa0] sm:$0xf] %v1507_v62  ;;  %v1511_v0 = vld [vmem:[%s2393_s20 + $0xa8] sm:$0xf] }
 0x1ce   : >> { %1510 = vst [vmem:[%s2389_s15 + $0xa4] sm:$0xf] %v1509_v63  ;;  %v1513_v1 = vld [vmem:[%s2393_s20 + $0xac] sm:$0xf]  ;;  %v1515_v2 = vld [vmem:[%s2393_s20 + $0xb0] sm:$0xf] }
 0x1cf   : >> { %1512 = vst [vmem:[%s2389_s15 + $0xa8] sm:$0xf] %v1511_v0  ;;  %1514 = vst [vmem:[%s2389_s15 + $0xac] sm:$0xf] %v1513_v1  ;;  %v1517_v3 = vld [vmem:[%s2393_s20 + $0xb4] sm:$0xf] }
 0x1d0   : >> { %1516 = vst [vmem:[%s2389_s15 + $0xb0] sm:$0xf] %v1515_v2  ;;  %v1519_v4 = vld [vmem:[%s2393_s20 + $0xb8] sm:$0xf]  ;;  %v1521_v5 = vld [vmem:[%s2393_s20 + $0xbc] sm:$0xf] }
 0x1d1   : >> { %1518 = vst [vmem:[%s2389_s15 + $0xb4] sm:$0xf] %v1517_v3  ;;  %1520 = vst [vmem:[%s2389_s15 + $0xb8] sm:$0xf] %v1519_v4  ;;  %v1523_v6 = vld [vmem:[%s2393_s20 + $0xc0] sm:$0xf] }
 0x1d2   : >> { %1522 = vst [vmem:[%s2389_s15 + $0xbc] sm:$0xf] %v1521_v5  ;;  %v1525_v7 = vld [vmem:[%s2393_s20 + $0xc4] sm:$0xf]  ;;  %v1527_v8 = vld [vmem:[%s2393_s20 + $0xc8] sm:$0xf] }
 0x1d3   : >> { %1524 = vst [vmem:[%s2389_s15 + $0xc0] sm:$0xf] %v1523_v6  ;;  %1526 = vst [vmem:[%s2389_s15 + $0xc4] sm:$0xf] %v1525_v7  ;;  %v1529_v9 = vld [vmem:[%s2393_s20 + $0xcc] sm:$0xf] }
 0x1d4   : >> { %1528 = vst [vmem:[%s2389_s15 + $0xc8] sm:$0xf] %v1527_v8  ;;  %v1531_v10 = vld [vmem:[%s2393_s20 + $0xd0] sm:$0xf]  ;;  %v1533_v11 = vld [vmem:[%s2393_s20 + $0xd4] sm:$0xf] }
 0x1d5   : >> { %1530 = vst [vmem:[%s2389_s15 + $0xcc] sm:$0xf] %v1529_v9  ;;  %1532 = vst [vmem:[%s2389_s15 + $0xd0] sm:$0xf] %v1531_v10  ;;  %v1535_v12 = vld [vmem:[%s2393_s20 + $0xd8] sm:$0xf] }
 0x1d6   : >> { %1534 = vst [vmem:[%s2389_s15 + $0xd4] sm:$0xf] %v1533_v11  ;;  %v1537_v13 = vld [vmem:[%s2393_s20 + $0xdc] sm:$0xf]  ;;  %v1539_v14 = vld [vmem:[%s2393_s20 + $0xe0] sm:$0xf] }
 0x1d7   : >> { %1536 = vst [vmem:[%s2389_s15 + $0xd8] sm:$0xf] %v1535_v12  ;;  %1538 = vst [vmem:[%s2389_s15 + $0xdc] sm:$0xf] %v1537_v13  ;;  %v1541_v15 = vld [vmem:[%s2393_s20 + $0xe4] sm:$0xf] }
 0x1d8   : >> { %1540 = vst [vmem:[%s2389_s15 + $0xe0] sm:$0xf] %v1539_v14  ;;  %v1543_v16 = vld [vmem:[%s2393_s20 + $0xe8] sm:$0xf]  ;;  %v1545_v18 = vld [vmem:[%s2393_s20 + $0xec] sm:$0xf] }
 0x1d9   : >> { %1542 = vst [vmem:[%s2389_s15 + $0xe4] sm:$0xf] %v1541_v15  ;;  %1544 = vst [vmem:[%s2389_s15 + $0xe8] sm:$0xf] %v1543_v16  ;;  %v1547_v19 = vld [vmem:[%s2393_s20 + $0xf0] sm:$0xf] }
 0x1da   : >> { %1546 = vst [vmem:[%s2389_s15 + $0xec] sm:$0xf] %v1545_v18  ;;  %v1549_v20 = vld [vmem:[%s2393_s20 + $0xf4] sm:$0xf]  ;;  %v1551_v21 = vld [vmem:[%s2393_s20 + $0xf8] sm:$0xf] }
 0x1db   : >> { %1548 = vst [vmem:[%s2389_s15 + $0xf0] sm:$0xf] %v1547_v19  ;;  %1550 = vst [vmem:[%s2389_s15 + $0xf4] sm:$0xf] %v1549_v20  ;;  %v1553_v22 = vld [vmem:[%s2393_s20 + $0xfc] sm:$0xf] }
 0x1dc   : >> { %1552 = vst [vmem:[%s2389_s15 + $0xf8] sm:$0xf] %v1551_v21  ;;  %1554 = vst [vmem:[%s2389_s15 + $0xfc] sm:$0xf] %v1553_v22  ;;  %s3036_s4 = smov (%p1556_p11, %s1555_s4), 0  ;;  %s1421_s30 = sadd.s32 1, %s2401_s30  }
 0x1dd   : >> { %s2020_s5 = sshll.u32 %s3036_s4, 8  ;;  %p1420_p12 = scmp.ge.s32.totalorder %s1421_s30, %s2836_s29 }
 0x1de   : >> { %s1560_s20 = scalar_lea.vmem %s2633_s12, %s2020_s5 [#allocation2]   ;;  %s1561_s15 = scalar_lea.vmem %s2830_s27, %s2020_s5  }
 0x1df   : >> { %s3029_s23 = smov %s3036_s4  ;;  %1423 = sbr.rel (!%p1420_p12) target bundleno = 434 (0x1b2), region = 118 }
 0x1e6 PF: > { %s3004_s6 = sand.u32 63, %s3034_s9   ;;  %s2096_s7 = sshll.u32 %s2836_s29, 8 }
 0x1e7   : > { %s1566_s8 = scalar_lea.vmem %s2633_s12, %s2096_s7 [#allocation2]   ;;  %s1568_s10 = scalar_lea.vmem %s2830_s27, %s2096_s7  }
 0x1e8   : > { %p2025_p13 = scmp.le.s32.totalorder %s3004_s6, 0 }
 0x1e9   : > { %s2403_s11 = smov (!%p2025_p13), %s1568_s10   ;;  %s2407_s14 = smov (!%p2025_p13), %s1566_s8  }
 0x1ea   : > { %1830 = sbr.rel (%p2025_p13) target bundleno = 507 (0x1fb), region = 123  ;;  %s2411_s17 = smov (!%p2025_p13), 0  }
 0x1eb   : > { %s2415_s18 = smov (!%p2025_p13), 0  }
 0x1f1 LB: >> { %v1578_v17 = vld [vmem:[%s2409_s14] sm:$0xf]  ;;  %s1580_s21 = sadd.s32 1, %s2413_s17  ;;  %s1572_s18 = sadd.s32 1, %s2417_s18   ;;  %s2417_s18 = sphi %s2415_s18, %s1572_s18   ;;  %s2413_s17 = sphi %s2411_s17, %s2412_s17   ;;  %s2409_s14 = sphi %s2407_s14, %s1585_s14   ;;  %s2405_s11 = sphi %s2403_s11, %s1586_s11  }
 0x1f2   : >> { %1579 = vst [vmem:[%s2405_s11] sm:$0xf] %v1578_v17  ;;  %p1581_p0 = scmp.ge.s32.totalorder %s1580_s21, %s3004_s6  ;;  %p1571_p1 = scmp.ge.s32.totalorder %s1572_s18, %s3004_s6 }
 0x1f4   : >> { %s3038_s21 = smov (%p1581_p0, %s1580_s21), 0  ;;  %1574 = sbr.rel (!%p1571_p1) target bundleno = 497 (0x1f1), region = 129 }
 0x1f5   : >> { %s2026_s22 = sshll.u32 %s3038_s21, 2  ;;  %s2412_s17 = smov %s3038_s21  }
 0x1f6   : >> { %s1585_s14 = scalar_lea.vmem %s1566_s8, %s2026_s22 [#allocation2]   ;;  %s1586_s11 = scalar_lea.vmem %s1568_s10, %s2026_s22  }
 0x1fb PF: > { %p10_p2 = scmp.ge.s32.totalorder %s2455_s16, 4   ;;  %s3030_s12 = smov %s2381_s13 }
 0x1fc   : > { %s3031_s13 = smov %s2463_s19  ;;  %s3032_s14 = smov %s2455_s16 }
 0x1fd   :  { %12 = sbr.rel (!%p10_p2) target bundleno = 2 (0x2), region = 140 }

// kernel: convnet_forward.5
= control target key start
LH: loop header
LB: loop body
LE: loop exit
PB: predicated region body
PF: predicated region fallthrough
CT: control target
= control target key end

     0   :  { %vm880_vm0 = vcmask 519168   ;;  %vm901_vm1 = vcmask 516096   ;;  %s1637_s1 = inlined_call_operand.vmem [shape: bf16[512,64], index: 1, kind: input, shape index: {}]   ;;  %s1638_s0 = inlined_call_operand.vmem [shape: bf16[162,512], index: 0, kind: input, shape index: {}]   ;;  %s1639_s2 = inlined_call_operand.vmem [shape: f32[1,64], index: 2, kind: input, shape index: {}]   ;;  %s1640_s3 = inlined_call_operand.vmem [shape: bf16[162,64], index: 3, kind: output, shape index: {}]  }
   0x1   :  { %v1190_v0 = vld [vmem:[%s1637_s1 + $0x40] sm:$0xff]   ;;  %v1194_v4 = vld [vmem:[%s1637_s1 + $0x48] sm:$0xff]   ;;  %v1198_v8 = vld [vmem:[%s1637_s1 + $0x50] sm:$0xff]  }
   0x2   :  { %v1191_v1 = vld [vmem:[%s1637_s1 + $0xc0] sm:$0xff]   ;;  %1026 = vmatprep.subr.bf16.mxu0 %v1190_v0  ;;  %v1195_v5 = vld [vmem:[%s1637_s1 + $0xc8] sm:$0xff]   ;;  %v1199_v9 = vld [vmem:[%s1637_s1 + $0xd0] sm:$0xff]  }
   0x3   :  { %v1192_v2 = vld [vmem:[%s1637_s1] sm:$0xff]   ;;  %1108 = vmatprep.subr.bf16.mxu1 %v1191_v1  ;;  %v1196_v6 = vld [vmem:[%s1637_s1 + $0x8] sm:$0xff]   ;;  %v1200_v10 = vld [vmem:[%s1637_s1 + $0x10] sm:$0xff]  }
   0x4   :  { %v1193_v3 = vld [vmem:[%s1637_s1 + $0x80] sm:$0xff]   ;;  %1027 = vmatpush3.bf16.msra.mxu0 %v1192_v2  ;;  %v1197_v7 = vld [vmem:[%s1637_s1 + $0x88] sm:$0xff]   ;;  %v1201_v11 = vld [vmem:[%s1637_s1 + $0x90] sm:$0xff]  }
   0x5   :  { %1109 = vmatpush3.bf16.msra.mxu1 %v1193_v3  ;;  %1028 = vmatprep.subr.bf16.mxu0 %v1194_v4  ;;  %v1202_v12 = vld [vmem:[%s1637_s1 + $0x58] sm:$0xff]   ;;  %v1206_v16 = vld [vmem:[%s1637_s1 + $0x60] sm:$0xff]   ;;  %v1210_v20 = vld [vmem:[%s1637_s1 + $0x68] sm:$0xff]  }
   0x6   :  { %1110 = vmatprep.subr.bf16.mxu1 %v1195_v5  ;;  %v1203_v13 = vld [vmem:[%s1637_s1 + $0xd8] sm:$0xff]   ;;  %v1207_v17 = vld [vmem:[%s1637_s1 + $0xe0] sm:$0xff]   ;;  %v1211_v21 = vld [vmem:[%s1637_s1 + $0xe8] sm:$0xff]  }
   0x7   :  { %v1204_v14 = vld [vmem:[%s1637_s1 + $0x18] sm:$0xff]   ;;  %v1208_v18 = vld [vmem:[%s1637_s1 + $0x20] sm:$0xff]   ;;  %v1212_v22 = vld [vmem:[%s1637_s1 + $0x28] sm:$0xff]  }
   0x8   :  { %1029 = vmatpush3.bf16.msra.mxu0 %v1196_v6  ;;  %v1205_v15 = vld [vmem:[%s1637_s1 + $0x98] sm:$0xff]   ;;  %v1209_v19 = vld [vmem:[%s1637_s1 + $0xa0] sm:$0xff]   ;;  %v1213_v23 = vld [vmem:[%s1637_s1 + $0xa8] sm:$0xff]  }
   0x9   :  { %1111 = vmatpush3.bf16.msra.mxu1 %v1197_v7  ;;  %1030 = vmatprep.subr.bf16.mxu0 %v1198_v8  ;;  %v1214_v24 = vld [vmem:[%s1637_s1 + $0x70] sm:$0xff]   ;;  %v1218_v28 = vld [vmem:[%s1637_s1 + $0x78] sm:$0xff]   ;;  %v55_v6 = vld [vmem:[%s1638_s0 + $0x140] sm:$0x11] }
   0xa   :  { %1112 = vmatprep.subr.bf16.mxu1 %v1199_v9  ;;  %v1215_v25 = vld [vmem:[%s1637_s1 + $0xf0] sm:$0xff]   ;;  %v1219_v29 = vld [vmem:[%s1637_s1 + $0xf8] sm:$0xff]   ;;  %v56_v7 = vld [vmem:[%s1638_s0 + $0x148] sm:$0x11] }
   0xb   :  { %v1216_v26 = vld [vmem:[%s1637_s1 + $0x30] sm:$0xff]   ;;  %v1220_v30 = vld [vmem:[%s1637_s1 + $0x38] sm:$0xff]  }
   0xc   :  { %1031 = vmatpush3.bf16.msra.mxu0 %v1200_v10  ;;  %v1217_v27 = vld [vmem:[%s1637_s1 + $0xb0] sm:$0xff]   ;;  %v1221_v31 = vld [vmem:[%s1637_s1 + $0xb8] sm:$0xff]   ;;  %v949_v10 = vcombine.high %v55_v6, %v55_v6 }
   0xd   :  { %1113 = vmatpush3.bf16.msra.mxu1 %v1201_v11  ;;  %1032 = vmatprep.subr.bf16.mxu0 %v1202_v12  ;;  %v1222_v32 = vld [vmem:[%s1638_s0] ss:$16 sps:$4 sm:$0xff]   ;;  %v1224_v33 = vld [vmem:[%s1638_s0 + $0x4] ss:$16 sps:$4 sm:$0xff]   ;;  %v1225_v34 = vld [vmem:[%s1638_s0 + $0x8] ss:$16 sps:$4 sm:$0xff]   ;;  %v951_v11 = vcombine.high %v56_v7, %v56_v7  ;;  %v948_v12 = vcombine.low %v55_v6, %v55_v6 }
   0xe   :  { %1114 = vmatprep.subr.bf16.mxu1 %v1203_v13  ;;  %v1227_v35 = vld [vmem:[%s1638_s0 + $0xc] ss:$16 sps:$4 sm:$0xff]   ;;  %566 = vmatprep.mubr.bf16.mxu0 %v1224_v33  ;;  %v1228_v36 = vld [vmem:[%s1638_s0 + $0x24] ss:$16 sps:$4 sm:$0xff]   ;;  %v1232_v38 = vld [vmem:[%s1638_s0 + $0x20] ss:$16 sps:$4 sm:$0xff]   ;;  %v950_v13 = vcombine.low %v56_v7, %v56_v7 }
   0xf   :  { %686 = vmatprep.mubr.bf16.mxu1 %v1227_v35  ;;  %v1230_v37 = vld [vmem:[%s1638_s0 + $0x2c] ss:$16 sps:$4 sm:$0xff]   ;;  %v1233_v39 = vld [vmem:[%s1638_s0 + $0x28] ss:$16 sps:$4 sm:$0xff]   ;;  %v1234_v40 = vld [vmem:[%s1638_s0 + $0x44] ss:$16 sps:$4 sm:$0xff]  }
  0x10   :  { %1033 = vmatpush3.bf16.msra.mxu0 %v1204_v14  ;;  %v1236_v41 = vld [vmem:[%s1638_s0 + $0x4c] ss:$16 sps:$4 sm:$0xff]   ;;  %v1238_v42 = vld [vmem:[%s1638_s0 + $0x40] ss:$16 sps:$4 sm:$0xff]   ;;  %v1239_v43 = vld [vmem:[%s1638_s0 + $0x48] ss:$16 sps:$4 sm:$0xff]  }
  0x11   :  { %1115 = vmatpush3.bf16.msra.mxu1 %v1205_v15  ;;  %1034 = vmatprep.subr.bf16.mxu0 %v1206_v16  ;;  %v1240_v44 = vld [vmem:[%s1638_s0 + $0x64] ss:$16 sps:$4 sm:$0xff]   ;;  %v1242_v45 = vld [vmem:[%s1638_s0 + $0x6c] ss:$16 sps:$4 sm:$0xff]   ;;  %v1244_v46 = vld [vmem:[%s1638_s0 + $0x60] ss:$16 sps:$4 sm:$0xff]  }
  0x12   :  { %1116 = vmatprep.subr.bf16.mxu1 %v1207_v17  ;;  %v1245_v47 = vld [vmem:[%s1638_s0 + $0x68] ss:$16 sps:$4 sm:$0xff]   ;;  %v1246_v48 = vld [vmem:[%s1638_s0 + $0x84] ss:$16 sps:$4 sm:$0xff]   ;;  %v1248_v49 = vld [vmem:[%s1638_s0 + $0x8c] ss:$16 sps:$4 sm:$0xff]  }
  0x13   :  { %v1250_v50 = vld [vmem:[%s1638_s0 + $0x80] ss:$16 sps:$4 sm:$0xff]   ;;  %v1251_v51 = vld [vmem:[%s1638_s0 + $0x88] ss:$16 sps:$4 sm:$0xff]   ;;  %v1252_v52 = vld [vmem:[%s1638_s0 + $0xa4] ss:$16 sps:$4 sm:$0xff]  }
  0x14   :  { %1035 = vmatpush3.bf16.msra.mxu0 %v1208_v18  ;;  %v1254_v53 = vld [vmem:[%s1638_s0 + $0xac] ss:$16 sps:$4 sm:$0xff]   ;;  %v1256_v54 = vld [vmem:[%s1638_s0 + $0xa0] ss:$16 sps:$4 sm:$0xff]   ;;  %v1257_v55 = vld [vmem:[%s1638_s0 + $0xa8] ss:$16 sps:$4 sm:$0xff]  }
  0x15   :  { %1117 = vmatpush3.bf16.msra.mxu1 %v1209_v19  ;;  %1036 = vmatprep.subr.bf16.mxu0 %v1210_v20  ;;  %v1258_v56 = vld [vmem:[%s1638_s0 + $0xc4] ss:$16 sps:$4 sm:$0xff]   ;;  %v1260_v57 = vld [vmem:[%s1638_s0 + $0xcc] ss:$16 sps:$4 sm:$0xff]   ;;  %v1262_v58 = vld [vmem:[%s1638_s0 + $0xc0] ss:$16 sps:$4 sm:$0xff]  }
  0x16   :  { %1118 = vmatprep.subr.bf16.mxu1 %v1211_v21  ;;  %v1263_v59 = vld [vmem:[%s1638_s0 + $0xc8] ss:$16 sps:$4 sm:$0xff]   ;;  %v1264_v60 = vld [vmem:[%s1638_s0 + $0xe4] ss:$16 sps:$4 sm:$0xff]   ;;  %v1266_v61 = vld [vmem:[%s1638_s0 + $0xec] ss:$16 sps:$4 sm:$0xff]  }
  0x17   :  { %v1268_v62 = vld [vmem:[%s1638_s0 + $0xe0] ss:$16 sps:$4 sm:$0xff]   ;;  %v1269_v63 = vld [vmem:[%s1638_s0 + $0xe8] ss:$16 sps:$4 sm:$0xff]   ;;  %v1270_v0 = vld [vmem:[%s1638_s0 + $0x104] ss:$16 sps:$4 sm:$0xff]  }
  0x18   :  { %1037 = vmatpush3.bf16.msra.mxu0 %v1212_v22  ;;  %v1272_v1 = vld [vmem:[%s1638_s0 + $0x10c] ss:$16 sps:$4 sm:$0xff]   ;;  %v1274_v2 = vld [vmem:[%s1638_s0 + $0x100] ss:$16 sps:$4 sm:$0xff]   ;;  %v1275_v3 = vld [vmem:[%s1638_s0 + $0x108] ss:$16 sps:$4 sm:$0xff]  }
  0x19   :  { %1119 = vmatpush3.bf16.msra.mxu1 %v1213_v23  ;;  %1038 = vmatprep.subr.bf16.mxu0 %v1214_v24  ;;  %v1276_v4 = vld [vmem:[%s1638_s0 + $0x124] ss:$16 sps:$4 sm:$0xff]   ;;  %v1278_v5 = vld [vmem:[%s1638_s0 + $0x12c] ss:$16 sps:$4 sm:$0xff]   ;;  %v1280_v8 = vld [vmem:[%s1638_s0 + $0x120] ss:$16 sps:$4 sm:$0xff]  }
  0x1a   :  { %1120 = vmatprep.subr.bf16.mxu1 %v1215_v25  ;;  %v1281_v9 = vld [vmem:[%s1638_s0 + $0x128] ss:$16 sps:$4 sm:$0xff]   ;;  %v1531_v16 = vld [vmem:[%s1639_s2] ss:$0 sm:$0xff] }
  0x1c   :  { %1039 = vmatpush3.bf16.msra.mxu0 %v1216_v26 }
  0x1d   :  { %1121 = vmatpush3.bf16.msra.mxu1 %v1217_v27  ;;  %1040 = vmatprep.subr.bf16.mxu0 %v1218_v28 }
  0x1e   :  { %1122 = vmatprep.subr.bf16.mxu1 %v1219_v29 }
  0x20   :  { %1041 = vmatpush3.bf16.msra.mxu0 %v1220_v30 }
  0x21   :  { %1123 = vmatpush3.bf16.msra.mxu1 %v1221_v31 }
  0x23   :  { %567 = vmatmul.mubr.bf16.vlgmr.msra.gmra.mrb[0].mxu0 %v1222_v32 }
  0x24   :  { %687 = vmatmul.mubr.bf16.vlgmr.msra.gmra.mrb[0].mxu1 %v1225_v34  ;;  %574 = vmatprep.mubr.bf16.mxu0 %v1228_v36 }
  0x25   :  { %694 = vmatprep.mubr.bf16.mxu1 %v1230_v37 }
  0x2b   :  { %575 = vmatmul.mubr.bf16.gmra.mrb[4].mxu0 %v1232_v38 }
  0x2c   :  { %695 = vmatmul.mubr.bf16.gmra.mrb[4].mxu1 %v1233_v39  ;;  %582 = vmatprep.mubr.bf16.mxu0 %v1234_v40 }
  0x2d   :  { %702 = vmatprep.mubr.bf16.mxu1 %v1236_v41 }
  0x33   :  { %583 = vmatmul.mubr.bf16.gmra.mrb[8].mxu0 %v1238_v42 }
  0x34   :  { %703 = vmatmul.mubr.bf16.gmra.mrb[8].mxu1 %v1239_v43  ;;  %590 = vmatprep.mubr.bf16.mxu0 %v1240_v44 }
  0x35   :  { %710 = vmatprep.mubr.bf16.mxu1 %v1242_v45 }
  0x3b   :  { %591 = vmatmul.mubr.bf16.gmra.mrb[12].mxu0 %v1244_v46 }
  0x3c   :  { %711 = vmatmul.mubr.bf16.gmra.mrb[12].mxu1 %v1245_v47  ;;  %598 = vmatprep.mubr.bf16.mxu0 %v1246_v48 }
  0x3d   :  { %718 = vmatprep.mubr.bf16.mxu1 %v1248_v49 }
  0x43   :  { %599 = vmatmul.mubr.bf16.gmra.mrb[16].mxu0 %v1250_v50 }
  0x44   :  { %719 = vmatmul.mubr.bf16.gmra.mrb[16].mxu1 %v1251_v51  ;;  %606 = vmatprep.mubr.bf16.mxu0 %v1252_v52 }
  0x45   :  { %726 = vmatprep.mubr.bf16.mxu1 %v1254_v53 }
  0x4b   :  { %607 = vmatmul.mubr.bf16.gmra.mrb[20].mxu0 %v1256_v54 }
  0x4c   :  { %727 = vmatmul.mubr.bf16.gmra.mrb[20].mxu1 %v1257_v55  ;;  %614 = vmatprep.mubr.bf16.mxu0 %v1258_v56 }
  0x4d   :  { %734 = vmatprep.mubr.bf16.mxu1 %v1260_v57 }
  0x53   :  { %615 = vmatmul.mubr.bf16.gmra.mrb[24].mxu0 %v1262_v58 }
  0x54   :  { %735 = vmatmul.mubr.bf16.gmra.mrb[24].mxu1 %v1263_v59  ;;  %622 = vmatprep.mubr.bf16.mxu0 %v1264_v60 }
  0x55   :  { %742 = vmatprep.mubr.bf16.mxu1 %v1266_v61 }
  0x5b   :  { %623 = vmatmul.mubr.bf16.gmra.mrb[28].mxu0 %v1268_v62 }
  0x5c   :  { %743 = vmatmul.mubr.bf16.gmra.mrb[28].mxu1 %v1269_v63  ;;  %630 = vmatprep.mubr.bf16.mxu0 %v1270_v0 }
  0x5d   :  { %750 = vmatprep.mubr.bf16.mxu1 %v1272_v1 }
  0x63   :  { %631 = vmatmul.mubr.bf16.gmra.mrb[32].mxu0 %v1274_v2 }
  0x64   :  { %751 = vmatmul.mubr.bf16.gmra.mrb[32].mxu1 %v1275_v3  ;;  %638 = vmatprep.mubr.bf16.mxu0 %v1276_v4 }
  0x65   :  { %758 = vmatprep.mubr.bf16.mxu1 %v1278_v5 }
  0x6b   :  { %639 = vmatmul.mubr.bf16.gmra.mrb[36].mxu0 %v1280_v8 }
  0x6c   :  { %759 = vmatmul.mubr.bf16.gmra.mrb[36].mxu1 %v1281_v9  ;;  %646 = vmatprep.mubr.bf16.mxu0 %v949_v10 }
  0x6d   :  { %766 = vmatprep.mubr.bf16.mxu1 %v951_v11 }
  0x73   :  { %647 = vmatmul.mubr.bf16.gmra.mrb[40].mxu0 %v948_v12 }
  0x74   :  { %767 = vmatmul.mubr.bf16.gmra.mrb[40].mxu1 %v950_v13 }
  0xf6   :  { %v1042_v14 = vpop.f32.mrb[0].mxu0 }
  0xf7   :  { %v1124_v15 = vpop.f32.mrb[0].mxu1  ;;  %v1043_v17 = vpop.f32.mrb[1].mxu0 }
  0xf8   :  { %v1044_v18 = vadd.f32 %v1043_v17, %v1042_v14  ;;  %v1125_v19 = vpop.f32.mrb[1].mxu1  ;;  %v1045_v20 = vpop.f32.mrb[2].mxu0 }
  0xf9   :  { %v1126_v21 = vadd.f32 %v1125_v19, %v1124_v15  ;;  %v1127_v22 = vpop.f32.mrb[2].mxu1  ;;  %v1046_v23 = vpop.f32.mrb[3].mxu0 }
  0xfa   :  { %v569_v24 = vadd.f32 %v1044_v18, %v1531_v16  ;;  %v1047_v25 = vadd.f32 %v1046_v23, %v1045_v20  ;;  %v1128_v26 = vpop.f32.mrb[3].mxu1 }
  0xfb   :  { %v1129_v27 = vadd.f32 %v1128_v26, %v1127_v22 }
  0xfc   :  { %v689_v28 = vadd.f32 %v1126_v21, %v569_v24  ;;  %v572_v29 = vadd.f32 %v1047_v25, %v1531_v16 }
  0xfe   :  { %v774_v30 = vmax.f32 %v689_v28, 0.0  ;;  %v692_v31 = vadd.f32 %v1129_v27, %v572_v29  ;;  %v1048_v32 = vpop.f32.mrb[4].mxu0 }
  0xff   :  { %v1130_v33 = vpop.f32.mrb[4].mxu1  ;;  %v1049_v34 = vpop.f32.mrb[5].mxu0 }
 0x100   :  { %v1005_v35 = vpack.c.bf16 %v774_v30, %v774_v30  ;;  %v775_v36 = vmax.f32 %v692_v31, 0.0  ;;  %v1050_v37 = vadd.f32 %v1049_v34, %v1048_v32  ;;  %v1131_v38 = vpop.f32.mrb[5].mxu1  ;;  %v1051_v39 = vpop.f32.mrb[6].mxu0 }
 0x101   :  { %v1132_v40 = vadd.f32 %v1131_v38, %v1130_v33  ;;  %v1133_v41 = vpop.f32.mrb[6].mxu1  ;;  %v1052_v42 = vpop.f32.mrb[7].mxu0 }
 0x102   :  { %881 = vst.msk [vmem:[%s1640_s3] sm:$0xf] %vm880_vm0, %v1005_v35  ;;  %v1006_v43 = vpack.c.bf16 %v775_v36, %v775_v36  ;;  %v577_v44 = vadd.f32 %v1050_v37, %v1531_v16  ;;  %v1053_v45 = vadd.f32 %v1052_v42, %v1051_v39  ;;  %v1134_v46 = vpop.f32.mrb[7].mxu1 }
 0x103   :  { %v1135_v47 = vadd.f32 %v1134_v46, %v1133_v41 }
 0x104   :  { %882 = vst.msk [vmem:[%s1640_s3 + $0x4] sm:$0xf] %vm880_vm0, %v1006_v43  ;;  %v697_v48 = vadd.f32 %v1132_v40, %v577_v44  ;;  %v580_v49 = vadd.f32 %v1053_v45, %v1531_v16 }
 0x106   :  { %v776_v50 = vmax.f32 %v697_v48, 0.0  ;;  %v700_v51 = vadd.f32 %v1135_v47, %v580_v49  ;;  %v1054_v52 = vpop.f32.mrb[8].mxu0 }
 0x107   :  { %v1136_v53 = vpop.f32.mrb[8].mxu1  ;;  %v1055_v54 = vpop.f32.mrb[9].mxu0 }
 0x108   :  { %v1007_v55 = vpack.c.bf16 %v776_v50, %v776_v50  ;;  %v777_v56 = vmax.f32 %v700_v51, 0.0  ;;  %v1056_v57 = vadd.f32 %v1055_v54, %v1054_v52  ;;  %v1137_v58 = vpop.f32.mrb[9].mxu1  ;;  %v1057_v59 = vpop.f32.mrb[10].mxu0 }
 0x109   :  { %v1138_v60 = vadd.f32 %v1137_v58, %v1136_v53  ;;  %v1139_v61 = vpop.f32.mrb[10].mxu1  ;;  %v1058_v62 = vpop.f32.mrb[11].mxu0 }
 0x10a   :  { %883 = vst.msk [vmem:[%s1640_s3 + $0x8] sm:$0xf] %vm880_vm0, %v1007_v55  ;;  %v1008_v63 = vpack.c.bf16 %v777_v56, %v777_v56  ;;  %v585_v0 = vadd.f32 %v1056_v57, %v1531_v16  ;;  %v1059_v1 = vadd.f32 %v1058_v62, %v1057_v59  ;;  %v1140_v2 = vpop.f32.mrb[11].mxu1 }
 0x10b   :  { %v1141_v3 = vadd.f32 %v1140_v2, %v1139_v61 }
 0x10c   :  { %884 = vst.msk [vmem:[%s1640_s3 + $0xc] sm:$0xf] %vm880_vm0, %v1008_v63  ;;  %v705_v4 = vadd.f32 %v1138_v60, %v585_v0  ;;  %v588_v5 = vadd.f32 %v1059_v1, %v1531_v16 }
 0x10e   :  { %v778_v6 = vmax.f32 %v705_v4, 0.0  ;;  %v708_v7 = vadd.f32 %v1141_v3, %v588_v5  ;;  %v1060_v8 = vpop.f32.mrb[12].mxu0 }
 0x10f   :  { %v1142_v9 = vpop.f32.mrb[12].mxu1  ;;  %v1061_v10 = vpop.f32.mrb[13].mxu0 }
 0x110   :  { %v1009_v11 = vpack.c.bf16 %v778_v6, %v778_v6  ;;  %v779_v12 = vmax.f32 %v708_v7, 0.0  ;;  %v1062_v13 = vadd.f32 %v1061_v10, %v1060_v8  ;;  %v1143_v14 = vpop.f32.mrb[13].mxu1  ;;  %v1063_v15 = vpop.f32.mrb[14].mxu0 }
 0x111   :  { %v1144_v17 = vadd.f32 %v1143_v14, %v1142_v9  ;;  %v1145_v18 = vpop.f32.mrb[14].mxu1  ;;  %v1064_v19 = vpop.f32.mrb[15].mxu0 }
 0x112   :  { %885 = vst.msk [vmem:[%s1640_s3 + $0x10] sm:$0xf] %vm880_vm0, %v1009_v11  ;;  %v1010_v20 = vpack.c.bf16 %v779_v12, %v779_v12  ;;  %v593_v21 = vadd.f32 %v1062_v13, %v1531_v16  ;;  %v1065_v22 = vadd.f32 %v1064_v19, %v1063_v15  ;;  %v1146_v23 = vpop.f32.mrb[15].mxu1 }
 0x113   :  { %v1147_v24 = vadd.f32 %v1146_v23, %v1145_v18 }
 0x114   :  { %886 = vst.msk [vmem:[%s1640_s3 + $0x14] sm:$0xf] %vm880_vm0, %v1010_v20  ;;  %v713_v25 = vadd.f32 %v1144_v17, %v593_v21  ;;  %v596_v26 = vadd.f32 %v1065_v22, %v1531_v16 }
 0x116   :  { %v780_v27 = vmax.f32 %v713_v25, 0.0  ;;  %v716_v28 = vadd.f32 %v1147_v24, %v596_v26  ;;  %v1066_v29 = vpop.f32.mrb[16].mxu0 }
 0x117   :  { %v1148_v30 = vpop.f32.mrb[16].mxu1  ;;  %v1067_v31 = vpop.f32.mrb[17].mxu0 }
 0x118   :  { %v1011_v32 = vpack.c.bf16 %v780_v27, %v780_v27  ;;  %v781_v33 = vmax.f32 %v716_v28, 0.0  ;;  %v1068_v34 = vadd.f32 %v1067_v31, %v1066_v29  ;;  %v1149_v35 = vpop.f32.mrb[17].mxu1  ;;  %v1069_v36 = vpop.f32.mrb[18].mxu0 }
 0x119   :  { %v1150_v37 = vadd.f32 %v1149_v35, %v1148_v30  ;;  %v1151_v38 = vpop.f32.mrb[18].mxu1  ;;  %v1070_v39 = vpop.f32.mrb[19].mxu0 }
 0x11a   :  { %887 = vst.msk [vmem:[%s1640_s3 + $0x18] sm:$0xf] %vm880_vm0, %v1011_v32  ;;  %v1012_v40 = vpack.c.bf16 %v781_v33, %v781_v33  ;;  %v601_v41 = vadd.f32 %v1068_v34, %v1531_v16  ;;  %v1071_v42 = vadd.f32 %v1070_v39, %v1069_v36  ;;  %v1152_v43 = vpop.f32.mrb[19].mxu1 }
 0x11b   :  { %v1153_v44 = vadd.f32 %v1152_v43, %v1151_v38 }
 0x11c   :  { %888 = vst.msk [vmem:[%s1640_s3 + $0x1c] sm:$0xf] %vm880_vm0, %v1012_v40  ;;  %v721_v45 = vadd.f32 %v1150_v37, %v601_v41  ;;  %v604_v46 = vadd.f32 %v1071_v42, %v1531_v16 }
 0x11e   :  { %v782_v47 = vmax.f32 %v721_v45, 0.0  ;;  %v724_v48 = vadd.f32 %v1153_v44, %v604_v46  ;;  %v1072_v49 = vpop.f32.mrb[20].mxu0 }
 0x11f   :  { %v1154_v50 = vpop.f32.mrb[20].mxu1  ;;  %v1073_v51 = vpop.f32.mrb[21].mxu0 }
 0x120   :  { %v1013_v52 = vpack.c.bf16 %v782_v47, %v782_v47  ;;  %v783_v53 = vmax.f32 %v724_v48, 0.0  ;;  %v1074_v54 = vadd.f32 %v1073_v51, %v1072_v49  ;;  %v1155_v55 = vpop.f32.mrb[21].mxu1  ;;  %v1075_v56 = vpop.f32.mrb[22].mxu0 }
 0x121   :  { %v1156_v57 = vadd.f32 %v1155_v55, %v1154_v50  ;;  %v1157_v58 = vpop.f32.mrb[22].mxu1  ;;  %v1076_v59 = vpop.f32.mrb[23].mxu0 }
 0x122   :  { %889 = vst.msk [vmem:[%s1640_s3 + $0x20] sm:$0xf] %vm880_vm0, %v1013_v52  ;;  %v1014_v60 = vpack.c.bf16 %v783_v53, %v783_v53  ;;  %v609_v61 = vadd.f32 %v1074_v54, %v1531_v16  ;;  %v1077_v62 = vadd.f32 %v1076_v59, %v1075_v56  ;;  %v1158_v63 = vpop.f32.mrb[23].mxu1 }
 0x123   :  { %v1159_v0 = vadd.f32 %v1158_v63, %v1157_v58 }
 0x124   :  { %890 = vst.msk [vmem:[%s1640_s3 + $0x24] sm:$0xf] %vm880_vm0, %v1014_v60  ;;  %v729_v1 = vadd.f32 %v1156_v57, %v609_v61  ;;  %v612_v2 = vadd.f32 %v1077_v62, %v1531_v16 }
 0x126   :  { %v784_v3 = vmax.f32 %v729_v1, 0.0  ;;  %v732_v4 = vadd.f32 %v1159_v0, %v612_v2  ;;  %v1078_v5 = vpop.f32.mrb[24].mxu0 }
 0x127   :  { %v1160_v6 = vpop.f32.mrb[24].mxu1  ;;  %v1079_v7 = vpop.f32.mrb[25].mxu0 }
 0x128   :  { %v1015_v8 = vpack.c.bf16 %v784_v3, %v784_v3  ;;  %v785_v9 = vmax.f32 %v732_v4, 0.0  ;;  %v1080_v10 = vadd.f32 %v1079_v7, %v1078_v5  ;;  %v1161_v11 = vpop.f32.mrb[25].mxu1  ;;  %v1081_v12 = vpop.f32.mrb[26].mxu0 }
 0x129   :  { %v1162_v13 = vadd.f32 %v1161_v11, %v1160_v6  ;;  %v1163_v14 = vpop.f32.mrb[26].mxu1  ;;  %v1082_v15 = vpop.f32.mrb[27].mxu0 }
 0x12a   :  { %891 = vst.msk [vmem:[%s1640_s3 + $0x28] sm:$0xf] %vm880_vm0, %v1015_v8  ;;  %v1016_v17 = vpack.c.bf16 %v785_v9, %v785_v9  ;;  %v617_v18 = vadd.f32 %v1080_v10, %v1531_v16  ;;  %v1083_v19 = vadd.f32 %v1082_v15, %v1081_v12  ;;  %v1164_v20 = vpop.f32.mrb[27].mxu1 }
 0x12b   :  { %v1165_v21 = vadd.f32 %v1164_v20, %v1163_v14 }
 0x12c   :  { %892 = vst.msk [vmem:[%s1640_s3 + $0x2c] sm:$0xf] %vm880_vm0, %v1016_v17  ;;  %v737_v22 = vadd.f32 %v1162_v13, %v617_v18  ;;  %v620_v23 = vadd.f32 %v1083_v19, %v1531_v16 }
 0x12e   :  { %v786_v24 = vmax.f32 %v737_v22, 0.0  ;;  %v740_v25 = vadd.f32 %v1165_v21, %v620_v23  ;;  %v1084_v26 = vpop.f32.mrb[28].mxu0 }
 0x12f   :  { %v1166_v27 = vpop.f32.mrb[28].mxu1  ;;  %v1085_v28 = vpop.f32.mrb[29].mxu0 }
 0x130   :  { %v1017_v29 = vpack.c.bf16 %v786_v24, %v786_v24  ;;  %v787_v30 = vmax.f32 %v740_v25, 0.0  ;;  %v1086_v31 = vadd.f32 %v1085_v28, %v1084_v26  ;;  %v1167_v32 = vpop.f32.mrb[29].mxu1  ;;  %v1087_v33 = vpop.f32.mrb[30].mxu0 }
 0x131   :  { %v1168_v34 = vadd.f32 %v1167_v32, %v1166_v27  ;;  %v1169_v35 = vpop.f32.mrb[30].mxu1  ;;  %v1088_v36 = vpop.f32.mrb[31].mxu0 }
 0x132   :  { %893 = vst.msk [vmem:[%s1640_s3 + $0x30] sm:$0xf] %vm880_vm0, %v1017_v29  ;;  %v1018_v37 = vpack.c.bf16 %v787_v30, %v787_v30  ;;  %v625_v38 = vadd.f32 %v1086_v31, %v1531_v16  ;;  %v1089_v39 = vadd.f32 %v1088_v36, %v1087_v33  ;;  %v1170_v40 = vpop.f32.mrb[31].mxu1 }
 0x133   :  { %v1171_v41 = vadd.f32 %v1170_v40, %v1169_v35 }
 0x134   :  { %894 = vst.msk [vmem:[%s1640_s3 + $0x34] sm:$0xf] %vm880_vm0, %v1018_v37  ;;  %v745_v42 = vadd.f32 %v1168_v34, %v625_v38  ;;  %v628_v43 = vadd.f32 %v1089_v39, %v1531_v16 }
 0x136   :  { %v788_v44 = vmax.f32 %v745_v42, 0.0  ;;  %v748_v45 = vadd.f32 %v1171_v41, %v628_v43  ;;  %v1090_v46 = vpop.f32.mrb[32].mxu0 }
 0x137   :  { %v1172_v47 = vpop.f32.mrb[32].mxu1  ;;  %v1091_v48 = vpop.f32.mrb[33].mxu0 }
 0x138   :  { %v1019_v49 = vpack.c.bf16 %v788_v44, %v788_v44  ;;  %v789_v50 = vmax.f32 %v748_v45, 0.0  ;;  %v1092_v51 = vadd.f32 %v1091_v48, %v1090_v46  ;;  %v1173_v52 = vpop.f32.mrb[33].mxu1  ;;  %v1093_v53 = vpop.f32.mrb[34].mxu0 }
 0x139   :  { %v1174_v54 = vadd.f32 %v1173_v52, %v1172_v47  ;;  %v1175_v55 = vpop.f32.mrb[34].mxu1  ;;  %v1094_v56 = vpop.f32.mrb[35].mxu0 }
 0x13a   :  { %895 = vst.msk [vmem:[%s1640_s3 + $0x38] sm:$0xf] %vm880_vm0, %v1019_v49  ;;  %v1020_v57 = vpack.c.bf16 %v789_v50, %v789_v50  ;;  %v633_v58 = vadd.f32 %v1092_v51, %v1531_v16  ;;  %v1095_v59 = vadd.f32 %v1094_v56, %v1093_v53  ;;  %v1176_v60 = vpop.f32.mrb[35].mxu1 }
 0x13b   :  { %v1177_v61 = vadd.f32 %v1176_v60, %v1175_v55 }
 0x13c   :  { %896 = vst.msk [vmem:[%s1640_s3 + $0x3c] sm:$0xf] %vm880_vm0, %v1020_v57  ;;  %v753_v62 = vadd.f32 %v1174_v54, %v633_v58  ;;  %v636_v63 = vadd.f32 %v1095_v59, %v1531_v16 }
 0x13e   :  { %v790_v0 = vmax.f32 %v753_v62, 0.0  ;;  %v756_v1 = vadd.f32 %v1177_v61, %v636_v63  ;;  %v1096_v2 = vpop.f32.mrb[36].mxu0 }
 0x13f   :  { %v1178_v3 = vpop.f32.mrb[36].mxu1  ;;  %v1097_v4 = vpop.f32.mrb[37].mxu0 }
 0x140   :  { %v1021_v5 = vpack.c.bf16 %v790_v0, %v790_v0  ;;  %v791_v6 = vmax.f32 %v756_v1, 0.0  ;;  %v1098_v7 = vadd.f32 %v1097_v4, %v1096_v2  ;;  %v1179_v8 = vpop.f32.mrb[37].mxu1  ;;  %v1099_v9 = vpop.f32.mrb[38].mxu0 }
 0x141   :  { %v1180_v10 = vadd.f32 %v1179_v8, %v1178_v3  ;;  %v1181_v11 = vpop.f32.mrb[38].mxu1  ;;  %v1100_v12 = vpop.f32.mrb[39].mxu0 }
 0x142   :  { %897 = vst.msk [vmem:[%s1640_s3 + $0x40] sm:$0xf] %vm880_vm0, %v1021_v5  ;;  %v1022_v13 = vpack.c.bf16 %v791_v6, %v791_v6  ;;  %v641_v14 = vadd.f32 %v1098_v7, %v1531_v16  ;;  %v1101_v15 = vadd.f32 %v1100_v12, %v1099_v9  ;;  %v1182_v17 = vpop.f32.mrb[39].mxu1 }
 0x143   :  { %v1183_v18 = vadd.f32 %v1182_v17, %v1181_v11 }
 0x144   :  { %898 = vst.msk [vmem:[%s1640_s3 + $0x44] sm:$0xf] %vm880_vm0, %v1022_v13  ;;  %v761_v19 = vadd.f32 %v1180_v10, %v641_v14  ;;  %v644_v20 = vadd.f32 %v1101_v15, %v1531_v16 }
 0x146   :  { %v792_v21 = vmax.f32 %v761_v19, 0.0  ;;  %v764_v22 = vadd.f32 %v1183_v18, %v644_v20  ;;  %v1102_v23 = vpop.f32.mrb[40].mxu0 }
 0x147   :  { %v1184_v24 = vpop.f32.mrb[40].mxu1  ;;  %v1103_v25 = vpop.f32.mrb[41].mxu0 }
 0x148   :  { %v1023_v26 = vpack.c.bf16 %v792_v21, %v792_v21  ;;  %v793_v27 = vmax.f32 %v764_v22, 0.0  ;;  %v1104_v28 = vadd.f32 %v1103_v25, %v1102_v23  ;;  %v1185_v29 = vpop.f32.mrb[41].mxu1  ;;  %v1105_v30 = vpop.f32.mrb[42].mxu0 }
 0x149   :  { %v1186_v31 = vadd.f32 %v1185_v29, %v1184_v24  ;;  %v1187_v32 = vpop.f32.mrb[42].mxu1  ;;  %v1106_v33 = vpop.f32.mrb[43].mxu0 }
 0x14a   :  { %899 = vst.msk [vmem:[%s1640_s3 + $0x48] sm:$0xf] %vm880_vm0, %v1023_v26  ;;  %v1024_v34 = vpack.c.bf16 %v793_v27, %v793_v27  ;;  %v649_v35 = vadd.f32 %v1104_v28, %v1531_v16  ;;  %v1188_v36 = vpop.f32.mrb[43].mxu1 }
 0x14c   :  { %900 = vst.msk [vmem:[%s1640_s3 + $0x4c] sm:$0xf] %vm880_vm0, %v1024_v34  ;;  %v769_v37 = vadd.f32 %v1186_v31, %v649_v35 }
 0x14e   :  { %v794_v38 = vmax.f32 %v769_v37, 0.0 }
 0x150   :  { %v1025_v39 = vpack.c.bf16 %v794_v38, %v794_v38 }
 0x152   :  { %902 = vst.msk [vmem:[%s1640_s3 + $0x50] sm:$0x1] %vm901_vm1, %v1025_v39 }

// kernel: convnet_forward.6
= control target key start
LH: loop header
LB: loop body
LE: loop exit
PB: predicated region body
PF: predicated region fallthrough
CT: control target
= control target key end

     0   :  { %v1248_v34 = vmov 0.0   ;;  %vm1249_vm0 = vmmov 0   ;;  %vm516_vm1 = vcmask 523264   ;;  %vm868_vm2 = vcmask 519168   ;;  %s1599_s1 = inlined_call_operand.vmem [shape: bf16[576,64], index: 1, kind: input, shape index: {}]   ;;  %s1600_s0 = inlined_call_operand.vmem [shape: bf16[98,576], index: 0, kind: input, shape index: {}]   ;;  %s1601_s2 = inlined_call_operand.vmem [shape: f32[1,64], index: 2, kind: input, shape index: {}]   ;;  %s1602_s3 = inlined_call_operand.vmem [shape: bf16[98,64], index: 3, kind: output, shape index: {}]  }
   0x1   :  { %v1165_v0 = vld [vmem:[%s1599_s1 + $0x40] sm:$0xff]   ;;  %v1169_v4 = vld [vmem:[%s1599_s1 + $0x48] sm:$0xff]   ;;  %v1173_v8 = vld [vmem:[%s1599_s1 + $0x50] sm:$0xff]   ;;  %vm881_vm3 = vcmask 516096  }
   0x2   :  { %v1166_v1 = vld [vmem:[%s1599_s1 + $0xc0] sm:$0xff]   ;;  %992 = vmatprep.subr.bf16.mxu0 %v1165_v0  ;;  %v1170_v5 = vld [vmem:[%s1599_s1 + $0xc8] sm:$0xff]   ;;  %v1174_v9 = vld [vmem:[%s1599_s1 + $0xd0] sm:$0xff]  }
   0x3   :  { %v1167_v2 = vld [vmem:[%s1599_s1] sm:$0xff]   ;;  %1050 = vmatprep.subr.bf16.mxu1 %v1166_v1  ;;  %v1171_v6 = vld [vmem:[%s1599_s1 + $0x8] sm:$0xff]   ;;  %v1175_v10 = vld [vmem:[%s1599_s1 + $0x10] sm:$0xff]  }
   0x4   :  { %v1168_v3 = vld [vmem:[%s1599_s1 + $0x80] sm:$0xff]   ;;  %993 = vmatpush3.bf16.msra.mxu0 %v1167_v2  ;;  %v1172_v7 = vld [vmem:[%s1599_s1 + $0x88] sm:$0xff]   ;;  %v1176_v11 = vld [vmem:[%s1599_s1 + $0x90] sm:$0xff]  }
   0x5   :  { %1051 = vmatpush3.bf16.msra.mxu1 %v1168_v3  ;;  %994 = vmatprep.subr.bf16.mxu0 %v1169_v4  ;;  %v1177_v12 = vld [vmem:[%s1599_s1 + $0x58] sm:$0xff]   ;;  %v1181_v16 = vld [vmem:[%s1599_s1 + $0x60] sm:$0xff]   ;;  %v1185_v20 = vld [vmem:[%s1599_s1 + $0x68] sm:$0xff]  }
   0x6   :  { %1052 = vmatprep.subr.bf16.mxu1 %v1170_v5  ;;  %v1178_v13 = vld [vmem:[%s1599_s1 + $0xd8] sm:$0xff]   ;;  %v1182_v17 = vld [vmem:[%s1599_s1 + $0xe0] sm:$0xff]   ;;  %v1186_v21 = vld [vmem:[%s1599_s1 + $0xe8] sm:$0xff]  }
   0x7   :  { %v1179_v14 = vld [vmem:[%s1599_s1 + $0x18] sm:$0xff]   ;;  %v1183_v18 = vld [vmem:[%s1599_s1 + $0x20] sm:$0xff]   ;;  %v1187_v22 = vld [vmem:[%s1599_s1 + $0x28] sm:$0xff]  }
   0x8   :  { %995 = vmatpush3.bf16.msra.mxu0 %v1171_v6  ;;  %v1180_v15 = vld [vmem:[%s1599_s1 + $0x98] sm:$0xff]   ;;  %v1184_v19 = vld [vmem:[%s1599_s1 + $0xa0] sm:$0xff]   ;;  %v1188_v23 = vld [vmem:[%s1599_s1 + $0xa8] sm:$0xff]  }
   0x9   :  { %1053 = vmatpush3.bf16.msra.mxu1 %v1172_v7  ;;  %996 = vmatprep.subr.bf16.mxu0 %v1173_v8  ;;  %v1189_v24 = vld [vmem:[%s1599_s1 + $0x70] sm:$0xff]   ;;  %v1193_v28 = vld [vmem:[%s1599_s1 + $0x78] sm:$0xff]   ;;  %v1202_v36 = vld [vmem:[%s1600_s0 + $0xc] ss:$20 sps:$4 sm:$0xff]  }
   0xa   :  { %1054 = vmatprep.subr.bf16.mxu1 %v1174_v9  ;;  %v1190_v25 = vld [vmem:[%s1599_s1 + $0xf0] sm:$0xff]   ;;  %v1194_v29 = vld [vmem:[%s1599_s1 + $0xf8] sm:$0xff]   ;;  %v1203_v37 = vld [vmem:[%s1599_s1 + $0x100] sm:$0xff]   ;;  %658 = vmatprep.mubr.bf16.mxu1 %v1202_v36 }
   0xb   :  { %v1191_v26 = vld [vmem:[%s1599_s1 + $0x30] sm:$0xff]   ;;  %v1195_v30 = vld [vmem:[%s1599_s1 + $0x38] sm:$0xff]   ;;  %v1204_v38 = vld [vmem:[%s1600_s0 + $0x2c] ss:$20 sps:$4 sm:$0xff]  }
   0xc   :  { %997 = vmatpush3.bf16.msra.mxu0 %v1175_v10  ;;  %v1192_v27 = vld [vmem:[%s1599_s1 + $0xb0] sm:$0xff]   ;;  %v1196_v31 = vld [vmem:[%s1599_s1 + $0xb8] sm:$0xff]   ;;  %v1214_v43 = vld [vmem:[%s1599_s1 + $0x108] sm:$0xff]  }
   0xd   :  { %1055 = vmatpush3.bf16.msra.mxu1 %v1176_v11  ;;  %998 = vmatprep.subr.bf16.mxu0 %v1177_v12  ;;  %v1197_v32 = vld [vmem:[%s1600_s0] ss:$20 sps:$4 sm:$0xff]   ;;  %v1199_v33 = vld [vmem:[%s1600_s0 + $0x4] ss:$20 sps:$4 sm:$0xff]   ;;  %v1200_v35 = vld [vmem:[%s1600_s0 + $0x8] ss:$20 sps:$4 sm:$0xff]  }
   0xe   :  { %1056 = vmatprep.subr.bf16.mxu1 %v1178_v13  ;;  %570 = vmatprep.mubr.bf16.mxu0 %v1199_v33  ;;  %v1206_v39 = vld [vmem:[%s1600_s0 + $0x34] ss:$20 sps:$4 sm:$0xff]   ;;  %v1209_v41 = vld [vmem:[%s1600_s0 + $0x30] ss:$20 sps:$4 sm:$0xff]   ;;  %v1216_v47 = vld [vmem:[%s1600_s0 + $0x58] ss:$20 sps:$4 sm:$0xff]  }
   0xf   :  { %v1208_v40 = vld [vmem:[%s1600_s0 + $0x28] ss:$20 sps:$4 sm:$0xff]   ;;  %v1223_v45 = vld [vmem:[%s1599_s1 + $0x110] sm:$0xff]   ;;  %v1219_v49 = vld [vmem:[%s1600_s0 + $0x84] ss:$20 sps:$4 sm:$0xff]  }
  0x10   :  { %999 = vmatpush3.bf16.msra.mxu0 %v1179_v14  ;;  %v1210_v42 = vld [vmem:[%s1600_s0 + $0x54] ss:$20 sps:$4 sm:$0xff]   ;;  %v1212_v44 = vld [vmem:[%s1600_s0 + $0x5c] ss:$20 sps:$4 sm:$0xff]   ;;  %v1221_v51 = vld [vmem:[%s1600_s0 + $0x78] ss:$20 sps:$4 sm:$0xff]  }
  0x11   :  { %1057 = vmatpush3.bf16.msra.mxu1 %v1180_v15  ;;  %1000 = vmatprep.subr.bf16.mxu0 %v1181_v16  ;;  %v1215_v46 = vld [vmem:[%s1600_s0 + $0x50] ss:$20 sps:$4 sm:$0xff]   ;;  %v1236_v50 = vld [vmem:[%s1599_s1 + $0x118] sm:$0xff]   ;;  %v1222_v52 = vld [vmem:[%s1600_s0 + $0x80] ss:$20 sps:$4 sm:$0xff]  }
  0x12   :  { %1058 = vmatprep.subr.bf16.mxu1 %v1182_v17  ;;  %v1217_v48 = vld [vmem:[%s1600_s0 + $0x7c] ss:$20 sps:$4 sm:$0xff]   ;;  %v1224_v53 = vld [vmem:[%s1600_s0 + $0xa4] ss:$20 sps:$4 sm:$0xff]   ;;  %v1226_v54 = vld [vmem:[%s1600_s0 + $0xac] ss:$20 sps:$4 sm:$0xff]  }
  0x13   :  { %v1228_v55 = vld [vmem:[%s1600_s0 + $0xa0] ss:$20 sps:$4 sm:$0xff]   ;;  %v1229_v56 = vld [vmem:[%s1600_s0 + $0xa8] ss:$20 sps:$4 sm:$0xff]   ;;  %v1235_v62 = vld [vmem:[%s1600_s0 + $0xd0] ss:$20 sps:$4 sm:$0xff]  }
  0x14   :  { %1001 = vmatpush3.bf16.msra.mxu0 %v1183_v18  ;;  %v1230_v57 = vld [vmem:[%s1600_s0 + $0xcc] ss:$20 sps:$4 sm:$0xff]   ;;  %v1232_v58 = vld [vmem:[%s1600_s0 + $0xd4] ss:$20 sps:$4 sm:$0xff]   ;;  %v52_v60 = vld [vmem:[%s1600_s0 + $0xf8] sm:$0x11] }
  0x15   :  { %1059 = vmatpush3.bf16.msra.mxu1 %v1184_v19  ;;  %1002 = vmatprep.subr.bf16.mxu0 %v1185_v20  ;;  %v51_v59 = vld [vmem:[%s1600_s0 + $0xf0] sm:$0x11]  ;;  %v1234_v61 = vld [vmem:[%s1600_s0 + $0xc8] ss:$20 sps:$4 sm:$0xff]   ;;  %v921_v0 = vcombine.high %v52_v60, %v52_v60  ;;  %v920_v2 = vcombine.low %v52_v60, %v52_v60  ;;  %v1243_v5 = vld [vmem:[%s1600_s0 + $0x38] ss:$20 sps:$4 sm:$0xff]  }
  0x16   :  { %1060 = vmatprep.subr.bf16.mxu1 %v1186_v21  ;;  %v919_v63 = vcombine.high %v51_v59, %v51_v59  ;;  %v918_v1 = vcombine.low %v51_v59, %v51_v59  ;;  %v1241_v3 = vld [vmem:[%s1600_s0 + $0x10] ss:$20 sps:$4 sm:$0xff]   ;;  %v1244_v6 = vld [vmem:[%s1600_s0 + $0xd8] ss:$20 sps:$4 sm:$0xff]   ;;  %v1245_v7 = vld [vmem:[%s1600_s0 + $0x60] ss:$20 sps:$4 sm:$0xff]  }
  0x17   :  { %v1242_v4 = vld [vmem:[%s1600_s0 + $0xb0] ss:$20 sps:$4 sm:$0xff]   ;;  %v1246_v8 = vld [vmem:[%s1600_s0 + $0x100] ss:$0 sps:$4 sm:$0x11]  }
  0x18   :  { %1003 = vmatpush3.bf16.msra.mxu0 %v1187_v22  ;;  %v1247_v9 = vld [vmem:[%s1600_s0 + $0x88] ss:$20 sps:$4 sm:$0xff]   ;;  %v1509_v11 = vld [vmem:[%s1601_s2] ss:$0 sm:$0xff] }
  0x19   :  { %1061 = vmatpush3.bf16.msra.mxu1 %v1188_v23  ;;  %1004 = vmatprep.subr.bf16.mxu0 %v1189_v24 }
  0x1a   :  { %1062 = vmatprep.subr.bf16.mxu1 %v1190_v25 }
  0x1c   :  { %1005 = vmatpush3.bf16.msra.mxu0 %v1191_v26 }
  0x1d   :  { %1063 = vmatpush3.bf16.msra.mxu1 %v1192_v27  ;;  %1006 = vmatprep.subr.bf16.mxu0 %v1193_v28 }
  0x1e   :  { %1064 = vmatprep.subr.bf16.mxu1 %v1194_v29 }
  0x20   :  { %1007 = vmatpush3.bf16.msra.mxu0 %v1195_v30 }
  0x21   :  { %1065 = vmatpush3.bf16.msra.mxu1 %v1196_v31  ;;  %1119 = vmatprep.subr.bf16.mxu0 %v1248_v34 }
  0x22   :  { %1155 = vmatprep.subr.bf16.mxu1 %v1248_v34 }
  0x23   :  { %571 = vmatmul.mubr.bf16.vlgmr.msra.gmra.mrb[0].mxu0 %v1197_v32 }
  0x24   :  { %659 = vmatmul.mubr.bf16.vlgmr.msra.gmra.mrb[0].mxu1 %v1200_v35  ;;  %1120 = vmatpush3.bf16.msra.mxu0 %v1203_v37 }
  0x25   :  { %578 = vmatprep.mubr.bf16.mxu0 %v1204_v38  ;;  %1159 = vmatpush3.bf16.msra.mxu1 %v1203_v37 }
  0x26   :  { %666 = vmatprep.mubr.bf16.mxu1 %v1206_v39  ;;  %1121 = vmatprep.subr.bf16.mxu0 %v1248_v34 }
  0x27   :  { %1156 = vmatprep.subr.bf16.mxu1 %v1248_v34 }
  0x28   :  { %1122 = vmatpush3.bf16.msra.mxu0 %v1214_v43 }
  0x29   :  { %1160 = vmatpush3.bf16.msra.mxu1 %v1214_v43  ;;  %1123 = vmatprep.subr.bf16.mxu0 %v1248_v34 }
  0x2a   :  { %1157 = vmatprep.subr.bf16.mxu1 %v1248_v34 }
  0x2b   :  { %579 = vmatmul.mubr.bf16.gmra.mrb[4].mxu0 %v1208_v40 }
  0x2c   :  { %667 = vmatmul.mubr.bf16.gmra.mrb[4].mxu1 %v1209_v41  ;;  %586 = vmatprep.mubr.bf16.mxu0 %v1210_v42 }
  0x2d   :  { %674 = vmatprep.mubr.bf16.mxu1 %v1212_v44  ;;  %1124 = vmatpush3.bf16.msra.mxu0 %v1223_v45 }
  0x2e   :  { %1161 = vmatpush3.bf16.msra.mxu1 %v1223_v45  ;;  %1125 = vmatprep.subr.bf16.mxu0 %v1248_v34 }
  0x2f   :  { %1158 = vmatprep.subr.bf16.mxu1 %v1248_v34 }
  0x31   :  { %1126 = vmatpush3.bf16.msra.mxu0 %v1236_v50 }
  0x32   :  { %1162 = vmatpush3.bf16.msra.mxu1 %v1236_v50 }
  0x33   :  { %587 = vmatmul.mubr.bf16.gmra.mrb[8].mxu0 %v1215_v46 }
  0x34   :  { %675 = vmatmul.mubr.bf16.gmra.mrb[8].mxu1 %v1216_v47  ;;  %594 = vmatprep.mubr.bf16.mxu0 %v1217_v48 }
  0x35   :  { %682 = vmatprep.mubr.bf16.mxu1 %v1219_v49 }
  0x3b   :  { %595 = vmatmul.mubr.bf16.gmra.mrb[12].mxu0 %v1221_v51 }
  0x3c   :  { %683 = vmatmul.mubr.bf16.gmra.mrb[12].mxu1 %v1222_v52  ;;  %602 = vmatprep.mubr.bf16.mxu0 %v1224_v53 }
  0x3d   :  { %690 = vmatprep.mubr.bf16.mxu1 %v1226_v54 }
  0x43   :  { %603 = vmatmul.mubr.bf16.gmra.mrb[16].mxu0 %v1228_v55 }
  0x44   :  { %691 = vmatmul.mubr.bf16.gmra.mrb[16].mxu1 %v1229_v56  ;;  %610 = vmatprep.mubr.bf16.mxu0 %v1230_v57 }
  0x45   :  { %698 = vmatprep.mubr.bf16.mxu1 %v1232_v58 }
  0x4b   :  { %611 = vmatmul.mubr.bf16.gmra.mrb[20].mxu0 %v1234_v61 }
  0x4c   :  { %699 = vmatmul.mubr.bf16.gmra.mrb[20].mxu1 %v1235_v62  ;;  %618 = vmatprep.mubr.bf16.mxu0 %v919_v63 }
  0x4d   :  { %706 = vmatprep.mubr.bf16.mxu1 %v921_v0 }
  0x53   :  { %619 = vmatmul.mubr.bf16.gmra.mrb[24].mxu0 %v918_v1 }
  0x54   :  { %707 = vmatmul.mubr.bf16.gmra.mrb[24].mxu1 %v920_v2  ;;  %1127 = vmatprep.mubr.msk.bf16.mxu0 %vm1249_vm0, %v1248_v34 }
  0x55   :  { %1143 = vmatprep.mubr.msk.bf16.mxu1 %vm1249_vm0, %v1248_v34 }
  0x5b   :  { %1128 = vmatmul.mubr.msk.bf16.vlgmr.msra.gmra.mrb[28].mxu0 %vm516_vm1, %v1241_v3 }
  0x5c   :  { %1144 = vmatmul.mubr.msk.bf16.vlgmr.msra.gmra.mrb[28].mxu1 %vm516_vm1, %v1242_v4  ;;  %1131 = vmatprep.mubr.msk.bf16.mxu0 %vm1249_vm0, %v1248_v34 }
  0x5d   :  { %1147 = vmatprep.mubr.msk.bf16.mxu1 %vm1249_vm0, %v1248_v34 }
  0x63   :  { %1132 = vmatmul.mubr.msk.bf16.gmra.mrb[32].mxu0 %vm516_vm1, %v1243_v5 }
  0x64   :  { %1148 = vmatmul.mubr.msk.bf16.gmra.mrb[32].mxu1 %vm516_vm1, %v1244_v6  ;;  %1135 = vmatprep.mubr.msk.bf16.mxu0 %vm1249_vm0, %v1248_v34 }
  0x65   :  { %1151 = vmatprep.mubr.msk.bf16.mxu1 %vm1249_vm0, %v1248_v34 }
  0x6b   :  { %1136 = vmatmul.mubr.msk.bf16.gmra.mrb[36].mxu0 %vm516_vm1, %v1245_v7 }
  0x6c   :  { %1152 = vmatmul.mubr.msk.bf16.gmra.mrb[36].mxu1 %vm516_vm1, %v1246_v8  ;;  %1139 = vmatprep.mubr.msk.bf16.mxu0 %vm1249_vm0, %v1248_v34 }
  0x73   :  { %1140 = vmatmul.mubr.msk.bf16.gmra.mrb[40].mxu0 %vm516_vm1, %v1247_v9 }
  0xf6   :  { %v1008_v10 = vpop.f32.mrb[0].mxu0 }
  0xf7   :  { %v1009_v12 = vpop.f32.mrb[1].mxu0  ;;  %v1066_v13 = vpop.f32.mrb[0].mxu1 }
  0xf8   :  { %v1010_v14 = vadd.f32 %v1009_v12, %v1008_v10  ;;  %v1011_v15 = vpop.f32.mrb[2].mxu0  ;;  %v1067_v16 = vpop.f32.mrb[1].mxu1 }
  0xf9   :  { %v1012_v17 = vpop.f32.mrb[3].mxu0  ;;  %v1068_v18 = vadd.f32 %v1067_v16, %v1066_v13  ;;  %v1069_v19 = vpop.f32.mrb[2].mxu1 }
  0xfa   :  { %v573_v20 = vadd.f32 %v1010_v14, %v1509_v11  ;;  %v1013_v21 = vadd.f32 %v1012_v17, %v1011_v15  ;;  %v1070_v22 = vpop.f32.mrb[3].mxu1 }
  0xfb   :  { %v1071_v23 = vadd.f32 %v1070_v22, %v1069_v19 }
  0xfc   :  { %v576_v24 = vadd.f32 %v1013_v21, %v1509_v11  ;;  %v1513_v25 = vadd.f32 %v1068_v18, %v573_v20 }
  0xfe   :  { %v1014_v26 = vpop.f32.mrb[4].mxu0  ;;  %v1515_v27 = vadd.f32 %v1071_v23, %v576_v24 }
  0xff   :  { %v1015_v28 = vpop.f32.mrb[5].mxu0  ;;  %v1072_v29 = vpop.f32.mrb[4].mxu1 }
 0x100   :  { %v1016_v30 = vadd.f32 %v1015_v28, %v1014_v26  ;;  %v1017_v31 = vpop.f32.mrb[6].mxu0  ;;  %v1073_v32 = vpop.f32.mrb[5].mxu1 }
 0x101   :  { %v1018_v33 = vpop.f32.mrb[7].mxu0  ;;  %v1074_v34 = vadd.f32 %v1073_v32, %v1072_v29  ;;  %v1075_v35 = vpop.f32.mrb[6].mxu1 }
 0x102   :  { %v581_v36 = vadd.f32 %v1016_v30, %v1509_v11  ;;  %v1019_v37 = vadd.f32 %v1018_v33, %v1017_v31  ;;  %v1076_v38 = vpop.f32.mrb[7].mxu1 }
 0x103   :  { %v1077_v39 = vadd.f32 %v1076_v38, %v1075_v35 }
 0x104   :  { %v584_v40 = vadd.f32 %v1019_v37, %v1509_v11  ;;  %v1519_v41 = vadd.f32 %v1074_v34, %v581_v36 }
 0x106   :  { %v1020_v42 = vpop.f32.mrb[8].mxu0  ;;  %v1521_v43 = vadd.f32 %v1077_v39, %v584_v40 }
 0x107   :  { %v1021_v44 = vpop.f32.mrb[9].mxu0  ;;  %v1078_v45 = vpop.f32.mrb[8].mxu1 }
 0x108   :  { %v1022_v46 = vadd.f32 %v1021_v44, %v1020_v42  ;;  %v1023_v47 = vpop.f32.mrb[10].mxu0  ;;  %v1079_v48 = vpop.f32.mrb[9].mxu1 }
 0x109   :  { %v1024_v49 = vpop.f32.mrb[11].mxu0  ;;  %v1080_v50 = vadd.f32 %v1079_v48, %v1078_v45  ;;  %v1081_v51 = vpop.f32.mrb[10].mxu1 }
 0x10a   :  { %v589_v52 = vadd.f32 %v1022_v46, %v1509_v11  ;;  %v1025_v53 = vadd.f32 %v1024_v49, %v1023_v47  ;;  %v1082_v54 = vpop.f32.mrb[11].mxu1 }
 0x10b   :  { %v1083_v55 = vadd.f32 %v1082_v54, %v1081_v51 }
 0x10c   :  { %v592_v56 = vadd.f32 %v1025_v53, %v1509_v11  ;;  %v1525_v57 = vadd.f32 %v1080_v50, %v589_v52 }
 0x10e   :  { %v1026_v58 = vpop.f32.mrb[12].mxu0  ;;  %v1527_v59 = vadd.f32 %v1083_v55, %v592_v56 }
 0x10f   :  { %v1027_v60 = vpop.f32.mrb[13].mxu0  ;;  %v1084_v61 = vpop.f32.mrb[12].mxu1 }
 0x110   :  { %v1028_v62 = vadd.f32 %v1027_v60, %v1026_v58  ;;  %v1029_v63 = vpop.f32.mrb[14].mxu0  ;;  %v1085_v0 = vpop.f32.mrb[13].mxu1 }
 0x111   :  { %v1030_v1 = vpop.f32.mrb[15].mxu0  ;;  %v1086_v2 = vadd.f32 %v1085_v0, %v1084_v61  ;;  %v1087_v3 = vpop.f32.mrb[14].mxu1 }
 0x112   :  { %v597_v4 = vadd.f32 %v1028_v62, %v1509_v11  ;;  %v1031_v5 = vadd.f32 %v1030_v1, %v1029_v63  ;;  %v1088_v6 = vpop.f32.mrb[15].mxu1 }
 0x113   :  { %v1089_v7 = vadd.f32 %v1088_v6, %v1087_v3 }
 0x114   :  { %v600_v8 = vadd.f32 %v1031_v5, %v1509_v11  ;;  %v1531_v9 = vadd.f32 %v1086_v2, %v597_v4 }
 0x116   :  { %v1032_v10 = vpop.f32.mrb[16].mxu0  ;;  %v1533_v12 = vadd.f32 %v1089_v7, %v600_v8 }
 0x117   :  { %v1033_v13 = vpop.f32.mrb[17].mxu0  ;;  %v1090_v14 = vpop.f32.mrb[16].mxu1 }
 0x118   :  { %v1034_v15 = vadd.f32 %v1033_v13, %v1032_v10  ;;  %v1035_v16 = vpop.f32.mrb[18].mxu0  ;;  %v1091_v17 = vpop.f32.mrb[17].mxu1 }
 0x119   :  { %v1036_v18 = vpop.f32.mrb[19].mxu0  ;;  %v1092_v19 = vadd.f32 %v1091_v17, %v1090_v14  ;;  %v1093_v20 = vpop.f32.mrb[18].mxu1 }
 0x11a   :  { %v605_v21 = vadd.f32 %v1034_v15, %v1509_v11  ;;  %v1037_v22 = vadd.f32 %v1036_v18, %v1035_v16  ;;  %v1094_v23 = vpop.f32.mrb[19].mxu1 }
 0x11b   :  { %v1095_v24 = vadd.f32 %v1094_v23, %v1093_v20 }
 0x11c   :  { %v608_v26 = vadd.f32 %v1037_v22, %v1509_v11  ;;  %v693_v28 = vadd.f32 %v1092_v19, %v605_v21 }
 0x11e   :  { %v1038_v29 = vpop.f32.mrb[20].mxu0  ;;  %v696_v30 = vadd.f32 %v1095_v24, %v608_v26 }
 0x11f   :  { %v1039_v31 = vpop.f32.mrb[21].mxu0  ;;  %v1096_v32 = vpop.f32.mrb[20].mxu1 }
 0x120   :  { %v1040_v33 = vadd.f32 %v1039_v31, %v1038_v29  ;;  %v1041_v34 = vpop.f32.mrb[22].mxu0  ;;  %v1097_v35 = vpop.f32.mrb[21].mxu1 }
 0x121   :  { %v1042_v36 = vpop.f32.mrb[23].mxu0  ;;  %v1098_v37 = vadd.f32 %v1097_v35, %v1096_v32  ;;  %v1099_v38 = vpop.f32.mrb[22].mxu1 }
 0x122   :  { %v613_v39 = vadd.f32 %v1040_v33, %v1509_v11  ;;  %v1043_v40 = vadd.f32 %v1042_v36, %v1041_v34  ;;  %v1100_v42 = vpop.f32.mrb[23].mxu1 }
 0x123   :  { %v1101_v44 = vadd.f32 %v1100_v42, %v1099_v38 }
 0x124   :  { %v616_v45 = vadd.f32 %v1043_v40, %v1509_v11  ;;  %v701_v46 = vadd.f32 %v1098_v37, %v613_v39 }
 0x126   :  { %v1044_v47 = vpop.f32.mrb[24].mxu0  ;;  %v704_v48 = vadd.f32 %v1101_v44, %v616_v45 }
 0x127   :  { %v1045_v49 = vpop.f32.mrb[25].mxu0  ;;  %v1102_v50 = vpop.f32.mrb[24].mxu1 }
 0x128   :  { %v1046_v51 = vadd.f32 %v1045_v49, %v1044_v47  ;;  %v1047_v52 = vpop.f32.mrb[26].mxu0  ;;  %v1103_v53 = vpop.f32.mrb[25].mxu1 }
 0x129   :  { %v1048_v54 = vpop.f32.mrb[27].mxu0  ;;  %v1104_v55 = vadd.f32 %v1103_v53, %v1102_v50  ;;  %v1105_v56 = vpop.f32.mrb[26].mxu1 }
 0x12a   :  { %v621_v58 = vadd.f32 %v1046_v51, %v1509_v11  ;;  %v1106_v60 = vpop.f32.mrb[27].mxu1 }
 0x12c   :  { %v709_v61 = vadd.f32 %v1104_v55, %v621_v58 }
 0x12e   :  { %v748_v62 = vpop.f32.mrb[28].mxu0 }
 0x12f   :  { %v749_v63 = vadd.f32 %v748_v62, %v1513_v25  ;;  %v780_v0 = vpop.f32.mrb[28].mxu1  ;;  %v1129_v1 = vpop.f32.mrb[29].mxu0 }
 0x130   :  { %v781_v2 = vadd.f32 %v780_v0, %v693_v28  ;;  %v1145_v3 = vpop.f32.mrb[29].mxu1  ;;  %v751_v4 = vpop.f32.mrb[30].mxu0 }
 0x131   :  { %v802_v5 = vmax.f32 %v749_v63, 0.0  ;;  %v752_v6 = vadd.f32 %v751_v4, %v1515_v27  ;;  %v783_v7 = vpop.f32.mrb[30].mxu1  ;;  %v1130_v8 = vpop.f32.mrb[31].mxu0 }
 0x132   :  { %v810_v10 = vmax.f32 %v781_v2, 0.0  ;;  %v784_v13 = vadd.f32 %v783_v7, %v696_v30  ;;  %v1146_v14 = vpop.f32.mrb[31].mxu1 }
 0x133   :  { %v979_v11 = vpack.c.bf16 %v802_v5, %v802_v5  ;;  %v803_v15 = vmax.f32 %v752_v6, 0.0 }
 0x134   :  { %v987_v16 = vpack.c.bf16 %v810_v10, %v810_v10  ;;  %v811_v17 = vmax.f32 %v784_v13, 0.0 }
 0x135   :  { %869 = vst.msk [vmem:[%s1602_s3] sm:$0xf] %vm868_vm2, %v979_v11  ;;  %v980_v25 = vpack.c.bf16 %v803_v15, %v803_v15 }
 0x136   :  { %877 = vst.msk [vmem:[%s1602_s3 + $0x20] sm:$0xf] %vm868_vm2, %v987_v16  ;;  %v988_v27 = vpack.c.bf16 %v811_v17, %v811_v17  ;;  %v756_v18 = vpop.f32.mrb[32].mxu0 }
 0x137   :  { %870 = vst.msk [vmem:[%s1602_s3 + $0x4] sm:$0xf] %vm868_vm2, %v980_v25  ;;  %v757_v19 = vadd.f32 %v756_v18, %v1519_v41  ;;  %v788_v20 = vpop.f32.mrb[32].mxu1  ;;  %v1133_v21 = vpop.f32.mrb[33].mxu0 }
 0x138   :  { %878 = vst.msk [vmem:[%s1602_s3 + $0x24] sm:$0xf] %vm868_vm2, %v988_v27  ;;  %v789_v22 = vadd.f32 %v788_v20, %v701_v46  ;;  %v1149_v23 = vpop.f32.mrb[33].mxu1  ;;  %v759_v24 = vpop.f32.mrb[34].mxu0 }
 0x139   :  { %v804_v26 = vmax.f32 %v757_v19, 0.0  ;;  %v760_v28 = vadd.f32 %v759_v24, %v1521_v43  ;;  %v791_v29 = vpop.f32.mrb[34].mxu1  ;;  %v1134_v30 = vpop.f32.mrb[35].mxu0 }
 0x13a   :  { %v812_v31 = vmax.f32 %v789_v22, 0.0  ;;  %v792_v32 = vadd.f32 %v791_v29, %v704_v48  ;;  %v1150_v33 = vpop.f32.mrb[35].mxu1 }
 0x13b   :  { %v981_v34 = vpack.c.bf16 %v804_v26, %v804_v26  ;;  %v805_v41 = vmax.f32 %v760_v28, 0.0 }
 0x13c   :  { %v989_v35 = vpack.c.bf16 %v812_v31, %v812_v31  ;;  %v813_v36 = vmax.f32 %v792_v32, 0.0 }
 0x13d   :  { %871 = vst.msk [vmem:[%s1602_s3 + $0x8] sm:$0xf] %vm868_vm2, %v981_v34  ;;  %v982_v37 = vpack.c.bf16 %v805_v41, %v805_v41 }
 0x13e   :  { %879 = vst.msk [vmem:[%s1602_s3 + $0x28] sm:$0xf] %vm868_vm2, %v989_v35  ;;  %v990_v43 = vpack.c.bf16 %v813_v36, %v813_v36  ;;  %v764_v38 = vpop.f32.mrb[36].mxu0 }
 0x13f   :  { %872 = vst.msk [vmem:[%s1602_s3 + $0xc] sm:$0xf] %vm868_vm2, %v982_v37  ;;  %v765_v39 = vadd.f32 %v764_v38, %v1525_v57  ;;  %v796_v40 = vpop.f32.mrb[36].mxu1  ;;  %v1137_v42 = vpop.f32.mrb[37].mxu0 }
 0x140   :  { %880 = vst.msk [vmem:[%s1602_s3 + $0x2c] sm:$0xf] %vm868_vm2, %v990_v43  ;;  %v797_v44 = vadd.f32 %v796_v40, %v709_v61  ;;  %v767_v45 = vpop.f32.mrb[38].mxu0  ;;  %v1153_v46 = vpop.f32.mrb[37].mxu1 }
 0x141   :  { %v806_v47 = vmax.f32 %v765_v39, 0.0  ;;  %v768_v48 = vadd.f32 %v767_v45, %v1527_v59  ;;  %v1138_v49 = vpop.f32.mrb[39].mxu0  ;;  %v799_v50 = vpop.f32.mrb[38].mxu1 }
 0x142   :  { %v814_v51 = vmax.f32 %v797_v44, 0.0  ;;  %v1154_v52 = vpop.f32.mrb[39].mxu1 }
 0x143   :  { %v983_v53 = vpack.c.bf16 %v806_v47, %v806_v47  ;;  %v807_v57 = vmax.f32 %v768_v48, 0.0 }
 0x144   :  { %v991_v54 = vpack.c.bf16 %v814_v51, %v814_v51 }
 0x145   :  { %873 = vst.msk [vmem:[%s1602_s3 + $0x10] sm:$0xf] %vm868_vm2, %v983_v53  ;;  %v984_v55 = vpack.c.bf16 %v807_v57, %v807_v57 }
 0x146   :  { %882 = vst.msk [vmem:[%s1602_s3 + $0x30] sm:$0x1] %vm881_vm3, %v991_v54  ;;  %v772_v56 = vpop.f32.mrb[40].mxu0 }
 0x147   :  { %874 = vst.msk [vmem:[%s1602_s3 + $0x14] sm:$0xf] %vm868_vm2, %v984_v55  ;;  %v773_v59 = vadd.f32 %v772_v56, %v1531_v9  ;;  %v1141_v58 = vpop.f32.mrb[41].mxu0 }
 0x148   :  { %v775_v60 = vpop.f32.mrb[42].mxu0 }
 0x149   :  { %v808_v61 = vmax.f32 %v773_v59, 0.0  ;;  %v776_v62 = vadd.f32 %v775_v60, %v1533_v12  ;;  %v1142_v63 = vpop.f32.mrb[43].mxu0 }
 0x14b   :  { %v985_v0 = vpack.c.bf16 %v808_v61, %v808_v61  ;;  %v809_v1 = vmax.f32 %v776_v62, 0.0 }
 0x14d   :  { %875 = vst.msk [vmem:[%s1602_s3 + $0x18] sm:$0xf] %vm868_vm2, %v985_v0  ;;  %v986_v2 = vpack.c.bf16 %v809_v1, %v809_v1 }
 0x14f   :  { %876 = vst.msk [vmem:[%s1602_s3 + $0x1c] sm:$0xf] %vm868_vm2, %v986_v2 }

// kernel: convnet_forward.7
= control target key start
LH: loop header
LB: loop body
LE: loop exit
PB: predicated region body
PF: predicated region fallthrough
CT: control target
= control target key end

     0   :  { %v811_v36 = vlaneseq  ;;  %v10172_v37 = vmov 1966171168   ;;  %vm4940_vm0 = vcmask 523264   ;;  %vm6361_vm1 = vcmask 410624   ;;  %s13146_s1 = inlined_call_operand.vmem [shape: bf16[3136,512], index: 1, kind: input, shape index: {}]   ;;  %s13147_s0 = inlined_call_operand.vmem [shape: bf16[2,3136], index: 0, kind: input, shape index: {}]   ;;  %s13148_s3 = inlined_call_operand.vmem [shape: bf16[4,512,51], index: 3, kind: input, shape index: {}]   ;;  %s13149_s2 = inlined_call_operand.vmem [shape: f32[1,512], index: 2, kind: input, shape index: {}]   ;;  %s13150_s4 = inlined_call_operand.vmem [shape: f32[4,1,51], index: 4, kind: input, shape index: {}]   ;;  %s13151_s5 = inlined_call_operand.vmem [shape: f32[4,2,51], index: 5, kind: output, shape index: {}]  }
   0x1   :  { %v8847_v0 = vld [vmem:[%s13146_s1 + $0x4] ss:$16 sps:$4 sm:$0xff]   ;;  %v8849_v1 = vld [vmem:[%s13146_s1 + $0xc] ss:$16 sps:$4 sm:$0xff]   ;;  %v8851_v2 = vld [vmem:[%s13146_s1] ss:$16 sps:$4 sm:$0xff]   ;;  %v837_v38 = vunpack.c.l.s4 %v10172_v37 }
   0x2   :  { %4944 = vmatprep.subr.bf16.mxu0 %v8847_v0  ;;  %v8852_v3 = vld [vmem:[%s13146_s1 + $0x8] ss:$16 sps:$4 sm:$0xff]   ;;  %5477 = vmatprep.subr.bf16.mxu1 %v8849_v1  ;;  %v8853_v4 = vld [vmem:[%s13146_s1 + $0x24] ss:$16 sps:$4 sm:$0xff]   ;;  %v8855_v5 = vld [vmem:[%s13146_s1 + $0x2c] ss:$16 sps:$4 sm:$0xff]  }
   0x3   :  { %4945 = vmatpush1.bf16.msra.mxu0 %v8851_v2  ;;  %5478 = vmatpush1.bf16.msra.mxu1 %v8852_v3  ;;  %v8857_v6 = vld [vmem:[%s13146_s1 + $0x20] ss:$16 sps:$4 sm:$0xff]   ;;  %v8858_v7 = vld [vmem:[%s13146_s1 + $0x28] ss:$16 sps:$4 sm:$0xff]   ;;  %v8859_v8 = vld [vmem:[%s13146_s1 + $0x44] ss:$16 sps:$4 sm:$0xff]   ;;  %v838_v43 = vunpack.c.0.s8 %v837_v38 }
   0x4   :  { %4946 = vmatprep.subr.bf16.mxu0 %v8853_v4  ;;  %5479 = vmatprep.subr.bf16.mxu1 %v8855_v5  ;;  %v8861_v9 = vld [vmem:[%s13146_s1 + $0x4c] ss:$16 sps:$4 sm:$0xff]   ;;  %v8863_v10 = vld [vmem:[%s13146_s1 + $0x40] ss:$16 sps:$4 sm:$0xff]   ;;  %v8864_v11 = vld [vmem:[%s13146_s1 + $0x48] ss:$16 sps:$4 sm:$0xff]  }
   0x5   :  { %v8865_v12 = vld [vmem:[%s13146_s1 + $0x64] ss:$16 sps:$4 sm:$0xff]   ;;  %v8867_v13 = vld [vmem:[%s13146_s1 + $0x6c] ss:$16 sps:$4 sm:$0xff]   ;;  %v8869_v14 = vld [vmem:[%s13146_s1 + $0x60] ss:$16 sps:$4 sm:$0xff]  }
   0x6   :  { %v8870_v15 = vld [vmem:[%s13146_s1 + $0x68] ss:$16 sps:$4 sm:$0xff]   ;;  %v8871_v16 = vld [vmem:[%s13146_s1 + $0x84] ss:$16 sps:$4 sm:$0xff]   ;;  %v8873_v17 = vld [vmem:[%s13146_s1 + $0x8c] ss:$16 sps:$4 sm:$0xff]  }
   0x7   :  { %4947 = vmatpush1.bf16.msra.mxu0 %v8857_v6  ;;  %5480 = vmatpush1.bf16.msra.mxu1 %v8858_v7  ;;  %v8875_v18 = vld [vmem:[%s13146_s1 + $0x80] ss:$16 sps:$4 sm:$0xff]   ;;  %v8876_v19 = vld [vmem:[%s13146_s1 + $0x88] ss:$16 sps:$4 sm:$0xff]   ;;  %v8877_v20 = vld [vmem:[%s13146_s1 + $0xa4] ss:$16 sps:$4 sm:$0xff]  }
   0x8   :  { %4948 = vmatprep.subr.bf16.mxu0 %v8859_v8  ;;  %5481 = vmatprep.subr.bf16.mxu1 %v8861_v9  ;;  %v8879_v21 = vld [vmem:[%s13146_s1 + $0xac] ss:$16 sps:$4 sm:$0xff]   ;;  %v8881_v22 = vld [vmem:[%s13146_s1 + $0xa0] ss:$16 sps:$4 sm:$0xff]   ;;  %v8882_v23 = vld [vmem:[%s13146_s1 + $0xa8] ss:$16 sps:$4 sm:$0xff]  }
   0x9   :  { %v8883_v24 = vld [vmem:[%s13146_s1 + $0xc4] ss:$16 sps:$4 sm:$0xff]   ;;  %v8885_v25 = vld [vmem:[%s13146_s1 + $0xcc] ss:$16 sps:$4 sm:$0xff]   ;;  %v8887_v26 = vld [vmem:[%s13146_s1 + $0xc0] ss:$16 sps:$4 sm:$0xff]  }
   0xa   :  { %v8888_v27 = vld [vmem:[%s13146_s1 + $0xc8] ss:$16 sps:$4 sm:$0xff]   ;;  %v8889_v28 = vld [vmem:[%s13146_s1 + $0xe4] ss:$16 sps:$4 sm:$0xff]   ;;  %v8891_v29 = vld [vmem:[%s13146_s1 + $0xec] ss:$16 sps:$4 sm:$0xff]  }
   0xb   :  { %4949 = vmatpush1.bf16.msra.mxu0 %v8863_v10  ;;  %5482 = vmatpush1.bf16.msra.mxu1 %v8864_v11  ;;  %v8893_v30 = vld [vmem:[%s13146_s1 + $0xe0] ss:$16 sps:$4 sm:$0xff]   ;;  %v8894_v31 = vld [vmem:[%s13146_s1 + $0xe8] ss:$16 sps:$4 sm:$0xff]   ;;  %v8895_v32 = vld [vmem:[%s13146_s1 + $0x104] ss:$16 sps:$4 sm:$0xff]  }
   0xc   :  { %4950 = vmatprep.subr.bf16.mxu0 %v8865_v12  ;;  %5483 = vmatprep.subr.bf16.mxu1 %v8867_v13  ;;  %v8897_v33 = vld [vmem:[%s13146_s1 + $0x10c] ss:$16 sps:$4 sm:$0xff]   ;;  %v8899_v34 = vld [vmem:[%s13146_s1 + $0x100] ss:$16 sps:$4 sm:$0xff]   ;;  %v8900_v35 = vld [vmem:[%s13146_s1 + $0x108] ss:$16 sps:$4 sm:$0xff]  }
   0xd   :  { %v8901_v39 = vld [vmem:[%s13146_s1 + $0x124] ss:$16 sps:$4 sm:$0xff]   ;;  %v8903_v40 = vld [vmem:[%s13146_s1 + $0x12c] ss:$16 sps:$4 sm:$0xff]   ;;  %v8905_v41 = vld [vmem:[%s13146_s1 + $0x120] ss:$16 sps:$4 sm:$0xff]  }
   0xe   :  { %v10321_v42 = vshrl.u32 %v811_v36, 7  ;;  %v8906_v44 = vld [vmem:[%s13146_s1 + $0x128] ss:$16 sps:$4 sm:$0xff]   ;;  %v8907_v45 = vld [vmem:[%s13146_s1 + $0x144] ss:$16 sps:$4 sm:$0xff]  }
   0xf   :  { %4951 = vmatpush1.bf16.msra.mxu0 %v8869_v14  ;;  %5484 = vmatpush1.bf16.msra.mxu1 %v8870_v15  ;;  %v8909_v46 = vld [vmem:[%s13146_s1 + $0x14c] ss:$16 sps:$4 sm:$0xff]   ;;  %v8911_v47 = vld [vmem:[%s13146_s1 + $0x140] ss:$16 sps:$4 sm:$0xff]   ;;  %v8912_v48 = vld [vmem:[%s13146_s1 + $0x148] ss:$16 sps:$4 sm:$0xff]  }
  0x10   :  { %4952 = vmatprep.subr.bf16.mxu0 %v8871_v16  ;;  %5485 = vmatprep.subr.bf16.mxu1 %v8873_v17  ;;  %v10339_v49 = vsub.s32 %v838_v43, %v10321_v42  ;;  %v8913_v50 = vld [vmem:[%s13146_s1 + $0x164] ss:$16 sps:$4 sm:$0xff]   ;;  %v8915_v51 = vld [vmem:[%s13146_s1 + $0x16c] ss:$16 sps:$4 sm:$0xff]   ;;  %v8917_v53 = vld [vmem:[%s13146_s1 + $0x160] ss:$16 sps:$4 sm:$0xff]  }
  0x11   :  { %v10350_v52 = vld [vmem:[%s13147_s0] sm:$0xff]  ;;  %v8918_v55 = vld [vmem:[%s13146_s1 + $0x168] ss:$16 sps:$4 sm:$0xff]   ;;  %v8921_v57 = vld [vmem:[%s13146_s1 + $0x18c] ss:$16 sps:$4 sm:$0xff]  }
  0x12   :  { %v842_v54 = vrot.slane %v10350_v52, %v10339_v49  ;;  %v8919_v56 = vld [vmem:[%s13146_s1 + $0x184] ss:$16 sps:$4 sm:$0xff]   ;;  %v8923_v59 = vld [vmem:[%s13146_s1 + $0x180] ss:$16 sps:$4 sm:$0xff]   ;;  %v8924_v61 = vld [vmem:[%s13146_s1 + $0x188] ss:$16 sps:$4 sm:$0xff]  }
  0x13   :  { %4953 = vmatpush1.bf16.msra.mxu0 %v8875_v18  ;;  %5486 = vmatpush1.bf16.msra.mxu1 %v8876_v19  ;;  %v8925_v62 = vld [vmem:[%s13146_s1 + $0x1a4] ss:$16 sps:$4 sm:$0xff]   ;;  %v8927_v63 = vld [vmem:[%s13146_s1 + $0x1ac] ss:$16 sps:$4 sm:$0xff]   ;;  %v8929_v0 = vld [vmem:[%s13146_s1 + $0x1a0] ss:$16 sps:$4 sm:$0xff]  }
  0x14   :  { %4954 = vmatprep.subr.bf16.mxu0 %v8877_v20  ;;  %5487 = vmatprep.subr.bf16.mxu1 %v8879_v21  ;;  %v850_v58 = vcombine.high %v842_v54, %v842_v54  ;;  %v8930_v1 = vld [vmem:[%s13146_s1 + $0x1a8] ss:$16 sps:$4 sm:$0xff]   ;;  %v8931_v2 = vld [vmem:[%s13146_s1 + $0x1c4] ss:$16 sps:$4 sm:$0xff]   ;;  %v8933_v3 = vld [vmem:[%s13146_s1 + $0x1cc] ss:$16 sps:$4 sm:$0xff]   ;;  %v10419_v13 = vrot.slane %v842_v54, %v10339_v49 }
  0x15   :  { %v8935_v4 = vld [vmem:[%s13146_s1 + $0x1c0] ss:$16 sps:$4 sm:$0xff]   ;;  %v8936_v5 = vld [vmem:[%s13146_s1 + $0x1c8] ss:$16 sps:$4 sm:$0xff]   ;;  %v8937_v6 = vld [vmem:[%s13146_s1 + $0x1e4] ss:$16 sps:$4 sm:$0xff]  }
  0x16   :  { %v872_v60 = vrot.slane %v850_v58, %v10339_v49  ;;  %v8939_v7 = vld [vmem:[%s13146_s1 + $0x1ec] ss:$16 sps:$4 sm:$0xff]   ;;  %v8941_v8 = vld [vmem:[%s13146_s1 + $0x1e0] ss:$16 sps:$4 sm:$0xff]   ;;  %v8942_v9 = vld [vmem:[%s13146_s1 + $0x1e8] ss:$16 sps:$4 sm:$0xff]  }
  0x17   :  { %4955 = vmatpush1.bf16.msra.mxu0 %v8881_v22  ;;  %5488 = vmatpush1.bf16.msra.mxu1 %v8882_v23  ;;  %v8945_v10 = vld [vmem:[%s13146_s1 + $0x204] ss:$16 sps:$4 sm:$0xff]   ;;  %v8948_v11 = vld [vmem:[%s13146_s1 + $0x20c] ss:$16 sps:$4 sm:$0xff]   ;;  %v8943_v12 = vld [vmem:[%s13146_s1 + $0x200] ss:$16 sps:$4 sm:$0xff]  }
  0x18   :  { %4956 = vmatprep.subr.bf16.mxu0 %v8883_v24  ;;  %5489 = vmatprep.subr.bf16.mxu1 %v8885_v25  ;;  %v8946_v14 = vld [vmem:[%s13146_s1 + $0x208] ss:$16 sps:$4 sm:$0xff]   ;;  %v8951_v15 = vld [vmem:[%s13146_s1 + $0x224] ss:$16 sps:$4 sm:$0xff]   ;;  %v8954_v16 = vld [vmem:[%s13146_s1 + $0x22c] ss:$16 sps:$4 sm:$0xff]   ;;  %v882_v17 = vcombine.high %v872_v60, %v872_v60 }
  0x19   :  { %4976 = vmatprep.mubr.bf16.mxu0 %v872_v60  ;;  %5509 = vmatprep.mubr.bf16.mxu1 %v872_v60  ;;  %v8949_v18 = vld [vmem:[%s13146_s1 + $0x220] ss:$16 sps:$4 sm:$0xff]   ;;  %v8952_v19 = vld [vmem:[%s13146_s1 + $0x228] ss:$16 sps:$4 sm:$0xff]   ;;  %v8957_v20 = vld [vmem:[%s13146_s1 + $0x244] ss:$16 sps:$4 sm:$0xff]  }
  0x1a   :  { %v8960_v21 = vld [vmem:[%s13146_s1 + $0x24c] ss:$16 sps:$4 sm:$0xff]   ;;  %v8955_v22 = vld [vmem:[%s13146_s1 + $0x240] ss:$16 sps:$4 sm:$0xff]   ;;  %v8958_v23 = vld [vmem:[%s13146_s1 + $0x248] ss:$16 sps:$4 sm:$0xff]  }
  0x1b   :  { %4957 = vmatpush1.bf16.msra.mxu0 %v8887_v26  ;;  %5490 = vmatpush1.bf16.msra.mxu1 %v8888_v27  ;;  %v8963_v24 = vld [vmem:[%s13146_s1 + $0x264] ss:$16 sps:$4 sm:$0xff]   ;;  %v8966_v25 = vld [vmem:[%s13146_s1 + $0x26c] ss:$16 sps:$4 sm:$0xff]   ;;  %v8961_v26 = vld [vmem:[%s13146_s1 + $0x260] ss:$16 sps:$4 sm:$0xff]  }
  0x1c   :  { %4958 = vmatprep.subr.bf16.mxu0 %v8889_v28  ;;  %5491 = vmatprep.subr.bf16.mxu1 %v8891_v29  ;;  %v8964_v27 = vld [vmem:[%s13146_s1 + $0x268] ss:$16 sps:$4 sm:$0xff]   ;;  %v8969_v28 = vld [vmem:[%s13146_s1 + $0x284] ss:$16 sps:$4 sm:$0xff]   ;;  %v8972_v29 = vld [vmem:[%s13146_s1 + $0x28c] ss:$16 sps:$4 sm:$0xff]  }
  0x1d   :  { %v8981_v36 = vld [vmem:[%s13146_s1 + $0x2c4] ss:$16 sps:$4 sm:$0xff]   ;;  %v8984_v37 = vld [vmem:[%s13146_s1 + $0x2cc] ss:$16 sps:$4 sm:$0xff]   ;;  %v8979_v38 = vld [vmem:[%s13146_s1 + $0x2c0] ss:$16 sps:$4 sm:$0xff]  }
  0x1e   :  { %v8985_v43 = vld [vmem:[%s13146_s1 + $0x2e0] ss:$16 sps:$4 sm:$0xff]   ;;  %v9000_v54 = vld [vmem:[%s13146_s1 + $0x328] ss:$16 sps:$4 sm:$0xff]   ;;  %v9014_v60 = vld [vmem:[%s13146_s1 + $0x36c] ss:$16 sps:$4 sm:$0xff]  }
  0x1f   :  { %4959 = vmatpush1.bf16.msra.mxu0 %v8893_v30  ;;  %5492 = vmatpush1.bf16.msra.mxu1 %v8894_v31  ;;  %v8967_v30 = vld [vmem:[%s13146_s1 + $0x280] ss:$16 sps:$4 sm:$0xff]   ;;  %v8970_v31 = vld [vmem:[%s13146_s1 + $0x288] ss:$16 sps:$4 sm:$0xff]  }
  0x20   :  { %4960 = vmatprep.subr.bf16.mxu0 %v8895_v32  ;;  %5493 = vmatprep.subr.bf16.mxu1 %v8897_v33  ;;  %v8975_v32 = vld [vmem:[%s13146_s1 + $0x2a4] ss:$16 sps:$4 sm:$0xff]   ;;  %v8978_v33 = vld [vmem:[%s13146_s1 + $0x2ac] ss:$16 sps:$4 sm:$0xff]   ;;  %v9006_v58 = vld [vmem:[%s13146_s1 + $0x348] ss:$16 sps:$4 sm:$0xff]  }
  0x23   :  { %4961 = vmatpush1.bf16.msra.mxu0 %v8899_v34  ;;  %5494 = vmatpush1.bf16.msra.mxu1 %v8900_v35  ;;  %v8973_v34 = vld [vmem:[%s13146_s1 + $0x2a0] ss:$16 sps:$4 sm:$0xff]   ;;  %v8976_v35 = vld [vmem:[%s13146_s1 + $0x2a8] ss:$16 sps:$4 sm:$0xff]  }
  0x24   :  { %4962 = vmatprep.subr.bf16.mxu0 %v8901_v39  ;;  %5495 = vmatprep.subr.bf16.mxu1 %v8903_v40  ;;  %v8982_v39 = vld [vmem:[%s13146_s1 + $0x2c8] ss:$16 sps:$4 sm:$0xff]   ;;  %v8987_v40 = vld [vmem:[%s13146_s1 + $0x2e4] ss:$16 sps:$4 sm:$0xff]  }
  0x27   :  { %4963 = vmatpush1.bf16.msra.mxu0 %v8905_v41  ;;  %5496 = vmatpush1.bf16.msra.mxu1 %v8906_v44  ;;  %v8990_v41 = vld [vmem:[%s13146_s1 + $0x2ec] ss:$16 sps:$4 sm:$0xff]   ;;  %v8988_v44 = vld [vmem:[%s13146_s1 + $0x2e8] ss:$16 sps:$4 sm:$0xff]  }
  0x28   :  { %4964 = vmatprep.subr.bf16.mxu0 %v8907_v45  ;;  %5497 = vmatprep.subr.bf16.mxu1 %v8909_v46  ;;  %v8993_v45 = vld [vmem:[%s13146_s1 + $0x304] ss:$16 sps:$4 sm:$0xff]   ;;  %v8996_v46 = vld [vmem:[%s13146_s1 + $0x30c] ss:$16 sps:$4 sm:$0xff]  }
  0x2b   :  { %4965 = vmatpush1.bf16.msra.mxu0 %v8911_v47  ;;  %5498 = vmatpush1.bf16.msra.mxu1 %v8912_v48  ;;  %v8991_v47 = vld [vmem:[%s13146_s1 + $0x300] ss:$16 sps:$4 sm:$0xff]   ;;  %v8994_v48 = vld [vmem:[%s13146_s1 + $0x308] ss:$16 sps:$4 sm:$0xff]  }
  0x2c   :  { %4966 = vmatprep.subr.bf16.mxu0 %v8913_v50  ;;  %5499 = vmatprep.subr.bf16.mxu1 %v8915_v51  ;;  %v8999_v50 = vld [vmem:[%s13146_s1 + $0x324] ss:$16 sps:$4 sm:$0xff]   ;;  %v9002_v51 = vld [vmem:[%s13146_s1 + $0x32c] ss:$16 sps:$4 sm:$0xff]  }
  0x2f   :  { %4967 = vmatpush1.bf16.msra.mxu0 %v8917_v53  ;;  %5500 = vmatpush1.bf16.msra.mxu1 %v8918_v55  ;;  %v8997_v53 = vld [vmem:[%s13146_s1 + $0x320] ss:$16 sps:$4 sm:$0xff]   ;;  %v9005_v55 = vld [vmem:[%s13146_s1 + $0x344] ss:$16 sps:$4 sm:$0xff]  }
  0x30   :  { %4968 = vmatprep.subr.bf16.mxu0 %v8919_v56  ;;  %5501 = vmatprep.subr.bf16.mxu1 %v8921_v57  ;;  %v9008_v56 = vld [vmem:[%s13146_s1 + $0x34c] ss:$16 sps:$4 sm:$0xff]   ;;  %v9003_v57 = vld [vmem:[%s13146_s1 + $0x340] ss:$16 sps:$4 sm:$0xff]  }
  0x33   :  { %4969 = vmatpush1.bf16.msra.mxu0 %v8923_v59  ;;  %5502 = vmatpush1.bf16.msra.mxu1 %v8924_v61  ;;  %v9011_v59 = vld [vmem:[%s13146_s1 + $0x364] ss:$16 sps:$4 sm:$0xff]   ;;  %v9009_v61 = vld [vmem:[%s13146_s1 + $0x360] ss:$16 sps:$4 sm:$0xff]  }
  0x34   :  { %4970 = vmatprep.subr.bf16.mxu0 %v8925_v62  ;;  %5503 = vmatprep.subr.bf16.mxu1 %v8927_v63  ;;  %v9012_v62 = vld [vmem:[%s13146_s1 + $0x368] ss:$16 sps:$4 sm:$0xff]   ;;  %v9017_v63 = vld [vmem:[%s13146_s1 + $0x384] ss:$16 sps:$4 sm:$0xff]  }
  0x37   :  { %4971 = vmatpush1.bf16.msra.mxu0 %v8929_v0  ;;  %5504 = vmatpush1.bf16.msra.mxu1 %v8930_v1  ;;  %v9020_v0 = vld [vmem:[%s13146_s1 + $0x38c] ss:$16 sps:$4 sm:$0xff]   ;;  %v9015_v1 = vld [vmem:[%s13146_s1 + $0x380] ss:$16 sps:$4 sm:$0xff]  }
  0x38   :  { %4972 = vmatprep.subr.bf16.mxu0 %v8931_v2  ;;  %5505 = vmatprep.subr.bf16.mxu1 %v8933_v3  ;;  %v9018_v2 = vld [vmem:[%s13146_s1 + $0x388] ss:$16 sps:$4 sm:$0xff]   ;;  %v9023_v3 = vld [vmem:[%s13146_s1 + $0x3a4] ss:$16 sps:$4 sm:$0xff]  }
  0x3b   :  { %4973 = vmatpush1.bf16.msra.mxu0 %v8935_v4  ;;  %5506 = vmatpush1.bf16.msra.mxu1 %v8936_v5  ;;  %v9026_v4 = vld [vmem:[%s13146_s1 + $0x3ac] ss:$16 sps:$4 sm:$0xff]   ;;  %v9021_v5 = vld [vmem:[%s13146_s1 + $0x3a0] ss:$16 sps:$4 sm:$0xff]  }
  0x3c   :  { %4974 = vmatprep.subr.bf16.mxu0 %v8937_v6  ;;  %5507 = vmatprep.subr.bf16.mxu1 %v8939_v7  ;;  %v9024_v6 = vld [vmem:[%s13146_s1 + $0x3a8] ss:$16 sps:$4 sm:$0xff]   ;;  %v9029_v7 = vld [vmem:[%s13146_s1 + $0x3c4] ss:$16 sps:$4 sm:$0xff]  }
  0x3f   :  { %4975 = vmatpush1.bf16.msra.mxu0 %v8941_v8  ;;  %5508 = vmatpush1.bf16.msra.mxu1 %v8942_v9  ;;  %v9032_v8 = vld [vmem:[%s13146_s1 + $0x3cc] ss:$16 sps:$4 sm:$0xff]   ;;  %v835_v9 = vcombine.high %v10350_v52, %v10350_v52 }
  0x40   :  { %4985 = vmatprep.subr.bf16.mxu0 %v8945_v10  ;;  %5518 = vmatprep.subr.bf16.mxu1 %v8948_v11  ;;  %v9027_v10 = vld [vmem:[%s13146_s1 + $0x3c0] ss:$16 sps:$4 sm:$0xff]   ;;  %v9030_v11 = vld [vmem:[%s13146_s1 + $0x3c8] ss:$16 sps:$4 sm:$0xff]   ;;  %v9038_v52 = vld [vmem:[%s13146_s1 + $0x3ec] ss:$16 sps:$4 sm:$0xff]  }
  0x42   :  { %4977 = vmatmul.mubr.bf16.vlgmr.msra.gmra.mrb[0].mxu0 %v10419_v13  ;;  %5510 = vmatmul.mubr.bf16.vlgmr.msra.gmra.mrb[0].mxu1 %v10419_v13 }
  0x43   :  { %4986 = vmatpush1.bf16.msra.mxu0 %v8943_v12  ;;  %5519 = vmatpush1.bf16.msra.mxu1 %v8946_v14  ;;  %v9035_v12 = vld [vmem:[%s13146_s1 + $0x3e4] ss:$16 sps:$4 sm:$0xff]   ;;  %v10603_v14 = vrot.slane %v835_v9, %v10339_v49  ;;  %v9114_v9 = vld [vmem:[%s13146_s1 + $0x588] ss:$16 sps:$4 sm:$0xff]  }
  0x44   :  { %4987 = vmatprep.subr.bf16.mxu0 %v8951_v15  ;;  %5520 = vmatprep.subr.bf16.mxu1 %v8954_v16  ;;  %v9033_v15 = vld [vmem:[%s13146_s1 + $0x3e0] ss:$16 sps:$4 sm:$0xff]   ;;  %v9036_v16 = vld [vmem:[%s13146_s1 + $0x3e8] ss:$16 sps:$4 sm:$0xff]  }
  0x45   :  { %5017 = vmatprep.mubr.bf16.mxu0 %v882_v17  ;;  %5550 = vmatprep.mubr.bf16.mxu1 %v882_v17  ;;  %v9041_v17 = vld [vmem:[%s13146_s1 + $0x404] ss:$16 sps:$4 sm:$0xff]  }
  0x47   :  { %4988 = vmatpush1.bf16.msra.mxu0 %v8949_v18  ;;  %5521 = vmatpush1.bf16.msra.mxu1 %v8952_v19  ;;  %v9044_v18 = vld [vmem:[%s13146_s1 + $0x40c] ss:$16 sps:$4 sm:$0xff]   ;;  %v851_v19 = vcombine.high %v10603_v14, %v10603_v14 }
  0x48   :  { %4989 = vmatprep.subr.bf16.mxu0 %v8957_v20  ;;  %5522 = vmatprep.subr.bf16.mxu1 %v8960_v21  ;;  %v9039_v20 = vld [vmem:[%s13146_s1 + $0x400] ss:$16 sps:$4 sm:$0xff]   ;;  %v880_v21 = vcombine.high %v10419_v13, %v10419_v13 }
  0x49   :  { %v9045_v13 = vld [vmem:[%s13146_s1 + $0x420] ss:$16 sps:$4 sm:$0xff]  }
  0x4b   :  { %4990 = vmatpush1.bf16.msra.mxu0 %v8955_v22  ;;  %5523 = vmatpush1.bf16.msra.mxu1 %v8958_v23  ;;  %v9042_v22 = vld [vmem:[%s13146_s1 + $0x408] ss:$16 sps:$4 sm:$0xff]   ;;  %v9047_v23 = vld [vmem:[%s13146_s1 + $0x424] ss:$16 sps:$4 sm:$0xff]  }
  0x4c   :  { %4991 = vmatprep.subr.bf16.mxu0 %v8963_v24  ;;  %5524 = vmatprep.subr.bf16.mxu1 %v8966_v25  ;;  %v9050_v24 = vld [vmem:[%s13146_s1 + $0x42c] ss:$16 sps:$4 sm:$0xff]   ;;  %v10634_v25 = vrot.slane %v851_v19, %v10339_v49  ;;  %v9131_v19 = vld [vmem:[%s13146_s1 + $0x5e4] ss:$16 sps:$4 sm:$0xff]  }
  0x4f   :  { %4992 = vmatpush1.bf16.msra.mxu0 %v8961_v26  ;;  %5525 = vmatpush1.bf16.msra.mxu1 %v8964_v27  ;;  %v9048_v26 = vld [vmem:[%s13146_s1 + $0x428] ss:$16 sps:$4 sm:$0xff]   ;;  %v9053_v27 = vld [vmem:[%s13146_s1 + $0x444] ss:$16 sps:$4 sm:$0xff]  }
  0x50   :  { %4993 = vmatprep.subr.bf16.mxu0 %v8969_v28  ;;  %5526 = vmatprep.subr.bf16.mxu1 %v8972_v29  ;;  %v9056_v28 = vld [vmem:[%s13146_s1 + $0x44c] ss:$16 sps:$4 sm:$0xff]   ;;  %v9051_v29 = vld [vmem:[%s13146_s1 + $0x440] ss:$16 sps:$4 sm:$0xff]  }
  0x53   :  { %4994 = vmatpush1.bf16.msra.mxu0 %v8967_v30  ;;  %5527 = vmatpush1.bf16.msra.mxu1 %v8970_v31  ;;  %v9054_v30 = vld [vmem:[%s13146_s1 + $0x448] ss:$16 sps:$4 sm:$0xff]   ;;  %v9059_v31 = vld [vmem:[%s13146_s1 + $0x464] ss:$16 sps:$4 sm:$0xff]  }
  0x54   :  { %4995 = vmatprep.subr.bf16.mxu0 %v8975_v32  ;;  %5528 = vmatprep.subr.bf16.mxu1 %v8978_v33  ;;  %v9062_v32 = vld [vmem:[%s13146_s1 + $0x46c] ss:$16 sps:$4 sm:$0xff]   ;;  %v9057_v33 = vld [vmem:[%s13146_s1 + $0x460] ss:$16 sps:$4 sm:$0xff]  }
  0x57   :  { %4996 = vmatpush1.bf16.msra.mxu0 %v8973_v34  ;;  %5529 = vmatpush1.bf16.msra.mxu1 %v8976_v35  ;;  %v9060_v34 = vld [vmem:[%s13146_s1 + $0x468] ss:$16 sps:$4 sm:$0xff]   ;;  %v9065_v35 = vld [vmem:[%s13146_s1 + $0x484] ss:$16 sps:$4 sm:$0xff]  }
  0x58   :  { %4997 = vmatprep.subr.bf16.mxu0 %v8981_v36  ;;  %5530 = vmatprep.subr.bf16.mxu1 %v8984_v37  ;;  %v9068_v36 = vld [vmem:[%s13146_s1 + $0x48c] ss:$16 sps:$4 sm:$0xff]   ;;  %v9063_v37 = vld [vmem:[%s13146_s1 + $0x480] ss:$16 sps:$4 sm:$0xff]  }
  0x5b   :  { %4998 = vmatpush1.bf16.msra.mxu0 %v8979_v38  ;;  %5531 = vmatpush1.bf16.msra.mxu1 %v8982_v39  ;;  %v9066_v38 = vld [vmem:[%s13146_s1 + $0x488] ss:$16 sps:$4 sm:$0xff]   ;;  %v9071_v39 = vld [vmem:[%s13146_s1 + $0x4a4] ss:$16 sps:$4 sm:$0xff]  }
  0x5c   :  { %4999 = vmatprep.subr.bf16.mxu0 %v8987_v40  ;;  %5532 = vmatprep.subr.bf16.mxu1 %v8990_v41  ;;  %v9074_v40 = vld [vmem:[%s13146_s1 + $0x4ac] ss:$16 sps:$4 sm:$0xff]   ;;  %v9069_v41 = vld [vmem:[%s13146_s1 + $0x4a0] ss:$16 sps:$4 sm:$0xff]  }
  0x5f   :  { %5000 = vmatpush1.bf16.msra.mxu0 %v8985_v43  ;;  %5533 = vmatpush1.bf16.msra.mxu1 %v8988_v44  ;;  %v9072_v43 = vld [vmem:[%s13146_s1 + $0x4a8] ss:$16 sps:$4 sm:$0xff]   ;;  %v9077_v44 = vld [vmem:[%s13146_s1 + $0x4c4] ss:$16 sps:$4 sm:$0xff]  }
  0x60   :  { %5001 = vmatprep.subr.bf16.mxu0 %v8993_v45  ;;  %5534 = vmatprep.subr.bf16.mxu1 %v8996_v46  ;;  %v9080_v45 = vld [vmem:[%s13146_s1 + $0x4cc] ss:$16 sps:$4 sm:$0xff]   ;;  %v9075_v46 = vld [vmem:[%s13146_s1 + $0x4c0] ss:$16 sps:$4 sm:$0xff]  }
  0x63   :  { %5002 = vmatpush1.bf16.msra.mxu0 %v8991_v47  ;;  %5535 = vmatpush1.bf16.msra.mxu1 %v8994_v48  ;;  %v9078_v47 = vld [vmem:[%s13146_s1 + $0x4c8] ss:$16 sps:$4 sm:$0xff]   ;;  %v9083_v48 = vld [vmem:[%s13146_s1 + $0x4e4] ss:$16 sps:$4 sm:$0xff]  }
  0x64   :  { %5003 = vmatprep.subr.bf16.mxu0 %v8999_v50  ;;  %5536 = vmatprep.subr.bf16.mxu1 %v9002_v51  ;;  %v9086_v50 = vld [vmem:[%s13146_s1 + $0x4ec] ss:$16 sps:$4 sm:$0xff]   ;;  %v9081_v51 = vld [vmem:[%s13146_s1 + $0x4e0] ss:$16 sps:$4 sm:$0xff]  }
  0x67   :  { %5004 = vmatpush1.bf16.msra.mxu0 %v8997_v53  ;;  %5537 = vmatpush1.bf16.msra.mxu1 %v9000_v54  ;;  %v9084_v53 = vld [vmem:[%s13146_s1 + $0x4e8] ss:$16 sps:$4 sm:$0xff]   ;;  %v9089_v54 = vld [vmem:[%s13146_s1 + $0x504] ss:$16 sps:$4 sm:$0xff]  }
  0x68   :  { %5005 = vmatprep.subr.bf16.mxu0 %v9005_v55  ;;  %5538 = vmatprep.subr.bf16.mxu1 %v9008_v56  ;;  %v9092_v55 = vld [vmem:[%s13146_s1 + $0x50c] ss:$16 sps:$4 sm:$0xff]   ;;  %v9087_v56 = vld [vmem:[%s13146_s1 + $0x500] ss:$16 sps:$4 sm:$0xff]  }
  0x6b   :  { %5006 = vmatpush1.bf16.msra.mxu0 %v9003_v57  ;;  %5539 = vmatpush1.bf16.msra.mxu1 %v9006_v58  ;;  %v9090_v57 = vld [vmem:[%s13146_s1 + $0x508] ss:$16 sps:$4 sm:$0xff]   ;;  %v9095_v58 = vld [vmem:[%s13146_s1 + $0x524] ss:$16 sps:$4 sm:$0xff]  }
  0x6c   :  { %5007 = vmatprep.subr.bf16.mxu0 %v9011_v59  ;;  %5540 = vmatprep.subr.bf16.mxu1 %v9014_v60  ;;  %v9098_v59 = vld [vmem:[%s13146_s1 + $0x52c] ss:$16 sps:$4 sm:$0xff]   ;;  %v9093_v60 = vld [vmem:[%s13146_s1 + $0x520] ss:$16 sps:$4 sm:$0xff]  }
  0x6f   :  { %5008 = vmatpush1.bf16.msra.mxu0 %v9009_v61  ;;  %5541 = vmatpush1.bf16.msra.mxu1 %v9012_v62  ;;  %v9096_v61 = vld [vmem:[%s13146_s1 + $0x528] ss:$16 sps:$4 sm:$0xff]   ;;  %v9101_v62 = vld [vmem:[%s13146_s1 + $0x544] ss:$16 sps:$4 sm:$0xff]  }
  0x70   :  { %5009 = vmatprep.subr.bf16.mxu0 %v9017_v63  ;;  %5542 = vmatprep.subr.bf16.mxu1 %v9020_v0  ;;  %v9104_v63 = vld [vmem:[%s13146_s1 + $0x54c] ss:$16 sps:$4 sm:$0xff]   ;;  %v9099_v0 = vld [vmem:[%s13146_s1 + $0x540] ss:$16 sps:$4 sm:$0xff]  }
  0x73   :  { %5010 = vmatpush1.bf16.msra.mxu0 %v9015_v1  ;;  %5543 = vmatpush1.bf16.msra.mxu1 %v9018_v2  ;;  %v9102_v1 = vld [vmem:[%s13146_s1 + $0x548] ss:$16 sps:$4 sm:$0xff]   ;;  %v9107_v2 = vld [vmem:[%s13146_s1 + $0x564] ss:$16 sps:$4 sm:$0xff]  }
  0x74   :  { %5011 = vmatprep.subr.bf16.mxu0 %v9023_v3  ;;  %5544 = vmatprep.subr.bf16.mxu1 %v9026_v4  ;;  %v9110_v3 = vld [vmem:[%s13146_s1 + $0x56c] ss:$16 sps:$4 sm:$0xff]   ;;  %v9105_v4 = vld [vmem:[%s13146_s1 + $0x560] ss:$16 sps:$4 sm:$0xff]  }
  0x77   :  { %5012 = vmatpush1.bf16.msra.mxu0 %v9021_v5  ;;  %5545 = vmatpush1.bf16.msra.mxu1 %v9024_v6  ;;  %v9108_v5 = vld [vmem:[%s13146_s1 + $0x568] ss:$16 sps:$4 sm:$0xff]   ;;  %v9113_v6 = vld [vmem:[%s13146_s1 + $0x584] ss:$16 sps:$4 sm:$0xff]  }
  0x78   :  { %5013 = vmatprep.subr.bf16.mxu0 %v9029_v7  ;;  %5546 = vmatprep.subr.bf16.mxu1 %v9032_v8  ;;  %v9116_v7 = vld [vmem:[%s13146_s1 + $0x58c] ss:$16 sps:$4 sm:$0xff]   ;;  %v9111_v8 = vld [vmem:[%s13146_s1 + $0x580] ss:$16 sps:$4 sm:$0xff]  }
  0x7b   :  { %5014 = vmatpush1.bf16.msra.mxu0 %v9027_v10  ;;  %5547 = vmatpush1.bf16.msra.mxu1 %v9030_v11  ;;  %v9119_v10 = vld [vmem:[%s13146_s1 + $0x5a4] ss:$16 sps:$4 sm:$0xff]   ;;  %v9122_v11 = vld [vmem:[%s13146_s1 + $0x5ac] ss:$16 sps:$4 sm:$0xff]  }
  0x7c   :  { %5015 = vmatprep.subr.bf16.mxu0 %v9035_v12  ;;  %5548 = vmatprep.subr.bf16.mxu1 %v9038_v52  ;;  %v9117_v12 = vld [vmem:[%s13146_s1 + $0x5a0] ss:$16 sps:$4 sm:$0xff]   ;;  %v9120_v52 = vld [vmem:[%s13146_s1 + $0x5a8] ss:$16 sps:$4 sm:$0xff]  }
  0x7f   :  { %5016 = vmatpush1.bf16.msra.mxu0 %v9033_v15  ;;  %5549 = vmatpush1.bf16.msra.mxu1 %v9036_v16  ;;  %v9125_v15 = vld [vmem:[%s13146_s1 + $0x5c4] ss:$16 sps:$4 sm:$0xff]   ;;  %v9128_v16 = vld [vmem:[%s13146_s1 + $0x5cc] ss:$16 sps:$4 sm:$0xff]  }
  0x80   :  { %5026 = vmatprep.subr.bf16.mxu0 %v9041_v17  ;;  %5559 = vmatprep.subr.bf16.mxu1 %v9044_v18  ;;  %v9123_v17 = vld [vmem:[%s13146_s1 + $0x5c0] ss:$16 sps:$4 sm:$0xff]   ;;  %v9126_v18 = vld [vmem:[%s13146_s1 + $0x5c8] ss:$16 sps:$4 sm:$0xff]  }
  0x82   :  { %5018 = vmatmul.mubr.bf16.vlgmr.msra.gmra.mrb[0].mxu0 %v880_v21  ;;  %5551 = vmatmul.mubr.bf16.vlgmr.msra.gmra.mrb[0].mxu1 %v880_v21  ;;  %v9129_v21 = vld [vmem:[%s13146_s1 + $0x5e0] ss:$16 sps:$4 sm:$0xff]  }
  0x83   :  { %5027 = vmatpush1.bf16.msra.mxu0 %v9039_v20  ;;  %5560 = vmatpush1.bf16.msra.mxu1 %v9042_v22  ;;  %v9134_v20 = vld [vmem:[%s13146_s1 + $0x5ec] ss:$16 sps:$4 sm:$0xff]   ;;  %v9132_v22 = vld [vmem:[%s13146_s1 + $0x5e8] ss:$16 sps:$4 sm:$0xff]  }
  0x84   :  { %5028 = vmatprep.subr.bf16.mxu0 %v9047_v23  ;;  %5561 = vmatprep.subr.bf16.mxu1 %v9050_v24  ;;  %v9138_v23 = vld [vmem:[%s13146_s1 + $0x604] ss:$16 sps:$4 sm:$0xff]   ;;  %v9141_v24 = vld [vmem:[%s13146_s1 + $0x60c] ss:$16 sps:$4 sm:$0xff]  }
  0x85   :  { %5058 = vmatprep.mubr.bf16.mxu0 %v10634_v25  ;;  %5591 = vmatprep.mubr.bf16.mxu1 %v10634_v25 }
  0x87   :  { %5029 = vmatpush1.bf16.msra.mxu0 %v9045_v13  ;;  %5562 = vmatpush1.bf16.msra.mxu1 %v9048_v26  ;;  %v9136_v13 = vld [vmem:[%s13146_s1 + $0x600] ss:$16 sps:$4 sm:$0xff]   ;;  %v10823_v26 = vrot.slane %v10603_v14, %v10339_v49  ;;  %v883_v14 = vcombine.high %v10634_v25, %v10634_v25  ;;  %v9150_v25 = vld [vmem:[%s13146_s1 + $0x644] ss:$16 sps:$4 sm:$0xff]  }
  0x88   :  { %5030 = vmatprep.subr.bf16.mxu0 %v9053_v27  ;;  %5563 = vmatprep.subr.bf16.mxu1 %v9056_v28  ;;  %v9139_v27 = vld [vmem:[%s13146_s1 + $0x608] ss:$16 sps:$4 sm:$0xff]   ;;  %v9144_v28 = vld [vmem:[%s13146_s1 + $0x624] ss:$16 sps:$4 sm:$0xff]  }
  0x8b   :  { %5031 = vmatpush1.bf16.msra.mxu0 %v9051_v29  ;;  %5564 = vmatpush1.bf16.msra.mxu1 %v9054_v30  ;;  %v9147_v29 = vld [vmem:[%s13146_s1 + $0x62c] ss:$16 sps:$4 sm:$0xff]   ;;  %v9142_v30 = vld [vmem:[%s13146_s1 + $0x620] ss:$16 sps:$4 sm:$0xff]  }
  0x8c   :  { %5032 = vmatprep.subr.bf16.mxu0 %v9059_v31  ;;  %5565 = vmatprep.subr.bf16.mxu1 %v9062_v32  ;;  %v9145_v31 = vld [vmem:[%s13146_s1 + $0x628] ss:$16 sps:$4 sm:$0xff]   ;;  %v9153_v32 = vld [vmem:[%s13146_s1 + $0x64c] ss:$16 sps:$4 sm:$0xff]  }
  0x8f   :  { %5033 = vmatpush1.bf16.msra.mxu0 %v9057_v33  ;;  %5566 = vmatpush1.bf16.msra.mxu1 %v9060_v34  ;;  %v9148_v33 = vld [vmem:[%s13146_s1 + $0x640] ss:$16 sps:$4 sm:$0xff]   ;;  %v9151_v34 = vld [vmem:[%s13146_s1 + $0x648] ss:$16 sps:$4 sm:$0xff]  }
  0x90   :  { %5034 = vmatprep.subr.bf16.mxu0 %v9065_v35  ;;  %5567 = vmatprep.subr.bf16.mxu1 %v9068_v36  ;;  %v9156_v35 = vld [vmem:[%s13146_s1 + $0x664] ss:$16 sps:$4 sm:$0xff]   ;;  %v9159_v36 = vld [vmem:[%s13146_s1 + $0x66c] ss:$16 sps:$4 sm:$0xff]  }
  0x93   :  { %5035 = vmatpush1.bf16.msra.mxu0 %v9063_v37  ;;  %5568 = vmatpush1.bf16.msra.mxu1 %v9066_v38  ;;  %v9154_v37 = vld [vmem:[%s13146_s1 + $0x660] ss:$16 sps:$4 sm:$0xff]   ;;  %v9157_v38 = vld [vmem:[%s13146_s1 + $0x668] ss:$16 sps:$4 sm:$0xff]  }
  0x94   :  { %5036 = vmatprep.subr.bf16.mxu0 %v9071_v39  ;;  %5569 = vmatprep.subr.bf16.mxu1 %v9074_v40  ;;  %v9162_v39 = vld [vmem:[%s13146_s1 + $0x684] ss:$16 sps:$4 sm:$0xff]   ;;  %v9165_v40 = vld [vmem:[%s13146_s1 + $0x68c] ss:$16 sps:$4 sm:$0xff]  }
  0x97   :  { %5037 = vmatpush1.bf16.msra.mxu0 %v9069_v41  ;;  %5570 = vmatpush1.bf16.msra.mxu1 %v9072_v43  ;;  %v9160_v41 = vld [vmem:[%s13146_s1 + $0x680] ss:$16 sps:$4 sm:$0xff]   ;;  %v9163_v43 = vld [vmem:[%s13146_s1 + $0x688] ss:$16 sps:$4 sm:$0xff]  }
  0x98   :  { %5038 = vmatprep.subr.bf16.mxu0 %v9077_v44  ;;  %5571 = vmatprep.subr.bf16.mxu1 %v9080_v45  ;;  %v9168_v44 = vld [vmem:[%s13146_s1 + $0x6a4] ss:$16 sps:$4 sm:$0xff]   ;;  %v9171_v45 = vld [vmem:[%s13146_s1 + $0x6ac] ss:$16 sps:$4 sm:$0xff]  }
  0x9b   :  { %5039 = vmatpush1.bf16.msra.mxu0 %v9075_v46  ;;  %5572 = vmatpush1.bf16.msra.mxu1 %v9078_v47  ;;  %v9166_v46 = vld [vmem:[%s13146_s1 + $0x6a0] ss:$16 sps:$4 sm:$0xff]   ;;  %v9169_v47 = vld [vmem:[%s13146_s1 + $0x6a8] ss:$16 sps:$4 sm:$0xff]  }
  0x9c   :  { %5040 = vmatprep.subr.bf16.mxu0 %v9083_v48  ;;  %5573 = vmatprep.subr.bf16.mxu1 %v9086_v50  ;;  %v9174_v48 = vld [vmem:[%s13146_s1 + $0x6c4] ss:$16 sps:$4 sm:$0xff]   ;;  %v9177_v50 = vld [vmem:[%s13146_s1 + $0x6cc] ss:$16 sps:$4 sm:$0xff]  }
  0x9f   :  { %5041 = vmatpush1.bf16.msra.mxu0 %v9081_v51  ;;  %5574 = vmatpush1.bf16.msra.mxu1 %v9084_v53  ;;  %v9172_v51 = vld [vmem:[%s13146_s1 + $0x6c0] ss:$16 sps:$4 sm:$0xff]   ;;  %v9175_v53 = vld [vmem:[%s13146_s1 + $0x6c8] ss:$16 sps:$4 sm:$0xff]  }
  0xa0   :  { %5042 = vmatprep.subr.bf16.mxu0 %v9089_v54  ;;  %5575 = vmatprep.subr.bf16.mxu1 %v9092_v55  ;;  %v9180_v54 = vld [vmem:[%s13146_s1 + $0x6e4] ss:$16 sps:$4 sm:$0xff]   ;;  %v9183_v55 = vld [vmem:[%s13146_s1 + $0x6ec] ss:$16 sps:$4 sm:$0xff]  }
  0xa3   :  { %5043 = vmatpush1.bf16.msra.mxu0 %v9087_v56  ;;  %5576 = vmatpush1.bf16.msra.mxu1 %v9090_v57  ;;  %v9178_v56 = vld [vmem:[%s13146_s1 + $0x6e0] ss:$16 sps:$4 sm:$0xff]   ;;  %v9181_v57 = vld [vmem:[%s13146_s1 + $0x6e8] ss:$16 sps:$4 sm:$0xff]  }
  0xa4   :  { %5044 = vmatprep.subr.bf16.mxu0 %v9095_v58  ;;  %5577 = vmatprep.subr.bf16.mxu1 %v9098_v59  ;;  %v9186_v58 = vld [vmem:[%s13146_s1 + $0x704] ss:$16 sps:$4 sm:$0xff]   ;;  %v9189_v59 = vld [vmem:[%s13146_s1 + $0x70c] ss:$16 sps:$4 sm:$0xff]  }
  0xa7   :  { %5045 = vmatpush1.bf16.msra.mxu0 %v9093_v60  ;;  %5578 = vmatpush1.bf16.msra.mxu1 %v9096_v61  ;;  %v9184_v60 = vld [vmem:[%s13146_s1 + $0x700] ss:$16 sps:$4 sm:$0xff]   ;;  %v9187_v61 = vld [vmem:[%s13146_s1 + $0x708] ss:$16 sps:$4 sm:$0xff]  }
  0xa8   :  { %5046 = vmatprep.subr.bf16.mxu0 %v9101_v62  ;;  %5579 = vmatprep.subr.bf16.mxu1 %v9104_v63  ;;  %v9192_v62 = vld [vmem:[%s13146_s1 + $0x724] ss:$16 sps:$4 sm:$0xff]   ;;  %v9195_v63 = vld [vmem:[%s13146_s1 + $0x72c] ss:$16 sps:$4 sm:$0xff]  }
  0xab   :  { %5047 = vmatpush1.bf16.msra.mxu0 %v9099_v0  ;;  %5580 = vmatpush1.bf16.msra.mxu1 %v9102_v1  ;;  %v9190_v0 = vld [vmem:[%s13146_s1 + $0x720] ss:$16 sps:$4 sm:$0xff]   ;;  %v9193_v1 = vld [vmem:[%s13146_s1 + $0x728] ss:$16 sps:$4 sm:$0xff]  }
  0xac   :  { %5048 = vmatprep.subr.bf16.mxu0 %v9107_v2  ;;  %5581 = vmatprep.subr.bf16.mxu1 %v9110_v3  ;;  %v9198_v2 = vld [vmem:[%s13146_s1 + $0x744] ss:$16 sps:$4 sm:$0xff]   ;;  %v9201_v3 = vld [vmem:[%s13146_s1 + $0x74c] ss:$16 sps:$4 sm:$0xff]  }
  0xaf   :  { %5049 = vmatpush1.bf16.msra.mxu0 %v9105_v4  ;;  %5582 = vmatpush1.bf16.msra.mxu1 %v9108_v5  ;;  %v9196_v4 = vld [vmem:[%s13146_s1 + $0x740] ss:$16 sps:$4 sm:$0xff]   ;;  %v9199_v5 = vld [vmem:[%s13146_s1 + $0x748] ss:$16 sps:$4 sm:$0xff]  }
  0xb0   :  { %5050 = vmatprep.subr.bf16.mxu0 %v9113_v6  ;;  %5583 = vmatprep.subr.bf16.mxu1 %v9116_v7  ;;  %v9204_v6 = vld [vmem:[%s13146_s1 + $0x764] ss:$16 sps:$4 sm:$0xff]   ;;  %v9207_v7 = vld [vmem:[%s13146_s1 + $0x76c] ss:$16 sps:$4 sm:$0xff]  }
  0xb3   :  { %5051 = vmatpush1.bf16.msra.mxu0 %v9111_v8  ;;  %5584 = vmatpush1.bf16.msra.mxu1 %v9114_v9  ;;  %v9202_v8 = vld [vmem:[%s13146_s1 + $0x760] ss:$16 sps:$4 sm:$0xff]   ;;  %v9205_v9 = vld [vmem:[%s13146_s1 + $0x768] ss:$16 sps:$4 sm:$0xff]  }
  0xb4   :  { %5052 = vmatprep.subr.bf16.mxu0 %v9119_v10  ;;  %5585 = vmatprep.subr.bf16.mxu1 %v9122_v11  ;;  %v9210_v10 = vld [vmem:[%s13146_s1 + $0x784] ss:$16 sps:$4 sm:$0xff]   ;;  %v9213_v11 = vld [vmem:[%s13146_s1 + $0x78c] ss:$16 sps:$4 sm:$0xff]  }
  0xb7   :  { %5053 = vmatpush1.bf16.msra.mxu0 %v9117_v12  ;;  %5586 = vmatpush1.bf16.msra.mxu1 %v9120_v52  ;;  %v9208_v12 = vld [vmem:[%s13146_s1 + $0x780] ss:$16 sps:$4 sm:$0xff]   ;;  %v9211_v52 = vld [vmem:[%s13146_s1 + $0x788] ss:$16 sps:$4 sm:$0xff]  }
  0xb8   :  { %5054 = vmatprep.subr.bf16.mxu0 %v9125_v15  ;;  %5587 = vmatprep.subr.bf16.mxu1 %v9128_v16  ;;  %v9216_v15 = vld [vmem:[%s13146_s1 + $0x7a4] ss:$16 sps:$4 sm:$0xff]   ;;  %v9219_v16 = vld [vmem:[%s13146_s1 + $0x7ac] ss:$16 sps:$4 sm:$0xff]  }
  0xbb   :  { %5055 = vmatpush1.bf16.msra.mxu0 %v9123_v17  ;;  %5588 = vmatpush1.bf16.msra.mxu1 %v9126_v18  ;;  %v9214_v17 = vld [vmem:[%s13146_s1 + $0x7a0] ss:$16 sps:$4 sm:$0xff]   ;;  %v9217_v18 = vld [vmem:[%s13146_s1 + $0x7a8] ss:$16 sps:$4 sm:$0xff]  }
  0xbc   :  { %5056 = vmatprep.subr.bf16.mxu0 %v9131_v19  ;;  %5589 = vmatprep.subr.bf16.mxu1 %v9134_v20  ;;  %v9222_v19 = vld [vmem:[%s13146_s1 + $0x7c4] ss:$16 sps:$4 sm:$0xff]   ;;  %v9225_v20 = vld [vmem:[%s13146_s1 + $0x7cc] ss:$16 sps:$4 sm:$0xff]  }
  0xbf   :  { %5057 = vmatpush1.bf16.msra.mxu0 %v9129_v21  ;;  %5590 = vmatpush1.bf16.msra.mxu1 %v9132_v22  ;;  %v10997_v21 = vld.sshfl [vmem:[%s13147_s0 + $0x8] sm:$0xff pattern:$0x75316420]  ;;  %v9220_v22 = vld [vmem:[%s13146_s1 + $0x7c0] ss:$16 sps:$4 sm:$0xff]  }
  0xc0   :  { %5067 = vmatprep.subr.bf16.mxu0 %v9138_v23  ;;  %5600 = vmatprep.subr.bf16.mxu1 %v9141_v24  ;;  %v9223_v23 = vld [vmem:[%s13146_s1 + $0x7c8] ss:$16 sps:$4 sm:$0xff]   ;;  %v9228_v24 = vld [vmem:[%s13146_s1 + $0x7e4] ss:$16 sps:$4 sm:$0xff]  }
  0xc2   :  { %5059 = vmatmul.mubr.bf16.vlgmr.msra.gmra.mrb[0].mxu0 %v10823_v26  ;;  %5592 = vmatmul.mubr.bf16.vlgmr.msra.gmra.mrb[0].mxu1 %v10823_v26 }
  0xc3   :  { %5068 = vmatpush1.bf16.msra.mxu0 %v9136_v13  ;;  %5601 = vmatpush1.bf16.msra.mxu1 %v9139_v27  ;;  %v9231_v13 = vld [vmem:[%s13146_s1 + $0x7ec] ss:$16 sps:$4 sm:$0xff]   ;;  %v9226_v27 = vld [vmem:[%s13146_s1 + $0x7e0] ss:$16 sps:$4 sm:$0xff]  }
  0xc4   :  { %5069 = vmatprep.subr.bf16.mxu0 %v9144_v28  ;;  %5602 = vmatprep.subr.bf16.mxu1 %v9147_v29  ;;  %v9229_v28 = vld [vmem:[%s13146_s1 + $0x7e8] ss:$16 sps:$4 sm:$0xff]   ;;  %v9234_v29 = vld [vmem:[%s13146_s1 + $0x804] ss:$16 sps:$4 sm:$0xff]  }
  0xc5   :  { %5099 = vmatprep.mubr.bf16.mxu0 %v883_v14  ;;  %5632 = vmatprep.mubr.bf16.mxu1 %v883_v14  ;;  %v9237_v14 = vld [vmem:[%s13146_s1 + $0x80c] ss:$16 sps:$4 sm:$0xff]  }
  0xc7   :  { %5070 = vmatpush1.bf16.msra.mxu0 %v9142_v30  ;;  %5603 = vmatpush1.bf16.msra.mxu1 %v9145_v31  ;;  %v899_v30 = vcombine.high %v10997_v21, %v10997_v21  ;;  %v881_v31 = vcombine.high %v10823_v26, %v10823_v26  ;;  %v9243_v26 = vld [vmem:[%s13146_s1 + $0x82c] ss:$16 sps:$4 sm:$0xff]  }
  0xc8   :  { %5071 = vmatprep.subr.bf16.mxu0 %v9150_v25  ;;  %5604 = vmatprep.subr.bf16.mxu1 %v9153_v32  ;;  %v9232_v25 = vld [vmem:[%s13146_s1 + $0x800] ss:$16 sps:$4 sm:$0xff]   ;;  %v9235_v32 = vld [vmem:[%s13146_s1 + $0x808] ss:$16 sps:$4 sm:$0xff]  }
  0xcb   :  { %5072 = vmatpush1.bf16.msra.mxu0 %v9148_v33  ;;  %5605 = vmatpush1.bf16.msra.mxu1 %v9151_v34  ;;  %v9240_v33 = vld [vmem:[%s13146_s1 + $0x824] ss:$16 sps:$4 sm:$0xff]   ;;  %v11040_v34 = vrot.slane %v899_v30, %v10339_v49 }
  0xcc   :  { %5073 = vmatprep.subr.bf16.mxu0 %v9156_v35  ;;  %5606 = vmatprep.subr.bf16.mxu1 %v9159_v36  ;;  %v9238_v35 = vld [vmem:[%s13146_s1 + $0x820] ss:$16 sps:$4 sm:$0xff]   ;;  %v9241_v36 = vld [vmem:[%s13146_s1 + $0x828] ss:$16 sps:$4 sm:$0xff]   ;;  %v9324_v30 = vld [vmem:[%s13146_s1 + $0x9e4] ss:$16 sps:$4 sm:$0xff]  }
  0xcf   :  { %5074 = vmatpush1.bf16.msra.mxu0 %v9154_v37  ;;  %5607 = vmatpush1.bf16.msra.mxu1 %v9157_v38  ;;  %v9246_v37 = vld [vmem:[%s13146_s1 + $0x844] ss:$16 sps:$4 sm:$0xff]   ;;  %v9249_v38 = vld [vmem:[%s13146_s1 + $0x84c] ss:$16 sps:$4 sm:$0xff]  }
  0xd0   :  { %5075 = vmatprep.subr.bf16.mxu0 %v9162_v39  ;;  %5608 = vmatprep.subr.bf16.mxu1 %v9165_v40  ;;  %v9244_v39 = vld [vmem:[%s13146_s1 + $0x840] ss:$16 sps:$4 sm:$0xff]   ;;  %v9247_v40 = vld [vmem:[%s13146_s1 + $0x848] ss:$16 sps:$4 sm:$0xff]  }
  0xd3   :  { %5076 = vmatpush1.bf16.msra.mxu0 %v9160_v41  ;;  %5609 = vmatpush1.bf16.msra.mxu1 %v9163_v43  ;;  %v9252_v41 = vld [vmem:[%s13146_s1 + $0x864] ss:$16 sps:$4 sm:$0xff]   ;;  %v9255_v43 = vld [vmem:[%s13146_s1 + $0x86c] ss:$16 sps:$4 sm:$0xff]  }
  0xd4   :  { %5077 = vmatprep.subr.bf16.mxu0 %v9168_v44  ;;  %5610 = vmatprep.subr.bf16.mxu1 %v9171_v45  ;;  %v9250_v44 = vld [vmem:[%s13146_s1 + $0x860] ss:$16 sps:$4 sm:$0xff]   ;;  %v9253_v45 = vld [vmem:[%s13146_s1 + $0x868] ss:$16 sps:$4 sm:$0xff]  }
  0xd7   :  { %5078 = vmatpush1.bf16.msra.mxu0 %v9166_v46  ;;  %5611 = vmatpush1.bf16.msra.mxu1 %v9169_v47  ;;  %v9258_v46 = vld [vmem:[%s13146_s1 + $0x884] ss:$16 sps:$4 sm:$0xff]   ;;  %v9261_v47 = vld [vmem:[%s13146_s1 + $0x88c] ss:$16 sps:$4 sm:$0xff]  }
  0xd8   :  { %5079 = vmatprep.subr.bf16.mxu0 %v9174_v48  ;;  %5612 = vmatprep.subr.bf16.mxu1 %v9177_v50  ;;  %v9256_v48 = vld [vmem:[%s13146_s1 + $0x880] ss:$16 sps:$4 sm:$0xff]   ;;  %v9259_v50 = vld [vmem:[%s13146_s1 + $0x888] ss:$16 sps:$4 sm:$0xff]  }
  0xdb   :  { %5080 = vmatpush1.bf16.msra.mxu0 %v9172_v51  ;;  %5613 = vmatpush1.bf16.msra.mxu1 %v9175_v53  ;;  %v9264_v51 = vld [vmem:[%s13146_s1 + $0x8a4] ss:$16 sps:$4 sm:$0xff]   ;;  %v9267_v53 = vld [vmem:[%s13146_s1 + $0x8ac] ss:$16 sps:$4 sm:$0xff]  }
  0xdc   :  { %5081 = vmatprep.subr.bf16.mxu0 %v9180_v54  ;;  %5614 = vmatprep.subr.bf16.mxu1 %v9183_v55  ;;  %v9262_v54 = vld [vmem:[%s13146_s1 + $0x8a0] ss:$16 sps:$4 sm:$0xff]   ;;  %v9265_v55 = vld [vmem:[%s13146_s1 + $0x8a8] ss:$16 sps:$4 sm:$0xff]  }
  0xdf   :  { %5082 = vmatpush1.bf16.msra.mxu0 %v9178_v56  ;;  %5615 = vmatpush1.bf16.msra.mxu1 %v9181_v57  ;;  %v9270_v56 = vld [vmem:[%s13146_s1 + $0x8c4] ss:$16 sps:$4 sm:$0xff]   ;;  %v9273_v57 = vld [vmem:[%s13146_s1 + $0x8cc] ss:$16 sps:$4 sm:$0xff]  }
  0xe0   :  { %5083 = vmatprep.subr.bf16.mxu0 %v9186_v58  ;;  %5616 = vmatprep.subr.bf16.mxu1 %v9189_v59  ;;  %v9268_v58 = vld [vmem:[%s13146_s1 + $0x8c0] ss:$16 sps:$4 sm:$0xff]   ;;  %v9271_v59 = vld [vmem:[%s13146_s1 + $0x8c8] ss:$16 sps:$4 sm:$0xff]  }
  0xe3   :  { %5084 = vmatpush1.bf16.msra.mxu0 %v9184_v60  ;;  %5617 = vmatpush1.bf16.msra.mxu1 %v9187_v61  ;;  %v9276_v60 = vld [vmem:[%s13146_s1 + $0x8e4] ss:$16 sps:$4 sm:$0xff]   ;;  %v9279_v61 = vld [vmem:[%s13146_s1 + $0x8ec] ss:$16 sps:$4 sm:$0xff]  }
  0xe4   :  { %5085 = vmatprep.subr.bf16.mxu0 %v9192_v62  ;;  %5618 = vmatprep.subr.bf16.mxu1 %v9195_v63  ;;  %v9274_v62 = vld [vmem:[%s13146_s1 + $0x8e0] ss:$16 sps:$4 sm:$0xff]   ;;  %v9277_v63 = vld [vmem:[%s13146_s1 + $0x8e8] ss:$16 sps:$4 sm:$0xff]  }
  0xe7   :  { %5086 = vmatpush1.bf16.msra.mxu0 %v9190_v0  ;;  %5619 = vmatpush1.bf16.msra.mxu1 %v9193_v1  ;;  %v9282_v0 = vld [vmem:[%s13146_s1 + $0x904] ss:$16 sps:$4 sm:$0xff]   ;;  %v9285_v1 = vld [vmem:[%s13146_s1 + $0x90c] ss:$16 sps:$4 sm:$0xff]  }
  0xe8   :  { %5087 = vmatprep.subr.bf16.mxu0 %v9198_v2  ;;  %5620 = vmatprep.subr.bf16.mxu1 %v9201_v3  ;;  %v9280_v2 = vld [vmem:[%s13146_s1 + $0x900] ss:$16 sps:$4 sm:$0xff]   ;;  %v9283_v3 = vld [vmem:[%s13146_s1 + $0x908] ss:$16 sps:$4 sm:$0xff]  }
  0xeb   :  { %5088 = vmatpush1.bf16.msra.mxu0 %v9196_v4  ;;  %5621 = vmatpush1.bf16.msra.mxu1 %v9199_v5  ;;  %v9288_v4 = vld [vmem:[%s13146_s1 + $0x924] ss:$16 sps:$4 sm:$0xff]   ;;  %v9291_v5 = vld [vmem:[%s13146_s1 + $0x92c] ss:$16 sps:$4 sm:$0xff]  }
  0xec   :  { %5089 = vmatprep.subr.bf16.mxu0 %v9204_v6  ;;  %5622 = vmatprep.subr.bf16.mxu1 %v9207_v7  ;;  %v9286_v6 = vld [vmem:[%s13146_s1 + $0x920] ss:$16 sps:$4 sm:$0xff]   ;;  %v9289_v7 = vld [vmem:[%s13146_s1 + $0x928] ss:$16 sps:$4 sm:$0xff]  }
  0xef   :  { %5090 = vmatpush1.bf16.msra.mxu0 %v9202_v8  ;;  %5623 = vmatpush1.bf16.msra.mxu1 %v9205_v9  ;;  %v9294_v8 = vld [vmem:[%s13146_s1 + $0x944] ss:$16 sps:$4 sm:$0xff]   ;;  %v9297_v9 = vld [vmem:[%s13146_s1 + $0x94c] ss:$16 sps:$4 sm:$0xff]  }
  0xf0   :  { %5091 = vmatprep.subr.bf16.mxu0 %v9210_v10  ;;  %5624 = vmatprep.subr.bf16.mxu1 %v9213_v11  ;;  %v9292_v10 = vld [vmem:[%s13146_s1 + $0x940] ss:$16 sps:$4 sm:$0xff]   ;;  %v9295_v11 = vld [vmem:[%s13146_s1 + $0x948] ss:$16 sps:$4 sm:$0xff]  }
  0xf3   :  { %5092 = vmatpush1.bf16.msra.mxu0 %v9208_v12  ;;  %5625 = vmatpush1.bf16.msra.mxu1 %v9211_v52  ;;  %v9300_v12 = vld [vmem:[%s13146_s1 + $0x964] ss:$16 sps:$4 sm:$0xff]   ;;  %v9303_v52 = vld [vmem:[%s13146_s1 + $0x96c] ss:$16 sps:$4 sm:$0xff]  }
  0xf4   :  { %5093 = vmatprep.subr.bf16.mxu0 %v9216_v15  ;;  %5626 = vmatprep.subr.bf16.mxu1 %v9219_v16  ;;  %v9298_v15 = vld [vmem:[%s13146_s1 + $0x960] ss:$16 sps:$4 sm:$0xff]   ;;  %v9301_v16 = vld [vmem:[%s13146_s1 + $0x968] ss:$16 sps:$4 sm:$0xff]  }
  0xf7   :  { %5094 = vmatpush1.bf16.msra.mxu0 %v9214_v17  ;;  %5627 = vmatpush1.bf16.msra.mxu1 %v9217_v18  ;;  %v9306_v17 = vld [vmem:[%s13146_s1 + $0x984] ss:$16 sps:$4 sm:$0xff]   ;;  %v9309_v18 = vld [vmem:[%s13146_s1 + $0x98c] ss:$16 sps:$4 sm:$0xff]  }
  0xf8   :  { %5095 = vmatprep.subr.bf16.mxu0 %v9222_v19  ;;  %5628 = vmatprep.subr.bf16.mxu1 %v9225_v20  ;;  %v9304_v19 = vld [vmem:[%s13146_s1 + $0x980] ss:$16 sps:$4 sm:$0xff]   ;;  %v9307_v20 = vld [vmem:[%s13146_s1 + $0x988] ss:$16 sps:$4 sm:$0xff]  }
  0xfb   :  { %5096 = vmatpush1.bf16.msra.mxu0 %v9220_v22  ;;  %5629 = vmatpush1.bf16.msra.mxu1 %v9223_v23  ;;  %v9312_v22 = vld [vmem:[%s13146_s1 + $0x9a4] ss:$16 sps:$4 sm:$0xff]   ;;  %v9315_v23 = vld [vmem:[%s13146_s1 + $0x9ac] ss:$16 sps:$4 sm:$0xff]  }
  0xfc   :  { %5097 = vmatprep.subr.bf16.mxu0 %v9228_v24  ;;  %5630 = vmatprep.subr.bf16.mxu1 %v9231_v13  ;;  %v9310_v24 = vld [vmem:[%s13146_s1 + $0x9a0] ss:$16 sps:$4 sm:$0xff]   ;;  %v9313_v13 = vld [vmem:[%s13146_s1 + $0x9a8] ss:$16 sps:$4 sm:$0xff]  }
  0xff   :  { %5098 = vmatpush1.bf16.msra.mxu0 %v9226_v27  ;;  %5631 = vmatpush1.bf16.msra.mxu1 %v9229_v28  ;;  %v9318_v27 = vld [vmem:[%s13146_s1 + $0x9c4] ss:$16 sps:$4 sm:$0xff]   ;;  %v9321_v28 = vld [vmem:[%s13146_s1 + $0x9cc] ss:$16 sps:$4 sm:$0xff]  }
 0x100   :  { %5108 = vmatprep.subr.bf16.mxu0 %v9234_v29  ;;  %5641 = vmatprep.subr.bf16.mxu1 %v9237_v14  ;;  %v9316_v29 = vld [vmem:[%s13146_s1 + $0x9c0] ss:$16 sps:$4 sm:$0xff]   ;;  %v9319_v14 = vld [vmem:[%s13146_s1 + $0x9c8] ss:$16 sps:$4 sm:$0xff]  }
 0x102   :  { %5100 = vmatmul.mubr.bf16.vlgmr.msra.gmra.mrb[0].mxu0 %v881_v31  ;;  %5633 = vmatmul.mubr.bf16.vlgmr.msra.gmra.mrb[0].mxu1 %v881_v31  ;;  %v9327_v31 = vld [vmem:[%s13146_s1 + $0x9ec] ss:$16 sps:$4 sm:$0xff]  }
 0x103   :  { %5109 = vmatpush1.bf16.msra.mxu0 %v9232_v25  ;;  %5642 = vmatpush1.bf16.msra.mxu1 %v9235_v32  ;;  %v9322_v25 = vld [vmem:[%s13146_s1 + $0x9e0] ss:$16 sps:$4 sm:$0xff]   ;;  %v9325_v32 = vld [vmem:[%s13146_s1 + $0x9e8] ss:$16 sps:$4 sm:$0xff]  }
 0x104   :  { %5110 = vmatprep.subr.bf16.mxu0 %v9240_v33  ;;  %5643 = vmatprep.subr.bf16.mxu1 %v9243_v26  ;;  %v9330_v33 = vld [vmem:[%s13146_s1 + $0xa04] ss:$16 sps:$4 sm:$0xff]   ;;  %v9333_v26 = vld [vmem:[%s13146_s1 + $0xa0c] ss:$16 sps:$4 sm:$0xff]  }
 0x105   :  { %5140 = vmatprep.mubr.bf16.mxu0 %v11040_v34  ;;  %5673 = vmatprep.mubr.bf16.mxu1 %v11040_v34 }
 0x107   :  { %5111 = vmatpush1.bf16.msra.mxu0 %v9238_v35  ;;  %5644 = vmatpush1.bf16.msra.mxu1 %v9241_v36  ;;  %v11226_v35 = vrot.slane %v10997_v21, %v10339_v49  ;;  %v9328_v36 = vld [vmem:[%s13146_s1 + $0xa00] ss:$16 sps:$4 sm:$0xff]   ;;  %v9339_v21 = vld [vmem:[%s13146_s1 + $0xa2c] ss:$16 sps:$4 sm:$0xff]  }
 0x108   :  { %5112 = vmatprep.subr.bf16.mxu0 %v9246_v37  ;;  %5645 = vmatprep.subr.bf16.mxu1 %v9249_v38  ;;  %v9331_v37 = vld [vmem:[%s13146_s1 + $0xa08] ss:$16 sps:$4 sm:$0xff]   ;;  %v9336_v38 = vld [vmem:[%s13146_s1 + $0xa24] ss:$16 sps:$4 sm:$0xff]  }
 0x10b   :  { %5113 = vmatpush1.bf16.msra.mxu0 %v9244_v39  ;;  %5646 = vmatpush1.bf16.msra.mxu1 %v9247_v40  ;;  %v931_v39 = vcombine.high %v11040_v34, %v11040_v34  ;;  %v9334_v40 = vld [vmem:[%s13146_s1 + $0xa20] ss:$16 sps:$4 sm:$0xff]   ;;  %v9342_v34 = vld [vmem:[%s13146_s1 + $0xa44] ss:$16 sps:$4 sm:$0xff]  }
 0x10c   :  { %5114 = vmatprep.subr.bf16.mxu0 %v9252_v41  ;;  %5647 = vmatprep.subr.bf16.mxu1 %v9255_v43  ;;  %v9337_v41 = vld [vmem:[%s13146_s1 + $0xa28] ss:$16 sps:$4 sm:$0xff]   ;;  %v9345_v43 = vld [vmem:[%s13146_s1 + $0xa4c] ss:$16 sps:$4 sm:$0xff]  }
 0x10f   :  { %5115 = vmatpush1.bf16.msra.mxu0 %v9250_v44  ;;  %5648 = vmatpush1.bf16.msra.mxu1 %v9253_v45  ;;  %v9340_v44 = vld [vmem:[%s13146_s1 + $0xa40] ss:$16 sps:$4 sm:$0xff]   ;;  %v9343_v45 = vld [vmem:[%s13146_s1 + $0xa48] ss:$16 sps:$4 sm:$0xff]  }
 0x110   :  { %5116 = vmatprep.subr.bf16.mxu0 %v9258_v46  ;;  %5649 = vmatprep.subr.bf16.mxu1 %v9261_v47  ;;  %v9348_v46 = vld [vmem:[%s13146_s1 + $0xa64] ss:$16 sps:$4 sm:$0xff]   ;;  %v9351_v47 = vld [vmem:[%s13146_s1 + $0xa6c] ss:$16 sps:$4 sm:$0xff]  }
 0x113   :  { %5117 = vmatpush1.bf16.msra.mxu0 %v9256_v48  ;;  %5650 = vmatpush1.bf16.msra.mxu1 %v9259_v50  ;;  %v9346_v48 = vld [vmem:[%s13146_s1 + $0xa60] ss:$16 sps:$4 sm:$0xff]   ;;  %v9349_v50 = vld [vmem:[%s13146_s1 + $0xa68] ss:$16 sps:$4 sm:$0xff]  }
 0x114   :  { %5118 = vmatprep.subr.bf16.mxu0 %v9264_v51  ;;  %5651 = vmatprep.subr.bf16.mxu1 %v9267_v53  ;;  %v9354_v51 = vld [vmem:[%s13146_s1 + $0xa84] ss:$16 sps:$4 sm:$0xff]   ;;  %v9357_v53 = vld [vmem:[%s13146_s1 + $0xa8c] ss:$16 sps:$4 sm:$0xff]  }
 0x117   :  { %5119 = vmatpush1.bf16.msra.mxu0 %v9262_v54  ;;  %5652 = vmatpush1.bf16.msra.mxu1 %v9265_v55  ;;  %v9352_v54 = vld [vmem:[%s13146_s1 + $0xa80] ss:$16 sps:$4 sm:$0xff]   ;;  %v9355_v55 = vld [vmem:[%s13146_s1 + $0xa88] ss:$16 sps:$4 sm:$0xff]  }
 0x118   :  { %5120 = vmatprep.subr.bf16.mxu0 %v9270_v56  ;;  %5653 = vmatprep.subr.bf16.mxu1 %v9273_v57  ;;  %v9360_v56 = vld [vmem:[%s13146_s1 + $0xaa4] ss:$16 sps:$4 sm:$0xff]   ;;  %v9363_v57 = vld [vmem:[%s13146_s1 + $0xaac] ss:$16 sps:$4 sm:$0xff]  }
 0x11b   :  { %5121 = vmatpush1.bf16.msra.mxu0 %v9268_v58  ;;  %5654 = vmatpush1.bf16.msra.mxu1 %v9271_v59  ;;  %v9358_v58 = vld [vmem:[%s13146_s1 + $0xaa0] ss:$16 sps:$4 sm:$0xff]   ;;  %v9361_v59 = vld [vmem:[%s13146_s1 + $0xaa8] ss:$16 sps:$4 sm:$0xff]  }
 0x11c   :  { %5122 = vmatprep.subr.bf16.mxu0 %v9276_v60  ;;  %5655 = vmatprep.subr.bf16.mxu1 %v9279_v61  ;;  %v9366_v60 = vld [vmem:[%s13146_s1 + $0xac4] ss:$16 sps:$4 sm:$0xff]   ;;  %v9369_v61 = vld [vmem:[%s13146_s1 + $0xacc] ss:$16 sps:$4 sm:$0xff]  }
 0x11f   :  { %5123 = vmatpush1.bf16.msra.mxu0 %v9274_v62  ;;  %5656 = vmatpush1.bf16.msra.mxu1 %v9277_v63  ;;  %v9364_v62 = vld [vmem:[%s13146_s1 + $0xac0] ss:$16 sps:$4 sm:$0xff]   ;;  %v9367_v63 = vld [vmem:[%s13146_s1 + $0xac8] ss:$16 sps:$4 sm:$0xff]  }
 0x120   :  { %5124 = vmatprep.subr.bf16.mxu0 %v9282_v0  ;;  %5657 = vmatprep.subr.bf16.mxu1 %v9285_v1  ;;  %v9372_v0 = vld [vmem:[%s13146_s1 + $0xae4] ss:$16 sps:$4 sm:$0xff]   ;;  %v9375_v1 = vld [vmem:[%s13146_s1 + $0xaec] ss:$16 sps:$4 sm:$0xff]  }
 0x123   :  { %5125 = vmatpush1.bf16.msra.mxu0 %v9280_v2  ;;  %5658 = vmatpush1.bf16.msra.mxu1 %v9283_v3  ;;  %v9370_v2 = vld [vmem:[%s13146_s1 + $0xae0] ss:$16 sps:$4 sm:$0xff]   ;;  %v9373_v3 = vld [vmem:[%s13146_s1 + $0xae8] ss:$16 sps:$4 sm:$0xff]  }
 0x124   :  { %5126 = vmatprep.subr.bf16.mxu0 %v9288_v4  ;;  %5659 = vmatprep.subr.bf16.mxu1 %v9291_v5  ;;  %v9378_v4 = vld [vmem:[%s13146_s1 + $0xb04] ss:$16 sps:$4 sm:$0xff]   ;;  %v9381_v5 = vld [vmem:[%s13146_s1 + $0xb0c] ss:$16 sps:$4 sm:$0xff]  }
 0x127   :  { %5127 = vmatpush1.bf16.msra.mxu0 %v9286_v6  ;;  %5660 = vmatpush1.bf16.msra.mxu1 %v9289_v7  ;;  %v9376_v6 = vld [vmem:[%s13146_s1 + $0xb00] ss:$16 sps:$4 sm:$0xff]   ;;  %v9379_v7 = vld [vmem:[%s13146_s1 + $0xb08] ss:$16 sps:$4 sm:$0xff]  }
 0x128   :  { %5128 = vmatprep.subr.bf16.mxu0 %v9294_v8  ;;  %5661 = vmatprep.subr.bf16.mxu1 %v9297_v9  ;;  %v9384_v8 = vld [vmem:[%s13146_s1 + $0xb24] ss:$16 sps:$4 sm:$0xff]   ;;  %v9387_v9 = vld [vmem:[%s13146_s1 + $0xb2c] ss:$16 sps:$4 sm:$0xff]  }
 0x12b   :  { %5129 = vmatpush1.bf16.msra.mxu0 %v9292_v10  ;;  %5662 = vmatpush1.bf16.msra.mxu1 %v9295_v11  ;;  %v9382_v10 = vld [vmem:[%s13146_s1 + $0xb20] ss:$16 sps:$4 sm:$0xff]   ;;  %v9385_v11 = vld [vmem:[%s13146_s1 + $0xb28] ss:$16 sps:$4 sm:$0xff]  }
 0x12c   :  { %5130 = vmatprep.subr.bf16.mxu0 %v9300_v12  ;;  %5663 = vmatprep.subr.bf16.mxu1 %v9303_v52  ;;  %v9390_v12 = vld [vmem:[%s13146_s1 + $0xb44] ss:$16 sps:$4 sm:$0xff]   ;;  %v9393_v52 = vld [vmem:[%s13146_s1 + $0xb4c] ss:$16 sps:$4 sm:$0xff]  }
 0x12f   :  { %5131 = vmatpush1.bf16.msra.mxu0 %v9298_v15  ;;  %5664 = vmatpush1.bf16.msra.mxu1 %v9301_v16  ;;  %v9388_v15 = vld [vmem:[%s13146_s1 + $0xb40] ss:$16 sps:$4 sm:$0xff]   ;;  %v9391_v16 = vld [vmem:[%s13146_s1 + $0xb48] ss:$16 sps:$4 sm:$0xff]  }
 0x130   :  { %5132 = vmatprep.subr.bf16.mxu0 %v9306_v17  ;;  %5665 = vmatprep.subr.bf16.mxu1 %v9309_v18  ;;  %v9396_v17 = vld [vmem:[%s13146_s1 + $0xb64] ss:$16 sps:$4 sm:$0xff]   ;;  %v9399_v18 = vld [vmem:[%s13146_s1 + $0xb6c] ss:$16 sps:$4 sm:$0xff]  }
 0x133   :  { %5133 = vmatpush1.bf16.msra.mxu0 %v9304_v19  ;;  %5666 = vmatpush1.bf16.msra.mxu1 %v9307_v20  ;;  %v9394_v19 = vld [vmem:[%s13146_s1 + $0xb60] ss:$16 sps:$4 sm:$0xff]   ;;  %v9397_v20 = vld [vmem:[%s13146_s1 + $0xb68] ss:$16 sps:$4 sm:$0xff]  }
 0x134   :  { %5134 = vmatprep.subr.bf16.mxu0 %v9312_v22  ;;  %5667 = vmatprep.subr.bf16.mxu1 %v9315_v23  ;;  %v9402_v22 = vld [vmem:[%s13146_s1 + $0xb84] ss:$16 sps:$4 sm:$0xff]   ;;  %v9405_v23 = vld [vmem:[%s13146_s1 + $0xb8c] ss:$16 sps:$4 sm:$0xff]  }
 0x137   :  { %5135 = vmatpush1.bf16.msra.mxu0 %v9310_v24  ;;  %5668 = vmatpush1.bf16.msra.mxu1 %v9313_v13  ;;  %v9400_v24 = vld [vmem:[%s13146_s1 + $0xb80] ss:$16 sps:$4 sm:$0xff]   ;;  %v9403_v13 = vld [vmem:[%s13146_s1 + $0xb88] ss:$16 sps:$4 sm:$0xff]  }
 0x138   :  { %5136 = vmatprep.subr.bf16.mxu0 %v9318_v27  ;;  %5669 = vmatprep.subr.bf16.mxu1 %v9321_v28  ;;  %v9408_v27 = vld [vmem:[%s13146_s1 + $0xba4] ss:$16 sps:$4 sm:$0xff]   ;;  %v9411_v28 = vld [vmem:[%s13146_s1 + $0xbac] ss:$16 sps:$4 sm:$0xff]  }
 0x13b   :  { %5137 = vmatpush1.bf16.msra.mxu0 %v9316_v29  ;;  %5670 = vmatpush1.bf16.msra.mxu1 %v9319_v14  ;;  %v9406_v29 = vld [vmem:[%s13146_s1 + $0xba0] ss:$16 sps:$4 sm:$0xff]   ;;  %v9409_v14 = vld [vmem:[%s13146_s1 + $0xba8] ss:$16 sps:$4 sm:$0xff]  }
 0x13c   :  { %5138 = vmatprep.subr.bf16.mxu0 %v9324_v30  ;;  %5671 = vmatprep.subr.bf16.mxu1 %v9327_v31  ;;  %v9414_v30 = vld [vmem:[%s13146_s1 + $0xbc4] ss:$16 sps:$4 sm:$0xff]   ;;  %v9417_v31 = vld [vmem:[%s13146_s1 + $0xbcc] ss:$16 sps:$4 sm:$0xff]  }
 0x13f   :  { %5139 = vmatpush1.bf16.msra.mxu0 %v9322_v25  ;;  %5672 = vmatpush1.bf16.msra.mxu1 %v9325_v32  ;;  %v10170_v25 = vld [vmem:[%s13147_s0 + $0x8] sm:$0xff] }
 0x140   :  { %5149 = vmatprep.subr.bf16.mxu0 %v9330_v33  ;;  %5682 = vmatprep.subr.bf16.mxu1 %v9333_v26  ;;  %v884_v32 = vcombine.high %v10170_v25, %v10170_v25  ;;  %v9412_v33 = vld [vmem:[%s13146_s1 + $0xbc0] ss:$16 sps:$4 sm:$0xff]   ;;  %v9415_v26 = vld [vmem:[%s13146_s1 + $0xbc8] ss:$16 sps:$4 sm:$0xff]  }
 0x141   :  { %v9496_v25 = vld [vmem:[%s13146_s1 + $0xd80] ss:$16 sps:$4 sm:$0xff]  }
 0x142   :  { %5141 = vmatmul.mubr.bf16.vlgmr.msra.gmra.mrb[0].mxu0 %v11226_v35  ;;  %5674 = vmatmul.mubr.bf16.vlgmr.msra.gmra.mrb[0].mxu1 %v11226_v35 }
 0x143   :  { %5150 = vmatpush1.bf16.msra.mxu0 %v9328_v36  ;;  %5683 = vmatpush1.bf16.msra.mxu1 %v9331_v37  ;;  %v9420_v36 = vld [vmem:[%s13146_s1 + $0xbe4] ss:$16 sps:$4 sm:$0xff]   ;;  %v9423_v37 = vld [vmem:[%s13146_s1 + $0xbec] ss:$16 sps:$4 sm:$0xff]  }
 0x144   :  { %5151 = vmatprep.subr.bf16.mxu0 %v9336_v38  ;;  %5684 = vmatprep.subr.bf16.mxu1 %v9339_v21  ;;  %v11416_v38 = vrot.slane %v884_v32, %v10339_v49  ;;  %v9418_v21 = vld [vmem:[%s13146_s1 + $0xbe0] ss:$16 sps:$4 sm:$0xff]   ;;  %v9499_v32 = vld [vmem:[%s13146_s1 + $0xd88] ss:$16 sps:$4 sm:$0xff]  }
 0x145   :  { %5181 = vmatprep.mubr.bf16.mxu0 %v931_v39  ;;  %5714 = vmatprep.mubr.bf16.mxu1 %v931_v39  ;;  %v9421_v39 = vld [vmem:[%s13146_s1 + $0xbe8] ss:$16 sps:$4 sm:$0xff]  }
 0x147   :  { %5152 = vmatpush1.bf16.msra.mxu0 %v9334_v40  ;;  %5685 = vmatpush1.bf16.msra.mxu1 %v9337_v41  ;;  %v9426_v40 = vld [vmem:[%s13146_s1 + $0xc04] ss:$16 sps:$4 sm:$0xff]   ;;  %v9429_v41 = vld [vmem:[%s13146_s1 + $0xc0c] ss:$16 sps:$4 sm:$0xff]  }
 0x148   :  { %5153 = vmatprep.subr.bf16.mxu0 %v9342_v34  ;;  %5686 = vmatprep.subr.bf16.mxu1 %v9345_v43  ;;  %v900_v34 = vcombine.high %v11416_v38, %v11416_v38  ;;  %v929_v43 = vcombine.high %v11226_v35, %v11226_v35  ;;  %v9435_v35 = vld [vmem:[%s13146_s1 + $0xc2c] ss:$16 sps:$4 sm:$0xff]  }
 0x14b   :  { %5154 = vmatpush1.bf16.msra.mxu0 %v9340_v44  ;;  %5687 = vmatpush1.bf16.msra.mxu1 %v9343_v45  ;;  %v9424_v44 = vld [vmem:[%s13146_s1 + $0xc00] ss:$16 sps:$4 sm:$0xff]   ;;  %v9427_v45 = vld [vmem:[%s13146_s1 + $0xc08] ss:$16 sps:$4 sm:$0xff]  }
 0x14c   :  { %5155 = vmatprep.subr.bf16.mxu0 %v9348_v46  ;;  %5688 = vmatprep.subr.bf16.mxu1 %v9351_v47  ;;  %v9432_v46 = vld [vmem:[%s13146_s1 + $0xc24] ss:$16 sps:$4 sm:$0xff]   ;;  %v11447_v47 = vrot.slane %v900_v34, %v10339_v49 }
 0x14d   :  { %v9516_v34 = vld [vmem:[%s13146_s1 + $0xde4] ss:$16 sps:$4 sm:$0xff]  }
 0x14f   :  { %5156 = vmatpush1.bf16.msra.mxu0 %v9346_v48  ;;  %5689 = vmatpush1.bf16.msra.mxu1 %v9349_v50  ;;  %v9430_v48 = vld [vmem:[%s13146_s1 + $0xc20] ss:$16 sps:$4 sm:$0xff]   ;;  %v9433_v50 = vld [vmem:[%s13146_s1 + $0xc28] ss:$16 sps:$4 sm:$0xff]  }
 0x150   :  { %5157 = vmatprep.subr.bf16.mxu0 %v9354_v51  ;;  %5690 = vmatprep.subr.bf16.mxu1 %v9357_v53  ;;  %v9438_v51 = vld [vmem:[%s13146_s1 + $0xc44] ss:$16 sps:$4 sm:$0xff]   ;;  %v9441_v53 = vld [vmem:[%s13146_s1 + $0xc4c] ss:$16 sps:$4 sm:$0xff]  }
 0x153   :  { %5158 = vmatpush1.bf16.msra.mxu0 %v9352_v54  ;;  %5691 = vmatpush1.bf16.msra.mxu1 %v9355_v55  ;;  %v9436_v54 = vld [vmem:[%s13146_s1 + $0xc40] ss:$16 sps:$4 sm:$0xff]   ;;  %v9439_v55 = vld [vmem:[%s13146_s1 + $0xc48] ss:$16 sps:$4 sm:$0xff]  }
 0x154   :  { %5159 = vmatprep.subr.bf16.mxu0 %v9360_v56  ;;  %5692 = vmatprep.subr.bf16.mxu1 %v9363_v57  ;;  %v9444_v56 = vld [vmem:[%s13146_s1 + $0xc64] ss:$16 sps:$4 sm:$0xff]   ;;  %v9447_v57 = vld [vmem:[%s13146_s1 + $0xc6c] ss:$16 sps:$4 sm:$0xff]  }
 0x157   :  { %5160 = vmatpush1.bf16.msra.mxu0 %v9358_v58  ;;  %5693 = vmatpush1.bf16.msra.mxu1 %v9361_v59  ;;  %v9442_v58 = vld [vmem:[%s13146_s1 + $0xc60] ss:$16 sps:$4 sm:$0xff]   ;;  %v9445_v59 = vld [vmem:[%s13146_s1 + $0xc68] ss:$16 sps:$4 sm:$0xff]  }
 0x158   :  { %5161 = vmatprep.subr.bf16.mxu0 %v9366_v60  ;;  %5694 = vmatprep.subr.bf16.mxu1 %v9369_v61  ;;  %v9450_v60 = vld [vmem:[%s13146_s1 + $0xc84] ss:$16 sps:$4 sm:$0xff]   ;;  %v9453_v61 = vld [vmem:[%s13146_s1 + $0xc8c] ss:$16 sps:$4 sm:$0xff]  }
 0x15b   :  { %5162 = vmatpush1.bf16.msra.mxu0 %v9364_v62  ;;  %5695 = vmatpush1.bf16.msra.mxu1 %v9367_v63  ;;  %v9448_v62 = vld [vmem:[%s13146_s1 + $0xc80] ss:$16 sps:$4 sm:$0xff]   ;;  %v9451_v63 = vld [vmem:[%s13146_s1 + $0xc88] ss:$16 sps:$4 sm:$0xff]  }
 0x15c   :  { %5163 = vmatprep.subr.bf16.mxu0 %v9372_v0  ;;  %5696 = vmatprep.subr.bf16.mxu1 %v9375_v1  ;;  %v9456_v0 = vld [vmem:[%s13146_s1 + $0xca4] ss:$16 sps:$4 sm:$0xff]   ;;  %v9459_v1 = vld [vmem:[%s13146_s1 + $0xcac] ss:$16 sps:$4 sm:$0xff]  }
 0x15f   :  { %5164 = vmatpush1.bf16.msra.mxu0 %v9370_v2  ;;  %5697 = vmatpush1.bf16.msra.mxu1 %v9373_v3  ;;  %v9454_v2 = vld [vmem:[%s13146_s1 + $0xca0] ss:$16 sps:$4 sm:$0xff]   ;;  %v9457_v3 = vld [vmem:[%s13146_s1 + $0xca8] ss:$16 sps:$4 sm:$0xff]  }
 0x160   :  { %5165 = vmatprep.subr.bf16.mxu0 %v9378_v4  ;;  %5698 = vmatprep.subr.bf16.mxu1 %v9381_v5  ;;  %v9462_v4 = vld [vmem:[%s13146_s1 + $0xcc4] ss:$16 sps:$4 sm:$0xff]   ;;  %v9465_v5 = vld [vmem:[%s13146_s1 + $0xccc] ss:$16 sps:$4 sm:$0xff]  }
 0x163   :  { %5166 = vmatpush1.bf16.msra.mxu0 %v9376_v6  ;;  %5699 = vmatpush1.bf16.msra.mxu1 %v9379_v7  ;;  %v9460_v6 = vld [vmem:[%s13146_s1 + $0xcc0] ss:$16 sps:$4 sm:$0xff]   ;;  %v9463_v7 = vld [vmem:[%s13146_s1 + $0xcc8] ss:$16 sps:$4 sm:$0xff]  }
 0x164   :  { %5167 = vmatprep.subr.bf16.mxu0 %v9384_v8  ;;  %5700 = vmatprep.subr.bf16.mxu1 %v9387_v9  ;;  %v9468_v8 = vld [vmem:[%s13146_s1 + $0xce4] ss:$16 sps:$4 sm:$0xff]   ;;  %v9471_v9 = vld [vmem:[%s13146_s1 + $0xcec] ss:$16 sps:$4 sm:$0xff]  }
 0x167   :  { %5168 = vmatpush1.bf16.msra.mxu0 %v9382_v10  ;;  %5701 = vmatpush1.bf16.msra.mxu1 %v9385_v11  ;;  %v9466_v10 = vld [vmem:[%s13146_s1 + $0xce0] ss:$16 sps:$4 sm:$0xff]   ;;  %v9469_v11 = vld [vmem:[%s13146_s1 + $0xce8] ss:$16 sps:$4 sm:$0xff]  }
 0x168   :  { %5169 = vmatprep.subr.bf16.mxu0 %v9390_v12  ;;  %5702 = vmatprep.subr.bf16.mxu1 %v9393_v52  ;;  %v9474_v12 = vld [vmem:[%s13146_s1 + $0xd04] ss:$16 sps:$4 sm:$0xff]   ;;  %v9477_v52 = vld [vmem:[%s13146_s1 + $0xd0c] ss:$16 sps:$4 sm:$0xff]  }
 0x16b   :  { %5170 = vmatpush1.bf16.msra.mxu0 %v9388_v15  ;;  %5703 = vmatpush1.bf16.msra.mxu1 %v9391_v16  ;;  %v9472_v15 = vld [vmem:[%s13146_s1 + $0xd00] ss:$16 sps:$4 sm:$0xff]   ;;  %v9475_v16 = vld [vmem:[%s13146_s1 + $0xd08] ss:$16 sps:$4 sm:$0xff]  }
 0x16c   :  { %5171 = vmatprep.subr.bf16.mxu0 %v9396_v17  ;;  %5704 = vmatprep.subr.bf16.mxu1 %v9399_v18  ;;  %v9480_v17 = vld [vmem:[%s13146_s1 + $0xd24] ss:$16 sps:$4 sm:$0xff]   ;;  %v9483_v18 = vld [vmem:[%s13146_s1 + $0xd2c] ss:$16 sps:$4 sm:$0xff]  }
 0x16f   :  { %5172 = vmatpush1.bf16.msra.mxu0 %v9394_v19  ;;  %5705 = vmatpush1.bf16.msra.mxu1 %v9397_v20  ;;  %v9478_v19 = vld [vmem:[%s13146_s1 + $0xd20] ss:$16 sps:$4 sm:$0xff]   ;;  %v9481_v20 = vld [vmem:[%s13146_s1 + $0xd28] ss:$16 sps:$4 sm:$0xff]  }
 0x170   :  { %5173 = vmatprep.subr.bf16.mxu0 %v9402_v22  ;;  %5706 = vmatprep.subr.bf16.mxu1 %v9405_v23  ;;  %v9486_v22 = vld [vmem:[%s13146_s1 + $0xd44] ss:$16 sps:$4 sm:$0xff]   ;;  %v9489_v23 = vld [vmem:[%s13146_s1 + $0xd4c] ss:$16 sps:$4 sm:$0xff]  }
 0x173   :  { %5174 = vmatpush1.bf16.msra.mxu0 %v9400_v24  ;;  %5707 = vmatpush1.bf16.msra.mxu1 %v9403_v13  ;;  %v9484_v24 = vld [vmem:[%s13146_s1 + $0xd40] ss:$16 sps:$4 sm:$0xff]   ;;  %v9487_v13 = vld [vmem:[%s13146_s1 + $0xd48] ss:$16 sps:$4 sm:$0xff]  }
 0x174   :  { %5175 = vmatprep.subr.bf16.mxu0 %v9408_v27  ;;  %5708 = vmatprep.subr.bf16.mxu1 %v9411_v28  ;;  %v9492_v27 = vld [vmem:[%s13146_s1 + $0xd64] ss:$16 sps:$4 sm:$0xff]   ;;  %v9495_v28 = vld [vmem:[%s13146_s1 + $0xd6c] ss:$16 sps:$4 sm:$0xff]  }
 0x177   :  { %5176 = vmatpush1.bf16.msra.mxu0 %v9406_v29  ;;  %5709 = vmatpush1.bf16.msra.mxu1 %v9409_v14  ;;  %v9490_v29 = vld [vmem:[%s13146_s1 + $0xd60] ss:$16 sps:$4 sm:$0xff]   ;;  %v9493_v14 = vld [vmem:[%s13146_s1 + $0xd68] ss:$16 sps:$4 sm:$0xff]  }
 0x178   :  { %5177 = vmatprep.subr.bf16.mxu0 %v9414_v30  ;;  %5710 = vmatprep.subr.bf16.mxu1 %v9417_v31  ;;  %v9498_v30 = vld [vmem:[%s13146_s1 + $0xd84] ss:$16 sps:$4 sm:$0xff]   ;;  %v9501_v31 = vld [vmem:[%s13146_s1 + $0xd8c] ss:$16 sps:$4 sm:$0xff]  }
 0x17b   :  { %5178 = vmatpush1.bf16.msra.mxu0 %v9412_v33  ;;  %5711 = vmatpush1.bf16.msra.mxu1 %v9415_v26  ;;  %v9504_v33 = vld [vmem:[%s13146_s1 + $0xda4] ss:$16 sps:$4 sm:$0xff]   ;;  %v9507_v26 = vld [vmem:[%s13146_s1 + $0xdac] ss:$16 sps:$4 sm:$0xff]  }
 0x17c   :  { %5179 = vmatprep.subr.bf16.mxu0 %v9420_v36  ;;  %5712 = vmatprep.subr.bf16.mxu1 %v9423_v37  ;;  %v9502_v36 = vld [vmem:[%s13146_s1 + $0xda0] ss:$16 sps:$4 sm:$0xff]   ;;  %v9505_v37 = vld [vmem:[%s13146_s1 + $0xda8] ss:$16 sps:$4 sm:$0xff]  }
 0x17f   :  { %5180 = vmatpush1.bf16.msra.mxu0 %v9418_v21  ;;  %5713 = vmatpush1.bf16.msra.mxu1 %v9421_v39  ;;  %v9510_v21 = vld [vmem:[%s13146_s1 + $0xdc4] ss:$16 sps:$4 sm:$0xff]   ;;  %v9513_v39 = vld [vmem:[%s13146_s1 + $0xdcc] ss:$16 sps:$4 sm:$0xff]  }
 0x180   :  { %5190 = vmatprep.subr.bf16.mxu0 %v9426_v40  ;;  %5723 = vmatprep.subr.bf16.mxu1 %v9429_v41  ;;  %v9508_v40 = vld [vmem:[%s13146_s1 + $0xdc0] ss:$16 sps:$4 sm:$0xff]   ;;  %v9511_v41 = vld [vmem:[%s13146_s1 + $0xdc8] ss:$16 sps:$4 sm:$0xff]  }
 0x182   :  { %5182 = vmatmul.mubr.bf16.vlgmr.msra.gmra.mrb[0].mxu0 %v929_v43  ;;  %5715 = vmatmul.mubr.bf16.vlgmr.msra.gmra.mrb[0].mxu1 %v929_v43  ;;  %v9519_v43 = vld [vmem:[%s13146_s1 + $0xdec] ss:$16 sps:$4 sm:$0xff]  }
 0x183   :  { %5191 = vmatpush1.bf16.msra.mxu0 %v9424_v44  ;;  %5724 = vmatpush1.bf16.msra.mxu1 %v9427_v45  ;;  %v9514_v44 = vld [vmem:[%s13146_s1 + $0xde0] ss:$16 sps:$4 sm:$0xff]   ;;  %v9517_v45 = vld [vmem:[%s13146_s1 + $0xde8] ss:$16 sps:$4 sm:$0xff]  }
 0x184   :  { %5192 = vmatprep.subr.bf16.mxu0 %v9432_v46  ;;  %5725 = vmatprep.subr.bf16.mxu1 %v9435_v35  ;;  %v9523_v46 = vld [vmem:[%s13146_s1 + $0xe04] ss:$16 sps:$4 sm:$0xff]   ;;  %v9526_v35 = vld [vmem:[%s13146_s1 + $0xe0c] ss:$16 sps:$4 sm:$0xff]  }
 0x185   :  { %5222 = vmatprep.mubr.bf16.mxu0 %v11447_v47  ;;  %5755 = vmatprep.mubr.bf16.mxu1 %v11447_v47 }
 0x187   :  { %5193 = vmatpush1.bf16.msra.mxu0 %v9430_v48  ;;  %5726 = vmatpush1.bf16.msra.mxu1 %v9433_v50  ;;  %v11633_v48 = vrot.slane %v11416_v38, %v10339_v49  ;;  %v9521_v50 = vld [vmem:[%s13146_s1 + $0xe00] ss:$16 sps:$4 sm:$0xff]   ;;  %v9532_v38 = vld [vmem:[%s13146_s1 + $0xe2c] ss:$16 sps:$4 sm:$0xff]  }
 0x188   :  { %5194 = vmatprep.subr.bf16.mxu0 %v9438_v51  ;;  %5727 = vmatprep.subr.bf16.mxu1 %v9441_v53  ;;  %v9524_v51 = vld [vmem:[%s13146_s1 + $0xe08] ss:$16 sps:$4 sm:$0xff]   ;;  %v9529_v53 = vld [vmem:[%s13146_s1 + $0xe24] ss:$16 sps:$4 sm:$0xff]  }
 0x18b   :  { %5195 = vmatpush1.bf16.msra.mxu0 %v9436_v54  ;;  %5728 = vmatpush1.bf16.msra.mxu1 %v9439_v55  ;;  %v932_v54 = vcombine.high %v11447_v47, %v11447_v47  ;;  %v9527_v55 = vld [vmem:[%s13146_s1 + $0xe20] ss:$16 sps:$4 sm:$0xff]   ;;  %v9535_v47 = vld [vmem:[%s13146_s1 + $0xe44] ss:$16 sps:$4 sm:$0xff]  }
 0x18c   :  { %5196 = vmatprep.subr.bf16.mxu0 %v9444_v56  ;;  %5729 = vmatprep.subr.bf16.mxu1 %v9447_v57  ;;  %v9530_v56 = vld [vmem:[%s13146_s1 + $0xe28] ss:$16 sps:$4 sm:$0xff]   ;;  %v9538_v57 = vld [vmem:[%s13146_s1 + $0xe4c] ss:$16 sps:$4 sm:$0xff]  }
 0x18f   :  { %5197 = vmatpush1.bf16.msra.mxu0 %v9442_v58  ;;  %5730 = vmatpush1.bf16.msra.mxu1 %v9445_v59  ;;  %v9533_v58 = vld [vmem:[%s13146_s1 + $0xe40] ss:$16 sps:$4 sm:$0xff]   ;;  %v9536_v59 = vld [vmem:[%s13146_s1 + $0xe48] ss:$16 sps:$4 sm:$0xff]  }
 0x190   :  { %5198 = vmatprep.subr.bf16.mxu0 %v9450_v60  ;;  %5731 = vmatprep.subr.bf16.mxu1 %v9453_v61  ;;  %v9541_v60 = vld [vmem:[%s13146_s1 + $0xe64] ss:$16 sps:$4 sm:$0xff]   ;;  %v9544_v61 = vld [vmem:[%s13146_s1 + $0xe6c] ss:$16 sps:$4 sm:$0xff]  }
 0x193   :  { %5199 = vmatpush1.bf16.msra.mxu0 %v9448_v62  ;;  %5732 = vmatpush1.bf16.msra.mxu1 %v9451_v63  ;;  %v9539_v62 = vld [vmem:[%s13146_s1 + $0xe60] ss:$16 sps:$4 sm:$0xff]   ;;  %v9542_v63 = vld [vmem:[%s13146_s1 + $0xe68] ss:$16 sps:$4 sm:$0xff]  }
 0x194   :  { %5200 = vmatprep.subr.bf16.mxu0 %v9456_v0  ;;  %5733 = vmatprep.subr.bf16.mxu1 %v9459_v1  ;;  %v9547_v0 = vld [vmem:[%s13146_s1 + $0xe84] ss:$16 sps:$4 sm:$0xff]   ;;  %v9550_v1 = vld [vmem:[%s13146_s1 + $0xe8c] ss:$16 sps:$4 sm:$0xff]  }
 0x197   :  { %5201 = vmatpush1.bf16.msra.mxu0 %v9454_v2  ;;  %5734 = vmatpush1.bf16.msra.mxu1 %v9457_v3  ;;  %v9545_v2 = vld [vmem:[%s13146_s1 + $0xe80] ss:$16 sps:$4 sm:$0xff]   ;;  %v9548_v3 = vld [vmem:[%s13146_s1 + $0xe88] ss:$16 sps:$4 sm:$0xff]  }
 0x198   :  { %5202 = vmatprep.subr.bf16.mxu0 %v9462_v4  ;;  %5735 = vmatprep.subr.bf16.mxu1 %v9465_v5  ;;  %v9553_v4 = vld [vmem:[%s13146_s1 + $0xea4] ss:$16 sps:$4 sm:$0xff]   ;;  %v9556_v5 = vld [vmem:[%s13146_s1 + $0xeac] ss:$16 sps:$4 sm:$0xff]  }
 0x19b   :  { %5203 = vmatpush1.bf16.msra.mxu0 %v9460_v6  ;;  %5736 = vmatpush1.bf16.msra.mxu1 %v9463_v7  ;;  %v9551_v6 = vld [vmem:[%s13146_s1 + $0xea0] ss:$16 sps:$4 sm:$0xff]   ;;  %v9554_v7 = vld [vmem:[%s13146_s1 + $0xea8] ss:$16 sps:$4 sm:$0xff]  }
 0x19c   :  { %5204 = vmatprep.subr.bf16.mxu0 %v9468_v8  ;;  %5737 = vmatprep.subr.bf16.mxu1 %v9471_v9  ;;  %v9559_v8 = vld [vmem:[%s13146_s1 + $0xec4] ss:$16 sps:$4 sm:$0xff]   ;;  %v9562_v9 = vld [vmem:[%s13146_s1 + $0xecc] ss:$16 sps:$4 sm:$0xff]  }
 0x19f   :  { %5205 = vmatpush1.bf16.msra.mxu0 %v9466_v10  ;;  %5738 = vmatpush1.bf16.msra.mxu1 %v9469_v11  ;;  %v9557_v10 = vld [vmem:[%s13146_s1 + $0xec0] ss:$16 sps:$4 sm:$0xff]   ;;  %v9560_v11 = vld [vmem:[%s13146_s1 + $0xec8] ss:$16 sps:$4 sm:$0xff]  }
 0x1a0   :  { %5206 = vmatprep.subr.bf16.mxu0 %v9474_v12  ;;  %5739 = vmatprep.subr.bf16.mxu1 %v9477_v52  ;;  %v9565_v12 = vld [vmem:[%s13146_s1 + $0xee4] ss:$16 sps:$4 sm:$0xff]   ;;  %v9568_v52 = vld [vmem:[%s13146_s1 + $0xeec] ss:$16 sps:$4 sm:$0xff]  }
 0x1a3   :  { %5207 = vmatpush1.bf16.msra.mxu0 %v9472_v15  ;;  %5740 = vmatpush1.bf16.msra.mxu1 %v9475_v16  ;;  %v9563_v15 = vld [vmem:[%s13146_s1 + $0xee0] ss:$16 sps:$4 sm:$0xff]   ;;  %v9566_v16 = vld [vmem:[%s13146_s1 + $0xee8] ss:$16 sps:$4 sm:$0xff]  }
 0x1a4   :  { %5208 = vmatprep.subr.bf16.mxu0 %v9480_v17  ;;  %5741 = vmatprep.subr.bf16.mxu1 %v9483_v18  ;;  %v9571_v17 = vld [vmem:[%s13146_s1 + $0xf04] ss:$16 sps:$4 sm:$0xff]   ;;  %v9574_v18 = vld [vmem:[%s13146_s1 + $0xf0c] ss:$16 sps:$4 sm:$0xff]  }
 0x1a7   :  { %5209 = vmatpush1.bf16.msra.mxu0 %v9478_v19  ;;  %5742 = vmatpush1.bf16.msra.mxu1 %v9481_v20  ;;  %v9569_v19 = vld [vmem:[%s13146_s1 + $0xf00] ss:$16 sps:$4 sm:$0xff]   ;;  %v9572_v20 = vld [vmem:[%s13146_s1 + $0xf08] ss:$16 sps:$4 sm:$0xff]  }
 0x1a8   :  { %5210 = vmatprep.subr.bf16.mxu0 %v9486_v22  ;;  %5743 = vmatprep.subr.bf16.mxu1 %v9489_v23  ;;  %v9577_v22 = vld [vmem:[%s13146_s1 + $0xf24] ss:$16 sps:$4 sm:$0xff]   ;;  %v9580_v23 = vld [vmem:[%s13146_s1 + $0xf2c] ss:$16 sps:$4 sm:$0xff]  }
 0x1ab   :  { %5211 = vmatpush1.bf16.msra.mxu0 %v9484_v24  ;;  %5744 = vmatpush1.bf16.msra.mxu1 %v9487_v13  ;;  %v9575_v24 = vld [vmem:[%s13146_s1 + $0xf20] ss:$16 sps:$4 sm:$0xff]   ;;  %v9578_v13 = vld [vmem:[%s13146_s1 + $0xf28] ss:$16 sps:$4 sm:$0xff]  }
 0x1ac   :  { %5212 = vmatprep.subr.bf16.mxu0 %v9492_v27  ;;  %5745 = vmatprep.subr.bf16.mxu1 %v9495_v28  ;;  %v9583_v27 = vld [vmem:[%s13146_s1 + $0xf44] ss:$16 sps:$4 sm:$0xff]   ;;  %v9586_v28 = vld [vmem:[%s13146_s1 + $0xf4c] ss:$16 sps:$4 sm:$0xff]  }
 0x1af   :  { %5213 = vmatpush1.bf16.msra.mxu0 %v9490_v29  ;;  %5746 = vmatpush1.bf16.msra.mxu1 %v9493_v14  ;;  %v9581_v29 = vld [vmem:[%s13146_s1 + $0xf40] ss:$16 sps:$4 sm:$0xff]   ;;  %v9584_v14 = vld [vmem:[%s13146_s1 + $0xf48] ss:$16 sps:$4 sm:$0xff]  }
 0x1b0   :  { %5214 = vmatprep.subr.bf16.mxu0 %v9498_v30  ;;  %5747 = vmatprep.subr.bf16.mxu1 %v9501_v31  ;;  %v9589_v30 = vld [vmem:[%s13146_s1 + $0xf64] ss:$16 sps:$4 sm:$0xff]   ;;  %v9592_v31 = vld [vmem:[%s13146_s1 + $0xf6c] ss:$16 sps:$4 sm:$0xff]  }
 0x1b3   :  { %5215 = vmatpush1.bf16.msra.mxu0 %v9496_v25  ;;  %5748 = vmatpush1.bf16.msra.mxu1 %v9499_v32  ;;  %v9587_v25 = vld [vmem:[%s13146_s1 + $0xf60] ss:$16 sps:$4 sm:$0xff]   ;;  %v9590_v32 = vld [vmem:[%s13146_s1 + $0xf68] ss:$16 sps:$4 sm:$0xff]  }
 0x1b4   :  { %5216 = vmatprep.subr.bf16.mxu0 %v9504_v33  ;;  %5749 = vmatprep.subr.bf16.mxu1 %v9507_v26  ;;  %v9595_v33 = vld [vmem:[%s13146_s1 + $0xf84] ss:$16 sps:$4 sm:$0xff]   ;;  %v9598_v26 = vld [vmem:[%s13146_s1 + $0xf8c] ss:$16 sps:$4 sm:$0xff]  }
 0x1b7   :  { %5217 = vmatpush1.bf16.msra.mxu0 %v9502_v36  ;;  %5750 = vmatpush1.bf16.msra.mxu1 %v9505_v37  ;;  %v9593_v36 = vld [vmem:[%s13146_s1 + $0xf80] ss:$16 sps:$4 sm:$0xff]   ;;  %v9596_v37 = vld [vmem:[%s13146_s1 + $0xf88] ss:$16 sps:$4 sm:$0xff]  }
 0x1b8   :  { %5218 = vmatprep.subr.bf16.mxu0 %v9510_v21  ;;  %5751 = vmatprep.subr.bf16.mxu1 %v9513_v39  ;;  %v9601_v21 = vld [vmem:[%s13146_s1 + $0xfa4] ss:$16 sps:$4 sm:$0xff]   ;;  %v9604_v39 = vld [vmem:[%s13146_s1 + $0xfac] ss:$16 sps:$4 sm:$0xff]  }
 0x1bb   :  { %5219 = vmatpush1.bf16.msra.mxu0 %v9508_v40  ;;  %5752 = vmatpush1.bf16.msra.mxu1 %v9511_v41  ;;  %v9599_v40 = vld [vmem:[%s13146_s1 + $0xfa0] ss:$16 sps:$4 sm:$0xff]   ;;  %v9602_v41 = vld [vmem:[%s13146_s1 + $0xfa8] ss:$16 sps:$4 sm:$0xff]  }
 0x1bc   :  { %5220 = vmatprep.subr.bf16.mxu0 %v9516_v34  ;;  %5753 = vmatprep.subr.bf16.mxu1 %v9519_v43  ;;  %v9607_v34 = vld [vmem:[%s13146_s1 + $0xfc4] ss:$16 sps:$4 sm:$0xff]   ;;  %v9610_v43 = vld [vmem:[%s13146_s1 + $0xfcc] ss:$16 sps:$4 sm:$0xff]  }
 0x1bf   :  { %5221 = vmatpush1.bf16.msra.mxu0 %v9514_v44  ;;  %5754 = vmatpush1.bf16.msra.mxu1 %v9517_v45  ;;  %v11810_v44 = vld [vmem:[%s13147_s0 + $0x10] sm:$0xff] }
 0x1c0   :  { %5231 = vmatprep.subr.bf16.mxu0 %v9523_v46  ;;  %5764 = vmatprep.subr.bf16.mxu1 %v9526_v35  ;;  %v9605_v45 = vld [vmem:[%s13146_s1 + $0xfc0] ss:$16 sps:$4 sm:$0xff]   ;;  %v9608_v46 = vld [vmem:[%s13146_s1 + $0xfc8] ss:$16 sps:$4 sm:$0xff]   ;;  %v9613_v35 = vld [vmem:[%s13146_s1 + $0xfe4] ss:$16 sps:$4 sm:$0xff]  }
 0x1c2   :  { %5223 = vmatmul.mubr.bf16.vlgmr.msra.gmra.mrb[0].mxu0 %v11633_v48  ;;  %5756 = vmatmul.mubr.bf16.vlgmr.msra.gmra.mrb[0].mxu1 %v11633_v48 }
 0x1c3   :  { %5232 = vmatpush1.bf16.msra.mxu0 %v9521_v50  ;;  %5765 = vmatpush1.bf16.msra.mxu1 %v9524_v51  ;;  %v9616_v50 = vld [vmem:[%s13146_s1 + $0xfec] ss:$16 sps:$4 sm:$0xff]   ;;  %v11826_v51 = vrot.slane %v11810_v44, %v10339_v49 }
 0x1c4   :  { %5233 = vmatprep.subr.bf16.mxu0 %v9529_v53  ;;  %5766 = vmatprep.subr.bf16.mxu1 %v9532_v38  ;;  %v9611_v53 = vld [vmem:[%s13146_s1 + $0xfe0] ss:$16 sps:$4 sm:$0xff]   ;;  %v9614_v38 = vld [vmem:[%s13146_s1 + $0xfe8] ss:$16 sps:$4 sm:$0xff]  }
 0x1c5   :  { %5263 = vmatprep.mubr.bf16.mxu0 %v932_v54  ;;  %5796 = vmatprep.mubr.bf16.mxu1 %v932_v54  ;;  %v9619_v54 = vld [vmem:[%s13146_s1 + $0x1004] ss:$16 sps:$4 sm:$0xff]  }
 0x1c7   :  { %5234 = vmatpush1.bf16.msra.mxu0 %v9527_v55  ;;  %5767 = vmatpush1.bf16.msra.mxu1 %v9530_v56  ;;  %v9622_v55 = vld [vmem:[%s13146_s1 + $0x100c] ss:$16 sps:$4 sm:$0xff]   ;;  %v948_v56 = vcombine.high %v11826_v51, %v11826_v51 }
 0x1c8   :  { %5235 = vmatprep.subr.bf16.mxu0 %v9535_v47  ;;  %5768 = vmatprep.subr.bf16.mxu1 %v9538_v57  ;;  %v930_v47 = vcombine.high %v11633_v48, %v11633_v48  ;;  %v9617_v57 = vld [vmem:[%s13146_s1 + $0x1000] ss:$16 sps:$4 sm:$0xff]   ;;  %v9628_v48 = vld [vmem:[%s13146_s1 + $0x102c] ss:$16 sps:$4 sm:$0xff]  }
 0x1cb   :  { %5236 = vmatpush1.bf16.msra.mxu0 %v9533_v58  ;;  %5769 = vmatpush1.bf16.msra.mxu1 %v9536_v59  ;;  %v9620_v58 = vld [vmem:[%s13146_s1 + $0x1008] ss:$16 sps:$4 sm:$0xff]   ;;  %v9625_v59 = vld [vmem:[%s13146_s1 + $0x1024] ss:$16 sps:$4 sm:$0xff]  }
 0x1cc   :  { %5237 = vmatprep.subr.bf16.mxu0 %v9541_v60  ;;  %5770 = vmatprep.subr.bf16.mxu1 %v9544_v61  ;;  %v11857_v60 = vrot.slane %v948_v56, %v10339_v49  ;;  %v9623_v61 = vld [vmem:[%s13146_s1 + $0x1020] ss:$16 sps:$4 sm:$0xff]   ;;  %v9704_v56 = vld [vmem:[%s13146_s1 + $0x11c8] ss:$16 sps:$4 sm:$0xff]  }
 0x1cf   :  { %5238 = vmatpush1.bf16.msra.mxu0 %v9539_v62  ;;  %5771 = vmatpush1.bf16.msra.mxu1 %v9542_v63  ;;  %v9626_v62 = vld [vmem:[%s13146_s1 + $0x1028] ss:$16 sps:$4 sm:$0xff]   ;;  %v9631_v63 = vld [vmem:[%s13146_s1 + $0x1044] ss:$16 sps:$4 sm:$0xff]  }
 0x1d0   :  { %5239 = vmatprep.subr.bf16.mxu0 %v9547_v0  ;;  %5772 = vmatprep.subr.bf16.mxu1 %v9550_v1  ;;  %v9634_v0 = vld [vmem:[%s13146_s1 + $0x104c] ss:$16 sps:$4 sm:$0xff]   ;;  %v9629_v1 = vld [vmem:[%s13146_s1 + $0x1040] ss:$16 sps:$4 sm:$0xff]  }
 0x1d3   :  { %5240 = vmatpush1.bf16.msra.mxu0 %v9545_v2  ;;  %5773 = vmatpush1.bf16.msra.mxu1 %v9548_v3  ;;  %v9632_v2 = vld [vmem:[%s13146_s1 + $0x1048] ss:$16 sps:$4 sm:$0xff]   ;;  %v9637_v3 = vld [vmem:[%s13146_s1 + $0x1064] ss:$16 sps:$4 sm:$0xff]  }
 0x1d4   :  { %5241 = vmatprep.subr.bf16.mxu0 %v9553_v4  ;;  %5774 = vmatprep.subr.bf16.mxu1 %v9556_v5  ;;  %v9640_v4 = vld [vmem:[%s13146_s1 + $0x106c] ss:$16 sps:$4 sm:$0xff]   ;;  %v9635_v5 = vld [vmem:[%s13146_s1 + $0x1060] ss:$16 sps:$4 sm:$0xff]  }
 0x1d7   :  { %5242 = vmatpush1.bf16.msra.mxu0 %v9551_v6  ;;  %5775 = vmatpush1.bf16.msra.mxu1 %v9554_v7  ;;  %v9638_v6 = vld [vmem:[%s13146_s1 + $0x1068] ss:$16 sps:$4 sm:$0xff]   ;;  %v9643_v7 = vld [vmem:[%s13146_s1 + $0x1084] ss:$16 sps:$4 sm:$0xff]  }
 0x1d8   :  { %5243 = vmatprep.subr.bf16.mxu0 %v9559_v8  ;;  %5776 = vmatprep.subr.bf16.mxu1 %v9562_v9  ;;  %v9646_v8 = vld [vmem:[%s13146_s1 + $0x108c] ss:$16 sps:$4 sm:$0xff]   ;;  %v9641_v9 = vld [vmem:[%s13146_s1 + $0x1080] ss:$16 sps:$4 sm:$0xff]  }
 0x1db   :  { %5244 = vmatpush1.bf16.msra.mxu0 %v9557_v10  ;;  %5777 = vmatpush1.bf16.msra.mxu1 %v9560_v11  ;;  %v9644_v10 = vld [vmem:[%s13146_s1 + $0x1088] ss:$16 sps:$4 sm:$0xff]   ;;  %v9649_v11 = vld [vmem:[%s13146_s1 + $0x10a4] ss:$16 sps:$4 sm:$0xff]  }
 0x1dc   :  { %5245 = vmatprep.subr.bf16.mxu0 %v9565_v12  ;;  %5778 = vmatprep.subr.bf16.mxu1 %v9568_v52  ;;  %v9652_v12 = vld [vmem:[%s13146_s1 + $0x10ac] ss:$16 sps:$4 sm:$0xff]   ;;  %v9647_v52 = vld [vmem:[%s13146_s1 + $0x10a0] ss:$16 sps:$4 sm:$0xff]  }
 0x1df   :  { %5246 = vmatpush1.bf16.msra.mxu0 %v9563_v15  ;;  %5779 = vmatpush1.bf16.msra.mxu1 %v9566_v16  ;;  %v9650_v15 = vld [vmem:[%s13146_s1 + $0x10a8] ss:$16 sps:$4 sm:$0xff]   ;;  %v9655_v16 = vld [vmem:[%s13146_s1 + $0x10c4] ss:$16 sps:$4 sm:$0xff]  }
 0x1e0   :  { %5247 = vmatprep.subr.bf16.mxu0 %v9571_v17  ;;  %5780 = vmatprep.subr.bf16.mxu1 %v9574_v18  ;;  %v9658_v17 = vld [vmem:[%s13146_s1 + $0x10cc] ss:$16 sps:$4 sm:$0xff]   ;;  %v9653_v18 = vld [vmem:[%s13146_s1 + $0x10c0] ss:$16 sps:$4 sm:$0xff]  }
 0x1e3   :  { %5248 = vmatpush1.bf16.msra.mxu0 %v9569_v19  ;;  %5781 = vmatpush1.bf16.msra.mxu1 %v9572_v20  ;;  %v9656_v19 = vld [vmem:[%s13146_s1 + $0x10c8] ss:$16 sps:$4 sm:$0xff]   ;;  %v9661_v20 = vld [vmem:[%s13146_s1 + $0x10e4] ss:$16 sps:$4 sm:$0xff]  }
 0x1e4   :  { %5249 = vmatprep.subr.bf16.mxu0 %v9577_v22  ;;  %5782 = vmatprep.subr.bf16.mxu1 %v9580_v23  ;;  %v9664_v22 = vld [vmem:[%s13146_s1 + $0x10ec] ss:$16 sps:$4 sm:$0xff]   ;;  %v9659_v23 = vld [vmem:[%s13146_s1 + $0x10e0] ss:$16 sps:$4 sm:$0xff]  }
 0x1e7   :  { %5250 = vmatpush1.bf16.msra.mxu0 %v9575_v24  ;;  %5783 = vmatpush1.bf16.msra.mxu1 %v9578_v13  ;;  %v9662_v24 = vld [vmem:[%s13146_s1 + $0x10e8] ss:$16 sps:$4 sm:$0xff]   ;;  %v9667_v13 = vld [vmem:[%s13146_s1 + $0x1104] ss:$16 sps:$4 sm:$0xff]  }
 0x1e8   :  { %5251 = vmatprep.subr.bf16.mxu0 %v9583_v27  ;;  %5784 = vmatprep.subr.bf16.mxu1 %v9586_v28  ;;  %v9670_v27 = vld [vmem:[%s13146_s1 + $0x110c] ss:$16 sps:$4 sm:$0xff]   ;;  %v9665_v28 = vld [vmem:[%s13146_s1 + $0x1100] ss:$16 sps:$4 sm:$0xff]  }
 0x1eb   :  { %5252 = vmatpush1.bf16.msra.mxu0 %v9581_v29  ;;  %5785 = vmatpush1.bf16.msra.mxu1 %v9584_v14  ;;  %v9668_v29 = vld [vmem:[%s13146_s1 + $0x1108] ss:$16 sps:$4 sm:$0xff]   ;;  %v9673_v14 = vld [vmem:[%s13146_s1 + $0x1124] ss:$16 sps:$4 sm:$0xff]  }
 0x1ec   :  { %5253 = vmatprep.subr.bf16.mxu0 %v9589_v30  ;;  %5786 = vmatprep.subr.bf16.mxu1 %v9592_v31  ;;  %v9676_v30 = vld [vmem:[%s13146_s1 + $0x112c] ss:$16 sps:$4 sm:$0xff]   ;;  %v9671_v31 = vld [vmem:[%s13146_s1 + $0x1120] ss:$16 sps:$4 sm:$0xff]  }
 0x1ef   :  { %5254 = vmatpush1.bf16.msra.mxu0 %v9587_v25  ;;  %5787 = vmatpush1.bf16.msra.mxu1 %v9590_v32  ;;  %v9674_v25 = vld [vmem:[%s13146_s1 + $0x1128] ss:$16 sps:$4 sm:$0xff]   ;;  %v9679_v32 = vld [vmem:[%s13146_s1 + $0x1144] ss:$16 sps:$4 sm:$0xff]  }
 0x1f0   :  { %5255 = vmatprep.subr.bf16.mxu0 %v9595_v33  ;;  %5788 = vmatprep.subr.bf16.mxu1 %v9598_v26  ;;  %v9682_v33 = vld [vmem:[%s13146_s1 + $0x114c] ss:$16 sps:$4 sm:$0xff]   ;;  %v9677_v26 = vld [vmem:[%s13146_s1 + $0x1140] ss:$16 sps:$4 sm:$0xff]  }
 0x1f3   :  { %5256 = vmatpush1.bf16.msra.mxu0 %v9593_v36  ;;  %5789 = vmatpush1.bf16.msra.mxu1 %v9596_v37  ;;  %v9680_v36 = vld [vmem:[%s13146_s1 + $0x1148] ss:$16 sps:$4 sm:$0xff]   ;;  %v9685_v37 = vld [vmem:[%s13146_s1 + $0x1164] ss:$16 sps:$4 sm:$0xff]  }
 0x1f4   :  { %5257 = vmatprep.subr.bf16.mxu0 %v9601_v21  ;;  %5790 = vmatprep.subr.bf16.mxu1 %v9604_v39  ;;  %v9688_v21 = vld [vmem:[%s13146_s1 + $0x116c] ss:$16 sps:$4 sm:$0xff]   ;;  %v9683_v39 = vld [vmem:[%s13146_s1 + $0x1160] ss:$16 sps:$4 sm:$0xff]  }
 0x1f7   :  { %5258 = vmatpush1.bf16.msra.mxu0 %v9599_v40  ;;  %5791 = vmatpush1.bf16.msra.mxu1 %v9602_v41  ;;  %v9686_v40 = vld [vmem:[%s13146_s1 + $0x1168] ss:$16 sps:$4 sm:$0xff]   ;;  %v9691_v41 = vld [vmem:[%s13146_s1 + $0x1184] ss:$16 sps:$4 sm:$0xff]  }
 0x1f8   :  { %5259 = vmatprep.subr.bf16.mxu0 %v9607_v34  ;;  %5792 = vmatprep.subr.bf16.mxu1 %v9610_v43  ;;  %v9694_v34 = vld [vmem:[%s13146_s1 + $0x118c] ss:$16 sps:$4 sm:$0xff]   ;;  %v9689_v43 = vld [vmem:[%s13146_s1 + $0x1180] ss:$16 sps:$4 sm:$0xff]  }
 0x1fb   :  { %5260 = vmatpush1.bf16.msra.mxu0 %v9605_v45  ;;  %5793 = vmatpush1.bf16.msra.mxu1 %v9608_v46  ;;  %v9692_v45 = vld [vmem:[%s13146_s1 + $0x1188] ss:$16 sps:$4 sm:$0xff]   ;;  %v9697_v46 = vld [vmem:[%s13146_s1 + $0x11a4] ss:$16 sps:$4 sm:$0xff]  }
 0x1fc   :  { %5261 = vmatprep.subr.bf16.mxu0 %v9613_v35  ;;  %5794 = vmatprep.subr.bf16.mxu1 %v9616_v50  ;;  %v9700_v35 = vld [vmem:[%s13146_s1 + $0x11ac] ss:$16 sps:$4 sm:$0xff]   ;;  %v9695_v50 = vld [vmem:[%s13146_s1 + $0x11a0] ss:$16 sps:$4 sm:$0xff]  }
 0x1ff   :  { %5262 = vmatpush1.bf16.msra.mxu0 %v9611_v53  ;;  %5795 = vmatpush1.bf16.msra.mxu1 %v9614_v38  ;;  %v9698_v53 = vld [vmem:[%s13146_s1 + $0x11a8] ss:$16 sps:$4 sm:$0xff]   ;;  %v9703_v38 = vld [vmem:[%s13146_s1 + $0x11c4] ss:$16 sps:$4 sm:$0xff]  }
 0x200   :  { %5272 = vmatprep.subr.bf16.mxu0 %v9619_v54  ;;  %5805 = vmatprep.subr.bf16.mxu1 %v9622_v55  ;;  %v9706_v54 = vld [vmem:[%s13146_s1 + $0x11cc] ss:$16 sps:$4 sm:$0xff]   ;;  %v9701_v55 = vld [vmem:[%s13146_s1 + $0x11c0] ss:$16 sps:$4 sm:$0xff]  }
 0x202   :  { %5264 = vmatmul.mubr.bf16.vlgmr.msra.gmra.mrb[0].mxu0 %v930_v47  ;;  %5797 = vmatmul.mubr.bf16.vlgmr.msra.gmra.mrb[0].mxu1 %v930_v47  ;;  %v9709_v47 = vld [vmem:[%s13146_s1 + $0x11e4] ss:$16 sps:$4 sm:$0xff]  }
 0x203   :  { %5273 = vmatpush1.bf16.msra.mxu0 %v9617_v57  ;;  %5806 = vmatpush1.bf16.msra.mxu1 %v9620_v58  ;;  %v9712_v57 = vld [vmem:[%s13146_s1 + $0x11ec] ss:$16 sps:$4 sm:$0xff]   ;;  %v9707_v58 = vld [vmem:[%s13146_s1 + $0x11e0] ss:$16 sps:$4 sm:$0xff]  }
 0x204   :  { %5274 = vmatprep.subr.bf16.mxu0 %v9625_v59  ;;  %5807 = vmatprep.subr.bf16.mxu1 %v9628_v48  ;;  %v9710_v59 = vld [vmem:[%s13146_s1 + $0x11e8] ss:$16 sps:$4 sm:$0xff]   ;;  %v9715_v48 = vld [vmem:[%s13146_s1 + $0x1204] ss:$16 sps:$4 sm:$0xff]  }
 0x205   :  { %5304 = vmatprep.mubr.bf16.mxu0 %v11857_v60  ;;  %5837 = vmatprep.mubr.bf16.mxu1 %v11857_v60 }
 0x207   :  { %5275 = vmatpush1.bf16.msra.mxu0 %v9623_v61  ;;  %5808 = vmatpush1.bf16.msra.mxu1 %v9626_v62  ;;  %v9718_v61 = vld [vmem:[%s13146_s1 + $0x120c] ss:$16 sps:$4 sm:$0xff]   ;;  %v12043_v62 = vrot.slane %v11826_v51, %v10339_v49 }
 0x208   :  { %5276 = vmatprep.subr.bf16.mxu0 %v9631_v63  ;;  %5809 = vmatprep.subr.bf16.mxu1 %v9634_v0  ;;  %v9713_v63 = vld [vmem:[%s13146_s1 + $0x1200] ss:$16 sps:$4 sm:$0xff]   ;;  %v9716_v0 = vld [vmem:[%s13146_s1 + $0x1208] ss:$16 sps:$4 sm:$0xff]   ;;  %v9724_v51 = vld [vmem:[%s13146_s1 + $0x122c] ss:$16 sps:$4 sm:$0xff]  }
 0x20b   :  { %5277 = vmatpush1.bf16.msra.mxu0 %v9629_v1  ;;  %5810 = vmatpush1.bf16.msra.mxu1 %v9632_v2  ;;  %v9721_v1 = vld [vmem:[%s13146_s1 + $0x1224] ss:$16 sps:$4 sm:$0xff]   ;;  %v980_v2 = vcombine.high %v11857_v60, %v11857_v60 }
 0x20c   :  { %5278 = vmatprep.subr.bf16.mxu0 %v9637_v3  ;;  %5811 = vmatprep.subr.bf16.mxu1 %v9640_v4  ;;  %v9719_v3 = vld [vmem:[%s13146_s1 + $0x1220] ss:$16 sps:$4 sm:$0xff]   ;;  %v9722_v4 = vld [vmem:[%s13146_s1 + $0x1228] ss:$16 sps:$4 sm:$0xff]   ;;  %v9727_v60 = vld [vmem:[%s13146_s1 + $0x1244] ss:$16 sps:$4 sm:$0xff]  }
 0x20f   :  { %5279 = vmatpush1.bf16.msra.mxu0 %v9635_v5  ;;  %5812 = vmatpush1.bf16.msra.mxu1 %v9638_v6  ;;  %v9730_v5 = vld [vmem:[%s13146_s1 + $0x124c] ss:$16 sps:$4 sm:$0xff]   ;;  %v9725_v6 = vld [vmem:[%s13146_s1 + $0x1240] ss:$16 sps:$4 sm:$0xff]  }
 0x210   :  { %5280 = vmatprep.subr.bf16.mxu0 %v9643_v7  ;;  %5813 = vmatprep.subr.bf16.mxu1 %v9646_v8  ;;  %v9728_v7 = vld [vmem:[%s13146_s1 + $0x1248] ss:$16 sps:$4 sm:$0xff]   ;;  %v9733_v8 = vld [vmem:[%s13146_s1 + $0x1264] ss:$16 sps:$4 sm:$0xff]  }
 0x213   :  { %5281 = vmatpush1.bf16.msra.mxu0 %v9641_v9  ;;  %5814 = vmatpush1.bf16.msra.mxu1 %v9644_v10  ;;  %v9736_v9 = vld [vmem:[%s13146_s1 + $0x126c] ss:$16 sps:$4 sm:$0xff]   ;;  %v9731_v10 = vld [vmem:[%s13146_s1 + $0x1260] ss:$16 sps:$4 sm:$0xff]  }
 0x214   :  { %5282 = vmatprep.subr.bf16.mxu0 %v9649_v11  ;;  %5815 = vmatprep.subr.bf16.mxu1 %v9652_v12  ;;  %v9734_v11 = vld [vmem:[%s13146_s1 + $0x1268] ss:$16 sps:$4 sm:$0xff]   ;;  %v9739_v12 = vld [vmem:[%s13146_s1 + $0x1284] ss:$16 sps:$4 sm:$0xff]  }
 0x217   :  { %5283 = vmatpush1.bf16.msra.mxu0 %v9647_v52  ;;  %5816 = vmatpush1.bf16.msra.mxu1 %v9650_v15  ;;  %v9742_v52 = vld [vmem:[%s13146_s1 + $0x128c] ss:$16 sps:$4 sm:$0xff]   ;;  %v9737_v15 = vld [vmem:[%s13146_s1 + $0x1280] ss:$16 sps:$4 sm:$0xff]  }
 0x218   :  { %5284 = vmatprep.subr.bf16.mxu0 %v9655_v16  ;;  %5817 = vmatprep.subr.bf16.mxu1 %v9658_v17  ;;  %v9740_v16 = vld [vmem:[%s13146_s1 + $0x1288] ss:$16 sps:$4 sm:$0xff]   ;;  %v9745_v17 = vld [vmem:[%s13146_s1 + $0x12a4] ss:$16 sps:$4 sm:$0xff]  }
 0x21b   :  { %5285 = vmatpush1.bf16.msra.mxu0 %v9653_v18  ;;  %5818 = vmatpush1.bf16.msra.mxu1 %v9656_v19  ;;  %v9748_v18 = vld [vmem:[%s13146_s1 + $0x12ac] ss:$16 sps:$4 sm:$0xff]   ;;  %v9743_v19 = vld [vmem:[%s13146_s1 + $0x12a0] ss:$16 sps:$4 sm:$0xff]  }
 0x21c   :  { %5286 = vmatprep.subr.bf16.mxu0 %v9661_v20  ;;  %5819 = vmatprep.subr.bf16.mxu1 %v9664_v22  ;;  %v9746_v20 = vld [vmem:[%s13146_s1 + $0x12a8] ss:$16 sps:$4 sm:$0xff]   ;;  %v9751_v22 = vld [vmem:[%s13146_s1 + $0x12c4] ss:$16 sps:$4 sm:$0xff]  }
 0x21f   :  { %5287 = vmatpush1.bf16.msra.mxu0 %v9659_v23  ;;  %5820 = vmatpush1.bf16.msra.mxu1 %v9662_v24  ;;  %v9754_v23 = vld [vmem:[%s13146_s1 + $0x12cc] ss:$16 sps:$4 sm:$0xff]   ;;  %v9749_v24 = vld [vmem:[%s13146_s1 + $0x12c0] ss:$16 sps:$4 sm:$0xff]  }
 0x220   :  { %5288 = vmatprep.subr.bf16.mxu0 %v9667_v13  ;;  %5821 = vmatprep.subr.bf16.mxu1 %v9670_v27  ;;  %v9752_v13 = vld [vmem:[%s13146_s1 + $0x12c8] ss:$16 sps:$4 sm:$0xff]   ;;  %v9757_v27 = vld [vmem:[%s13146_s1 + $0x12e4] ss:$16 sps:$4 sm:$0xff]  }
 0x223   :  { %5289 = vmatpush1.bf16.msra.mxu0 %v9665_v28  ;;  %5822 = vmatpush1.bf16.msra.mxu1 %v9668_v29  ;;  %v9760_v28 = vld [vmem:[%s13146_s1 + $0x12ec] ss:$16 sps:$4 sm:$0xff]   ;;  %v9755_v29 = vld [vmem:[%s13146_s1 + $0x12e0] ss:$16 sps:$4 sm:$0xff]  }
 0x224   :  { %5290 = vmatprep.subr.bf16.mxu0 %v9673_v14  ;;  %5823 = vmatprep.subr.bf16.mxu1 %v9676_v30  ;;  %v9758_v14 = vld [vmem:[%s13146_s1 + $0x12e8] ss:$16 sps:$4 sm:$0xff]   ;;  %v9763_v30 = vld [vmem:[%s13146_s1 + $0x1304] ss:$16 sps:$4 sm:$0xff]  }
 0x227   :  { %5291 = vmatpush1.bf16.msra.mxu0 %v9671_v31  ;;  %5824 = vmatpush1.bf16.msra.mxu1 %v9674_v25  ;;  %v9766_v31 = vld [vmem:[%s13146_s1 + $0x130c] ss:$16 sps:$4 sm:$0xff]   ;;  %v9761_v25 = vld [vmem:[%s13146_s1 + $0x1300] ss:$16 sps:$4 sm:$0xff]  }
 0x228   :  { %5292 = vmatprep.subr.bf16.mxu0 %v9679_v32  ;;  %5825 = vmatprep.subr.bf16.mxu1 %v9682_v33  ;;  %v9764_v32 = vld [vmem:[%s13146_s1 + $0x1308] ss:$16 sps:$4 sm:$0xff]   ;;  %v9769_v33 = vld [vmem:[%s13146_s1 + $0x1324] ss:$16 sps:$4 sm:$0xff]  }
 0x22b   :  { %5293 = vmatpush1.bf16.msra.mxu0 %v9677_v26  ;;  %5826 = vmatpush1.bf16.msra.mxu1 %v9680_v36  ;;  %v9772_v26 = vld [vmem:[%s13146_s1 + $0x132c] ss:$16 sps:$4 sm:$0xff]   ;;  %v9767_v36 = vld [vmem:[%s13146_s1 + $0x1320] ss:$16 sps:$4 sm:$0xff]  }
 0x22c   :  { %5294 = vmatprep.subr.bf16.mxu0 %v9685_v37  ;;  %5827 = vmatprep.subr.bf16.mxu1 %v9688_v21  ;;  %v9770_v37 = vld [vmem:[%s13146_s1 + $0x1328] ss:$16 sps:$4 sm:$0xff]   ;;  %v9775_v21 = vld [vmem:[%s13146_s1 + $0x1344] ss:$16 sps:$4 sm:$0xff]  }
 0x22f   :  { %5295 = vmatpush1.bf16.msra.mxu0 %v9683_v39  ;;  %5828 = vmatpush1.bf16.msra.mxu1 %v9686_v40  ;;  %v9778_v39 = vld [vmem:[%s13146_s1 + $0x134c] ss:$16 sps:$4 sm:$0xff]   ;;  %v9773_v40 = vld [vmem:[%s13146_s1 + $0x1340] ss:$16 sps:$4 sm:$0xff]  }
 0x230   :  { %5296 = vmatprep.subr.bf16.mxu0 %v9691_v41  ;;  %5829 = vmatprep.subr.bf16.mxu1 %v9694_v34  ;;  %v9776_v41 = vld [vmem:[%s13146_s1 + $0x1348] ss:$16 sps:$4 sm:$0xff]   ;;  %v9781_v34 = vld [vmem:[%s13146_s1 + $0x1364] ss:$16 sps:$4 sm:$0xff]  }
 0x233   :  { %5297 = vmatpush1.bf16.msra.mxu0 %v9689_v43  ;;  %5830 = vmatpush1.bf16.msra.mxu1 %v9692_v45  ;;  %v9784_v43 = vld [vmem:[%s13146_s1 + $0x136c] ss:$16 sps:$4 sm:$0xff]   ;;  %v9779_v45 = vld [vmem:[%s13146_s1 + $0x1360] ss:$16 sps:$4 sm:$0xff]  }
 0x234   :  { %5298 = vmatprep.subr.bf16.mxu0 %v9697_v46  ;;  %5831 = vmatprep.subr.bf16.mxu1 %v9700_v35  ;;  %v9782_v46 = vld [vmem:[%s13146_s1 + $0x1368] ss:$16 sps:$4 sm:$0xff]   ;;  %v9787_v35 = vld [vmem:[%s13146_s1 + $0x1384] ss:$16 sps:$4 sm:$0xff]  }
 0x237   :  { %5299 = vmatpush1.bf16.msra.mxu0 %v9695_v50  ;;  %5832 = vmatpush1.bf16.msra.mxu1 %v9698_v53  ;;  %v9790_v50 = vld [vmem:[%s13146_s1 + $0x138c] ss:$16 sps:$4 sm:$0xff]   ;;  %v9785_v53 = vld [vmem:[%s13146_s1 + $0x1380] ss:$16 sps:$4 sm:$0xff]  }
 0x238   :  { %5300 = vmatprep.subr.bf16.mxu0 %v9703_v38  ;;  %5833 = vmatprep.subr.bf16.mxu1 %v9706_v54  ;;  %v9788_v38 = vld [vmem:[%s13146_s1 + $0x1388] ss:$16 sps:$4 sm:$0xff]   ;;  %v9793_v54 = vld [vmem:[%s13146_s1 + $0x13a4] ss:$16 sps:$4 sm:$0xff]  }
 0x23b   :  { %5301 = vmatpush1.bf16.msra.mxu0 %v9701_v55  ;;  %5834 = vmatpush1.bf16.msra.mxu1 %v9704_v56  ;;  %v9796_v55 = vld [vmem:[%s13146_s1 + $0x13ac] ss:$16 sps:$4 sm:$0xff]   ;;  %v9791_v56 = vld [vmem:[%s13146_s1 + $0x13a0] ss:$16 sps:$4 sm:$0xff]  }
 0x23c   :  { %5302 = vmatprep.subr.bf16.mxu0 %v9709_v47  ;;  %5835 = vmatprep.subr.bf16.mxu1 %v9712_v57  ;;  %v9794_v47 = vld [vmem:[%s13146_s1 + $0x13a8] ss:$16 sps:$4 sm:$0xff]   ;;  %v9799_v57 = vld [vmem:[%s13146_s1 + $0x13c4] ss:$16 sps:$4 sm:$0xff]  }
 0x23f   :  { %5303 = vmatpush1.bf16.msra.mxu0 %v9707_v58  ;;  %5836 = vmatpush1.bf16.msra.mxu1 %v9710_v59  ;;  %v9802_v58 = vld [vmem:[%s13146_s1 + $0x13cc] ss:$16 sps:$4 sm:$0xff]   ;;  %v933_v59 = vcombine.high %v11810_v44, %v11810_v44 }
 0x240   :  { %5313 = vmatprep.subr.bf16.mxu0 %v9715_v48  ;;  %5846 = vmatprep.subr.bf16.mxu1 %v9718_v61  ;;  %v9797_v48 = vld [vmem:[%s13146_s1 + $0x13c0] ss:$16 sps:$4 sm:$0xff]   ;;  %v9800_v61 = vld [vmem:[%s13146_s1 + $0x13c8] ss:$16 sps:$4 sm:$0xff]   ;;  %v9808_v44 = vld [vmem:[%s13146_s1 + $0x13ec] ss:$16 sps:$4 sm:$0xff]  }
 0x242   :  { %5305 = vmatmul.mubr.bf16.vlgmr.msra.gmra.mrb[0].mxu0 %v12043_v62  ;;  %5838 = vmatmul.mubr.bf16.vlgmr.msra.gmra.mrb[0].mxu1 %v12043_v62 }
 0x243   :  { %5314 = vmatpush1.bf16.msra.mxu0 %v9713_v63  ;;  %5847 = vmatpush1.bf16.msra.mxu1 %v9716_v0  ;;  %v9805_v63 = vld [vmem:[%s13146_s1 + $0x13e4] ss:$16 sps:$4 sm:$0xff]   ;;  %v12232_v0 = vrot.slane %v933_v59, %v10339_v49  ;;  %v9884_v59 = vld [vmem:[%s13146_s1 + $0x1588] ss:$16 sps:$4 sm:$0xff]  }
 0x244   :  { %5315 = vmatprep.subr.bf16.mxu0 %v9721_v1  ;;  %5848 = vmatprep.subr.bf16.mxu1 %v9724_v51  ;;  %v9803_v1 = vld [vmem:[%s13146_s1 + $0x13e0] ss:$16 sps:$4 sm:$0xff]   ;;  %v9806_v51 = vld [vmem:[%s13146_s1 + $0x13e8] ss:$16 sps:$4 sm:$0xff]  }
 0x245   :  { %5345 = vmatprep.mubr.bf16.mxu0 %v980_v2  ;;  %5878 = vmatprep.mubr.bf16.mxu1 %v980_v2  ;;  %v9811_v2 = vld [vmem:[%s13146_s1 + $0x1404] ss:$16 sps:$4 sm:$0xff]  }
 0x247   :  { %5316 = vmatpush1.bf16.msra.mxu0 %v9719_v3  ;;  %5849 = vmatpush1.bf16.msra.mxu1 %v9722_v4  ;;  %v9814_v3 = vld [vmem:[%s13146_s1 + $0x140c] ss:$16 sps:$4 sm:$0xff]   ;;  %v949_v4 = vcombine.high %v12232_v0, %v12232_v0 }
 0x248   :  { %5317 = vmatprep.subr.bf16.mxu0 %v9727_v60  ;;  %5850 = vmatprep.subr.bf16.mxu1 %v9730_v5  ;;  %v978_v60 = vcombine.high %v12043_v62, %v12043_v62  ;;  %v9809_v5 = vld [vmem:[%s13146_s1 + $0x1400] ss:$16 sps:$4 sm:$0xff]   ;;  %v9820_v62 = vld [vmem:[%s13146_s1 + $0x142c] ss:$16 sps:$4 sm:$0xff]  }
 0x24b   :  { %5318 = vmatpush1.bf16.msra.mxu0 %v9725_v6  ;;  %5851 = vmatpush1.bf16.msra.mxu1 %v9728_v7  ;;  %v9812_v6 = vld [vmem:[%s13146_s1 + $0x1408] ss:$16 sps:$4 sm:$0xff]   ;;  %v9817_v7 = vld [vmem:[%s13146_s1 + $0x1424] ss:$16 sps:$4 sm:$0xff]  }
 0x24c   :  { %5319 = vmatprep.subr.bf16.mxu0 %v9733_v8  ;;  %5852 = vmatprep.subr.bf16.mxu1 %v9736_v9  ;;  %v12263_v8 = vrot.slane %v949_v4, %v10339_v49  ;;  %v9815_v9 = vld [vmem:[%s13146_s1 + $0x1420] ss:$16 sps:$4 sm:$0xff]   ;;  %v9901_v4 = vld [vmem:[%s13146_s1 + $0x15e4] ss:$16 sps:$4 sm:$0xff]  }
 0x24f   :  { %5320 = vmatpush1.bf16.msra.mxu0 %v9731_v10  ;;  %5853 = vmatpush1.bf16.msra.mxu1 %v9734_v11  ;;  %v9818_v10 = vld [vmem:[%s13146_s1 + $0x1428] ss:$16 sps:$4 sm:$0xff]   ;;  %v9823_v11 = vld [vmem:[%s13146_s1 + $0x1444] ss:$16 sps:$4 sm:$0xff]  }
 0x250   :  { %5321 = vmatprep.subr.bf16.mxu0 %v9739_v12  ;;  %5854 = vmatprep.subr.bf16.mxu1 %v9742_v52  ;;  %v9826_v12 = vld [vmem:[%s13146_s1 + $0x144c] ss:$16 sps:$4 sm:$0xff]   ;;  %v9821_v52 = vld [vmem:[%s13146_s1 + $0x1440] ss:$16 sps:$4 sm:$0xff]  }
 0x253   :  { %5322 = vmatpush1.bf16.msra.mxu0 %v9737_v15  ;;  %5855 = vmatpush1.bf16.msra.mxu1 %v9740_v16  ;;  %v9824_v15 = vld [vmem:[%s13146_s1 + $0x1448] ss:$16 sps:$4 sm:$0xff]   ;;  %v9829_v16 = vld [vmem:[%s13146_s1 + $0x1464] ss:$16 sps:$4 sm:$0xff]  }
 0x254   :  { %5323 = vmatprep.subr.bf16.mxu0 %v9745_v17  ;;  %5856 = vmatprep.subr.bf16.mxu1 %v9748_v18  ;;  %v9832_v17 = vld [vmem:[%s13146_s1 + $0x146c] ss:$16 sps:$4 sm:$0xff]   ;;  %v9827_v18 = vld [vmem:[%s13146_s1 + $0x1460] ss:$16 sps:$4 sm:$0xff]  }
 0x257   :  { %5324 = vmatpush1.bf16.msra.mxu0 %v9743_v19  ;;  %5857 = vmatpush1.bf16.msra.mxu1 %v9746_v20  ;;  %v9830_v19 = vld [vmem:[%s13146_s1 + $0x1468] ss:$16 sps:$4 sm:$0xff]   ;;  %v9835_v20 = vld [vmem:[%s13146_s1 + $0x1484] ss:$16 sps:$4 sm:$0xff]  }
 0x258   :  { %5325 = vmatprep.subr.bf16.mxu0 %v9751_v22  ;;  %5858 = vmatprep.subr.bf16.mxu1 %v9754_v23  ;;  %v9838_v22 = vld [vmem:[%s13146_s1 + $0x148c] ss:$16 sps:$4 sm:$0xff]   ;;  %v9833_v23 = vld [vmem:[%s13146_s1 + $0x1480] ss:$16 sps:$4 sm:$0xff]  }
 0x25b   :  { %5326 = vmatpush1.bf16.msra.mxu0 %v9749_v24  ;;  %5859 = vmatpush1.bf16.msra.mxu1 %v9752_v13  ;;  %v9836_v24 = vld [vmem:[%s13146_s1 + $0x1488] ss:$16 sps:$4 sm:$0xff]   ;;  %v9841_v13 = vld [vmem:[%s13146_s1 + $0x14a4] ss:$16 sps:$4 sm:$0xff]  }
 0x25c   :  { %5327 = vmatprep.subr.bf16.mxu0 %v9757_v27  ;;  %5860 = vmatprep.subr.bf16.mxu1 %v9760_v28  ;;  %v9844_v27 = vld [vmem:[%s13146_s1 + $0x14ac] ss:$16 sps:$4 sm:$0xff]   ;;  %v9839_v28 = vld [vmem:[%s13146_s1 + $0x14a0] ss:$16 sps:$4 sm:$0xff]  }
 0x25f   :  { %5328 = vmatpush1.bf16.msra.mxu0 %v9755_v29  ;;  %5861 = vmatpush1.bf16.msra.mxu1 %v9758_v14  ;;  %v9842_v29 = vld [vmem:[%s13146_s1 + $0x14a8] ss:$16 sps:$4 sm:$0xff]   ;;  %v9847_v14 = vld [vmem:[%s13146_s1 + $0x14c4] ss:$16 sps:$4 sm:$0xff]  }
 0x260   :  { %5329 = vmatprep.subr.bf16.mxu0 %v9763_v30  ;;  %5862 = vmatprep.subr.bf16.mxu1 %v9766_v31  ;;  %v9850_v30 = vld [vmem:[%s13146_s1 + $0x14cc] ss:$16 sps:$4 sm:$0xff]   ;;  %v9845_v31 = vld [vmem:[%s13146_s1 + $0x14c0] ss:$16 sps:$4 sm:$0xff]  }
 0x263   :  { %5330 = vmatpush1.bf16.msra.mxu0 %v9761_v25  ;;  %5863 = vmatpush1.bf16.msra.mxu1 %v9764_v32  ;;  %v9848_v25 = vld [vmem:[%s13146_s1 + $0x14c8] ss:$16 sps:$4 sm:$0xff]   ;;  %v9853_v32 = vld [vmem:[%s13146_s1 + $0x14e4] ss:$16 sps:$4 sm:$0xff]  }
 0x264   :  { %5331 = vmatprep.subr.bf16.mxu0 %v9769_v33  ;;  %5864 = vmatprep.subr.bf16.mxu1 %v9772_v26  ;;  %v9856_v33 = vld [vmem:[%s13146_s1 + $0x14ec] ss:$16 sps:$4 sm:$0xff]   ;;  %v9851_v26 = vld [vmem:[%s13146_s1 + $0x14e0] ss:$16 sps:$4 sm:$0xff]  }
 0x267   :  { %5332 = vmatpush1.bf16.msra.mxu0 %v9767_v36  ;;  %5865 = vmatpush1.bf16.msra.mxu1 %v9770_v37  ;;  %v9854_v36 = vld [vmem:[%s13146_s1 + $0x14e8] ss:$16 sps:$4 sm:$0xff]   ;;  %v9859_v37 = vld [vmem:[%s13146_s1 + $0x1504] ss:$16 sps:$4 sm:$0xff]  }
 0x268   :  { %5333 = vmatprep.subr.bf16.mxu0 %v9775_v21  ;;  %5866 = vmatprep.subr.bf16.mxu1 %v9778_v39  ;;  %v9862_v21 = vld [vmem:[%s13146_s1 + $0x150c] ss:$16 sps:$4 sm:$0xff]   ;;  %v9857_v39 = vld [vmem:[%s13146_s1 + $0x1500] ss:$16 sps:$4 sm:$0xff]  }
 0x26b   :  { %5334 = vmatpush1.bf16.msra.mxu0 %v9773_v40  ;;  %5867 = vmatpush1.bf16.msra.mxu1 %v9776_v41  ;;  %v9860_v40 = vld [vmem:[%s13146_s1 + $0x1508] ss:$16 sps:$4 sm:$0xff]   ;;  %v9865_v41 = vld [vmem:[%s13146_s1 + $0x1524] ss:$16 sps:$4 sm:$0xff]  }
 0x26c   :  { %5335 = vmatprep.subr.bf16.mxu0 %v9781_v34  ;;  %5868 = vmatprep.subr.bf16.mxu1 %v9784_v43  ;;  %v9868_v34 = vld [vmem:[%s13146_s1 + $0x152c] ss:$16 sps:$4 sm:$0xff]   ;;  %v9863_v43 = vld [vmem:[%s13146_s1 + $0x1520] ss:$16 sps:$4 sm:$0xff]  }
 0x26f   :  { %5336 = vmatpush1.bf16.msra.mxu0 %v9779_v45  ;;  %5869 = vmatpush1.bf16.msra.mxu1 %v9782_v46  ;;  %v9866_v45 = vld [vmem:[%s13146_s1 + $0x1528] ss:$16 sps:$4 sm:$0xff]   ;;  %v9871_v46 = vld [vmem:[%s13146_s1 + $0x1544] ss:$16 sps:$4 sm:$0xff]  }
 0x270   :  { %5337 = vmatprep.subr.bf16.mxu0 %v9787_v35  ;;  %5870 = vmatprep.subr.bf16.mxu1 %v9790_v50  ;;  %v9874_v35 = vld [vmem:[%s13146_s1 + $0x154c] ss:$16 sps:$4 sm:$0xff]   ;;  %v9869_v50 = vld [vmem:[%s13146_s1 + $0x1540] ss:$16 sps:$4 sm:$0xff]  }
 0x273   :  { %5338 = vmatpush1.bf16.msra.mxu0 %v9785_v53  ;;  %5871 = vmatpush1.bf16.msra.mxu1 %v9788_v38  ;;  %v9872_v53 = vld [vmem:[%s13146_s1 + $0x1548] ss:$16 sps:$4 sm:$0xff]   ;;  %v9877_v38 = vld [vmem:[%s13146_s1 + $0x1564] ss:$16 sps:$4 sm:$0xff]  }
 0x274   :  { %5339 = vmatprep.subr.bf16.mxu0 %v9793_v54  ;;  %5872 = vmatprep.subr.bf16.mxu1 %v9796_v55  ;;  %v9880_v54 = vld [vmem:[%s13146_s1 + $0x156c] ss:$16 sps:$4 sm:$0xff]   ;;  %v9875_v55 = vld [vmem:[%s13146_s1 + $0x1560] ss:$16 sps:$4 sm:$0xff]  }
 0x277   :  { %5340 = vmatpush1.bf16.msra.mxu0 %v9791_v56  ;;  %5873 = vmatpush1.bf16.msra.mxu1 %v9794_v47  ;;  %v9878_v56 = vld [vmem:[%s13146_s1 + $0x1568] ss:$16 sps:$4 sm:$0xff]   ;;  %v9883_v47 = vld [vmem:[%s13146_s1 + $0x1584] ss:$16 sps:$4 sm:$0xff]  }
 0x278   :  { %5341 = vmatprep.subr.bf16.mxu0 %v9799_v57  ;;  %5874 = vmatprep.subr.bf16.mxu1 %v9802_v58  ;;  %v9886_v57 = vld [vmem:[%s13146_s1 + $0x158c] ss:$16 sps:$4 sm:$0xff]   ;;  %v9881_v58 = vld [vmem:[%s13146_s1 + $0x1580] ss:$16 sps:$4 sm:$0xff]  }
 0x27b   :  { %5342 = vmatpush1.bf16.msra.mxu0 %v9797_v48  ;;  %5875 = vmatpush1.bf16.msra.mxu1 %v9800_v61  ;;  %v9889_v48 = vld [vmem:[%s13146_s1 + $0x15a4] ss:$16 sps:$4 sm:$0xff]   ;;  %v9892_v61 = vld [vmem:[%s13146_s1 + $0x15ac] ss:$16 sps:$4 sm:$0xff]  }
 0x27c   :  { %5343 = vmatprep.subr.bf16.mxu0 %v9805_v63  ;;  %5876 = vmatprep.subr.bf16.mxu1 %v9808_v44  ;;  %v9887_v63 = vld [vmem:[%s13146_s1 + $0x15a0] ss:$16 sps:$4 sm:$0xff]   ;;  %v9890_v44 = vld [vmem:[%s13146_s1 + $0x15a8] ss:$16 sps:$4 sm:$0xff]  }
 0x27f   :  { %5344 = vmatpush1.bf16.msra.mxu0 %v9803_v1  ;;  %5877 = vmatpush1.bf16.msra.mxu1 %v9806_v51  ;;  %v9895_v1 = vld [vmem:[%s13146_s1 + $0x15c4] ss:$16 sps:$4 sm:$0xff]   ;;  %v9898_v51 = vld [vmem:[%s13146_s1 + $0x15cc] ss:$16 sps:$4 sm:$0xff]  }
 0x280   :  { %5354 = vmatprep.subr.bf16.mxu0 %v9811_v2  ;;  %5887 = vmatprep.subr.bf16.mxu1 %v9814_v3  ;;  %v9893_v2 = vld [vmem:[%s13146_s1 + $0x15c0] ss:$16 sps:$4 sm:$0xff]   ;;  %v9896_v3 = vld [vmem:[%s13146_s1 + $0x15c8] ss:$16 sps:$4 sm:$0xff]  }
 0x282   :  { %5346 = vmatmul.mubr.bf16.vlgmr.msra.gmra.mrb[0].mxu0 %v978_v60  ;;  %5879 = vmatmul.mubr.bf16.vlgmr.msra.gmra.mrb[0].mxu1 %v978_v60  ;;  %v9904_v60 = vld [vmem:[%s13146_s1 + $0x15ec] ss:$16 sps:$4 sm:$0xff]  }
 0x283   :  { %5355 = vmatpush1.bf16.msra.mxu0 %v9809_v5  ;;  %5888 = vmatpush1.bf16.msra.mxu1 %v9812_v6  ;;  %v9899_v5 = vld [vmem:[%s13146_s1 + $0x15e0] ss:$16 sps:$4 sm:$0xff]   ;;  %v9902_v6 = vld [vmem:[%s13146_s1 + $0x15e8] ss:$16 sps:$4 sm:$0xff]  }
 0x284   :  { %5356 = vmatprep.subr.bf16.mxu0 %v9817_v7  ;;  %5889 = vmatprep.subr.bf16.mxu1 %v9820_v62  ;;  %v9908_v7 = vld [vmem:[%s13146_s1 + $0x1604] ss:$16 sps:$4 sm:$0xff]   ;;  %v9911_v62 = vld [vmem:[%s13146_s1 + $0x160c] ss:$16 sps:$4 sm:$0xff]  }
 0x285   :  { %5386 = vmatprep.mubr.bf16.mxu0 %v12263_v8  ;;  %5919 = vmatprep.mubr.bf16.mxu1 %v12263_v8 }
 0x287   :  { %5357 = vmatpush1.bf16.msra.mxu0 %v9815_v9  ;;  %5890 = vmatpush1.bf16.msra.mxu1 %v9818_v10  ;;  %v9906_v9 = vld [vmem:[%s13146_s1 + $0x1600] ss:$16 sps:$4 sm:$0xff]   ;;  %v9909_v10 = vld [vmem:[%s13146_s1 + $0x1608] ss:$16 sps:$4 sm:$0xff]  }
 0x288   :  { %5358 = vmatprep.subr.bf16.mxu0 %v9823_v11  ;;  %5891 = vmatprep.subr.bf16.mxu1 %v9826_v12  ;;  %v12455_v11 = vrot.slane %v12232_v0, %v10339_v49  ;;  %v9914_v12 = vld [vmem:[%s13146_s1 + $0x1624] ss:$16 sps:$4 sm:$0xff]   ;;  %v9915_v0 = vld [vmem:[%s13146_s1 + $0x1628] ss:$16 sps:$4 sm:$0xff]  }
 0x28b   :  { %5359 = vmatpush1.bf16.msra.mxu0 %v9821_v52  ;;  %5892 = vmatpush1.bf16.msra.mxu1 %v9824_v15  ;;  %v9917_v52 = vld [vmem:[%s13146_s1 + $0x162c] ss:$16 sps:$4 sm:$0xff]   ;;  %v9912_v15 = vld [vmem:[%s13146_s1 + $0x1620] ss:$16 sps:$4 sm:$0xff]  }
 0x28c   :  { %5360 = vmatprep.subr.bf16.mxu0 %v9829_v16  ;;  %5893 = vmatprep.subr.bf16.mxu1 %v9832_v17  ;;  %v981_v16 = vcombine.high %v12263_v8, %v12263_v8  ;;  %v9920_v17 = vld [vmem:[%s13146_s1 + $0x1644] ss:$16 sps:$4 sm:$0xff]   ;;  %v9918_v8 = vld [vmem:[%s13146_s1 + $0x1640] ss:$16 sps:$4 sm:$0xff]  }
 0x28f   :  { %5361 = vmatpush1.bf16.msra.mxu0 %v9827_v18  ;;  %5894 = vmatpush1.bf16.msra.mxu1 %v9830_v19  ;;  %v9923_v18 = vld [vmem:[%s13146_s1 + $0x164c] ss:$16 sps:$4 sm:$0xff]   ;;  %v9921_v19 = vld [vmem:[%s13146_s1 + $0x1648] ss:$16 sps:$4 sm:$0xff]  }
 0x290   :  { %5362 = vmatprep.subr.bf16.mxu0 %v9835_v20  ;;  %5895 = vmatprep.subr.bf16.mxu1 %v9838_v22  ;;  %v9926_v20 = vld [vmem:[%s13146_s1 + $0x1664] ss:$16 sps:$4 sm:$0xff]   ;;  %v9929_v22 = vld [vmem:[%s13146_s1 + $0x166c] ss:$16 sps:$4 sm:$0xff]  }
 0x293   :  { %5363 = vmatpush1.bf16.msra.mxu0 %v9833_v23  ;;  %5896 = vmatpush1.bf16.msra.mxu1 %v9836_v24  ;;  %v9924_v23 = vld [vmem:[%s13146_s1 + $0x1660] ss:$16 sps:$4 sm:$0xff]   ;;  %v9927_v24 = vld [vmem:[%s13146_s1 + $0x1668] ss:$16 sps:$4 sm:$0xff]  }
 0x294   :  { %5364 = vmatprep.subr.bf16.mxu0 %v9841_v13  ;;  %5897 = vmatprep.subr.bf16.mxu1 %v9844_v27  ;;  %v9932_v13 = vld [vmem:[%s13146_s1 + $0x1684] ss:$16 sps:$4 sm:$0xff]   ;;  %v9935_v27 = vld [vmem:[%s13146_s1 + $0x168c] ss:$16 sps:$4 sm:$0xff]  }
 0x297   :  { %5365 = vmatpush1.bf16.msra.mxu0 %v9839_v28  ;;  %5898 = vmatpush1.bf16.msra.mxu1 %v9842_v29  ;;  %v9930_v28 = vld [vmem:[%s13146_s1 + $0x1680] ss:$16 sps:$4 sm:$0xff]   ;;  %v9933_v29 = vld [vmem:[%s13146_s1 + $0x1688] ss:$16 sps:$4 sm:$0xff]  }
 0x298   :  { %5366 = vmatprep.subr.bf16.mxu0 %v9847_v14  ;;  %5899 = vmatprep.subr.bf16.mxu1 %v9850_v30  ;;  %v9938_v14 = vld [vmem:[%s13146_s1 + $0x16a4] ss:$16 sps:$4 sm:$0xff]   ;;  %v9941_v30 = vld [vmem:[%s13146_s1 + $0x16ac] ss:$16 sps:$4 sm:$0xff]  }
 0x29b   :  { %5367 = vmatpush1.bf16.msra.mxu0 %v9845_v31  ;;  %5900 = vmatpush1.bf16.msra.mxu1 %v9848_v25  ;;  %v9936_v31 = vld [vmem:[%s13146_s1 + $0x16a0] ss:$16 sps:$4 sm:$0xff]   ;;  %v9939_v25 = vld [vmem:[%s13146_s1 + $0x16a8] ss:$16 sps:$4 sm:$0xff]  }
 0x29c   :  { %5368 = vmatprep.subr.bf16.mxu0 %v9853_v32  ;;  %5901 = vmatprep.subr.bf16.mxu1 %v9856_v33  ;;  %v9944_v32 = vld [vmem:[%s13146_s1 + $0x16c4] ss:$16 sps:$4 sm:$0xff]   ;;  %v9947_v33 = vld [vmem:[%s13146_s1 + $0x16cc] ss:$16 sps:$4 sm:$0xff]  }
 0x29f   :  { %5369 = vmatpush1.bf16.msra.mxu0 %v9851_v26  ;;  %5902 = vmatpush1.bf16.msra.mxu1 %v9854_v36  ;;  %v9942_v26 = vld [vmem:[%s13146_s1 + $0x16c0] ss:$16 sps:$4 sm:$0xff]   ;;  %v9945_v36 = vld [vmem:[%s13146_s1 + $0x16c8] ss:$16 sps:$4 sm:$0xff]  }
 0x2a0   :  { %5370 = vmatprep.subr.bf16.mxu0 %v9859_v37  ;;  %5903 = vmatprep.subr.bf16.mxu1 %v9862_v21  ;;  %v9950_v37 = vld [vmem:[%s13146_s1 + $0x16e4] ss:$16 sps:$4 sm:$0xff]   ;;  %v9953_v21 = vld [vmem:[%s13146_s1 + $0x16ec] ss:$16 sps:$4 sm:$0xff]  }
 0x2a3   :  { %5371 = vmatpush1.bf16.msra.mxu0 %v9857_v39  ;;  %5904 = vmatpush1.bf16.msra.mxu1 %v9860_v40  ;;  %v9948_v39 = vld [vmem:[%s13146_s1 + $0x16e0] ss:$16 sps:$4 sm:$0xff]   ;;  %v9951_v40 = vld [vmem:[%s13146_s1 + $0x16e8] ss:$16 sps:$4 sm:$0xff]  }
 0x2a4   :  { %5372 = vmatprep.subr.bf16.mxu0 %v9865_v41  ;;  %5905 = vmatprep.subr.bf16.mxu1 %v9868_v34  ;;  %v9956_v41 = vld [vmem:[%s13146_s1 + $0x1704] ss:$16 sps:$4 sm:$0xff]   ;;  %v9959_v34 = vld [vmem:[%s13146_s1 + $0x170c] ss:$16 sps:$4 sm:$0xff]  }
 0x2a7   :  { %5373 = vmatpush1.bf16.msra.mxu0 %v9863_v43  ;;  %5906 = vmatpush1.bf16.msra.mxu1 %v9866_v45  ;;  %v9954_v43 = vld [vmem:[%s13146_s1 + $0x1700] ss:$16 sps:$4 sm:$0xff]   ;;  %v9957_v45 = vld [vmem:[%s13146_s1 + $0x1708] ss:$16 sps:$4 sm:$0xff]  }
 0x2a8   :  { %5374 = vmatprep.subr.bf16.mxu0 %v9871_v46  ;;  %5907 = vmatprep.subr.bf16.mxu1 %v9874_v35  ;;  %v9962_v46 = vld [vmem:[%s13146_s1 + $0x1724] ss:$16 sps:$4 sm:$0xff]   ;;  %v9965_v35 = vld [vmem:[%s13146_s1 + $0x172c] ss:$16 sps:$4 sm:$0xff]  }
 0x2ab   :  { %5375 = vmatpush1.bf16.msra.mxu0 %v9869_v50  ;;  %5908 = vmatpush1.bf16.msra.mxu1 %v9872_v53  ;;  %v9960_v50 = vld [vmem:[%s13146_s1 + $0x1720] ss:$16 sps:$4 sm:$0xff]   ;;  %v9963_v53 = vld [vmem:[%s13146_s1 + $0x1728] ss:$16 sps:$4 sm:$0xff]  }
 0x2ac   :  { %5376 = vmatprep.subr.bf16.mxu0 %v9877_v38  ;;  %5909 = vmatprep.subr.bf16.mxu1 %v9880_v54  ;;  %v9968_v38 = vld [vmem:[%s13146_s1 + $0x1744] ss:$16 sps:$4 sm:$0xff]   ;;  %v9971_v54 = vld [vmem:[%s13146_s1 + $0x174c] ss:$16 sps:$4 sm:$0xff]  }
 0x2af   :  { %5377 = vmatpush1.bf16.msra.mxu0 %v9875_v55  ;;  %5910 = vmatpush1.bf16.msra.mxu1 %v9878_v56  ;;  %v9966_v55 = vld [vmem:[%s13146_s1 + $0x1740] ss:$16 sps:$4 sm:$0xff]   ;;  %v9969_v56 = vld [vmem:[%s13146_s1 + $0x1748] ss:$16 sps:$4 sm:$0xff]  }
 0x2b0   :  { %5378 = vmatprep.subr.bf16.mxu0 %v9883_v47  ;;  %5911 = vmatprep.subr.bf16.mxu1 %v9886_v57  ;;  %v9974_v47 = vld [vmem:[%s13146_s1 + $0x1764] ss:$16 sps:$4 sm:$0xff]   ;;  %v9977_v57 = vld [vmem:[%s13146_s1 + $0x176c] ss:$16 sps:$4 sm:$0xff]  }
 0x2b3   :  { %5379 = vmatpush1.bf16.msra.mxu0 %v9881_v58  ;;  %5912 = vmatpush1.bf16.msra.mxu1 %v9884_v59  ;;  %v9972_v58 = vld [vmem:[%s13146_s1 + $0x1760] ss:$16 sps:$4 sm:$0xff]   ;;  %v9975_v59 = vld [vmem:[%s13146_s1 + $0x1768] ss:$16 sps:$4 sm:$0xff]  }
 0x2b4   :  { %5380 = vmatprep.subr.bf16.mxu0 %v9889_v48  ;;  %5913 = vmatprep.subr.bf16.mxu1 %v9892_v61  ;;  %v9980_v48 = vld [vmem:[%s13146_s1 + $0x1784] ss:$16 sps:$4 sm:$0xff]   ;;  %v9983_v61 = vld [vmem:[%s13146_s1 + $0x178c] ss:$16 sps:$4 sm:$0xff]  }
 0x2b7   :  { %5381 = vmatpush1.bf16.msra.mxu0 %v9887_v63  ;;  %5914 = vmatpush1.bf16.msra.mxu1 %v9890_v44  ;;  %v9978_v63 = vld [vmem:[%s13146_s1 + $0x1780] ss:$16 sps:$4 sm:$0xff]   ;;  %v9981_v44 = vld [vmem:[%s13146_s1 + $0x1788] ss:$16 sps:$4 sm:$0xff]  }
 0x2b8   :  { %5382 = vmatprep.subr.bf16.mxu0 %v9895_v1  ;;  %5915 = vmatprep.subr.bf16.mxu1 %v9898_v51  ;;  %v9986_v1 = vld [vmem:[%s13146_s1 + $0x17a4] ss:$16 sps:$4 sm:$0xff]   ;;  %v9989_v51 = vld [vmem:[%s13146_s1 + $0x17ac] ss:$16 sps:$4 sm:$0xff]  }
 0x2bb   :  { %5383 = vmatpush1.bf16.msra.mxu0 %v9893_v2  ;;  %5916 = vmatpush1.bf16.msra.mxu1 %v9896_v3  ;;  %v9984_v2 = vld [vmem:[%s13146_s1 + $0x17a0] ss:$16 sps:$4 sm:$0xff]   ;;  %v9987_v3 = vld [vmem:[%s13146_s1 + $0x17a8] ss:$16 sps:$4 sm:$0xff]  }
 0x2bc   :  { %5384 = vmatprep.subr.bf16.mxu0 %v9901_v4  ;;  %5917 = vmatprep.subr.bf16.mxu1 %v9904_v60  ;;  %v9992_v4 = vld [vmem:[%s13146_s1 + $0x17c4] ss:$16 sps:$4 sm:$0xff]   ;;  %v9995_v60 = vld [vmem:[%s13146_s1 + $0x17cc] ss:$16 sps:$4 sm:$0xff]  }
 0x2bf   :  { %5385 = vmatpush1.bf16.msra.mxu0 %v9899_v5  ;;  %5918 = vmatpush1.bf16.msra.mxu1 %v9902_v6  ;;  %v9990_v5 = vld [vmem:[%s13146_s1 + $0x17c0] ss:$16 sps:$4 sm:$0xff]   ;;  %v9993_v6 = vld [vmem:[%s13146_s1 + $0x17c8] ss:$16 sps:$4 sm:$0xff]  }
 0x2c0   :  { %5395 = vmatprep.subr.bf16.mxu0 %v9908_v7  ;;  %5928 = vmatprep.subr.bf16.mxu1 %v9911_v62  ;;  %v9998_v7 = vld [vmem:[%s13146_s1 + $0x17e4] ss:$16 sps:$4 sm:$0xff]   ;;  %v10001_v62 = vld [vmem:[%s13146_s1 + $0x17ec] ss:$16 sps:$4 sm:$0xff]  }
 0x2c2   :  { %5387 = vmatmul.mubr.bf16.vlgmr.msra.gmra.mrb[0].mxu0 %v12455_v11  ;;  %5920 = vmatmul.mubr.bf16.vlgmr.msra.gmra.mrb[0].mxu1 %v12455_v11 }
 0x2c3   :  { %5396 = vmatpush1.bf16.msra.mxu0 %v9906_v9  ;;  %5929 = vmatpush1.bf16.msra.mxu1 %v9909_v10  ;;  %v9996_v9 = vld [vmem:[%s13146_s1 + $0x17e0] ss:$16 sps:$4 sm:$0xff]   ;;  %v9999_v10 = vld [vmem:[%s13146_s1 + $0x17e8] ss:$16 sps:$4 sm:$0xff]  }
 0x2c4   :  { %5397 = vmatprep.subr.bf16.mxu0 %v9914_v12  ;;  %5930 = vmatprep.subr.bf16.mxu1 %v9917_v52  ;;  %v10004_v12 = vld [vmem:[%s13146_s1 + $0x1804] ss:$16 sps:$4 sm:$0xff]   ;;  %v10007_v52 = vld [vmem:[%s13146_s1 + $0x180c] ss:$16 sps:$4 sm:$0xff]  }
 0x2c5   :  { %5427 = vmatprep.mubr.bf16.mxu0 %v981_v16  ;;  %5960 = vmatprep.mubr.bf16.mxu1 %v981_v16  ;;  %v10005_v16 = vld [vmem:[%s13146_s1 + $0x1808] ss:$16 sps:$4 sm:$0xff]  }
 0x2c7   :  { %5398 = vmatpush1.bf16.msra.mxu0 %v9912_v15  ;;  %5931 = vmatpush1.bf16.msra.mxu1 %v9915_v0  ;;  %v979_v15 = vcombine.high %v12455_v11, %v12455_v11  ;;  %v10002_v0 = vld [vmem:[%s13146_s1 + $0x1800] ss:$16 sps:$4 sm:$0xff]   ;;  %v10013_v11 = vld [vmem:[%s13146_s1 + $0x182c] ss:$16 sps:$4 sm:$0xff]  }
 0x2c8   :  { %5399 = vmatprep.subr.bf16.mxu0 %v9920_v17  ;;  %5932 = vmatprep.subr.bf16.mxu1 %v9923_v18  ;;  %v10010_v17 = vld [vmem:[%s13146_s1 + $0x1824] ss:$16 sps:$4 sm:$0xff]   ;;  %v10008_v18 = vld [vmem:[%s13146_s1 + $0x1820] ss:$16 sps:$4 sm:$0xff]  }
 0x2cb   :  { %5400 = vmatpush1.bf16.msra.mxu0 %v9918_v8  ;;  %5933 = vmatpush1.bf16.msra.mxu1 %v9921_v19  ;;  %v10011_v8 = vld [vmem:[%s13146_s1 + $0x1828] ss:$16 sps:$4 sm:$0xff]   ;;  %v10016_v19 = vld [vmem:[%s13146_s1 + $0x1844] ss:$16 sps:$4 sm:$0xff]  }
 0x2cc   :  { %5401 = vmatprep.subr.bf16.mxu0 %v9926_v20  ;;  %5934 = vmatprep.subr.bf16.mxu1 %v9929_v22  ;;  %v10019_v20 = vld [vmem:[%s13146_s1 + $0x184c] ss:$16 sps:$4 sm:$0xff]   ;;  %v10173_v22 = vmov 0  }
 0x2cf   :  { %5402 = vmatpush1.bf16.msra.mxu0 %v9924_v23  ;;  %5935 = vmatpush1.bf16.msra.mxu1 %v9927_v24  ;;  %v10014_v23 = vld [vmem:[%s13146_s1 + $0x1840] ss:$16 sps:$4 sm:$0xff]   ;;  %v10017_v24 = vld [vmem:[%s13146_s1 + $0x1848] ss:$16 sps:$4 sm:$0xff]  }
 0x2d0   :  { %5403 = vmatprep.subr.bf16.mxu0 %v9932_v13  ;;  %5936 = vmatprep.subr.bf16.mxu1 %v9935_v27  ;;  %v10022_v13 = vld [vmem:[%s13146_s1 + $0x1864] ss:$16 sps:$4 sm:$0xff]   ;;  %v10025_v27 = vld [vmem:[%s13146_s1 + $0x186c] ss:$16 sps:$4 sm:$0xff]  }
 0x2d3   :  { %5404 = vmatpush1.bf16.msra.mxu0 %v9930_v28  ;;  %5937 = vmatpush1.bf16.msra.mxu1 %v9933_v29  ;;  %v10020_v28 = vld [vmem:[%s13146_s1 + $0x1860] ss:$16 sps:$4 sm:$0xff]   ;;  %v10023_v29 = vld [vmem:[%s13146_s1 + $0x1868] ss:$16 sps:$4 sm:$0xff]  }
 0x2d4   :  { %5405 = vmatprep.subr.bf16.mxu0 %v9938_v14  ;;  %5938 = vmatprep.subr.bf16.mxu1 %v9941_v30  ;;  %v7452_v14 = vld.sshfl [vmem:[%s13147_s0 + $0x18] sm:$0x1 pattern:$0x75316420]  ;;  %v10026_v30 = vld [vmem:[%s13148_s3 + $0x40] sm:$0xff]  }
 0x2d7   :  { %5406 = vmatpush1.bf16.msra.mxu0 %v9936_v31  ;;  %5939 = vmatpush1.bf16.msra.mxu1 %v9939_v25  ;;  %v10027_v31 = vld [vmem:[%s13148_s3 + $0xc0] sm:$0xff]   ;;  %v995_v25 = vrot.slane %v7452_v14, %v10339_v49  ;;  %v10031_v49 = vld [vmem:[%s13148_s3 + $0xc8] sm:$0xff]  }
 0x2d8   :  { %5407 = vmatprep.subr.bf16.mxu0 %v9944_v32  ;;  %5940 = vmatprep.subr.bf16.mxu1 %v9947_v33  ;;  %v10028_v32 = vld [vmem:[%s13148_s3] sm:$0xff]  }
 0x2d9   :  { %v10029_v33 = vld [vmem:[%s13148_s3 + $0x80] sm:$0xff]  }
 0x2da   :  { %v10061_v14 = vld [vmem:[%s13148_s3 + $0x180] sm:$0xff]  }
 0x2db   :  { %5408 = vmatpush1.bf16.msra.mxu0 %v9942_v26  ;;  %5941 = vmatpush1.bf16.msra.mxu1 %v9945_v36  ;;  %v10030_v26 = vld [vmem:[%s13148_s3 + $0x48] sm:$0xff]  }
 0x2dc   :  { %5409 = vmatprep.subr.bf16.mxu0 %v9950_v37  ;;  %5942 = vmatprep.subr.bf16.mxu1 %v9953_v21  ;;  %v10032_v36 = vld [vmem:[%s13148_s3 + $0x8] sm:$0xff]   ;;  %v10034_v21 = vld [vmem:[%s13148_s3 + $0x50] sm:$0xff]  }
 0x2dd   :  { %v10033_v37 = vld [vmem:[%s13148_s3 + $0x88] sm:$0xff]  }
 0x2df   :  { %5410 = vmatpush1.bf16.msra.mxu0 %v9948_v39  ;;  %5943 = vmatpush1.bf16.msra.mxu1 %v9951_v40  ;;  %v10035_v39 = vld [vmem:[%s13148_s3 + $0xd0] sm:$0xff]  }
 0x2e0   :  { %5411 = vmatprep.subr.bf16.mxu0 %v9956_v41  ;;  %5944 = vmatprep.subr.bf16.mxu1 %v9959_v34  ;;  %v10036_v40 = vld [vmem:[%s13148_s3 + $0x10] sm:$0xff]   ;;  %v10038_v34 = vld [vmem:[%s13148_s3 + $0x58] sm:$0xff]  }
 0x2e1   :  { %v10037_v41 = vld [vmem:[%s13148_s3 + $0x90] sm:$0xff]  }
 0x2e3   :  { %5412 = vmatpush1.bf16.msra.mxu0 %v9954_v43  ;;  %5945 = vmatpush1.bf16.msra.mxu1 %v9957_v45  ;;  %v10039_v43 = vld [vmem:[%s13148_s3 + $0xd8] sm:$0xff]  }
 0x2e4   :  { %5413 = vmatprep.subr.bf16.mxu0 %v9962_v46  ;;  %5946 = vmatprep.subr.bf16.mxu1 %v9965_v35  ;;  %v10040_v45 = vld [vmem:[%s13148_s3 + $0x18] sm:$0xff]   ;;  %v10042_v35 = vld [vmem:[%s13148_s3 + $0x60] sm:$0xff]  }
 0x2e5   :  { %v10041_v46 = vld [vmem:[%s13148_s3 + $0x98] sm:$0xff]  }
 0x2e7   :  { %5414 = vmatpush1.bf16.msra.mxu0 %v9960_v50  ;;  %5947 = vmatpush1.bf16.msra.mxu1 %v9963_v53  ;;  %v10043_v50 = vld [vmem:[%s13148_s3 + $0xe0] sm:$0xff]  }
 0x2e8   :  { %5415 = vmatprep.subr.bf16.mxu0 %v9968_v38  ;;  %5948 = vmatprep.subr.bf16.mxu1 %v9971_v54  ;;  %v10044_v53 = vld [vmem:[%s13148_s3 + $0x20] sm:$0xff]   ;;  %v10046_v54 = vld [vmem:[%s13148_s3 + $0x68] sm:$0xff]  }
 0x2e9   :  { %v10045_v38 = vld [vmem:[%s13148_s3 + $0xa0] sm:$0xff]  }
 0x2eb   :  { %5416 = vmatpush1.bf16.msra.mxu0 %v9966_v55  ;;  %5949 = vmatpush1.bf16.msra.mxu1 %v9969_v56  ;;  %v10047_v55 = vld [vmem:[%s13148_s3 + $0xe8] sm:$0xff]  }
 0x2ec   :  { %5417 = vmatprep.subr.bf16.mxu0 %v9974_v47  ;;  %5950 = vmatprep.subr.bf16.mxu1 %v9977_v57  ;;  %v10048_v56 = vld [vmem:[%s13148_s3 + $0x28] sm:$0xff]   ;;  %v10050_v57 = vld [vmem:[%s13148_s3 + $0x70] sm:$0xff]  }
 0x2ed   :  { %v10049_v47 = vld [vmem:[%s13148_s3 + $0xa8] sm:$0xff]  }
 0x2ef   :  { %5418 = vmatpush1.bf16.msra.mxu0 %v9972_v58  ;;  %5951 = vmatpush1.bf16.msra.mxu1 %v9975_v59  ;;  %v10051_v58 = vld [vmem:[%s13148_s3 + $0xf0] sm:$0xff]  }
 0x2f0   :  { %5419 = vmatprep.subr.bf16.mxu0 %v9980_v48  ;;  %5952 = vmatprep.subr.bf16.mxu1 %v9983_v61  ;;  %v10052_v59 = vld [vmem:[%s13148_s3 + $0x30] sm:$0xff]   ;;  %v10054_v61 = vld [vmem:[%s13148_s3 + $0x78] sm:$0xff]  }
 0x2f1   :  { %v10053_v48 = vld [vmem:[%s13148_s3 + $0xb0] sm:$0xff]  }
 0x2f3   :  { %5420 = vmatpush1.bf16.msra.mxu0 %v9978_v63  ;;  %5953 = vmatpush1.bf16.msra.mxu1 %v9981_v44  ;;  %v10055_v63 = vld [vmem:[%s13148_s3 + $0xf8] sm:$0xff]  }
 0x2f4   :  { %5421 = vmatprep.subr.bf16.mxu0 %v9986_v1  ;;  %5954 = vmatprep.subr.bf16.mxu1 %v9989_v51  ;;  %v10056_v44 = vld [vmem:[%s13148_s3 + $0x38] sm:$0xff]   ;;  %v10058_v51 = vld [vmem:[%s13148_s3 + $0x140] sm:$0xff]  }
 0x2f5   :  { %v10057_v1 = vld [vmem:[%s13148_s3 + $0xb8] sm:$0xff]  }
 0x2f7   :  { %5422 = vmatpush1.bf16.msra.mxu0 %v9984_v2  ;;  %5955 = vmatpush1.bf16.msra.mxu1 %v9987_v3  ;;  %v10059_v2 = vld [vmem:[%s13148_s3 + $0x1c0] sm:$0xff]   ;;  %v813_v3 = vsub.s32 0, %v10321_v42 }
 0x2f8   :  { %5423 = vmatprep.subr.bf16.mxu0 %v9992_v4  ;;  %5956 = vmatprep.subr.bf16.mxu1 %v9995_v60  ;;  %v821_v4 = vsub.s32 2, %v10321_v42  ;;  %v809_v60 = vld [vmem:[%s13149_s2] sm:$0xf] }
 0x2fb   :  { %5424 = vmatpush1.bf16.msra.mxu0 %v9990_v5  ;;  %5957 = vmatpush1.bf16.msra.mxu1 %v9993_v6  ;;  %v817_v5 = vsub.s32 1, %v10321_v42  ;;  %v825_v6 = vsub.s32 3, %v10321_v42 }
 0x2fc   :  { %5425 = vmatprep.subr.bf16.mxu0 %v9998_v7  ;;  %5958 = vmatprep.subr.bf16.mxu1 %v10001_v62  ;;  %v814_v7 = vrot.slane %v809_v60, %v813_v3  ;;  %v822_v62 = vrot.slane %v809_v60, %v821_v4  ;;  %v10095_v3 = vld [vmem:[%s13148_s3 + $0x2c8] sm:$0xff]  }
 0x2fd   :  { %v10096_v4 = vld [vmem:[%s13148_s3 + $0x208] sm:$0xff]  }
 0x2ff   :  { %5426 = vmatpush1.bf16.msra.mxu0 %v9996_v9  ;;  %5959 = vmatpush1.bf16.msra.mxu1 %v9999_v10  ;;  %v818_v9 = vrot.slane %v809_v60, %v817_v5  ;;  %v826_v10 = vrot.slane %v809_v60, %v825_v6  ;;  %v10097_v60 = vld [vmem:[%s13148_s3 + $0x288] sm:$0xff]   ;;  %v10098_v5 = vld [vmem:[%s13148_s3 + $0x250] sm:$0xff]  }
 0x300   :  { %5436 = vmatprep.subr.bf16.mxu0 %v10004_v12  ;;  %5969 = vmatprep.subr.bf16.mxu1 %v10007_v52  ;;  %v10099_v6 = vld [vmem:[%s13148_s3 + $0x2d0] sm:$0xff]  }
 0x302   :  { %5428 = vmatmul.mubr.bf16.vlgmr.msra.gmra.mrb[0].mxu0 %v979_v15  ;;  %5961 = vmatmul.mubr.bf16.vlgmr.msra.gmra.mrb[0].mxu1 %v979_v15 }
 0x303   :  { %5437 = vmatpush1.bf16.msra.mxu0 %v10002_v0  ;;  %5970 = vmatpush1.bf16.msra.mxu1 %v10005_v16 }
 0x304   :  { %5438 = vmatprep.subr.bf16.mxu0 %v10010_v17  ;;  %5971 = vmatprep.subr.bf16.mxu1 %v10013_v11 }
 0x305   :  { %5468 = vmatprep.mubr.bf16.mxu0 %v10173_v22  ;;  %6001 = vmatprep.mubr.bf16.mxu1 %v10173_v22 }
 0x307   :  { %5439 = vmatpush1.bf16.msra.mxu0 %v10008_v18  ;;  %5972 = vmatpush1.bf16.msra.mxu1 %v10011_v8 }
 0x308   :  { %5440 = vmatprep.subr.bf16.mxu0 %v10016_v19  ;;  %5973 = vmatprep.subr.bf16.mxu1 %v10019_v20 }
 0x30b   :  { %5441 = vmatpush1.bf16.msra.mxu0 %v10014_v23  ;;  %5974 = vmatpush1.bf16.msra.mxu1 %v10017_v24 }
 0x30c   :  { %5442 = vmatprep.subr.bf16.mxu0 %v10022_v13  ;;  %5975 = vmatprep.subr.bf16.mxu1 %v10025_v27 }
 0x30f   :  { %5443 = vmatpush1.bf16.msra.mxu0 %v10020_v28  ;;  %5976 = vmatpush1.bf16.msra.mxu1 %v10023_v29  ;;  %v10060_v29 = vld [vmem:[%s13148_s3 + $0x100] sm:$0xff]  }
 0x310   :  { %8569 = vmatprep.subr.bf16.mxu0 %v10026_v30  ;;  %8591 = vmatprep.subr.bf16.mxu1 %v10027_v31 }
 0x312   :  { %8237 = vmatmul.mubr.msk.bf16.vlgmr.msra.gmra.mrb[0].mxu0 %vm4940_vm0, %v995_v25  ;;  %8238 = vmatmul.mubr.msk.bf16.vlgmr.msra.gmra.mrb[0].mxu1 %vm4940_vm0, %v995_v25  ;;  %v10062_v25 = vld [vmem:[%s13148_s3 + $0x148] sm:$0xff]  }
 0x313   :  { %8570 = vmatpush3.bf16.msra.mxu0 %v10028_v32  ;;  %8592 = vmatpush3.bf16.msra.mxu1 %v10029_v33  ;;  %v10063_v32 = vld [vmem:[%s13148_s3 + $0x1c8] sm:$0xff]  }
 0x314   :  { %8571 = vmatprep.subr.bf16.mxu0 %v10030_v26  ;;  %8593 = vmatprep.subr.bf16.mxu1 %v10031_v49  ;;  %v10064_v33 = vld [vmem:[%s13148_s3 + $0x108] sm:$0xff]   ;;  %v10066_v49 = vld [vmem:[%s13148_s3 + $0x150] sm:$0xff]  }
 0x315   :  { %v10065_v26 = vld [vmem:[%s13148_s3 + $0x188] sm:$0xff]  }
 0x317   :  { %8572 = vmatpush3.bf16.msra.mxu0 %v10032_v36  ;;  %8594 = vmatpush3.bf16.msra.mxu1 %v10033_v37  ;;  %v10067_v36 = vld [vmem:[%s13148_s3 + $0x1d0] sm:$0xff]  }
 0x318   :  { %8573 = vmatprep.subr.bf16.mxu0 %v10034_v21  ;;  %8595 = vmatprep.subr.bf16.mxu1 %v10035_v39  ;;  %v10068_v37 = vld [vmem:[%s13148_s3 + $0x110] sm:$0xff]   ;;  %v10070_v39 = vld [vmem:[%s13148_s3 + $0x158] sm:$0xff]  }
 0x319   :  { %v10069_v21 = vld [vmem:[%s13148_s3 + $0x190] sm:$0xff]  }
 0x31b   :  { %8574 = vmatpush3.bf16.msra.mxu0 %v10036_v40  ;;  %8596 = vmatpush3.bf16.msra.mxu1 %v10037_v41  ;;  %v10071_v40 = vld [vmem:[%s13148_s3 + $0x1d8] sm:$0xff]  }
 0x31c   :  { %8575 = vmatprep.subr.bf16.mxu0 %v10038_v34  ;;  %8597 = vmatprep.subr.bf16.mxu1 %v10039_v43  ;;  %v10072_v41 = vld [vmem:[%s13148_s3 + $0x118] sm:$0xff]   ;;  %v10074_v43 = vld [vmem:[%s13148_s3 + $0x160] sm:$0xff]  }
 0x31d   :  { %v10073_v34 = vld [vmem:[%s13148_s3 + $0x198] sm:$0xff]  }
 0x31f   :  { %8576 = vmatpush3.bf16.msra.mxu0 %v10040_v45  ;;  %8598 = vmatpush3.bf16.msra.mxu1 %v10041_v46  ;;  %v10075_v45 = vld [vmem:[%s13148_s3 + $0x1e0] sm:$0xff]  }
 0x320   :  { %8577 = vmatprep.subr.bf16.mxu0 %v10042_v35  ;;  %8599 = vmatprep.subr.bf16.mxu1 %v10043_v50  ;;  %v10076_v46 = vld [vmem:[%s13148_s3 + $0x120] sm:$0xff]   ;;  %v10078_v50 = vld [vmem:[%s13148_s3 + $0x168] sm:$0xff]  }
 0x321   :  { %v10077_v35 = vld [vmem:[%s13148_s3 + $0x1a0] sm:$0xff]  }
 0x323   :  { %8578 = vmatpush3.bf16.msra.mxu0 %v10044_v53  ;;  %8600 = vmatpush3.bf16.msra.mxu1 %v10045_v38  ;;  %v10079_v53 = vld [vmem:[%s13148_s3 + $0x1e8] sm:$0xff]  }
 0x324   :  { %8579 = vmatprep.subr.bf16.mxu0 %v10046_v54  ;;  %8601 = vmatprep.subr.bf16.mxu1 %v10047_v55  ;;  %v10080_v38 = vld [vmem:[%s13148_s3 + $0x128] sm:$0xff]   ;;  %v10082_v55 = vld [vmem:[%s13148_s3 + $0x170] sm:$0xff]  }
 0x325   :  { %v10081_v54 = vld [vmem:[%s13148_s3 + $0x1a8] sm:$0xff]  }
 0x327   :  { %8580 = vmatpush3.bf16.msra.mxu0 %v10048_v56  ;;  %8602 = vmatpush3.bf16.msra.mxu1 %v10049_v47  ;;  %v10083_v56 = vld [vmem:[%s13148_s3 + $0x1f0] sm:$0xff]  }
 0x328   :  { %8581 = vmatprep.subr.bf16.mxu0 %v10050_v57  ;;  %8603 = vmatprep.subr.bf16.mxu1 %v10051_v58  ;;  %v10084_v47 = vld [vmem:[%s13148_s3 + $0x130] sm:$0xff]   ;;  %v10086_v58 = vld [vmem:[%s13148_s3 + $0x178] sm:$0xff]  }
 0x329   :  { %v10085_v57 = vld [vmem:[%s13148_s3 + $0x1b0] sm:$0xff]  }
 0x32b   :  { %8582 = vmatpush3.bf16.msra.mxu0 %v10052_v59  ;;  %8604 = vmatpush3.bf16.msra.mxu1 %v10053_v48  ;;  %v10087_v59 = vld [vmem:[%s13148_s3 + $0x1f8] sm:$0xff]  }
 0x32c   :  { %8583 = vmatprep.subr.bf16.mxu0 %v10054_v61  ;;  %8605 = vmatprep.subr.bf16.mxu1 %v10055_v63  ;;  %v10088_v48 = vld [vmem:[%s13148_s3 + $0x138] sm:$0xff]   ;;  %v10090_v63 = vld [vmem:[%s13148_s3 + $0x240] sm:$0xff]  }
 0x32d   :  { %v10089_v61 = vld [vmem:[%s13148_s3 + $0x1b8] sm:$0xff]  }
 0x32f   :  { %8584 = vmatpush3.bf16.msra.mxu0 %v10056_v44  ;;  %8606 = vmatpush3.bf16.msra.mxu1 %v10057_v1  ;;  %v10091_v44 = vld [vmem:[%s13148_s3 + $0x2c0] sm:$0xff]  }
 0x330   :  { %8613 = vmatprep.subr.bf16.mxu0 %v10058_v51  ;;  %8635 = vmatprep.subr.bf16.mxu1 %v10059_v2  ;;  %v10092_v1 = vld [vmem:[%s13148_s3 + $0x200] sm:$0xff]   ;;  %v10094_v2 = vld [vmem:[%s13148_s3 + $0x248] sm:$0xff]  }
 0x331   :  { %v10093_v51 = vld [vmem:[%s13148_s3 + $0x280] sm:$0xff]  }
 0x3e5   :  { %v5470_v12 = vpop.f32.mrb[0].mxu0  ;;  %v6003_v52 = vpop.f32.mrb[0].mxu1 }
 0x3e6   :  { %v8745_v15 = vadd.f32 %v5470_v12, %v814_v7  ;;  %v8747_v0 = vadd.f32 %v6003_v52, %v822_v62  ;;  %v5472_v16 = vpop.f32.mrb[1].mxu0  ;;  %v6005_v17 = vpop.f32.mrb[1].mxu1  ;;  %v10100_v7 = vld [vmem:[%s13148_s3 + $0x210] sm:$0xff]   ;;  %v10104_v12 = vld [vmem:[%s13148_s3 + $0x218] sm:$0xff]  }
 0x3e7   :  { %v8746_v11 = vadd.f32 %v5472_v16, %v818_v9  ;;  %v8748_v18 = vadd.f32 %v6005_v17, %v826_v10  ;;  %v5474_v8 = vpop.f32.mrb[2].mxu0  ;;  %v6007_v19 = vpop.f32.mrb[2].mxu1  ;;  %v10101_v62 = vld [vmem:[%s13148_s3 + $0x290] sm:$0xff]   ;;  %v10102_v9 = vld [vmem:[%s13148_s3 + $0x258] sm:$0xff]   ;;  %v10108_v16 = vld [vmem:[%s13148_s3 + $0x220] sm:$0xff]  }
 0x3e8   :  { %v6010_v20 = vmax.f32 %v8745_v15, 0.0  ;;  %v6012_v22 = vmax.f32 %v8747_v0, 0.0  ;;  %v5475_v23 = vpop.f32.mrb[3].mxu0  ;;  %v6008_v24 = vpop.f32.mrb[3].mxu1  ;;  %v10103_v10 = vld [vmem:[%s13148_s3 + $0x2d8] sm:$0xff]   ;;  %v10106_v15 = vld [vmem:[%s13148_s3 + $0x260] sm:$0xff]  }
 0x3e9   :  { %v6011_v13 = vmax.f32 %v8746_v11, 0.0  ;;  %v6013_v42 = vmax.f32 %v8748_v18, 0.0  ;;  %v10105_v52 = vld [vmem:[%s13148_s3 + $0x298] sm:$0xff]   ;;  %v10107_v0 = vld [vmem:[%s13148_s3 + $0x2e0] sm:$0xff]   ;;  %v10110_v11 = vld [vmem:[%s13148_s3 + $0x268] sm:$0xff]  }
 0x3ea   :  { %v12814_v30 = vpack.c.bf16 %v6010_v20, %v6010_v20  ;;  %v12816_v31 = vpack.c.bf16 %v6012_v22, %v6012_v22  ;;  %v10109_v17 = vld [vmem:[%s13148_s3 + $0x2a0] sm:$0xff]   ;;  %v10111_v18 = vld [vmem:[%s13148_s3 + $0x2e8] sm:$0xff]   ;;  %v10114_v20 = vld [vmem:[%s13148_s3 + $0x270] sm:$0xff]  }
 0x3eb   :  { %v12804_v27 = vpack.c.bf16 %v6011_v13, %v6011_v13  ;;  %v12806_v28 = vpack.c.bf16 %v6013_v42, %v6013_v42  ;;  %v10112_v8 = vld [vmem:[%s13148_s3 + $0x228] sm:$0xff]   ;;  %v10115_v22 = vld [vmem:[%s13148_s3 + $0x2f0] sm:$0xff]   ;;  %v10118_v13 = vld [vmem:[%s13148_s3 + $0x278] sm:$0xff]  }
 0x3ec   :  { %v10113_v19 = vld [vmem:[%s13148_s3 + $0x2a8] sm:$0xff]   ;;  %v10116_v23 = vld [vmem:[%s13148_s3 + $0x230] sm:$0xff]   ;;  %v10119_v42 = vld [vmem:[%s13148_s3 + $0x2f8] sm:$0xff]  }
 0x3ed   :  { %6313 = vmatprep.mubr.bf16.mxu0 %v12804_v27  ;;  %6353 = vmatprep.mubr.bf16.mxu1 %v12806_v28  ;;  %v10117_v24 = vld [vmem:[%s13148_s3 + $0x2b0] sm:$0xff]  }
 0x3ee   :  { %6314 = vmatmul.mubr.bf16.vlgmr.msra.gmra.mrb[4].mxu0 %v12814_v30  ;;  %6354 = vmatmul.mubr.bf16.vlgmr.msra.gmra.mrb[4].mxu1 %v12816_v31 }
 0x3ef   :  { %8614 = vmatpush3.bf16.msra.mxu0 %v10060_v29  ;;  %8636 = vmatpush3.bf16.msra.mxu1 %v10061_v14  ;;  %v10120_v29 = vld [vmem:[%s13148_s3 + $0x238] sm:$0xff]  }
 0x3f0   :  { %6671 = vmatprep.mubr.bf16.mxu0 %v12804_v27  ;;  %6711 = vmatprep.mubr.bf16.mxu1 %v12806_v28  ;;  %v10121_v14 = vld [vmem:[%s13148_s3 + $0x2b8] sm:$0xff]  }
 0x3f1   :  { %8615 = vmatprep.subr.bf16.mxu0 %v10062_v25  ;;  %8637 = vmatprep.subr.bf16.mxu1 %v10063_v32  ;;  %v10122_v25 = vld [vmem:[%s13148_s3 + $0x340] sm:$0xff]  }
 0x3f2   :  { %v10123_v32 = vld [vmem:[%s13148_s3 + $0x3c0] sm:$0xff]  }
 0x3f3   :  { %8616 = vmatpush3.bf16.msra.mxu0 %v10064_v33  ;;  %8638 = vmatpush3.bf16.msra.mxu1 %v10065_v26  ;;  %v10124_v33 = vld [vmem:[%s13148_s3 + $0x300] sm:$0xff]  }
 0x3f4   :  { %8617 = vmatprep.subr.bf16.mxu0 %v10066_v49  ;;  %8639 = vmatprep.subr.bf16.mxu1 %v10067_v36  ;;  %v10125_v26 = vld [vmem:[%s13148_s3 + $0x380] sm:$0xff]   ;;  %v10126_v49 = vld [vmem:[%s13148_s3 + $0x348] sm:$0xff]  }
 0x3f5   :  { %v10127_v36 = vld [vmem:[%s13148_s3 + $0x3c8] sm:$0xff]  }
 0x3f7   :  { %8618 = vmatpush3.bf16.msra.mxu0 %v10068_v37  ;;  %8640 = vmatpush3.bf16.msra.mxu1 %v10069_v21  ;;  %v10128_v37 = vld [vmem:[%s13148_s3 + $0x308] sm:$0xff]  }
 0x3f8   :  { %8619 = vmatprep.subr.bf16.mxu0 %v10070_v39  ;;  %8641 = vmatprep.subr.bf16.mxu1 %v10071_v40  ;;  %v10129_v21 = vld [vmem:[%s13148_s3 + $0x388] sm:$0xff]   ;;  %v10130_v39 = vld [vmem:[%s13148_s3 + $0x350] sm:$0xff]  }
 0x3f9   :  { %v10131_v40 = vld [vmem:[%s13148_s3 + $0x3d0] sm:$0xff]  }
 0x3fb   :  { %8620 = vmatpush3.bf16.msra.mxu0 %v10072_v41  ;;  %8642 = vmatpush3.bf16.msra.mxu1 %v10073_v34  ;;  %v10133_v41 = vld [vmem:[%s13148_s3 + $0x390] sm:$0xff]   ;;  %v10135_v34 = vld [vmem:[%s13148_s3 + $0x3d8] sm:$0xff]  }
 0x3fc   :  { %8621 = vmatprep.subr.bf16.mxu0 %v10074_v43  ;;  %8643 = vmatprep.subr.bf16.mxu1 %v10075_v45  ;;  %v10136_v43 = vld [vmem:[%s13148_s3 + $0x318] sm:$0xff]  }
 0x3fd   :  { %v10137_v45 = vld [vmem:[%s13148_s3 + $0x398] sm:$0xff]  }
 0x3ff   :  { %8622 = vmatpush3.bf16.msra.mxu0 %v10076_v46  ;;  %8644 = vmatpush3.bf16.msra.mxu1 %v10077_v35  ;;  %v10138_v46 = vld [vmem:[%s13148_s3 + $0x360] sm:$0xff]  }
 0x400   :  { %8623 = vmatprep.subr.bf16.mxu0 %v10078_v50  ;;  %8645 = vmatprep.subr.bf16.mxu1 %v10079_v53  ;;  %v10139_v35 = vld [vmem:[%s13148_s3 + $0x3e0] sm:$0xff]  }
 0x401   :  { %v10140_v50 = vld [vmem:[%s13148_s3 + $0x320] sm:$0xff]  }
 0x402   :  { %v10141_v53 = vld [vmem:[%s13148_s3 + $0x3a0] sm:$0xff]  }
 0x403   :  { %8624 = vmatpush3.bf16.msra.mxu0 %v10080_v38  ;;  %8646 = vmatpush3.bf16.msra.mxu1 %v10081_v54  ;;  %v10142_v38 = vld [vmem:[%s13148_s3 + $0x368] sm:$0xff]  }
 0x404   :  { %8625 = vmatprep.subr.bf16.mxu0 %v10082_v55  ;;  %8647 = vmatprep.subr.bf16.mxu1 %v10083_v56  ;;  %v10143_v54 = vld [vmem:[%s13148_s3 + $0x3e8] sm:$0xff]  }
 0x405   :  { %v10144_v55 = vld [vmem:[%s13148_s3 + $0x328] sm:$0xff]  }
 0x406   :  { %v10145_v56 = vld [vmem:[%s13148_s3 + $0x3a8] sm:$0xff]  }
 0x407   :  { %8626 = vmatpush3.bf16.msra.mxu0 %v10084_v47  ;;  %8648 = vmatpush3.bf16.msra.mxu1 %v10085_v57  ;;  %v10146_v47 = vld [vmem:[%s13148_s3 + $0x370] sm:$0xff]  }
 0x408   :  { %8627 = vmatprep.subr.bf16.mxu0 %v10086_v58  ;;  %8649 = vmatprep.subr.bf16.mxu1 %v10087_v59  ;;  %v10147_v57 = vld [vmem:[%s13148_s3 + $0x3f0] sm:$0xff]  }
 0x409   :  { %v10148_v58 = vld [vmem:[%s13148_s3 + $0x330] sm:$0xff]  }
 0x40a   :  { %v10149_v59 = vld [vmem:[%s13148_s3 + $0x3b0] sm:$0xff]  }
 0x40b   :  { %8628 = vmatpush3.bf16.msra.mxu0 %v10088_v48  ;;  %8650 = vmatpush3.bf16.msra.mxu1 %v10089_v61  ;;  %v10150_v48 = vld [vmem:[%s13148_s3 + $0x378] sm:$0xff]  }
 0x40c   :  { %8657 = vmatprep.subr.bf16.mxu0 %v10090_v63  ;;  %8679 = vmatprep.subr.bf16.mxu1 %v10091_v44  ;;  %v10151_v61 = vld [vmem:[%s13148_s3 + $0x3f8] sm:$0xff]  }
 0x40d   :  { %v10152_v63 = vld [vmem:[%s13148_s3 + $0x338] sm:$0xff]  }
 0x40e   :  { %6672 = vmatmul.mubr.bf16.vlgmr.msra.gmra.mrb[8].mxu0 %v12814_v30  ;;  %6712 = vmatmul.mubr.bf16.vlgmr.msra.gmra.mrb[8].mxu1 %v12816_v31  ;;  %v10153_v44 = vld [vmem:[%s13148_s3 + $0x3b8] sm:$0xff]  }
 0x40f   :  { %8658 = vmatpush3.bf16.msra.mxu0 %v10092_v1  ;;  %7029 = vmatprep.mubr.bf16.mxu0 %v12804_v27 }
 0x410   :  { %8680 = vmatpush3.bf16.msra.mxu1 %v10093_v51  ;;  %7069 = vmatprep.mubr.bf16.mxu1 %v12806_v28 }
 0x411   :  { %8659 = vmatprep.subr.bf16.mxu0 %v10094_v2  ;;  %8681 = vmatprep.subr.bf16.mxu1 %v10095_v3  ;;  %v8239_v2 = vld [vmem:[%s13150_s4] ss:$0 sm:$0xff] }
 0x413   :  { %8660 = vmatpush3.bf16.msra.mxu0 %v10096_v4 }
 0x414   :  { %8682 = vmatpush3.bf16.msra.mxu1 %v10097_v60  ;;  %8661 = vmatprep.subr.bf16.mxu0 %v10098_v5 }
 0x415   :  { %8683 = vmatprep.subr.bf16.mxu1 %v10099_v6 }
 0x417   :  { %8662 = vmatpush3.bf16.msra.mxu0 %v10100_v7 }
 0x418   :  { %8684 = vmatpush3.bf16.msra.mxu1 %v10101_v62  ;;  %8663 = vmatprep.subr.bf16.mxu0 %v10102_v9 }
 0x419   :  { %8685 = vmatprep.subr.bf16.mxu1 %v10103_v10 }
 0x41b   :  { %8664 = vmatpush3.bf16.msra.mxu0 %v10104_v12 }
 0x41c   :  { %8686 = vmatpush3.bf16.msra.mxu1 %v10105_v52  ;;  %8665 = vmatprep.subr.bf16.mxu0 %v10106_v15  ;;  %v8337_v15 = vld [vmem:[%s13150_s4 + $0x1] ss:$0 sm:$0xff] }
 0x41d   :  { %8687 = vmatprep.subr.bf16.mxu1 %v10107_v0 }
 0x41f   :  { %8666 = vmatpush3.bf16.msra.mxu0 %v10108_v16 }
 0x420   :  { %8688 = vmatpush3.bf16.msra.mxu1 %v10109_v17  ;;  %8667 = vmatprep.subr.bf16.mxu0 %v10110_v11 }
 0x421   :  { %8689 = vmatprep.subr.bf16.mxu1 %v10111_v18 }
 0x423   :  { %8668 = vmatpush3.bf16.msra.mxu0 %v10112_v8 }
 0x424   :  { %8690 = vmatpush3.bf16.msra.mxu1 %v10113_v19  ;;  %8669 = vmatprep.subr.bf16.mxu0 %v10114_v20 }
 0x425   :  { %8691 = vmatprep.subr.bf16.mxu1 %v10115_v22 }
 0x427   :  { %8670 = vmatpush3.bf16.msra.mxu0 %v10116_v23 }
 0x428   :  { %8692 = vmatpush3.bf16.msra.mxu1 %v10117_v24  ;;  %8671 = vmatprep.subr.bf16.mxu0 %v10118_v13 }
 0x429   :  { %8693 = vmatprep.subr.bf16.mxu1 %v10119_v42 }
 0x42b   :  { %8672 = vmatpush3.bf16.msra.mxu0 %v10120_v29  ;;  %v8436_v29 = vld [vmem:[%s13150_s4 + $0x2] ss:$0 sm:$0xff] }
 0x42c   :  { %8694 = vmatpush3.bf16.msra.mxu1 %v10121_v14  ;;  %8701 = vmatprep.subr.bf16.mxu0 %v10122_v25 }
 0x42d   :  { %8723 = vmatprep.subr.bf16.mxu1 %v10123_v32 }
 0x42e   :  { %7030 = vmatmul.mubr.bf16.vlgmr.msra.gmra.mrb[12].mxu0 %v12814_v30 }
 0x42f   :  { %7070 = vmatmul.mubr.bf16.vlgmr.msra.gmra.mrb[12].mxu1 %v12816_v31  ;;  %8702 = vmatpush3.bf16.msra.mxu0 %v10124_v33 }
 0x430   :  { %7387 = vmatprep.mubr.bf16.mxu0 %v12804_v27  ;;  %8724 = vmatpush3.bf16.msra.mxu1 %v10125_v26  ;;  %v10132_v27 = vld [vmem:[%s13148_s3 + $0x310] sm:$0xff]  }
 0x431   :  { %7427 = vmatprep.mubr.bf16.mxu1 %v12806_v28  ;;  %8703 = vmatprep.subr.bf16.mxu0 %v10126_v49  ;;  %v10134_v28 = vld [vmem:[%s13148_s3 + $0x358] sm:$0xff]  }
 0x432   :  { %8725 = vmatprep.subr.bf16.mxu1 %v10127_v36 }
 0x433   :  { %8704 = vmatpush3.bf16.msra.mxu0 %v10128_v37 }
 0x434   :  { %8726 = vmatpush3.bf16.msra.mxu1 %v10129_v21  ;;  %8705 = vmatprep.subr.bf16.mxu0 %v10130_v39 }
 0x435   :  { %8727 = vmatprep.subr.bf16.mxu1 %v10131_v40 }
 0x437   :  { %8706 = vmatpush3.bf16.msra.mxu0 %v10132_v27 }
 0x438   :  { %8728 = vmatpush3.bf16.msra.mxu1 %v10133_v41  ;;  %8707 = vmatprep.subr.bf16.mxu0 %v10134_v28  ;;  %v8535_v28 = vld [vmem:[%s13150_s4 + $0x3] ss:$0 sm:$0xff] }
 0x439   :  { %8729 = vmatprep.subr.bf16.mxu1 %v10135_v34 }
 0x43b   :  { %8708 = vmatpush3.bf16.msra.mxu0 %v10136_v43 }
 0x43c   :  { %8730 = vmatpush3.bf16.msra.mxu1 %v10137_v45  ;;  %8709 = vmatprep.subr.bf16.mxu0 %v10138_v46 }
 0x43d   :  { %8731 = vmatprep.subr.bf16.mxu1 %v10139_v35 }
 0x43f   :  { %8710 = vmatpush3.bf16.msra.mxu0 %v10140_v50 }
 0x440   :  { %8732 = vmatpush3.bf16.msra.mxu1 %v10141_v53  ;;  %8711 = vmatprep.subr.bf16.mxu0 %v10142_v38 }
 0x441   :  { %8733 = vmatprep.subr.bf16.mxu1 %v10143_v54 }
 0x443   :  { %8712 = vmatpush3.bf16.msra.mxu0 %v10144_v55 }
 0x444   :  { %8734 = vmatpush3.bf16.msra.mxu1 %v10145_v56  ;;  %8713 = vmatprep.subr.bf16.mxu0 %v10146_v47 }
 0x445   :  { %8735 = vmatprep.subr.bf16.mxu1 %v10147_v57 }
 0x447   :  { %8714 = vmatpush3.bf16.msra.mxu0 %v10148_v58 }
 0x448   :  { %8736 = vmatpush3.bf16.msra.mxu1 %v10149_v59  ;;  %8715 = vmatprep.subr.bf16.mxu0 %v10150_v48 }
 0x449   :  { %8737 = vmatprep.subr.bf16.mxu1 %v10151_v61 }
 0x44b   :  { %8716 = vmatpush3.bf16.msra.mxu0 %v10152_v63 }
 0x44c   :  { %8738 = vmatpush3.bf16.msra.mxu1 %v10153_v44 }
 0x44e   :  { %7388 = vmatmul.mubr.bf16.vlgmr.msra.gmra.mrb[16].mxu0 %v12814_v30 }
 0x44f   :  { %7428 = vmatmul.mubr.bf16.vlgmr.msra.gmra.mrb[16].mxu1 %v12816_v31 }
 0x4c1   :  { %v8585_v1 = vpop.f32.mrb[4].mxu0  ;;  %v8607_v51 = vpop.f32.mrb[4].mxu1 }
 0x4c2   :  { %v8586_v3 = vpop.f32.mrb[5].mxu0  ;;  %v8608_v4 = vpop.f32.mrb[5].mxu1 }
 0x4c3   :  { %v8587_v60 = vadd.f32 %v8586_v3, %v8585_v1  ;;  %v8609_v5 = vadd.f32 %v8608_v4, %v8607_v51  ;;  %v8588_v6 = vpop.f32.mrb[6].mxu0  ;;  %v8610_v7 = vpop.f32.mrb[6].mxu1 }
 0x4c4   :  { %v8589_v62 = vpop.f32.mrb[7].mxu0  ;;  %v8611_v9 = vpop.f32.mrb[7].mxu1 }
 0x4c5   :  { %v6316_v10 = vadd.f32 %v8587_v60, %v8239_v2 }
 0x4c7   :  { %v6356_v12 = vadd.f32 %v8609_v5, %v6316_v10 }
 0x4c9   :  { %v6362_v30 = vsel %vm6361_vm1, %v6356_v12, -inf }
 0x4ca   :  { %6363 = vmax.xlane.f32.xlu0 %v6362_v30 }
 0x4e1   :  { %v8629_v31 = vpop.f32.mrb[8].mxu0  ;;  %v8651_v52 = vpop.f32.mrb[8].mxu1 }
 0x4e2   :  { %v8630_v0 = vpop.f32.mrb[9].mxu0  ;;  %v8652_v16 = vpop.f32.mrb[9].mxu1 }
 0x4e3   :  { %v8631_v17 = vadd.f32 %v8630_v0, %v8629_v31  ;;  %v8653_v11 = vadd.f32 %v8652_v16, %v8651_v52  ;;  %v8632_v18 = vpop.f32.mrb[10].mxu0  ;;  %v8654_v8 = vpop.f32.mrb[10].mxu1 }
 0x4e4   :  { %v8633_v19 = vpop.f32.mrb[11].mxu0  ;;  %v8655_v20 = vpop.f32.mrb[11].mxu1 }
 0x4e5   :  { %v6674_v22 = vadd.f32 %v8631_v17, %v8337_v15 }
 0x4e7   :  { %v6714_v23 = vadd.f32 %v8653_v11, %v6674_v22 }
 0x4e9   :  { %v6719_v24 = vsel %vm6361_vm1, %v6714_v23, -inf }
 0x4ea   :  { %6720 = vmax.xlane.f32.xlu0 %v6719_v24 }
 0x501   :  { %v8673_v13 = vpop.f32.mrb[12].mxu0 }
 0x502   :  { %v8695_v42 = vpop.f32.mrb[12].mxu1  ;;  %v8674_v14 = vpop.f32.mrb[13].mxu0 }
 0x503   :  { %v8675_v25 = vadd.f32 %v8674_v14, %v8673_v13  ;;  %v8696_v32 = vpop.f32.mrb[13].mxu1  ;;  %v8676_v33 = vpop.f32.mrb[14].mxu0 }
 0x504   :  { %v8697_v26 = vadd.f32 %v8696_v32, %v8695_v42  ;;  %v8698_v49 = vpop.f32.mrb[14].mxu1  ;;  %v8677_v36 = vpop.f32.mrb[15].mxu0 }
 0x505   :  { %v7032_v37 = vadd.f32 %v8675_v25, %v8436_v29  ;;  %v8699_v21 = vpop.f32.mrb[15].mxu1 }
 0x507   :  { %v7072_v39 = vadd.f32 %v8697_v26, %v7032_v37 }
 0x509   :  { %v7077_v40 = vsel %vm6361_vm1, %v7072_v39, -inf }
 0x50a   :  { %7078 = vmax.xlane.f32.xlu1 %v7077_v40 }
 0x521   :  { %v8717_v27 = vpop.f32.mrb[16].mxu0 }
 0x522   :  { %v8739_v41 = vpop.f32.mrb[16].mxu1  ;;  %v8718_v34 = vpop.f32.mrb[17].mxu0 }
 0x523   :  { %v8719_v43 = vadd.f32 %v8718_v34, %v8717_v27  ;;  %v8740_v45 = vpop.f32.mrb[17].mxu1  ;;  %v8720_v46 = vpop.f32.mrb[18].mxu0 }
 0x524   :  { %v8741_v35 = vadd.f32 %v8740_v45, %v8739_v41  ;;  %v8742_v50 = vpop.f32.mrb[18].mxu1  ;;  %v8721_v53 = vpop.f32.mrb[19].mxu0 }
 0x525   :  { %v7390_v38 = vadd.f32 %v8719_v43, %v8535_v28  ;;  %v8743_v54 = vpop.f32.mrb[19].mxu1 }
 0x527   :  { %v7430_v55 = vadd.f32 %v8741_v35, %v7390_v38 }
 0x529   :  { %v7435_v56 = vsel %vm6361_vm1, %v7430_v55, -inf }
 0x52a   :  { %7436 = vmax.xlane.f32.xlu1 %v7435_v56 }
 0x557   :  { %v6364_v47 = vpop.xlane.xlu0 %6363 }
 0x558   :  { %v6365_v57 = vsub.f32 %v6356_v12, %v6364_v47 }
 0x55a   :  { %v6366_v58 = vmul.f32 1.442695, %v6365_v57 }
 0x55c   :  { %10154 = vpow2.f32 %v6366_v58 }
 0x566   :  { %v10155_v59 = vpop.eup %10154 }
 0x567   :  { %v6368_v48 = vsel %vm6361_vm1, %v10155_v59, 0.0 }
 0x568   :  { %6369 = vadd.xlane.f32.xlu0 %v6368_v48 }
 0x577   :  { %v6721_v61 = vpop.xlane.xlu0 %6720 }
 0x578   :  { %v6722_v63 = vsub.f32 %v6714_v23, %v6721_v61 }
 0x57a   :  { %v6723_v44 = vmul.f32 1.442695, %v6722_v63 }
 0x57c   :  { %10156 = vpow2.f32 %v6723_v44 }
 0x586   :  { %v10157_v1 = vpop.eup %10156 }
 0x587   :  { %v6725_v51 = vsel %vm6361_vm1, %v10157_v1, 0.0 }
 0x588   :  { %6726 = vadd.xlane.f32.xlu1 %v6725_v51 }
 0x597   :  { %v7079_v2 = vpop.xlane.xlu1 %7078 }
 0x598   :  { %v7080_v3 = vsub.f32 %v7072_v39, %v7079_v2 }
 0x59a   :  { %v7081_v4 = vmul.f32 1.442695, %v7080_v3 }
 0x59c   :  { %10158 = vpow2.f32 %v7081_v4 }
 0x5a6   :  { %v10159_v60 = vpop.eup %10158 }
 0x5a7   :  { %v7083_v5 = vsel %vm6361_vm1, %v10159_v60, 0.0 }
 0x5a8   :  { %7084 = vadd.xlane.f32.xlu0 %v7083_v5 }
 0x5b7   :  { %v7437_v6 = vpop.xlane.xlu1 %7436 }
 0x5b8   :  { %v7438_v7 = vsub.f32 %v7430_v55, %v7437_v6 }
 0x5ba   :  { %v7439_v62 = vmul.f32 1.442695, %v7438_v7 }
 0x5bc   :  { %10160 = vpow2.f32 %v7439_v62 }
 0x5c6   :  { %v10161_v9 = vpop.eup %10160 }
 0x5c7   :  { %v7441_v10 = vsel %vm6361_vm1, %v10161_v9, 0.0 }
 0x5c8   :  { %7442 = vadd.xlane.f32.xlu1 %v7441_v10 }
 0x5f5   :  { %v6370_v12 = vpop.xlane.xlu0 %6369 }
 0x5f6   :  { %10162 = vrcp.f32 %v6370_v12 }
 0x600   :  { %v10163_v30 = vpop.eup %10162 }
 0x601   :  { %v6372_v31 = vmul.f32 %v10163_v30, %v10155_v59 }
 0x603   :  { %6373 = vst.msk [vmem:[%s13151_s5] sm:$0x3] %vm6361_vm1, %v6372_v31 }
 0x615   :  { %v6727_v52 = vpop.xlane.xlu1 %6726 }
 0x616   :  { %10164 = vrcp.f32 %v6727_v52 }
 0x620   :  { %v10165_v15 = vpop.eup %10164 }
 0x621   :  { %v6729_v0 = vmul.f32 %v10165_v15, %v10157_v1 }
 0x623   :  { %8370 = vst.msk [vmem:[%s13151_s5 + $0x2] sm:$0x3] %vm6361_vm1, %v6729_v0 }
 0x635   :  { %v7085_v16 = vpop.xlane.xlu0 %7084 }
 0x636   :  { %10166 = vrcp.f32 %v7085_v16 }
 0x640   :  { %v10167_v17 = vpop.eup %10166 }
 0x641   :  { %v7087_v11 = vmul.f32 %v10167_v17, %v10159_v60 }
 0x643   :  { %8469 = vst.msk [vmem:[%s13151_s5 + $0x4] sm:$0x3] %vm6361_vm1, %v7087_v11 }
 0x655   :  { %v7443_v18 = vpop.xlane.xlu1 %7442 }
 0x656   :  { %10168 = vrcp.f32 %v7443_v18 }
 0x660   :  { %v10169_v8 = vpop.eup %10168 }
 0x661   :  { %v7445_v19 = vmul.f32 %v10169_v8, %v10161_v9 }
 0x663   :  { %8568 = vst.msk [vmem:[%s13151_s5 + $0x6] sm:$0x3] %vm6361_vm1, %v7445_v19 }

</bundles_post_ra>
